<compile_context>
chip_gen: v5e
topology: v5e:2x2
jax: 0.10.0
libtpu: 0.0.40
codegen_flags: <defaults>
</compile_context>

<pallas_src>
import numpy as np
import jax
import jax.numpy as jnp
from jax import lax
from jax.experimental import pallas as pl
from jax.experimental.pallas import tpu as pltpu

# tag vocabulary (matches the PyTorch script)
START_TAG_IX = 3
STOP_TAG_IX = 4
TAGSET_SIZE = 5

OUTW = 128  # lane-dense output width


# ----------------------------------------------------------------------------
# Fused kernel: embedding gather + BiLSTM + hidden2tag + CRF Viterbi decode
# ----------------------------------------------------------------------------
def _bilstm_crf_kernel(tok_ref, emb_ref, wihf_ref, wihb_ref, b_ref, whh_ref,
                       h0_ref, c0_ref, wtagf_ref, wtagb_ref, btag_ref, trans_ref,
                       feats_ref, path_ref, score_ref,
                       xpf_buf, xpb_buf):
    SB, outw = feats_ref.shape            # (S*Bc, 128)
    Bc = path_ref.shape[0]                # sentences in this chunk
    S = SB // Bc                          # sequence length
    H2, G8 = whh_ref.shape                # (2H, 8H)
    H = H2 // 2
    H6 = 3 * H2
    T = trans_ref.shape[0]
    V = emb_ref.shape[0]

    # ---- embedding lookup: one vectorized one-hot compare + MXU matmul -------
    lane_v = lax.broadcasted_iota(jnp.int32, (1, V), 1)
    onehot = (tok_ref[...] == lane_v).astype(jnp.float32)            # (S*Bc, V)
    embeds = jnp.dot(onehot, emb_ref[...],
                     preferred_element_type=jnp.float32)             # (S*Bc, E)

    # ---- hoisted input projections (both directions, all gates) --------------
    # layout L columns: [i_f,i_b | f_f,f_b | o_f,o_b | g_f,g_b]
    xpf_buf[...] = (jnp.dot(embeds, wihf_ref[...],
                            preferred_element_type=jnp.float32) + b_ref[...])
    xpb_buf[...] = jnp.dot(embeds, wihb_ref[...],
                           preferred_element_type=jnp.float32)

    # ---- fused fwd/bwd recurrence (fully unrolled; one matmul per step) -------
    whh = whh_ref[...]                                               # (2H, 8H)
    h_cat = jnp.broadcast_to(h0_ref[...], (Bc, H2))                  # [h_f | h_b]
    c_cat = jnp.broadcast_to(c0_ref[...], (Bc, H2))
    hs = [None] * S

    for k in range(S):
        tf = k
        tb = S - 1 - k
        # forward direction reads time tf, backward reads tb; columns are
        # direction-disjoint so a single VPU add combines both projections.
        gin = xpf_buf[tf * Bc:(tf + 1) * Bc, :] + xpb_buf[tb * Bc:(tb + 1) * Bc, :]
        gates = gin + jnp.dot(h_cat, whh,
                              preferred_element_type=jnp.float32)    # (Bc, 8H)
        sig = jax.nn.sigmoid(gates[:, 0:H6])      # i/f/o groups, one EUP region
        g = jnp.tanh(gates[:, H6:G8])             # g group
        i_cat = sig[:, 0:H2]
        f_cat = sig[:, H2:2 * H2]
        o_cat = sig[:, 2 * H2:3 * H2]
        c_cat = f_cat * c_cat + i_cat * g
        h_cat = o_cat * jnp.tanh(c_cat)
        hs[k] = h_cat                             # [h_f(tf) | h_b(tb)]

    # ---- hidden2tag (zero-padded weights -> lane-dense (S*Bc,128) feats) -----
    hf_all = jnp.concatenate(hs, axis=0)          # row t*Bc+b: fwd half = h_f(t)
    hb_all = jnp.concatenate(hs[::-1], axis=0)    # row t*Bc+b: bwd half = h_b(t)
    feats = (jnp.dot(hf_all, wtagf_ref[...], preferred_element_type=jnp.float32)
             + jnp.dot(hb_all, wtagb_ref[...], preferred_element_type=jnp.float32)
             + btag_ref[...])                                        # (S*Bc, 128)
    feats_ref[...] = feats

    # ---- CRF Viterbi decode (batched over Bc, unrolled; tiny tag axis) -------
    trans = trans_ref[...]                        # (T, T), [next, prev]
    lane_t = lax.broadcasted_iota(jnp.int32, (1, T), 1)
    neg = jnp.float32(-10000.0)
    big = jnp.int32(T)

    fv = jnp.broadcast_to(
        jnp.where(lane_t == START_TAG_IX, jnp.float32(0.0), neg), (Bc, T))

    bptrs = [None] * S
    for t in range(S):
        feat_t = feats[t * Bc:(t + 1) * Bc, 0:T]
        vals, idxs = [], []
        for n in range(T):
            v = fv + trans[n:n + 1, :]                          # (Bc, T)
            m = jnp.max(v, axis=1, keepdims=True)               # (Bc, 1)
            # first-max index (matches torch argmax tie-breaking)
            idx = jnp.min(jnp.where(v == m, lane_t, big), axis=1, keepdims=True)
            vals.append(m)
            idxs.append(idx)
        bptrs[t] = jnp.concatenate(idxs, axis=1)                # (Bc, T) int32
        fv = jnp.concatenate(vals, axis=1) + feat_t

    term = fv + trans[STOP_TAG_IX:STOP_TAG_IX + 1, :]
    best_score = jnp.max(term, axis=1, keepdims=True)           # (Bc, 1)
    best = jnp.min(jnp.where(term == best_score, lane_t, big),
                   axis=1, keepdims=True)                       # (Bc, 1)

    # backtracking via one-hot selects (final pointer into START is dropped)
    path_cols = [None] * S
    path_cols[S - 1] = best
    cur = best
    for t in range(S - 1, 0, -1):
        cur = jnp.sum(jnp.where(lane_t == cur, bptrs[t], 0), axis=1, keepdims=True)
        path_cols[t - 1] = cur
    # TODO(synk): the PyTorch `assert start == START_TAG` is a host-side check
    # and is not reproduced inside the kernel.

    path_mat = jnp.concatenate(path_cols, axis=1)               # (Bc, S)
    path_ref[...] = jnp.concatenate(
        [path_mat, jnp.zeros((Bc, path_ref.shape[1] - S), jnp.int32)], axis=1)
    score_ref[...] = jnp.broadcast_to(best_score, (Bc, score_ref.shape[1]))


# ----------------------------------------------------------------------------
# Wrapper: batch of sentences, grid over batch chunks (parallel -> 2 TCs on v7x)
# ----------------------------------------------------------------------------
def bilstm_crf_forward(sentences, p, *, b_chunk=8):
    B, S = sentences.shape
    assert B % b_chunk == 0 and b_chunk % 8 == 0, "b_chunk must be mult of 8, divide B"
    G = B // b_chunk
    T = p["trans"].shape[0]
    G8 = p["whh_blk"].shape[1]

    # time-major token ids per chunk: row = g*(S*Bc) + t*Bc + b  (layout plumbing)
    tok_tm = (sentences.astype(jnp.int32)
              .reshape(G, b_chunk, S)
              .transpose(0, 2, 1)
              .reshape(G * S * b_chunk, 1))

    weights = (p["emb"], p["wih_fz"], p["wih_bz"], p["b_L"], p["whh_blk"],
               p["h0_cat"], p["c0_cat"], p["wtag_f_pad"], p["wtag_b_pad"],
               p["btag_pad"], p["trans"])

    def resident(a):  # whole array, block index constant -> stays VMEM-resident
        return pl.BlockSpec(a.shape, lambda g: (0, 0))

    grid_spec = pltpu.PrefetchScalarGridSpec(
        num_scalar_prefetch=0,
        grid=(G,),
        in_specs=[pl.BlockSpec((S * b_chunk, 1), lambda g: (g, 0))]
                 + [resident(a) for a in weights],
        out_specs=[pl.BlockSpec((S * b_chunk, OUTW), lambda g: (g, 0)),
                   pl.BlockSpec((b_chunk, OUTW), lambda g: (g, 0)),
                   pl.BlockSpec((b_chunk, OUTW), lambda g: (g, 0))],
        scratch_shapes=[pltpu.VMEM((S * b_chunk, G8), jnp.float32),
                        pltpu.VMEM((S * b_chunk, G8), jnp.float32)],
    )

    feats_p, path_p, score_p = pl.pallas_call(
        _bilstm_crf_kernel,
        out_shape=(jax.ShapeDtypeStruct((G * S * b_chunk, OUTW), jnp.float32),
                   jax.ShapeDtypeStruct((G * b_chunk, OUTW), jnp.int32),
                   jax.ShapeDtypeStruct((G * b_chunk, OUTW), jnp.float32)),
        grid_spec=grid_spec,
        compiler_params=pltpu.CompilerParams(dimension_semantics=("parallel",)),
    )(tok_tm, *weights)

    feats = (feats_p[:, :T].reshape(G, S, b_chunk, T)
             .transpose(0, 2, 1, 3).reshape(B, S, T))
    path = path_p[:, :S]          # (B, S)
    score = score_p[:, 0]         # (B,)
    return score, path, feats


# ----------------------------------------------------------------------------
# Deterministic parameter construction (PyTorch-shaped raw weights + the
# kernel-layout repacked/fused/padded weights built once, host-side)
# ----------------------------------------------------------------------------
def init_params(key, vocab_size, embedding_dim, hidden_dim, tagset_size):
    H = hidden_dim // 2
    E = embedding_dim
    T = tagset_size
    G4 = 4 * H
    ks = jax.random.split(key, 16)
    s_h = 1.0 / np.sqrt(H)
    s_o = 1.0 / np.sqrt(hidden_dim)

    def uni(k, shape, scale):
        return jax.random.uniform(k, shape, jnp.float32, -scale, scale)

    emb = jax.random.normal(ks[0], (vocab_size, E), jnp.float32)

    # raw per-direction weights, PyTorch fused gate order [i, f, g, o]
    wih_f = uni(ks[1], (E, G4), s_h)
    whh_f = uni(ks[2], (H, G4), s_h)
    b_f = uni(ks[3], (1, G4), s_h) + uni(ks[4], (1, G4), s_h)   # b_ih + b_hh
    wih_b = uni(ks[5], (E, G4), s_h)
    whh_b = uni(ks[6], (H, G4), s_h)
    b_b = uni(ks[7], (1, G4), s_h) + uni(ks[8], (1, G4), s_h)

    # torch's init_hidden() samples fresh randoms each call; fixed draw here,
    # shared by every sentence in the batch.
    h0 = jax.random.normal(ks[9], (2, H), jnp.float32)
    c0 = jax.random.normal(ks[10], (2, H), jnp.float32)

    wtag = uni(ks[11], (hidden_dim, T), s_o)
    btag = uni(ks[12], (1, T), s_o)

    trans = jax.random.normal(ks[13], (T, T), jnp.float32)
    trans = trans.at[START_TAG_IX, :].set(-10000.0)
    trans = trans.at[:, STOP_TAG_IX].set(-10000.0)

    # ---- kernel-layout weights ------------------------------------------------
    def to_L(a_f, a_b):
        # [i,f,g,o] per direction -> layout L = [i_f,i_b | f_f,f_b | o_f,o_b | g_f,g_b]
        def gate(a, j):
            return a[:, j * H:(j + 1) * H]
        return jnp.concatenate(
            [gate(a_f, 0), gate(a_b, 0),    # i
             gate(a_f, 1), gate(a_b, 1),    # f
             gate(a_f, 3), gate(a_b, 3),    # o
             gate(a_f, 2), gate(a_b, 2)],   # g (tanh group last)
            axis=1)

    wih_fz = to_L(wih_f, jnp.zeros_like(wih_b))     # forward columns only
    wih_bz = to_L(jnp.zeros_like(wih_f), wih_b)     # backward columns only
    b_L = to_L(b_f, b_b)

    whh_blk = jnp.concatenate(                       # block-diagonal (2H, 8H)
        [to_L(whh_f, jnp.zeros_like(whh_b)),         # rows 0:H  <- h_f
         to_L(jnp.zeros_like(whh_f), whh_b)],        # rows H:2H <- h_b
        axis=0)

    h0_cat = jnp.concatenate([h0[0:1], h0[1:2]], axis=1)   # (1, 2H)
    c0_cat = jnp.concatenate([c0[0:1], c0[1:2]], axis=1)

    def pad_cols(a):
        return jnp.concatenate(
            [a, jnp.zeros((a.shape[0], OUTW - a.shape[1]), jnp.float32)], axis=1)

    wtag_f_pad = jnp.concatenate(
        [pad_cols(wtag[0:H]), jnp.zeros((H, OUTW), jnp.float32)], axis=0)
    wtag_b_pad = jnp.concatenate(
        [jnp.zeros((H, OUTW), jnp.float32), pad_cols(wtag[H:2 * H])], axis=0)
    btag_pad = pad_cols(btag)

    return dict(
        # raw params (used by the pure-JAX reference)
        emb=emb, wih_f=wih_f, whh_f=whh_f, b_f=b_f,
        wih_b=wih_b, whh_b=whh_b, b_b=b_b,
        h0=h0, c0=c0, wtag=wtag, btag=btag, trans=trans,
        # kernel-layout params
        wih_fz=wih_fz, wih_bz=wih_bz, b_L=b_L, whh_blk=whh_blk,
        h0_cat=h0_cat, c0_cat=c0_cat,
        wtag_f_pad=wtag_f_pad, wtag_b_pad=wtag_b_pad, btag_pad=btag_pad,
    )


# ----------------------------------------------------------------------------
# Pure-JAX / numpy references for sanity checks
# ----------------------------------------------------------------------------
def ref_lstm_features(sentences, p):
    H = p["h0"].shape[1]
    B = sentences.shape[0]
    embeds = p["emb"][sentences]                         # (B, S, E)

    def run(xs, wih, whh, b, h0, c0):
        h = jnp.broadcast_to(h0, (B, H))
        c = jnp.broadcast_to(c0, (B, H))
        hs = []
        for t in range(xs.shape[1]):
            g = xs[:, t, :] @ wih + h @ whh + b
            i = jax.nn.sigmoid(g[:, 0:H]); f = jax.nn.sigmoid(g[:, H:2 * H])
            gg = jnp.tanh(g[:, 2 * H:3 * H]); o = jax.nn.sigmoid(g[:, 3 * H:4 * H])
            c = f * c + i * gg
            h = o * jnp.tanh(c)
            hs.append(h)
        return jnp.stack(hs, axis=1)                     # (B, S, H)

    hf = run(embeds, p["wih_f"], p["whh_f"], p["b_f"], p["h0"][0:1], p["c0"][0:1])
    hb = run(embeds[:, ::-1], p["wih_b"], p["whh_b"], p["b_b"],
             p["h0"][1:2], p["c0"][1:2])[:, ::-1]
    out = jnp.concatenate([hf, hb], axis=-1)             # (B, S, 2H)
    return out @ p["wtag"] + p["btag"]                   # (B, S, T)


def ref_viterbi(feats, trans):
    feats = np.asarray(feats, np.float32)
    trans = np.asarray(trans, np.float32)
    S, T = feats.shape
    fv = np.full(T, -10000.0, np.float32)
    fv[START_TAG_IX] = 0.0
    bptrs = []
    for t in range(S):
        nb, nv = [], []
        for nxt in range(T):
            v = fv + trans[nxt]
            b = int(np.argmax(v))
            nb.append(b)
            nv.append(v[b] + feats[t, nxt])
        fv = np.array(nv, np.float32)
        bptrs.append(nb)
    term = fv + trans[STOP_TAG_IX]
    best = int(np.argmax(term))
    score = float(term[best])
    path = [best]
    for nb in reversed(bptrs):
        best = nb[best]
        path.append(best)
    start = path.pop()
    assert start == START_TAG_IX
    path.reverse()
    return score, path


# ----------------------------------------------------------------------------
if __name__ == "__main__":
    # hidden_dim=128 -> H=64, 2H=128: every gate group is exactly one vreg wide
    VOCAB, E, HIDDEN, S, B = 20, 32, 128, 8, 16

    key = jax.random.PRNGKey(0)
    k_param, k_sent = jax.random.split(key)
    params = init_params(k_param, VOCAB, E, HIDDEN, TAGSET_SIZE)
    sentences = jax.random.randint(k_sent, (B, S), 0, VOCAB, dtype=jnp.int32)

    score, path, feats = bilstm_crf_forward(sentences, params, b_chunk=8)
    jax.block_until_ready((score, path, feats))

    # sanity checks against pure-JAX / numpy references
    feats_ref = ref_lstm_features(sentences, params)
    assert np.allclose(np.asarray(feats), np.asarray(feats_ref), atol=5e-2), "feats mismatch"

    feats_np = np.asarray(feats)
    path_np = np.asarray(path)
    score_np = np.asarray(score)
    trans_np = np.asarray(params["trans"])
    for b in range(B):
        s_ref, p_ref = ref_viterbi(feats_np[b], trans_np)
        assert abs(float(score_np[b]) - s_ref) < 1e-3, "viterbi score mismatch"
        assert [int(x) for x in path_np[b]] == p_ref, "viterbi path mismatch"

    print("KERNEL_OK")
</pallas_src>

<mosaic_0001>
module attributes {stable_mosaic.version = 11 : i64} {
  func.func @_bilstm_crf_kernel(%arg0: i32, %arg1: memref<64x1xi32, #tpu.memory_space<vmem>>, %arg2: memref<20x32xf32, #tpu.memory_space<vmem>>, %arg3: memref<32x512xf32, #tpu.memory_space<vmem>>, %arg4: memref<32x512xf32, #tpu.memory_space<vmem>>, %arg5: memref<1x512xf32, #tpu.memory_space<vmem>>, %arg6: memref<128x512xf32, #tpu.memory_space<vmem>>, %arg7: memref<1x128xf32, #tpu.memory_space<vmem>>, %arg8: memref<1x128xf32, #tpu.memory_space<vmem>>, %arg9: memref<128x128xf32, #tpu.memory_space<vmem>>, %arg10: memref<128x128xf32, #tpu.memory_space<vmem>>, %arg11: memref<1x128xf32, #tpu.memory_space<vmem>>, %arg12: memref<5x5xf32, #tpu.memory_space<vmem>>, %arg13: memref<64x128xf32, #tpu.memory_space<vmem>>, %arg14: memref<8x128xi32, #tpu.memory_space<vmem>>, %arg15: memref<8x128xf32, #tpu.memory_space<vmem>>, %arg16: memref<64x512xf32, #tpu.memory_space<vmem>>, %arg17: memref<64x512xf32, #tpu.memory_space<vmem>>) attributes {dimension_semantics = [#tpu.dimension_semantics<parallel>], iteration_bounds = array<i64: 2>, scalar_prefetch = 0 : i64, scratch_operands = 2 : i64, tpu.core_type = #tpu.core_type<tc>, window_params = [{transform_indices = @transform_0, window_bounds = array<i64: 64, 1>}, {pipeline_mode = #tpu.pipeline_mode<synchronous>, transform_indices = @transform_1, window_bounds = array<i64: 20, 32>}, {pipeline_mode = #tpu.pipeline_mode<synchronous>, transform_indices = @transform_2, window_bounds = array<i64: 32, 512>}, {pipeline_mode = #tpu.pipeline_mode<synchronous>, transform_indices = @transform_3, window_bounds = array<i64: 32, 512>}, {pipeline_mode = #tpu.pipeline_mode<synchronous>, transform_indices = @transform_4, window_bounds = array<i64: 1, 512>}, {pipeline_mode = #tpu.pipeline_mode<synchronous>, transform_indices = @transform_5, window_bounds = array<i64: 128, 512>}, {pipeline_mode = #tpu.pipeline_mode<synchronous>, transform_indices = @transform_6, window_bounds = array<i64: 1, 128>}, {pipeline_mode = #tpu.pipeline_mode<synchronous>, transform_indices = @transform_7, window_bounds = array<i64: 1, 128>}, {pipeline_mode = #tpu.pipeline_mode<synchronous>, transform_indices = @transform_8, window_bounds = array<i64: 128, 128>}, {pipeline_mode = #tpu.pipeline_mode<synchronous>, transform_indices = @transform_9, window_bounds = array<i64: 128, 128>}, {pipeline_mode = #tpu.pipeline_mode<synchronous>, transform_indices = @transform_10, window_bounds = array<i64: 1, 128>}, {pipeline_mode = #tpu.pipeline_mode<synchronous>, transform_indices = @transform_11, window_bounds = array<i64: 5, 5>}, {transform_indices = @transform_12, window_bounds = array<i64: 64, 128>}, {transform_indices = @transform_13, window_bounds = array<i64: 8, 128>}, {transform_indices = @transform_14, window_bounds = array<i64: 8, 128>}]} {
    %0 = tpu.iota {dimensions = array<i32: 1>} : vector<1x20xi32>
    %c0 = arith.constant 0 : index
    %c0_0 = arith.constant 0 : index
    %1 = vector.load %arg1[%c0, %c0_0] : memref<64x1xi32, #tpu.memory_space<vmem>>, vector<64x1xi32>
    %2 = vector.broadcast %1 : vector<64x1xi32> to vector<64x20xi32>
    %3 = vector.broadcast %0 : vector<1x20xi32> to vector<64x20xi32>
    %4 = arith.cmpi eq, %2, %3 : vector<64x20xi32>
    %5 = arith.extui %4 : vector<64x20xi1> to vector<64x20xi32>
    %6 = arith.sitofp %5 : vector<64x20xi32> to vector<64x20xf32>
    %c0_1 = arith.constant 0 : index
    %c0_2 = arith.constant 0 : index
    %7 = vector.load %arg2[%c0_1, %c0_2] : memref<20x32xf32, #tpu.memory_space<vmem>>, vector<20x32xf32>
    %cst = arith.constant dense<0.000000e+00> : vector<64x32xf32>
    %8 = tpu.matmul %6, %7, %cst {dimension_numbers = #tpu.dot_dimension_numbers<[1], [0], [0], [1], [0, 0, 1, 1], [], []>} : vector<64x20xf32>, vector<20x32xf32>, vector<64x32xf32> -> vector<64x32xf32>
    %c0_3 = arith.constant 0 : index
    %c0_4 = arith.constant 0 : index
    %9 = vector.load %arg3[%c0_3, %c0_4] : memref<32x512xf32, #tpu.memory_space<vmem>>, vector<32x512xf32>
    %cst_5 = arith.constant dense<0.000000e+00> : vector<64x512xf32>
    %10 = tpu.matmul %8, %9, %cst_5 {dimension_numbers = #tpu.dot_dimension_numbers<[1], [0], [0], [1], [0, 0, 1, 1], [], []>} : vector<64x32xf32>, vector<32x512xf32>, vector<64x512xf32> -> vector<64x512xf32>
    %c0_6 = arith.constant 0 : index
    %c0_7 = arith.constant 0 : index
    %11 = vector.load %arg5[%c0_6, %c0_7] : memref<1x512xf32, #tpu.memory_space<vmem>>, vector<1x512xf32>
    %12 = vector.broadcast %11 : vector<1x512xf32> to vector<64x512xf32>
    %13 = arith.addf %10, %12 : vector<64x512xf32>
    %c0_8 = arith.constant 0 : index
    %c0_9 = arith.constant 0 : index
    %14 = vector.load %arg16[%c0_8, %c0_9] : memref<64x512xf32, #tpu.memory_space<vmem>>, vector<64x512xf32>
    tpu.vector_store %arg16[%c0_8, %c0_9], %13 {strides = array<i32>} : memref<64x512xf32, #tpu.memory_space<vmem>>, vector<64x512xf32>,
    %c0_10 = arith.constant 0 : index
    %c0_11 = arith.constant 0 : index
    %15 = vector.load %arg4[%c0_10, %c0_11] : memref<32x512xf32, #tpu.memory_space<vmem>>, vector<32x512xf32>
    %cst_12 = arith.constant dense<0.000000e+00> : vector<64x512xf32>
    %16 = tpu.matmul %8, %15, %cst_12 {dimension_numbers = #tpu.dot_dimension_numbers<[1], [0], [0], [1], [0, 0, 1, 1], [], []>} : vector<64x32xf32>, vector<32x512xf32>, vector<64x512xf32> -> vector<64x512xf32>
    %c0_13 = arith.constant 0 : index
    %c0_14 = arith.constant 0 : index
    %17 = vector.load %arg17[%c0_13, %c0_14] : memref<64x512xf32, #tpu.memory_space<vmem>>, vector<64x512xf32>
    tpu.vector_store %arg17[%c0_13, %c0_14], %16 {strides = array<i32>} : memref<64x512xf32, #tpu.memory_space<vmem>>, vector<64x512xf32>,
    %c0_15 = arith.constant 0 : index
    %c0_16 = arith.constant 0 : index
    %18 = vector.load %arg6[%c0_15, %c0_16] : memref<128x512xf32, #tpu.memory_space<vmem>>, vector<128x512xf32>
    %c0_17 = arith.constant 0 : index
    %c0_18 = arith.constant 0 : index
    %19 = vector.load %arg7[%c0_17, %c0_18] : memref<1x128xf32, #tpu.memory_space<vmem>>, vector<1x128xf32>
    %20 = vector.shape_cast %19 : vector<1x128xf32> to vector<1x128xf32>
    %21 = vector.broadcast %20 : vector<1x128xf32> to vector<8x128xf32>
    %c0_19 = arith.constant 0 : index
    %c0_20 = arith.constant 0 : index
    %22 = vector.load %arg8[%c0_19, %c0_20] : memref<1x128xf32, #tpu.memory_space<vmem>>, vector<1x128xf32>
    %23 = vector.shape_cast %22 : vector<1x128xf32> to vector<1x128xf32>
    %24 = vector.broadcast %23 : vector<1x128xf32> to vector<8x128xf32>
    %c0_21 = arith.constant 0 : index
    %c0_22 = arith.constant 0 : index
    %25 = vector.load %arg16[%c0_21, %c0_22] : memref<64x512xf32, #tpu.memory_space<vmem>>, vector<8x512xf32>
    %c56 = arith.constant 56 : index
    %c0_23 = arith.constant 0 : index
    %26 = vector.load %arg17[%c56, %c0_23] : memref<64x512xf32, #tpu.memory_space<vmem>>, vector<8x512xf32>
    %27 = arith.addf %25, %26 : vector<8x512xf32>
    %cst_24 = arith.constant dense<0.000000e+00> : vector<8x512xf32>
    %28 = tpu.matmul %21, %18, %cst_24 {dimension_numbers = #tpu.dot_dimension_numbers<[1], [0], [0], [1], [0, 0, 1, 1], [], []>} : vector<8x128xf32>, vector<128x512xf32>, vector<8x512xf32> -> vector<8x512xf32>
    %29 = arith.addf %27, %28 : vector<8x512xf32>
    %30 = vector.extract_strided_slice %29 {offsets = [0, 0], sizes = [8, 384], strides = [1, 1]} : vector<8x512xf32> to vector<8x384xf32>
    %31 = arith.negf %30 : vector<8x384xf32>
    %32 = math.exp %31 : vector<8x384xf32>
    %cst_25 = arith.constant 1.000000e+00 : f32
    %33 = vector.broadcast %cst_25 : f32 to vector<8x384xf32>
    %34 = arith.addf %33, %32 : vector<8x384xf32>
    %35 = arith.divf %33, %34 : vector<8x384xf32>
    %36 = vector.extract_strided_slice %29 {offsets = [0, 384], sizes = [8, 128], strides = [1, 1]} : vector<8x512xf32> to vector<8x128xf32>
    %37 = math.tanh %36 : vector<8x128xf32>
    %38 = vector.extract_strided_slice %35 {offsets = [0, 0], sizes = [8, 128], strides = [1, 1]} : vector<8x384xf32> to vector<8x128xf32>
    %39 = vector.extract_strided_slice %35 {offsets = [0, 128], sizes = [8, 128], strides = [1, 1]} : vector<8x384xf32> to vector<8x128xf32>
    %40 = vector.extract_strided_slice %35 {offsets = [0, 256], sizes = [8, 128], strides = [1, 1]} : vector<8x384xf32> to vector<8x128xf32>
    %41 = arith.mulf %39, %24 : vector<8x128xf32>
    %42 = arith.mulf %38, %37 : vector<8x128xf32>
    %43 = arith.addf %41, %42 : vector<8x128xf32>
    %44 = math.tanh %43 : vector<8x128xf32>
    %45 = arith.mulf %40, %44 : vector<8x128xf32>
    %c8 = arith.constant 8 : index
    %c0_26 = arith.constant 0 : index
    %46 = vector.load %arg16[%c8, %c0_26] : memref<64x512xf32, #tpu.memory_space<vmem>>, vector<8x512xf32>
    %c48 = arith.constant 48 : index
    %c0_27 = arith.constant 0 : index
    %47 = vector.load %arg17[%c48, %c0_27] : memref<64x512xf32, #tpu.memory_space<vmem>>, vector<8x512xf32>
    %48 = arith.addf %46, %47 : vector<8x512xf32>
    %cst_28 = arith.constant dense<0.000000e+00> : vector<8x512xf32>
    %49 = tpu.matmul %45, %18, %cst_28 {dimension_numbers = #tpu.dot_dimension_numbers<[1], [0], [0], [1], [0, 0, 1, 1], [], []>} : vector<8x128xf32>, vector<128x512xf32>, vector<8x512xf32> -> vector<8x512xf32>
    %50 = arith.addf %48, %49 : vector<8x512xf32>
    %51 = vector.extract_strided_slice %50 {offsets = [0, 0], sizes = [8, 384], strides = [1, 1]} : vector<8x512xf32> to vector<8x384xf32>
    %52 = arith.negf %51 : vector<8x384xf32>
    %53 = math.exp %52 : vector<8x384xf32>
    %cst_29 = arith.constant 1.000000e+00 : f32
    %54 = vector.broadcast %cst_29 : f32 to vector<8x384xf32>
    %55 = arith.addf %54, %53 : vector<8x384xf32>
    %56 = arith.divf %54, %55 : vector<8x384xf32>
    %57 = vector.extract_strided_slice %50 {offsets = [0, 384], sizes = [8, 128], strides = [1, 1]} : vector<8x512xf32> to vector<8x128xf32>
    %58 = math.tanh %57 : vector<8x128xf32>
    %59 = vector.extract_strided_slice %56 {offsets = [0, 0], sizes = [8, 128], strides = [1, 1]} : vector<8x384xf32> to vector<8x128xf32>
    %60 = vector.extract_strided_slice %56 {offsets = [0, 128], sizes = [8, 128], strides = [1, 1]} : vector<8x384xf32> to vector<8x128xf32>
    %61 = vector.extract_strided_slice %56 {offsets = [0, 256], sizes = [8, 128], strides = [1, 1]} : vector<8x384xf32> to vector<8x128xf32>
    %62 = arith.mulf %60, %43 : vector<8x128xf32>
    %63 = arith.mulf %59, %58 : vector<8x128xf32>
    %64 = arith.addf %62, %63 : vector<8x128xf32>
    %65 = math.tanh %64 : vector<8x128xf32>
    %66 = arith.mulf %61, %65 : vector<8x128xf32>
    %c16 = arith.constant 16 : index
    %c0_30 = arith.constant 0 : index
    %67 = vector.load %arg16[%c16, %c0_30] : memref<64x512xf32, #tpu.memory_space<vmem>>, vector<8x512xf32>
    %c40 = arith.constant 40 : index
    %c0_31 = arith.constant 0 : index
    %68 = vector.load %arg17[%c40, %c0_31] : memref<64x512xf32, #tpu.memory_space<vmem>>, vector<8x512xf32>
    %69 = arith.addf %67, %68 : vector<8x512xf32>
    %cst_32 = arith.constant dense<0.000000e+00> : vector<8x512xf32>
    %70 = tpu.matmul %66, %18, %cst_32 {dimension_numbers = #tpu.dot_dimension_numbers<[1], [0], [0], [1], [0, 0, 1, 1], [], []>} : vector<8x128xf32>, vector<128x512xf32>, vector<8x512xf32> -> vector<8x512xf32>
    %71 = arith.addf %69, %70 : vector<8x512xf32>
    %72 = vector.extract_strided_slice %71 {offsets = [0, 0], sizes = [8, 384], strides = [1, 1]} : vector<8x512xf32> to vector<8x384xf32>
    %73 = arith.negf %72 : vector<8x384xf32>
    %74 = math.exp %73 : vector<8x384xf32>
    %cst_33 = arith.constant 1.000000e+00 : f32
    %75 = vector.broadcast %cst_33 : f32 to vector<8x384xf32>
    %76 = arith.addf %75, %74 : vector<8x384xf32>
    %77 = arith.divf %75, %76 : vector<8x384xf32>
    %78 = vector.extract_strided_slice %71 {offsets = [0, 384], sizes = [8, 128], strides = [1, 1]} : vector<8x512xf32> to vector<8x128xf32>
    %79 = math.tanh %78 : vector<8x128xf32>
    %80 = vector.extract_strided_slice %77 {offsets = [0, 0], sizes = [8, 128], strides = [1, 1]} : vector<8x384xf32> to vector<8x128xf32>
    %81 = vector.extract_strided_slice %77 {offsets = [0, 128], sizes = [8, 128], strides = [1, 1]} : vector<8x384xf32> to vector<8x128xf32>
    %82 = vector.extract_strided_slice %77 {offsets = [0, 256], sizes = [8, 128], strides = [1, 1]} : vector<8x384xf32> to vector<8x128xf32>
    %83 = arith.mulf %81, %64 : vector<8x128xf32>
    %84 = arith.mulf %80, %79 : vector<8x128xf32>
    %85 = arith.addf %83, %84 : vector<8x128xf32>
    %86 = math.tanh %85 : vector<8x128xf32>
    %87 = arith.mulf %82, %86 : vector<8x128xf32>
    %c24 = arith.constant 24 : index
    %c0_34 = arith.constant 0 : index
    %88 = vector.load %arg16[%c24, %c0_34] : memref<64x512xf32, #tpu.memory_space<vmem>>, vector<8x512xf32>
    %c32 = arith.constant 32 : index
    %c0_35 = arith.constant 0 : index
    %89 = vector.load %arg17[%c32, %c0_35] : memref<64x512xf32, #tpu.memory_space<vmem>>, vector<8x512xf32>
    %90 = arith.addf %88, %89 : vector<8x512xf32>
    %cst_36 = arith.constant dense<0.000000e+00> : vector<8x512xf32>
    %91 = tpu.matmul %87, %18, %cst_36 {dimension_numbers = #tpu.dot_dimension_numbers<[1], [0], [0], [1], [0, 0, 1, 1], [], []>} : vector<8x128xf32>, vector<128x512xf32>, vector<8x512xf32> -> vector<8x512xf32>
    %92 = arith.addf %90, %91 : vector<8x512xf32>
    %93 = vector.extract_strided_slice %92 {offsets = [0, 0], sizes = [8, 384], strides = [1, 1]} : vector<8x512xf32> to vector<8x384xf32>
    %94 = arith.negf %93 : vector<8x384xf32>
    %95 = math.exp %94 : vector<8x384xf32>
    %cst_37 = arith.constant 1.000000e+00 : f32
    %96 = vector.broadcast %cst_37 : f32 to vector<8x384xf32>
    %97 = arith.addf %96, %95 : vector<8x384xf32>
    %98 = arith.divf %96, %97 : vector<8x384xf32>
    %99 = vector.extract_strided_slice %92 {offsets = [0, 384], sizes = [8, 128], strides = [1, 1]} : vector<8x512xf32> to vector<8x128xf32>
    %100 = math.tanh %99 : vector<8x128xf32>
    %101 = vector.extract_strided_slice %98 {offsets = [0, 0], sizes = [8, 128], strides = [1, 1]} : vector<8x384xf32> to vector<8x128xf32>
    %102 = vector.extract_strided_slice %98 {offsets = [0, 128], sizes = [8, 128], strides = [1, 1]} : vector<8x384xf32> to vector<8x128xf32>
    %103 = vector.extract_strided_slice %98 {offsets = [0, 256], sizes = [8, 128], strides = [1, 1]} : vector<8x384xf32> to vector<8x128xf32>
    %104 = arith.mulf %102, %85 : vector<8x128xf32>
    %105 = arith.mulf %101, %100 : vector<8x128xf32>
    %106 = arith.addf %104, %105 : vector<8x128xf32>
    %107 = math.tanh %106 : vector<8x128xf32>
    %108 = arith.mulf %103, %107 : vector<8x128xf32>
    %c32_38 = arith.constant 32 : index
    %c0_39 = arith.constant 0 : index
    %109 = vector.load %arg16[%c32_38, %c0_39] : memref<64x512xf32, #tpu.memory_space<vmem>>, vector<8x512xf32>
    %c24_40 = arith.constant 24 : index
    %c0_41 = arith.constant 0 : index
    %110 = vector.load %arg17[%c24_40, %c0_41] : memref<64x512xf32, #tpu.memory_space<vmem>>, vector<8x512xf32>
    %111 = arith.addf %109, %110 : vector<8x512xf32>
    %cst_42 = arith.constant dense<0.000000e+00> : vector<8x512xf32>
    %112 = tpu.matmul %108, %18, %cst_42 {dimension_numbers = #tpu.dot_dimension_numbers<[1], [0], [0], [1], [0, 0, 1, 1], [], []>} : vector<8x128xf32>, vector<128x512xf32>, vector<8x512xf32> -> vector<8x512xf32>
    %113 = arith.addf %111, %112 : vector<8x512xf32>
    %114 = vector.extract_strided_slice %113 {offsets = [0, 0], sizes = [8, 384], strides = [1, 1]} : vector<8x512xf32> to vector<8x384xf32>
    %115 = arith.negf %114 : vector<8x384xf32>
    %116 = math.exp %115 : vector<8x384xf32>
    %cst_43 = arith.constant 1.000000e+00 : f32
    %117 = vector.broadcast %cst_43 : f32 to vector<8x384xf32>
    %118 = arith.addf %117, %116 : vector<8x384xf32>
    %119 = arith.divf %117, %118 : vector<8x384xf32>
    %120 = vector.extract_strided_slice %113 {offsets = [0, 384], sizes = [8, 128], strides = [1, 1]} : vector<8x512xf32> to vector<8x128xf32>
    %121 = math.tanh %120 : vector<8x128xf32>
    %122 = vector.extract_strided_slice %119 {offsets = [0, 0], sizes = [8, 128], strides = [1, 1]} : vector<8x384xf32> to vector<8x128xf32>
    %123 = vector.extract_strided_slice %119 {offsets = [0, 128], sizes = [8, 128], strides = [1, 1]} : vector<8x384xf32> to vector<8x128xf32>
    %124 = vector.extract_strided_slice %119 {offsets = [0, 256], sizes = [8, 128], strides = [1, 1]} : vector<8x384xf32> to vector<8x128xf32>
    %125 = arith.mulf %123, %106 : vector<8x128xf32>
    %126 = arith.mulf %122, %121 : vector<8x128xf32>
    %127 = arith.addf %125, %126 : vector<8x128xf32>
    %128 = math.tanh %127 : vector<8x128xf32>
    %129 = arith.mulf %124, %128 : vector<8x128xf32>
    %c40_44 = arith.constant 40 : index
    %c0_45 = arith.constant 0 : index
    %130 = vector.load %arg16[%c40_44, %c0_45] : memref<64x512xf32, #tpu.memory_space<vmem>>, vector<8x512xf32>
    %c16_46 = arith.constant 16 : index
    %c0_47 = arith.constant 0 : index
    %131 = vector.load %arg17[%c16_46, %c0_47] : memref<64x512xf32, #tpu.memory_space<vmem>>, vector<8x512xf32>
    %132 = arith.addf %130, %131 : vector<8x512xf32>
    %cst_48 = arith.constant dense<0.000000e+00> : vector<8x512xf32>
    %133 = tpu.matmul %129, %18, %cst_48 {dimension_numbers = #tpu.dot_dimension_numbers<[1], [0], [0], [1], [0, 0, 1, 1], [], []>} : vector<8x128xf32>, vector<128x512xf32>, vector<8x512xf32> -> vector<8x512xf32>
    %134 = arith.addf %132, %133 : vector<8x512xf32>
    %135 = vector.extract_strided_slice %134 {offsets = [0, 0], sizes = [8, 384], strides = [1, 1]} : vector<8x512xf32> to vector<8x384xf32>
    %136 = arith.negf %135 : vector<8x384xf32>
    %137 = math.exp %136 : vector<8x384xf32>
    %cst_49 = arith.constant 1.000000e+00 : f32
    %138 = vector.broadcast %cst_49 : f32 to vector<8x384xf32>
    %139 = arith.addf %138, %137 : vector<8x384xf32>
    %140 = arith.divf %138, %139 : vector<8x384xf32>
    %141 = vector.extract_strided_slice %134 {offsets = [0, 384], sizes = [8, 128], strides = [1, 1]} : vector<8x512xf32> to vector<8x128xf32>
    %142 = math.tanh %141 : vector<8x128xf32>
    %143 = vector.extract_strided_slice %140 {offsets = [0, 0], sizes = [8, 128], strides = [1, 1]} : vector<8x384xf32> to vector<8x128xf32>
    %144 = vector.extract_strided_slice %140 {offsets = [0, 128], sizes = [8, 128], strides = [1, 1]} : vector<8x384xf32> to vector<8x128xf32>
    %145 = vector.extract_strided_slice %140 {offsets = [0, 256], sizes = [8, 128], strides = [1, 1]} : vector<8x384xf32> to vector<8x128xf32>
    %146 = arith.mulf %144, %127 : vector<8x128xf32>
    %147 = arith.mulf %143, %142 : vector<8x128xf32>
    %148 = arith.addf %146, %147 : vector<8x128xf32>
    %149 = math.tanh %148 : vector<8x128xf32>
    %150 = arith.mulf %145, %149 : vector<8x128xf32>
    %c48_50 = arith.constant 48 : index
    %c0_51 = arith.constant 0 : index
    %151 = vector.load %arg16[%c48_50, %c0_51] : memref<64x512xf32, #tpu.memory_space<vmem>>, vector<8x512xf32>
    %c8_52 = arith.constant 8 : index
    %c0_53 = arith.constant 0 : index
    %152 = vector.load %arg17[%c8_52, %c0_53] : memref<64x512xf32, #tpu.memory_space<vmem>>, vector<8x512xf32>
    %153 = arith.addf %151, %152 : vector<8x512xf32>
    %cst_54 = arith.constant dense<0.000000e+00> : vector<8x512xf32>
    %154 = tpu.matmul %150, %18, %cst_54 {dimension_numbers = #tpu.dot_dimension_numbers<[1], [0], [0], [1], [0, 0, 1, 1], [], []>} : vector<8x128xf32>, vector<128x512xf32>, vector<8x512xf32> -> vector<8x512xf32>
    %155 = arith.addf %153, %154 : vector<8x512xf32>
    %156 = vector.extract_strided_slice %155 {offsets = [0, 0], sizes = [8, 384], strides = [1, 1]} : vector<8x512xf32> to vector<8x384xf32>
    %157 = arith.negf %156 : vector<8x384xf32>
    %158 = math.exp %157 : vector<8x384xf32>
    %cst_55 = arith.constant 1.000000e+00 : f32
    %159 = vector.broadcast %cst_55 : f32 to vector<8x384xf32>
    %160 = arith.addf %159, %158 : vector<8x384xf32>
    %161 = arith.divf %159, %160 : vector<8x384xf32>
    %162 = vector.extract_strided_slice %155 {offsets = [0, 384], sizes = [8, 128], strides = [1, 1]} : vector<8x512xf32> to vector<8x128xf32>
    %163 = math.tanh %162 : vector<8x128xf32>
    %164 = vector.extract_strided_slice %161 {offsets = [0, 0], sizes = [8, 128], strides = [1, 1]} : vector<8x384xf32> to vector<8x128xf32>
    %165 = vector.extract_strided_slice %161 {offsets = [0, 128], sizes = [8, 128], strides = [1, 1]} : vector<8x384xf32> to vector<8x128xf32>
    %166 = vector.extract_strided_slice %161 {offsets = [0, 256], sizes = [8, 128], strides = [1, 1]} : vector<8x384xf32> to vector<8x128xf32>
    %167 = arith.mulf %165, %148 : vector<8x128xf32>
    %168 = arith.mulf %164, %163 : vector<8x128xf32>
    %169 = arith.addf %167, %168 : vector<8x128xf32>
    %170 = math.tanh %169 : vector<8x128xf32>
    %171 = arith.mulf %166, %170 : vector<8x128xf32>
    %c56_56 = arith.constant 56 : index
    %c0_57 = arith.constant 0 : index
    %172 = vector.load %arg16[%c56_56, %c0_57] : memref<64x512xf32, #tpu.memory_space<vmem>>, vector<8x512xf32>
    %c0_58 = arith.constant 0 : index
    %c0_59 = arith.constant 0 : index
    %173 = vector.load %arg17[%c0_58, %c0_59] : memref<64x512xf32, #tpu.memory_space<vmem>>, vector<8x512xf32>
    %174 = arith.addf %172, %173 : vector<8x512xf32>
    %cst_60 = arith.constant dense<0.000000e+00> : vector<8x512xf32>
    %175 = tpu.matmul %171, %18, %cst_60 {dimension_numbers = #tpu.dot_dimension_numbers<[1], [0], [0], [1], [0, 0, 1, 1], [], []>} : vector<8x128xf32>, vector<128x512xf32>, vector<8x512xf32> -> vector<8x512xf32>
    %176 = arith.addf %174, %175 : vector<8x512xf32>
    %177 = vector.extract_strided_slice %176 {offsets = [0, 0], sizes = [8, 384], strides = [1, 1]} : vector<8x512xf32> to vector<8x384xf32>
    %178 = arith.negf %177 : vector<8x384xf32>
    %179 = math.exp %178 : vector<8x384xf32>
    %cst_61 = arith.constant 1.000000e+00 : f32
    %180 = vector.broadcast %cst_61 : f32 to vector<8x384xf32>
    %181 = arith.addf %180, %179 : vector<8x384xf32>
    %182 = arith.divf %180, %181 : vector<8x384xf32>
    %183 = vector.extract_strided_slice %176 {offsets = [0, 384], sizes = [8, 128], strides = [1, 1]} : vector<8x512xf32> to vector<8x128xf32>
    %184 = math.tanh %183 : vector<8x128xf32>
    %185 = vector.extract_strided_slice %182 {offsets = [0, 0], sizes = [8, 128], strides = [1, 1]} : vector<8x384xf32> to vector<8x128xf32>
    %186 = vector.extract_strided_slice %182 {offsets = [0, 128], sizes = [8, 128], strides = [1, 1]} : vector<8x384xf32> to vector<8x128xf32>
    %187 = vector.extract_strided_slice %182 {offsets = [0, 256], sizes = [8, 128], strides = [1, 1]} : vector<8x384xf32> to vector<8x128xf32>
    %188 = arith.mulf %186, %169 : vector<8x128xf32>
    %189 = arith.mulf %185, %184 : vector<8x128xf32>
    %190 = arith.addf %188, %189 : vector<8x128xf32>
    %191 = math.tanh %190 : vector<8x128xf32>
    %192 = arith.mulf %187, %191 : vector<8x128xf32>
    %193 = tpu.concatenate %45, %66, %87, %108, %129, %150, %171, %192 in 0 : vector<8x128xf32>, vector<8x128xf32>, vector<8x128xf32>, vector<8x128xf32>, vector<8x128xf32>, vector<8x128xf32>, vector<8x128xf32>, vector<8x128xf32> -> vector<64x128xf32>
    %194 = tpu.concatenate %192, %171, %150, %129, %108, %87, %66, %45 in 0 : vector<8x128xf32>, vector<8x128xf32>, vector<8x128xf32>, vector<8x128xf32>, vector<8x128xf32>, vector<8x128xf32>, vector<8x128xf32>, vector<8x128xf32> -> vector<64x128xf32>
    %c0_62 = arith.constant 0 : index
    %c0_63 = arith.constant 0 : index
    %195 = vector.load %arg9[%c0_62, %c0_63] : memref<128x128xf32, #tpu.memory_space<vmem>>, vector<128x128xf32>
    %cst_64 = arith.constant dense<0.000000e+00> : vector<64x128xf32>
    %196 = tpu.matmul %193, %195, %cst_64 {dimension_numbers = #tpu.dot_dimension_numbers<[1], [0], [0], [1], [0, 0, 1, 1], [], []>} : vector<64x128xf32>, vector<128x128xf32>, vector<64x128xf32> -> vector<64x128xf32>
    %c0_65 = arith.constant 0 : index
    %c0_66 = arith.constant 0 : index
    %197 = vector.load %arg10[%c0_65, %c0_66] : memref<128x128xf32, #tpu.memory_space<vmem>>, vector<128x128xf32>
    %cst_67 = arith.constant dense<0.000000e+00> : vector<64x128xf32>
    %198 = tpu.matmul %194, %197, %cst_67 {dimension_numbers = #tpu.dot_dimension_numbers<[1], [0], [0], [1], [0, 0, 1, 1], [], []>} : vector<64x128xf32>, vector<128x128xf32>, vector<64x128xf32> -> vector<64x128xf32>
    %199 = arith.addf %196, %198 : vector<64x128xf32>
    %c0_68 = arith.constant 0 : index
    %c0_69 = arith.constant 0 : index
    %200 = vector.load %arg11[%c0_68, %c0_69] : memref<1x128xf32, #tpu.memory_space<vmem>>, vector<1x128xf32>
    %201 = vector.broadcast %200 : vector<1x128xf32> to vector<64x128xf32>
    %202 = arith.addf %199, %201 : vector<64x128xf32>
    %c0_70 = arith.constant 0 : index
    %c0_71 = arith.constant 0 : index
    %203 = vector.load %arg13[%c0_70, %c0_71] : memref<64x128xf32, #tpu.memory_space<vmem>>, vector<64x128xf32>
    tpu.vector_store %arg13[%c0_70, %c0_71], %202 {strides = array<i32>} : memref<64x128xf32, #tpu.memory_space<vmem>>, vector<64x128xf32>,
    %c0_72 = arith.constant 0 : index
    %c0_73 = arith.constant 0 : index
    %204 = vector.load %arg12[%c0_72, %c0_73] : memref<5x5xf32, #tpu.memory_space<vmem>>, vector<5x5xf32>
    %205 = tpu.iota {dimensions = array<i32: 1>} : vector<1x5xi32>
    %c3_i32 = arith.constant 3 : i32
    %206 = vector.broadcast %c3_i32 : i32 to vector<1x5xi32>
    %207 = arith.cmpi eq, %205, %206 : vector<1x5xi32>
    %cst_74 = arith.constant 0.000000e+00 : f32
    %cst_75 = arith.constant -1.000000e+04 : f32
    %208 = vector.broadcast %cst_74 : f32 to vector<1x5xf32>
    %209 = vector.broadcast %cst_75 : f32 to vector<1x5xf32>
    %210 = arith.select %207, %208, %209 : vector<1x5xi1>, vector<1x5xf32>
    %211 = vector.shape_cast %210 : vector<1x5xf32> to vector<1x5xf32>
    %212 = vector.broadcast %211 : vector<1x5xf32> to vector<8x5xf32>
    %213 = vector.extract_strided_slice %202 {offsets = [0, 0], sizes = [8, 5], strides = [1, 1]} : vector<64x128xf32> to vector<8x5xf32>
    %214 = vector.extract_strided_slice %204 {offsets = [0, 0], sizes = [1, 5], strides = [1, 1]} : vector<5x5xf32> to vector<1x5xf32>
    %215 = vector.broadcast %214 : vector<1x5xf32> to vector<8x5xf32>
    %216 = arith.addf %212, %215 : vector<8x5xf32>
    %cst_76 = arith.constant dense<0xFF800000> : vector<8xf32>
    %217 = vector.multi_reduction <maximumf>, %216, %cst_76 [1] : vector<8x5xf32> to vector<8xf32>
    %218 = vector.shape_cast %217 : vector<8xf32> to vector<8x1xf32>
    %219 = vector.extract_strided_slice %204 {offsets = [1, 0], sizes = [1, 5], strides = [1, 1]} : vector<5x5xf32> to vector<1x5xf32>
    %220 = vector.broadcast %219 : vector<1x5xf32> to vector<8x5xf32>
    %221 = arith.addf %212, %220 : vector<8x5xf32>
    %cst_77 = arith.constant dense<0xFF800000> : vector<8xf32>
    %222 = vector.multi_reduction <maximumf>, %221, %cst_77 [1] : vector<8x5xf32> to vector<8xf32>
    %223 = vector.shape_cast %222 : vector<8xf32> to vector<8x1xf32>
    %224 = vector.extract_strided_slice %204 {offsets = [2, 0], sizes = [1, 5], strides = [1, 1]} : vector<5x5xf32> to vector<1x5xf32>
    %225 = vector.broadcast %224 : vector<1x5xf32> to vector<8x5xf32>
    %226 = arith.addf %212, %225 : vector<8x5xf32>
    %cst_78 = arith.constant dense<0xFF800000> : vector<8xf32>
    %227 = vector.multi_reduction <maximumf>, %226, %cst_78 [1] : vector<8x5xf32> to vector<8xf32>
    %228 = vector.shape_cast %227 : vector<8xf32> to vector<8x1xf32>
    %229 = vector.extract_strided_slice %204 {offsets = [3, 0], sizes = [1, 5], strides = [1, 1]} : vector<5x5xf32> to vector<1x5xf32>
    %230 = vector.broadcast %229 : vector<1x5xf32> to vector<8x5xf32>
    %231 = arith.addf %212, %230 : vector<8x5xf32>
    %cst_79 = arith.constant dense<0xFF800000> : vector<8xf32>
    %232 = vector.multi_reduction <maximumf>, %231, %cst_79 [1] : vector<8x5xf32> to vector<8xf32>
    %233 = vector.shape_cast %232 : vector<8xf32> to vector<8x1xf32>
    %234 = vector.extract_strided_slice %204 {offsets = [4, 0], sizes = [1, 5], strides = [1, 1]} : vector<5x5xf32> to vector<1x5xf32>
    %235 = vector.broadcast %234 : vector<1x5xf32> to vector<8x5xf32>
    %236 = arith.addf %212, %235 : vector<8x5xf32>
    %cst_80 = arith.constant dense<0xFF800000> : vector<8xf32>
    %237 = vector.multi_reduction <maximumf>, %236, %cst_80 [1] : vector<8x5xf32> to vector<8xf32>
    %238 = vector.shape_cast %237 : vector<8xf32> to vector<8x1xf32>
    %239 = tpu.concatenate %218, %223, %228, %233, %238 in 1 : vector<8x1xf32>, vector<8x1xf32>, vector<8x1xf32>, vector<8x1xf32>, vector<8x1xf32> -> vector<8x5xf32>
    %240 = arith.addf %239, %213 : vector<8x5xf32>
    %241 = vector.extract_strided_slice %202 {offsets = [8, 0], sizes = [8, 5], strides = [1, 1]} : vector<64x128xf32> to vector<8x5xf32>
    %242 = vector.extract_strided_slice %204 {offsets = [0, 0], sizes = [1, 5], strides = [1, 1]} : vector<5x5xf32> to vector<1x5xf32>
    %243 = vector.broadcast %242 : vector<1x5xf32> to vector<8x5xf32>
    %244 = arith.addf %240, %243 : vector<8x5xf32>
    %cst_81 = arith.constant dense<0xFF800000> : vector<8xf32>
    %245 = vector.multi_reduction <maximumf>, %244, %cst_81 [1] : vector<8x5xf32> to vector<8xf32>
    %246 = vector.shape_cast %245 : vector<8xf32> to vector<8x1xf32>
    %247 = vector.broadcast %246 : vector<8x1xf32> to vector<8x5xf32>
    %248 = arith.cmpf oeq, %244, %247 : vector<8x5xf32>
    %c5_i32 = arith.constant 5 : i32
    %249 = vector.shape_cast %205 : vector<1x5xi32> to vector<1x5xi32>
    %250 = vector.broadcast %249 : vector<1x5xi32> to vector<8x5xi32>
    %251 = vector.broadcast %c5_i32 : i32 to vector<8x5xi32>
    %252 = arith.select %248, %250, %251 : vector<8x5xi1>, vector<8x5xi32>
    %cst_82 = arith.constant dense<2147483647> : vector<8xi32>
    %253 = vector.multi_reduction <minsi>, %252, %cst_82 [1] : vector<8x5xi32> to vector<8xi32>
    %254 = vector.shape_cast %253 : vector<8xi32> to vector<8x1xi32>
    %255 = vector.extract_strided_slice %204 {offsets = [1, 0], sizes = [1, 5], strides = [1, 1]} : vector<5x5xf32> to vector<1x5xf32>
    %256 = vector.broadcast %255 : vector<1x5xf32> to vector<8x5xf32>
    %257 = arith.addf %240, %256 : vector<8x5xf32>
    %cst_83 = arith.constant dense<0xFF800000> : vector<8xf32>
    %258 = vector.multi_reduction <maximumf>, %257, %cst_83 [1] : vector<8x5xf32> to vector<8xf32>
    %259 = vector.shape_cast %258 : vector<8xf32> to vector<8x1xf32>
    %260 = vector.broadcast %259 : vector<8x1xf32> to vector<8x5xf32>
    %261 = arith.cmpf oeq, %257, %260 : vector<8x5xf32>
    %c5_i32_84 = arith.constant 5 : i32
    %262 = vector.shape_cast %205 : vector<1x5xi32> to vector<1x5xi32>
    %263 = vector.broadcast %262 : vector<1x5xi32> to vector<8x5xi32>
    %264 = vector.broadcast %c5_i32_84 : i32 to vector<8x5xi32>
    %265 = arith.select %261, %263, %264 : vector<8x5xi1>, vector<8x5xi32>
    %cst_85 = arith.constant dense<2147483647> : vector<8xi32>
    %266 = vector.multi_reduction <minsi>, %265, %cst_85 [1] : vector<8x5xi32> to vector<8xi32>
    %267 = vector.shape_cast %266 : vector<8xi32> to vector<8x1xi32>
    %268 = vector.extract_strided_slice %204 {offsets = [2, 0], sizes = [1, 5], strides = [1, 1]} : vector<5x5xf32> to vector<1x5xf32>
    %269 = vector.broadcast %268 : vector<1x5xf32> to vector<8x5xf32>
    %270 = arith.addf %240, %269 : vector<8x5xf32>
    %cst_86 = arith.constant dense<0xFF800000> : vector<8xf32>
    %271 = vector.multi_reduction <maximumf>, %270, %cst_86 [1] : vector<8x5xf32> to vector<8xf32>
    %272 = vector.shape_cast %271 : vector<8xf32> to vector<8x1xf32>
    %273 = vector.broadcast %272 : vector<8x1xf32> to vector<8x5xf32>
    %274 = arith.cmpf oeq, %270, %273 : vector<8x5xf32>
    %c5_i32_87 = arith.constant 5 : i32
    %275 = vector.shape_cast %205 : vector<1x5xi32> to vector<1x5xi32>
    %276 = vector.broadcast %275 : vector<1x5xi32> to vector<8x5xi32>
    %277 = vector.broadcast %c5_i32_87 : i32 to vector<8x5xi32>
    %278 = arith.select %274, %276, %277 : vector<8x5xi1>, vector<8x5xi32>
    %cst_88 = arith.constant dense<2147483647> : vector<8xi32>
    %279 = vector.multi_reduction <minsi>, %278, %cst_88 [1] : vector<8x5xi32> to vector<8xi32>
    %280 = vector.shape_cast %279 : vector<8xi32> to vector<8x1xi32>
    %281 = vector.extract_strided_slice %204 {offsets = [3, 0], sizes = [1, 5], strides = [1, 1]} : vector<5x5xf32> to vector<1x5xf32>
    %282 = vector.broadcast %281 : vector<1x5xf32> to vector<8x5xf32>
    %283 = arith.addf %240, %282 : vector<8x5xf32>
    %cst_89 = arith.constant dense<0xFF800000> : vector<8xf32>
    %284 = vector.multi_reduction <maximumf>, %283, %cst_89 [1] : vector<8x5xf32> to vector<8xf32>
    %285 = vector.shape_cast %284 : vector<8xf32> to vector<8x1xf32>
    %286 = vector.broadcast %285 : vector<8x1xf32> to vector<8x5xf32>
    %287 = arith.cmpf oeq, %283, %286 : vector<8x5xf32>
    %c5_i32_90 = arith.constant 5 : i32
    %288 = vector.shape_cast %205 : vector<1x5xi32> to vector<1x5xi32>
    %289 = vector.broadcast %288 : vector<1x5xi32> to vector<8x5xi32>
    %290 = vector.broadcast %c5_i32_90 : i32 to vector<8x5xi32>
    %291 = arith.select %287, %289, %290 : vector<8x5xi1>, vector<8x5xi32>
    %cst_91 = arith.constant dense<2147483647> : vector<8xi32>
    %292 = vector.multi_reduction <minsi>, %291, %cst_91 [1] : vector<8x5xi32> to vector<8xi32>
    %293 = vector.shape_cast %292 : vector<8xi32> to vector<8x1xi32>
    %294 = vector.extract_strided_slice %204 {offsets = [4, 0], sizes = [1, 5], strides = [1, 1]} : vector<5x5xf32> to vector<1x5xf32>
    %295 = vector.broadcast %294 : vector<1x5xf32> to vector<8x5xf32>
    %296 = arith.addf %240, %295 : vector<8x5xf32>
    %cst_92 = arith.constant dense<0xFF800000> : vector<8xf32>
    %297 = vector.multi_reduction <maximumf>, %296, %cst_92 [1] : vector<8x5xf32> to vector<8xf32>
    %298 = vector.shape_cast %297 : vector<8xf32> to vector<8x1xf32>
    %299 = vector.broadcast %298 : vector<8x1xf32> to vector<8x5xf32>
    %300 = arith.cmpf oeq, %296, %299 : vector<8x5xf32>
    %c5_i32_93 = arith.constant 5 : i32
    %301 = vector.shape_cast %205 : vector<1x5xi32> to vector<1x5xi32>
    %302 = vector.broadcast %301 : vector<1x5xi32> to vector<8x5xi32>
    %303 = vector.broadcast %c5_i32_93 : i32 to vector<8x5xi32>
    %304 = arith.select %300, %302, %303 : vector<8x5xi1>, vector<8x5xi32>
    %cst_94 = arith.constant dense<2147483647> : vector<8xi32>
    %305 = vector.multi_reduction <minsi>, %304, %cst_94 [1] : vector<8x5xi32> to vector<8xi32>
    %306 = vector.shape_cast %305 : vector<8xi32> to vector<8x1xi32>
    %307 = tpu.concatenate %254, %267, %280, %293, %306 in 1 : vector<8x1xi32>, vector<8x1xi32>, vector<8x1xi32>, vector<8x1xi32>, vector<8x1xi32> -> vector<8x5xi32>
    %308 = tpu.concatenate %246, %259, %272, %285, %298 in 1 : vector<8x1xf32>, vector<8x1xf32>, vector<8x1xf32>, vector<8x1xf32>, vector<8x1xf32> -> vector<8x5xf32>
    %309 = arith.addf %308, %241 : vector<8x5xf32>
    %310 = vector.extract_strided_slice %202 {offsets = [16, 0], sizes = [8, 5], strides = [1, 1]} : vector<64x128xf32> to vector<8x5xf32>
    %311 = vector.extract_strided_slice %204 {offsets = [0, 0], sizes = [1, 5], strides = [1, 1]} : vector<5x5xf32> to vector<1x5xf32>
    %312 = vector.broadcast %311 : vector<1x5xf32> to vector<8x5xf32>
    %313 = arith.addf %309, %312 : vector<8x5xf32>
    %cst_95 = arith.constant dense<0xFF800000> : vector<8xf32>
    %314 = vector.multi_reduction <maximumf>, %313, %cst_95 [1] : vector<8x5xf32> to vector<8xf32>
    %315 = vector.shape_cast %314 : vector<8xf32> to vector<8x1xf32>
    %316 = vector.broadcast %315 : vector<8x1xf32> to vector<8x5xf32>
    %317 = arith.cmpf oeq, %313, %316 : vector<8x5xf32>
    %c5_i32_96 = arith.constant 5 : i32
    %318 = vector.shape_cast %205 : vector<1x5xi32> to vector<1x5xi32>
    %319 = vector.broadcast %318 : vector<1x5xi32> to vector<8x5xi32>
    %320 = vector.broadcast %c5_i32_96 : i32 to vector<8x5xi32>
    %321 = arith.select %317, %319, %320 : vector<8x5xi1>, vector<8x5xi32>
    %cst_97 = arith.constant dense<2147483647> : vector<8xi32>
    %322 = vector.multi_reduction <minsi>, %321, %cst_97 [1] : vector<8x5xi32> to vector<8xi32>
    %323 = vector.shape_cast %322 : vector<8xi32> to vector<8x1xi32>
    %324 = vector.extract_strided_slice %204 {offsets = [1, 0], sizes = [1, 5], strides = [1, 1]} : vector<5x5xf32> to vector<1x5xf32>
    %325 = vector.broadcast %324 : vector<1x5xf32> to vector<8x5xf32>
    %326 = arith.addf %309, %325 : vector<8x5xf32>
    %cst_98 = arith.constant dense<0xFF800000> : vector<8xf32>
    %327 = vector.multi_reduction <maximumf>, %326, %cst_98 [1] : vector<8x5xf32> to vector<8xf32>
    %328 = vector.shape_cast %327 : vector<8xf32> to vector<8x1xf32>
    %329 = vector.broadcast %328 : vector<8x1xf32> to vector<8x5xf32>
    %330 = arith.cmpf oeq, %326, %329 : vector<8x5xf32>
    %c5_i32_99 = arith.constant 5 : i32
    %331 = vector.shape_cast %205 : vector<1x5xi32> to vector<1x5xi32>
    %332 = vector.broadcast %331 : vector<1x5xi32> to vector<8x5xi32>
    %333 = vector.broadcast %c5_i32_99 : i32 to vector<8x5xi32>
    %334 = arith.select %330, %332, %333 : vector<8x5xi1>, vector<8x5xi32>
    %cst_100 = arith.constant dense<2147483647> : vector<8xi32>
    %335 = vector.multi_reduction <minsi>, %334, %cst_100 [1] : vector<8x5xi32> to vector<8xi32>
    %336 = vector.shape_cast %335 : vector<8xi32> to vector<8x1xi32>
    %337 = vector.extract_strided_slice %204 {offsets = [2, 0], sizes = [1, 5], strides = [1, 1]} : vector<5x5xf32> to vector<1x5xf32>
    %338 = vector.broadcast %337 : vector<1x5xf32> to vector<8x5xf32>
    %339 = arith.addf %309, %338 : vector<8x5xf32>
    %cst_101 = arith.constant dense<0xFF800000> : vector<8xf32>
    %340 = vector.multi_reduction <maximumf>, %339, %cst_101 [1] : vector<8x5xf32> to vector<8xf32>
    %341 = vector.shape_cast %340 : vector<8xf32> to vector<8x1xf32>
    %342 = vector.broadcast %341 : vector<8x1xf32> to vector<8x5xf32>
    %343 = arith.cmpf oeq, %339, %342 : vector<8x5xf32>
    %c5_i32_102 = arith.constant 5 : i32
    %344 = vector.shape_cast %205 : vector<1x5xi32> to vector<1x5xi32>
    %345 = vector.broadcast %344 : vector<1x5xi32> to vector<8x5xi32>
    %346 = vector.broadcast %c5_i32_102 : i32 to vector<8x5xi32>
    %347 = arith.select %343, %345, %346 : vector<8x5xi1>, vector<8x5xi32>
    %cst_103 = arith.constant dense<2147483647> : vector<8xi32>
    %348 = vector.multi_reduction <minsi>, %347, %cst_103 [1] : vector<8x5xi32> to vector<8xi32>
    %349 = vector.shape_cast %348 : vector<8xi32> to vector<8x1xi32>
    %350 = vector.extract_strided_slice %204 {offsets = [3, 0], sizes = [1, 5], strides = [1, 1]} : vector<5x5xf32> to vector<1x5xf32>
    %351 = vector.broadcast %350 : vector<1x5xf32> to vector<8x5xf32>
    %352 = arith.addf %309, %351 : vector<8x5xf32>
    %cst_104 = arith.constant dense<0xFF800000> : vector<8xf32>
    %353 = vector.multi_reduction <maximumf>, %352, %cst_104 [1] : vector<8x5xf32> to vector<8xf32>
    %354 = vector.shape_cast %353 : vector<8xf32> to vector<8x1xf32>
    %355 = vector.broadcast %354 : vector<8x1xf32> to vector<8x5xf32>
    %356 = arith.cmpf oeq, %352, %355 : vector<8x5xf32>
    %c5_i32_105 = arith.constant 5 : i32
    %357 = vector.shape_cast %205 : vector<1x5xi32> to vector<1x5xi32>
    %358 = vector.broadcast %357 : vector<1x5xi32> to vector<8x5xi32>
    %359 = vector.broadcast %c5_i32_105 : i32 to vector<8x5xi32>
    %360 = arith.select %356, %358, %359 : vector<8x5xi1>, vector<8x5xi32>
    %cst_106 = arith.constant dense<2147483647> : vector<8xi32>
    %361 = vector.multi_reduction <minsi>, %360, %cst_106 [1] : vector<8x5xi32> to vector<8xi32>
    %362 = vector.shape_cast %361 : vector<8xi32> to vector<8x1xi32>
    %363 = vector.extract_strided_slice %204 {offsets = [4, 0], sizes = [1, 5], strides = [1, 1]} : vector<5x5xf32> to vector<1x5xf32>
    %364 = vector.broadcast %363 : vector<1x5xf32> to vector<8x5xf32>
    %365 = arith.addf %309, %364 : vector<8x5xf32>
    %cst_107 = arith.constant dense<0xFF800000> : vector<8xf32>
    %366 = vector.multi_reduction <maximumf>, %365, %cst_107 [1] : vector<8x5xf32> to vector<8xf32>
    %367 = vector.shape_cast %366 : vector<8xf32> to vector<8x1xf32>
    %368 = vector.broadcast %367 : vector<8x1xf32> to vector<8x5xf32>
    %369 = arith.cmpf oeq, %365, %368 : vector<8x5xf32>
    %c5_i32_108 = arith.constant 5 : i32
    %370 = vector.shape_cast %205 : vector<1x5xi32> to vector<1x5xi32>
    %371 = vector.broadcast %370 : vector<1x5xi32> to vector<8x5xi32>
    %372 = vector.broadcast %c5_i32_108 : i32 to vector<8x5xi32>
    %373 = arith.select %369, %371, %372 : vector<8x5xi1>, vector<8x5xi32>
    %cst_109 = arith.constant dense<2147483647> : vector<8xi32>
    %374 = vector.multi_reduction <minsi>, %373, %cst_109 [1] : vector<8x5xi32> to vector<8xi32>
    %375 = vector.shape_cast %374 : vector<8xi32> to vector<8x1xi32>
    %376 = tpu.concatenate %323, %336, %349, %362, %375 in 1 : vector<8x1xi32>, vector<8x1xi32>, vector<8x1xi32>, vector<8x1xi32>, vector<8x1xi32> -> vector<8x5xi32>
    %377 = tpu.concatenate %315, %328, %341, %354, %367 in 1 : vector<8x1xf32>, vector<8x1xf32>, vector<8x1xf32>, vector<8x1xf32>, vector<8x1xf32> -> vector<8x5xf32>
    %378 = arith.addf %377, %310 : vector<8x5xf32>
    %379 = vector.extract_strided_slice %202 {offsets = [24, 0], sizes = [8, 5], strides = [1, 1]} : vector<64x128xf32> to vector<8x5xf32>
    %380 = vector.extract_strided_slice %204 {offsets = [0, 0], sizes = [1, 5], strides = [1, 1]} : vector<5x5xf32> to vector<1x5xf32>
    %381 = vector.broadcast %380 : vector<1x5xf32> to vector<8x5xf32>
    %382 = arith.addf %378, %381 : vector<8x5xf32>
    %cst_110 = arith.constant dense<0xFF800000> : vector<8xf32>
    %383 = vector.multi_reduction <maximumf>, %382, %cst_110 [1] : vector<8x5xf32> to vector<8xf32>
    %384 = vector.shape_cast %383 : vector<8xf32> to vector<8x1xf32>
    %385 = vector.broadcast %384 : vector<8x1xf32> to vector<8x5xf32>
    %386 = arith.cmpf oeq, %382, %385 : vector<8x5xf32>
    %c5_i32_111 = arith.constant 5 : i32
    %387 = vector.shape_cast %205 : vector<1x5xi32> to vector<1x5xi32>
    %388 = vector.broadcast %387 : vector<1x5xi32> to vector<8x5xi32>
    %389 = vector.broadcast %c5_i32_111 : i32 to vector<8x5xi32>
    %390 = arith.select %386, %388, %389 : vector<8x5xi1>, vector<8x5xi32>
    %cst_112 = arith.constant dense<2147483647> : vector<8xi32>
    %391 = vector.multi_reduction <minsi>, %390, %cst_112 [1] : vector<8x5xi32> to vector<8xi32>
    %392 = vector.shape_cast %391 : vector<8xi32> to vector<8x1xi32>
    %393 = vector.extract_strided_slice %204 {offsets = [1, 0], sizes = [1, 5], strides = [1, 1]} : vector<5x5xf32> to vector<1x5xf32>
    %394 = vector.broadcast %393 : vector<1x5xf32> to vector<8x5xf32>
    %395 = arith.addf %378, %394 : vector<8x5xf32>
    %cst_113 = arith.constant dense<0xFF800000> : vector<8xf32>
    %396 = vector.multi_reduction <maximumf>, %395, %cst_113 [1] : vector<8x5xf32> to vector<8xf32>
    %397 = vector.shape_cast %396 : vector<8xf32> to vector<8x1xf32>
    %398 = vector.broadcast %397 : vector<8x1xf32> to vector<8x5xf32>
    %399 = arith.cmpf oeq, %395, %398 : vector<8x5xf32>
    %c5_i32_114 = arith.constant 5 : i32
    %400 = vector.shape_cast %205 : vector<1x5xi32> to vector<1x5xi32>
    %401 = vector.broadcast %400 : vector<1x5xi32> to vector<8x5xi32>
    %402 = vector.broadcast %c5_i32_114 : i32 to vector<8x5xi32>
    %403 = arith.select %399, %401, %402 : vector<8x5xi1>, vector<8x5xi32>
    %cst_115 = arith.constant dense<2147483647> : vector<8xi32>
    %404 = vector.multi_reduction <minsi>, %403, %cst_115 [1] : vector<8x5xi32> to vector<8xi32>
    %405 = vector.shape_cast %404 : vector<8xi32> to vector<8x1xi32>
    %406 = vector.extract_strided_slice %204 {offsets = [2, 0], sizes = [1, 5], strides = [1, 1]} : vector<5x5xf32> to vector<1x5xf32>
    %407 = vector.broadcast %406 : vector<1x5xf32> to vector<8x5xf32>
    %408 = arith.addf %378, %407 : vector<8x5xf32>
    %cst_116 = arith.constant dense<0xFF800000> : vector<8xf32>
    %409 = vector.multi_reduction <maximumf>, %408, %cst_116 [1] : vector<8x5xf32> to vector<8xf32>
    %410 = vector.shape_cast %409 : vector<8xf32> to vector<8x1xf32>
    %411 = vector.broadcast %410 : vector<8x1xf32> to vector<8x5xf32>
    %412 = arith.cmpf oeq, %408, %411 : vector<8x5xf32>
    %c5_i32_117 = arith.constant 5 : i32
    %413 = vector.shape_cast %205 : vector<1x5xi32> to vector<1x5xi32>
    %414 = vector.broadcast %413 : vector<1x5xi32> to vector<8x5xi32>
    %415 = vector.broadcast %c5_i32_117 : i32 to vector<8x5xi32>
    %416 = arith.select %412, %414, %415 : vector<8x5xi1>, vector<8x5xi32>
    %cst_118 = arith.constant dense<2147483647> : vector<8xi32>
    %417 = vector.multi_reduction <minsi>, %416, %cst_118 [1] : vector<8x5xi32> to vector<8xi32>
    %418 = vector.shape_cast %417 : vector<8xi32> to vector<8x1xi32>
    %419 = vector.extract_strided_slice %204 {offsets = [3, 0], sizes = [1, 5], strides = [1, 1]} : vector<5x5xf32> to vector<1x5xf32>
    %420 = vector.broadcast %419 : vector<1x5xf32> to vector<8x5xf32>
    %421 = arith.addf %378, %420 : vector<8x5xf32>
    %cst_119 = arith.constant dense<0xFF800000> : vector<8xf32>
    %422 = vector.multi_reduction <maximumf>, %421, %cst_119 [1] : vector<8x5xf32> to vector<8xf32>
    %423 = vector.shape_cast %422 : vector<8xf32> to vector<8x1xf32>
    %424 = vector.broadcast %423 : vector<8x1xf32> to vector<8x5xf32>
    %425 = arith.cmpf oeq, %421, %424 : vector<8x5xf32>
    %c5_i32_120 = arith.constant 5 : i32
    %426 = vector.shape_cast %205 : vector<1x5xi32> to vector<1x5xi32>
    %427 = vector.broadcast %426 : vector<1x5xi32> to vector<8x5xi32>
    %428 = vector.broadcast %c5_i32_120 : i32 to vector<8x5xi32>
    %429 = arith.select %425, %427, %428 : vector<8x5xi1>, vector<8x5xi32>
    %cst_121 = arith.constant dense<2147483647> : vector<8xi32>
    %430 = vector.multi_reduction <minsi>, %429, %cst_121 [1] : vector<8x5xi32> to vector<8xi32>
    %431 = vector.shape_cast %430 : vector<8xi32> to vector<8x1xi32>
    %432 = vector.extract_strided_slice %204 {offsets = [4, 0], sizes = [1, 5], strides = [1, 1]} : vector<5x5xf32> to vector<1x5xf32>
    %433 = vector.broadcast %432 : vector<1x5xf32> to vector<8x5xf32>
    %434 = arith.addf %378, %433 : vector<8x5xf32>
    %cst_122 = arith.constant dense<0xFF800000> : vector<8xf32>
    %435 = vector.multi_reduction <maximumf>, %434, %cst_122 [1] : vector<8x5xf32> to vector<8xf32>
    %436 = vector.shape_cast %435 : vector<8xf32> to vector<8x1xf32>
    %437 = vector.broadcast %436 : vector<8x1xf32> to vector<8x5xf32>
    %438 = arith.cmpf oeq, %434, %437 : vector<8x5xf32>
    %c5_i32_123 = arith.constant 5 : i32
    %439 = vector.shape_cast %205 : vector<1x5xi32> to vector<1x5xi32>
    %440 = vector.broadcast %439 : vector<1x5xi32> to vector<8x5xi32>
    %441 = vector.broadcast %c5_i32_123 : i32 to vector<8x5xi32>
    %442 = arith.select %438, %440, %441 : vector<8x5xi1>, vector<8x5xi32>
    %cst_124 = arith.constant dense<2147483647> : vector<8xi32>
    %443 = vector.multi_reduction <minsi>, %442, %cst_124 [1] : vector<8x5xi32> to vector<8xi32>
    %444 = vector.shape_cast %443 : vector<8xi32> to vector<8x1xi32>
    %445 = tpu.concatenate %392, %405, %418, %431, %444 in 1 : vector<8x1xi32>, vector<8x1xi32>, vector<8x1xi32>, vector<8x1xi32>, vector<8x1xi32> -> vector<8x5xi32>
    %446 = tpu.concatenate %384, %397, %410, %423, %436 in 1 : vector<8x1xf32>, vector<8x1xf32>, vector<8x1xf32>, vector<8x1xf32>, vector<8x1xf32> -> vector<8x5xf32>
    %447 = arith.addf %446, %379 : vector<8x5xf32>
    %448 = vector.extract_strided_slice %202 {offsets = [32, 0], sizes = [8, 5], strides = [1, 1]} : vector<64x128xf32> to vector<8x5xf32>
    %449 = vector.extract_strided_slice %204 {offsets = [0, 0], sizes = [1, 5], strides = [1, 1]} : vector<5x5xf32> to vector<1x5xf32>
    %450 = vector.broadcast %449 : vector<1x5xf32> to vector<8x5xf32>
    %451 = arith.addf %447, %450 : vector<8x5xf32>
    %cst_125 = arith.constant dense<0xFF800000> : vector<8xf32>
    %452 = vector.multi_reduction <maximumf>, %451, %cst_125 [1] : vector<8x5xf32> to vector<8xf32>
    %453 = vector.shape_cast %452 : vector<8xf32> to vector<8x1xf32>
    %454 = vector.broadcast %453 : vector<8x1xf32> to vector<8x5xf32>
    %455 = arith.cmpf oeq, %451, %454 : vector<8x5xf32>
    %c5_i32_126 = arith.constant 5 : i32
    %456 = vector.shape_cast %205 : vector<1x5xi32> to vector<1x5xi32>
    %457 = vector.broadcast %456 : vector<1x5xi32> to vector<8x5xi32>
    %458 = vector.broadcast %c5_i32_126 : i32 to vector<8x5xi32>
    %459 = arith.select %455, %457, %458 : vector<8x5xi1>, vector<8x5xi32>
    %cst_127 = arith.constant dense<2147483647> : vector<8xi32>
    %460 = vector.multi_reduction <minsi>, %459, %cst_127 [1] : vector<8x5xi32> to vector<8xi32>
    %461 = vector.shape_cast %460 : vector<8xi32> to vector<8x1xi32>
    %462 = vector.extract_strided_slice %204 {offsets = [1, 0], sizes = [1, 5], strides = [1, 1]} : vector<5x5xf32> to vector<1x5xf32>
    %463 = vector.broadcast %462 : vector<1x5xf32> to vector<8x5xf32>
    %464 = arith.addf %447, %463 : vector<8x5xf32>
    %cst_128 = arith.constant dense<0xFF800000> : vector<8xf32>
    %465 = vector.multi_reduction <maximumf>, %464, %cst_128 [1] : vector<8x5xf32> to vector<8xf32>
    %466 = vector.shape_cast %465 : vector<8xf32> to vector<8x1xf32>
    %467 = vector.broadcast %466 : vector<8x1xf32> to vector<8x5xf32>
    %468 = arith.cmpf oeq, %464, %467 : vector<8x5xf32>
    %c5_i32_129 = arith.constant 5 : i32
    %469 = vector.shape_cast %205 : vector<1x5xi32> to vector<1x5xi32>
    %470 = vector.broadcast %469 : vector<1x5xi32> to vector<8x5xi32>
    %471 = vector.broadcast %c5_i32_129 : i32 to vector<8x5xi32>
    %472 = arith.select %468, %470, %471 : vector<8x5xi1>, vector<8x5xi32>
    %cst_130 = arith.constant dense<2147483647> : vector<8xi32>
    %473 = vector.multi_reduction <minsi>, %472, %cst_130 [1] : vector<8x5xi32> to vector<8xi32>
    %474 = vector.shape_cast %473 : vector<8xi32> to vector<8x1xi32>
    %475 = vector.extract_strided_slice %204 {offsets = [2, 0], sizes = [1, 5], strides = [1, 1]} : vector<5x5xf32> to vector<1x5xf32>
    %476 = vector.broadcast %475 : vector<1x5xf32> to vector<8x5xf32>
    %477 = arith.addf %447, %476 : vector<8x5xf32>
    %cst_131 = arith.constant dense<0xFF800000> : vector<8xf32>
    %478 = vector.multi_reduction <maximumf>, %477, %cst_131 [1] : vector<8x5xf32> to vector<8xf32>
    %479 = vector.shape_cast %478 : vector<8xf32> to vector<8x1xf32>
    %480 = vector.broadcast %479 : vector<8x1xf32> to vector<8x5xf32>
    %481 = arith.cmpf oeq, %477, %480 : vector<8x5xf32>
    %c5_i32_132 = arith.constant 5 : i32
    %482 = vector.shape_cast %205 : vector<1x5xi32> to vector<1x5xi32>
    %483 = vector.broadcast %482 : vector<1x5xi32> to vector<8x5xi32>
    %484 = vector.broadcast %c5_i32_132 : i32 to vector<8x5xi32>
    %485 = arith.select %481, %483, %484 : vector<8x5xi1>, vector<8x5xi32>
    %cst_133 = arith.constant dense<2147483647> : vector<8xi32>
    %486 = vector.multi_reduction <minsi>, %485, %cst_133 [1] : vector<8x5xi32> to vector<8xi32>
    %487 = vector.shape_cast %486 : vector<8xi32> to vector<8x1xi32>
    %488 = vector.extract_strided_slice %204 {offsets = [3, 0], sizes = [1, 5], strides = [1, 1]} : vector<5x5xf32> to vector<1x5xf32>
    %489 = vector.broadcast %488 : vector<1x5xf32> to vector<8x5xf32>
    %490 = arith.addf %447, %489 : vector<8x5xf32>
    %cst_134 = arith.constant dense<0xFF800000> : vector<8xf32>
    %491 = vector.multi_reduction <maximumf>, %490, %cst_134 [1] : vector<8x5xf32> to vector<8xf32>
    %492 = vector.shape_cast %491 : vector<8xf32> to vector<8x1xf32>
    %493 = vector.broadcast %492 : vector<8x1xf32> to vector<8x5xf32>
    %494 = arith.cmpf oeq, %490, %493 : vector<8x5xf32>
    %c5_i32_135 = arith.constant 5 : i32
    %495 = vector.shape_cast %205 : vector<1x5xi32> to vector<1x5xi32>
    %496 = vector.broadcast %495 : vector<1x5xi32> to vector<8x5xi32>
    %497 = vector.broadcast %c5_i32_135 : i32 to vector<8x5xi32>
    %498 = arith.select %494, %496, %497 : vector<8x5xi1>, vector<8x5xi32>
    %cst_136 = arith.constant dense<2147483647> : vector<8xi32>
    %499 = vector.multi_reduction <minsi>, %498, %cst_136 [1] : vector<8x5xi32> to vector<8xi32>
    %500 = vector.shape_cast %499 : vector<8xi32> to vector<8x1xi32>
    %501 = vector.extract_strided_slice %204 {offsets = [4, 0], sizes = [1, 5], strides = [1, 1]} : vector<5x5xf32> to vector<1x5xf32>
    %502 = vector.broadcast %501 : vector<1x5xf32> to vector<8x5xf32>
    %503 = arith.addf %447, %502 : vector<8x5xf32>
    %cst_137 = arith.constant dense<0xFF800000> : vector<8xf32>
    %504 = vector.multi_reduction <maximumf>, %503, %cst_137 [1] : vector<8x5xf32> to vector<8xf32>
    %505 = vector.shape_cast %504 : vector<8xf32> to vector<8x1xf32>
    %506 = vector.broadcast %505 : vector<8x1xf32> to vector<8x5xf32>
    %507 = arith.cmpf oeq, %503, %506 : vector<8x5xf32>
    %c5_i32_138 = arith.constant 5 : i32
    %508 = vector.shape_cast %205 : vector<1x5xi32> to vector<1x5xi32>
    %509 = vector.broadcast %508 : vector<1x5xi32> to vector<8x5xi32>
    %510 = vector.broadcast %c5_i32_138 : i32 to vector<8x5xi32>
    %511 = arith.select %507, %509, %510 : vector<8x5xi1>, vector<8x5xi32>
    %cst_139 = arith.constant dense<2147483647> : vector<8xi32>
    %512 = vector.multi_reduction <minsi>, %511, %cst_139 [1] : vector<8x5xi32> to vector<8xi32>
    %513 = vector.shape_cast %512 : vector<8xi32> to vector<8x1xi32>
    %514 = tpu.concatenate %461, %474, %487, %500, %513 in 1 : vector<8x1xi32>, vector<8x1xi32>, vector<8x1xi32>, vector<8x1xi32>, vector<8x1xi32> -> vector<8x5xi32>
    %515 = tpu.concatenate %453, %466, %479, %492, %505 in 1 : vector<8x1xf32>, vector<8x1xf32>, vector<8x1xf32>, vector<8x1xf32>, vector<8x1xf32> -> vector<8x5xf32>
    %516 = arith.addf %515, %448 : vector<8x5xf32>
    %517 = vector.extract_strided_slice %202 {offsets = [40, 0], sizes = [8, 5], strides = [1, 1]} : vector<64x128xf32> to vector<8x5xf32>
    %518 = vector.extract_strided_slice %204 {offsets = [0, 0], sizes = [1, 5], strides = [1, 1]} : vector<5x5xf32> to vector<1x5xf32>
    %519 = vector.broadcast %518 : vector<1x5xf32> to vector<8x5xf32>
    %520 = arith.addf %516, %519 : vector<8x5xf32>
    %cst_140 = arith.constant dense<0xFF800000> : vector<8xf32>
    %521 = vector.multi_reduction <maximumf>, %520, %cst_140 [1] : vector<8x5xf32> to vector<8xf32>
    %522 = vector.shape_cast %521 : vector<8xf32> to vector<8x1xf32>
    %523 = vector.broadcast %522 : vector<8x1xf32> to vector<8x5xf32>
    %524 = arith.cmpf oeq, %520, %523 : vector<8x5xf32>
    %c5_i32_141 = arith.constant 5 : i32
    %525 = vector.shape_cast %205 : vector<1x5xi32> to vector<1x5xi32>
    %526 = vector.broadcast %525 : vector<1x5xi32> to vector<8x5xi32>
    %527 = vector.broadcast %c5_i32_141 : i32 to vector<8x5xi32>
    %528 = arith.select %524, %526, %527 : vector<8x5xi1>, vector<8x5xi32>
    %cst_142 = arith.constant dense<2147483647> : vector<8xi32>
    %529 = vector.multi_reduction <minsi>, %528, %cst_142 [1] : vector<8x5xi32> to vector<8xi32>
    %530 = vector.shape_cast %529 : vector<8xi32> to vector<8x1xi32>
    %531 = vector.extract_strided_slice %204 {offsets = [1, 0], sizes = [1, 5], strides = [1, 1]} : vector<5x5xf32> to vector<1x5xf32>
    %532 = vector.broadcast %531 : vector<1x5xf32> to vector<8x5xf32>
    %533 = arith.addf %516, %532 : vector<8x5xf32>
    %cst_143 = arith.constant dense<0xFF800000> : vector<8xf32>
    %534 = vector.multi_reduction <maximumf>, %533, %cst_143 [1] : vector<8x5xf32> to vector<8xf32>
    %535 = vector.shape_cast %534 : vector<8xf32> to vector<8x1xf32>
    %536 = vector.broadcast %535 : vector<8x1xf32> to vector<8x5xf32>
    %537 = arith.cmpf oeq, %533, %536 : vector<8x5xf32>
    %c5_i32_144 = arith.constant 5 : i32
    %538 = vector.shape_cast %205 : vector<1x5xi32> to vector<1x5xi32>
    %539 = vector.broadcast %538 : vector<1x5xi32> to vector<8x5xi32>
    %540 = vector.broadcast %c5_i32_144 : i32 to vector<8x5xi32>
    %541 = arith.select %537, %539, %540 : vector<8x5xi1>, vector<8x5xi32>
    %cst_145 = arith.constant dense<2147483647> : vector<8xi32>
    %542 = vector.multi_reduction <minsi>, %541, %cst_145 [1] : vector<8x5xi32> to vector<8xi32>
    %543 = vector.shape_cast %542 : vector<8xi32> to vector<8x1xi32>
    %544 = vector.extract_strided_slice %204 {offsets = [2, 0], sizes = [1, 5], strides = [1, 1]} : vector<5x5xf32> to vector<1x5xf32>
    %545 = vector.broadcast %544 : vector<1x5xf32> to vector<8x5xf32>
    %546 = arith.addf %516, %545 : vector<8x5xf32>
    %cst_146 = arith.constant dense<0xFF800000> : vector<8xf32>
    %547 = vector.multi_reduction <maximumf>, %546, %cst_146 [1] : vector<8x5xf32> to vector<8xf32>
    %548 = vector.shape_cast %547 : vector<8xf32> to vector<8x1xf32>
    %549 = vector.broadcast %548 : vector<8x1xf32> to vector<8x5xf32>
    %550 = arith.cmpf oeq, %546, %549 : vector<8x5xf32>
    %c5_i32_147 = arith.constant 5 : i32
    %551 = vector.shape_cast %205 : vector<1x5xi32> to vector<1x5xi32>
    %552 = vector.broadcast %551 : vector<1x5xi32> to vector<8x5xi32>
    %553 = vector.broadcast %c5_i32_147 : i32 to vector<8x5xi32>
    %554 = arith.select %550, %552, %553 : vector<8x5xi1>, vector<8x5xi32>
    %cst_148 = arith.constant dense<2147483647> : vector<8xi32>
    %555 = vector.multi_reduction <minsi>, %554, %cst_148 [1] : vector<8x5xi32> to vector<8xi32>
    %556 = vector.shape_cast %555 : vector<8xi32> to vector<8x1xi32>
    %557 = vector.extract_strided_slice %204 {offsets = [3, 0], sizes = [1, 5], strides = [1, 1]} : vector<5x5xf32> to vector<1x5xf32>
    %558 = vector.broadcast %557 : vector<1x5xf32> to vector<8x5xf32>
    %559 = arith.addf %516, %558 : vector<8x5xf32>
    %cst_149 = arith.constant dense<0xFF800000> : vector<8xf32>
    %560 = vector.multi_reduction <maximumf>, %559, %cst_149 [1] : vector<8x5xf32> to vector<8xf32>
    %561 = vector.shape_cast %560 : vector<8xf32> to vector<8x1xf32>
    %562 = vector.broadcast %561 : vector<8x1xf32> to vector<8x5xf32>
    %563 = arith.cmpf oeq, %559, %562 : vector<8x5xf32>
    %c5_i32_150 = arith.constant 5 : i32
    %564 = vector.shape_cast %205 : vector<1x5xi32> to vector<1x5xi32>
    %565 = vector.broadcast %564 : vector<1x5xi32> to vector<8x5xi32>
    %566 = vector.broadcast %c5_i32_150 : i32 to vector<8x5xi32>
    %567 = arith.select %563, %565, %566 : vector<8x5xi1>, vector<8x5xi32>
    %cst_151 = arith.constant dense<2147483647> : vector<8xi32>
    %568 = vector.multi_reduction <minsi>, %567, %cst_151 [1] : vector<8x5xi32> to vector<8xi32>
    %569 = vector.shape_cast %568 : vector<8xi32> to vector<8x1xi32>
    %570 = vector.extract_strided_slice %204 {offsets = [4, 0], sizes = [1, 5], strides = [1, 1]} : vector<5x5xf32> to vector<1x5xf32>
    %571 = vector.broadcast %570 : vector<1x5xf32> to vector<8x5xf32>
    %572 = arith.addf %516, %571 : vector<8x5xf32>
    %cst_152 = arith.constant dense<0xFF800000> : vector<8xf32>
    %573 = vector.multi_reduction <maximumf>, %572, %cst_152 [1] : vector<8x5xf32> to vector<8xf32>
    %574 = vector.shape_cast %573 : vector<8xf32> to vector<8x1xf32>
    %575 = vector.broadcast %574 : vector<8x1xf32> to vector<8x5xf32>
    %576 = arith.cmpf oeq, %572, %575 : vector<8x5xf32>
    %c5_i32_153 = arith.constant 5 : i32
    %577 = vector.shape_cast %205 : vector<1x5xi32> to vector<1x5xi32>
    %578 = vector.broadcast %577 : vector<1x5xi32> to vector<8x5xi32>
    %579 = vector.broadcast %c5_i32_153 : i32 to vector<8x5xi32>
    %580 = arith.select %576, %578, %579 : vector<8x5xi1>, vector<8x5xi32>
    %cst_154 = arith.constant dense<2147483647> : vector<8xi32>
    %581 = vector.multi_reduction <minsi>, %580, %cst_154 [1] : vector<8x5xi32> to vector<8xi32>
    %582 = vector.shape_cast %581 : vector<8xi32> to vector<8x1xi32>
    %583 = tpu.concatenate %530, %543, %556, %569, %582 in 1 : vector<8x1xi32>, vector<8x1xi32>, vector<8x1xi32>, vector<8x1xi32>, vector<8x1xi32> -> vector<8x5xi32>
    %584 = tpu.concatenate %522, %535, %548, %561, %574 in 1 : vector<8x1xf32>, vector<8x1xf32>, vector<8x1xf32>, vector<8x1xf32>, vector<8x1xf32> -> vector<8x5xf32>
    %585 = arith.addf %584, %517 : vector<8x5xf32>
    %586 = vector.extract_strided_slice %202 {offsets = [48, 0], sizes = [8, 5], strides = [1, 1]} : vector<64x128xf32> to vector<8x5xf32>
    %587 = vector.extract_strided_slice %204 {offsets = [0, 0], sizes = [1, 5], strides = [1, 1]} : vector<5x5xf32> to vector<1x5xf32>
    %588 = vector.broadcast %587 : vector<1x5xf32> to vector<8x5xf32>
    %589 = arith.addf %585, %588 : vector<8x5xf32>
    %cst_155 = arith.constant dense<0xFF800000> : vector<8xf32>
    %590 = vector.multi_reduction <maximumf>, %589, %cst_155 [1] : vector<8x5xf32> to vector<8xf32>
    %591 = vector.shape_cast %590 : vector<8xf32> to vector<8x1xf32>
    %592 = vector.broadcast %591 : vector<8x1xf32> to vector<8x5xf32>
    %593 = arith.cmpf oeq, %589, %592 : vector<8x5xf32>
    %c5_i32_156 = arith.constant 5 : i32
    %594 = vector.shape_cast %205 : vector<1x5xi32> to vector<1x5xi32>
    %595 = vector.broadcast %594 : vector<1x5xi32> to vector<8x5xi32>
    %596 = vector.broadcast %c5_i32_156 : i32 to vector<8x5xi32>
    %597 = arith.select %593, %595, %596 : vector<8x5xi1>, vector<8x5xi32>
    %cst_157 = arith.constant dense<2147483647> : vector<8xi32>
    %598 = vector.multi_reduction <minsi>, %597, %cst_157 [1] : vector<8x5xi32> to vector<8xi32>
    %599 = vector.shape_cast %598 : vector<8xi32> to vector<8x1xi32>
    %600 = vector.extract_strided_slice %204 {offsets = [1, 0], sizes = [1, 5], strides = [1, 1]} : vector<5x5xf32> to vector<1x5xf32>
    %601 = vector.broadcast %600 : vector<1x5xf32> to vector<8x5xf32>
    %602 = arith.addf %585, %601 : vector<8x5xf32>
    %cst_158 = arith.constant dense<0xFF800000> : vector<8xf32>
    %603 = vector.multi_reduction <maximumf>, %602, %cst_158 [1] : vector<8x5xf32> to vector<8xf32>
    %604 = vector.shape_cast %603 : vector<8xf32> to vector<8x1xf32>
    %605 = vector.broadcast %604 : vector<8x1xf32> to vector<8x5xf32>
    %606 = arith.cmpf oeq, %602, %605 : vector<8x5xf32>
    %c5_i32_159 = arith.constant 5 : i32
    %607 = vector.shape_cast %205 : vector<1x5xi32> to vector<1x5xi32>
    %608 = vector.broadcast %607 : vector<1x5xi32> to vector<8x5xi32>
    %609 = vector.broadcast %c5_i32_159 : i32 to vector<8x5xi32>
    %610 = arith.select %606, %608, %609 : vector<8x5xi1>, vector<8x5xi32>
    %cst_160 = arith.constant dense<2147483647> : vector<8xi32>
    %611 = vector.multi_reduction <minsi>, %610, %cst_160 [1] : vector<8x5xi32> to vector<8xi32>
    %612 = vector.shape_cast %611 : vector<8xi32> to vector<8x1xi32>
    %613 = vector.extract_strided_slice %204 {offsets = [2, 0], sizes = [1, 5], strides = [1, 1]} : vector<5x5xf32> to vector<1x5xf32>
    %614 = vector.broadcast %613 : vector<1x5xf32> to vector<8x5xf32>
    %615 = arith.addf %585, %614 : vector<8x5xf32>
    %cst_161 = arith.constant dense<0xFF800000> : vector<8xf32>
    %616 = vector.multi_reduction <maximumf>, %615, %cst_161 [1] : vector<8x5xf32> to vector<8xf32>
    %617 = vector.shape_cast %616 : vector<8xf32> to vector<8x1xf32>
    %618 = vector.broadcast %617 : vector<8x1xf32> to vector<8x5xf32>
    %619 = arith.cmpf oeq, %615, %618 : vector<8x5xf32>
    %c5_i32_162 = arith.constant 5 : i32
    %620 = vector.shape_cast %205 : vector<1x5xi32> to vector<1x5xi32>
    %621 = vector.broadcast %620 : vector<1x5xi32> to vector<8x5xi32>
    %622 = vector.broadcast %c5_i32_162 : i32 to vector<8x5xi32>
    %623 = arith.select %619, %621, %622 : vector<8x5xi1>, vector<8x5xi32>
    %cst_163 = arith.constant dense<2147483647> : vector<8xi32>
    %624 = vector.multi_reduction <minsi>, %623, %cst_163 [1] : vector<8x5xi32> to vector<8xi32>
    %625 = vector.shape_cast %624 : vector<8xi32> to vector<8x1xi32>
    %626 = vector.extract_strided_slice %204 {offsets = [3, 0], sizes = [1, 5], strides = [1, 1]} : vector<5x5xf32> to vector<1x5xf32>
    %627 = vector.broadcast %626 : vector<1x5xf32> to vector<8x5xf32>
    %628 = arith.addf %585, %627 : vector<8x5xf32>
    %cst_164 = arith.constant dense<0xFF800000> : vector<8xf32>
    %629 = vector.multi_reduction <maximumf>, %628, %cst_164 [1] : vector<8x5xf32> to vector<8xf32>
    %630 = vector.shape_cast %629 : vector<8xf32> to vector<8x1xf32>
    %631 = vector.broadcast %630 : vector<8x1xf32> to vector<8x5xf32>
    %632 = arith.cmpf oeq, %628, %631 : vector<8x5xf32>
    %c5_i32_165 = arith.constant 5 : i32
    %633 = vector.shape_cast %205 : vector<1x5xi32> to vector<1x5xi32>
    %634 = vector.broadcast %633 : vector<1x5xi32> to vector<8x5xi32>
    %635 = vector.broadcast %c5_i32_165 : i32 to vector<8x5xi32>
    %636 = arith.select %632, %634, %635 : vector<8x5xi1>, vector<8x5xi32>
    %cst_166 = arith.constant dense<2147483647> : vector<8xi32>
    %637 = vector.multi_reduction <minsi>, %636, %cst_166 [1] : vector<8x5xi32> to vector<8xi32>
    %638 = vector.shape_cast %637 : vector<8xi32> to vector<8x1xi32>
    %639 = vector.extract_strided_slice %204 {offsets = [4, 0], sizes = [1, 5], strides = [1, 1]} : vector<5x5xf32> to vector<1x5xf32>
    %640 = vector.broadcast %639 : vector<1x5xf32> to vector<8x5xf32>
    %641 = arith.addf %585, %640 : vector<8x5xf32>
    %cst_167 = arith.constant dense<0xFF800000> : vector<8xf32>
    %642 = vector.multi_reduction <maximumf>, %641, %cst_167 [1] : vector<8x5xf32> to vector<8xf32>
    %643 = vector.shape_cast %642 : vector<8xf32> to vector<8x1xf32>
    %644 = vector.broadcast %643 : vector<8x1xf32> to vector<8x5xf32>
    %645 = arith.cmpf oeq, %641, %644 : vector<8x5xf32>
    %c5_i32_168 = arith.constant 5 : i32
    %646 = vector.shape_cast %205 : vector<1x5xi32> to vector<1x5xi32>
    %647 = vector.broadcast %646 : vector<1x5xi32> to vector<8x5xi32>
    %648 = vector.broadcast %c5_i32_168 : i32 to vector<8x5xi32>
    %649 = arith.select %645, %647, %648 : vector<8x5xi1>, vector<8x5xi32>
    %cst_169 = arith.constant dense<2147483647> : vector<8xi32>
    %650 = vector.multi_reduction <minsi>, %649, %cst_169 [1] : vector<8x5xi32> to vector<8xi32>
    %651 = vector.shape_cast %650 : vector<8xi32> to vector<8x1xi32>
    %652 = tpu.concatenate %599, %612, %625, %638, %651 in 1 : vector<8x1xi32>, vector<8x1xi32>, vector<8x1xi32>, vector<8x1xi32>, vector<8x1xi32> -> vector<8x5xi32>
    %653 = tpu.concatenate %591, %604, %617, %630, %643 in 1 : vector<8x1xf32>, vector<8x1xf32>, vector<8x1xf32>, vector<8x1xf32>, vector<8x1xf32> -> vector<8x5xf32>
    %654 = arith.addf %653, %586 : vector<8x5xf32>
    %655 = vector.extract_strided_slice %202 {offsets = [56, 0], sizes = [8, 5], strides = [1, 1]} : vector<64x128xf32> to vector<8x5xf32>
    %656 = vector.extract_strided_slice %204 {offsets = [0, 0], sizes = [1, 5], strides = [1, 1]} : vector<5x5xf32> to vector<1x5xf32>
    %657 = vector.broadcast %656 : vector<1x5xf32> to vector<8x5xf32>
    %658 = arith.addf %654, %657 : vector<8x5xf32>
    %cst_170 = arith.constant dense<0xFF800000> : vector<8xf32>
    %659 = vector.multi_reduction <maximumf>, %658, %cst_170 [1] : vector<8x5xf32> to vector<8xf32>
    %660 = vector.shape_cast %659 : vector<8xf32> to vector<8x1xf32>
    %661 = vector.broadcast %660 : vector<8x1xf32> to vector<8x5xf32>
    %662 = arith.cmpf oeq, %658, %661 : vector<8x5xf32>
    %c5_i32_171 = arith.constant 5 : i32
    %663 = vector.shape_cast %205 : vector<1x5xi32> to vector<1x5xi32>
    %664 = vector.broadcast %663 : vector<1x5xi32> to vector<8x5xi32>
    %665 = vector.broadcast %c5_i32_171 : i32 to vector<8x5xi32>
    %666 = arith.select %662, %664, %665 : vector<8x5xi1>, vector<8x5xi32>
    %cst_172 = arith.constant dense<2147483647> : vector<8xi32>
    %667 = vector.multi_reduction <minsi>, %666, %cst_172 [1] : vector<8x5xi32> to vector<8xi32>
    %668 = vector.shape_cast %667 : vector<8xi32> to vector<8x1xi32>
    %669 = vector.extract_strided_slice %204 {offsets = [1, 0], sizes = [1, 5], strides = [1, 1]} : vector<5x5xf32> to vector<1x5xf32>
    %670 = vector.broadcast %669 : vector<1x5xf32> to vector<8x5xf32>
    %671 = arith.addf %654, %670 : vector<8x5xf32>
    %cst_173 = arith.constant dense<0xFF800000> : vector<8xf32>
    %672 = vector.multi_reduction <maximumf>, %671, %cst_173 [1] : vector<8x5xf32> to vector<8xf32>
    %673 = vector.shape_cast %672 : vector<8xf32> to vector<8x1xf32>
    %674 = vector.broadcast %673 : vector<8x1xf32> to vector<8x5xf32>
    %675 = arith.cmpf oeq, %671, %674 : vector<8x5xf32>
    %c5_i32_174 = arith.constant 5 : i32
    %676 = vector.shape_cast %205 : vector<1x5xi32> to vector<1x5xi32>
    %677 = vector.broadcast %676 : vector<1x5xi32> to vector<8x5xi32>
    %678 = vector.broadcast %c5_i32_174 : i32 to vector<8x5xi32>
    %679 = arith.select %675, %677, %678 : vector<8x5xi1>, vector<8x5xi32>
    %cst_175 = arith.constant dense<2147483647> : vector<8xi32>
    %680 = vector.multi_reduction <minsi>, %679, %cst_175 [1] : vector<8x5xi32> to vector<8xi32>
    %681 = vector.shape_cast %680 : vector<8xi32> to vector<8x1xi32>
    %682 = vector.extract_strided_slice %204 {offsets = [2, 0], sizes = [1, 5], strides = [1, 1]} : vector<5x5xf32> to vector<1x5xf32>
    %683 = vector.broadcast %682 : vector<1x5xf32> to vector<8x5xf32>
    %684 = arith.addf %654, %683 : vector<8x5xf32>
    %cst_176 = arith.constant dense<0xFF800000> : vector<8xf32>
    %685 = vector.multi_reduction <maximumf>, %684, %cst_176 [1] : vector<8x5xf32> to vector<8xf32>
    %686 = vector.shape_cast %685 : vector<8xf32> to vector<8x1xf32>
    %687 = vector.broadcast %686 : vector<8x1xf32> to vector<8x5xf32>
    %688 = arith.cmpf oeq, %684, %687 : vector<8x5xf32>
    %c5_i32_177 = arith.constant 5 : i32
    %689 = vector.shape_cast %205 : vector<1x5xi32> to vector<1x5xi32>
    %690 = vector.broadcast %689 : vector<1x5xi32> to vector<8x5xi32>
    %691 = vector.broadcast %c5_i32_177 : i32 to vector<8x5xi32>
    %692 = arith.select %688, %690, %691 : vector<8x5xi1>, vector<8x5xi32>
    %cst_178 = arith.constant dense<2147483647> : vector<8xi32>
    %693 = vector.multi_reduction <minsi>, %692, %cst_178 [1] : vector<8x5xi32> to vector<8xi32>
    %694 = vector.shape_cast %693 : vector<8xi32> to vector<8x1xi32>
    %695 = vector.extract_strided_slice %204 {offsets = [3, 0], sizes = [1, 5], strides = [1, 1]} : vector<5x5xf32> to vector<1x5xf32>
    %696 = vector.broadcast %695 : vector<1x5xf32> to vector<8x5xf32>
    %697 = arith.addf %654, %696 : vector<8x5xf32>
    %cst_179 = arith.constant dense<0xFF800000> : vector<8xf32>
    %698 = vector.multi_reduction <maximumf>, %697, %cst_179 [1] : vector<8x5xf32> to vector<8xf32>
    %699 = vector.shape_cast %698 : vector<8xf32> to vector<8x1xf32>
    %700 = vector.broadcast %699 : vector<8x1xf32> to vector<8x5xf32>
    %701 = arith.cmpf oeq, %697, %700 : vector<8x5xf32>
    %c5_i32_180 = arith.constant 5 : i32
    %702 = vector.shape_cast %205 : vector<1x5xi32> to vector<1x5xi32>
    %703 = vector.broadcast %702 : vector<1x5xi32> to vector<8x5xi32>
    %704 = vector.broadcast %c5_i32_180 : i32 to vector<8x5xi32>
    %705 = arith.select %701, %703, %704 : vector<8x5xi1>, vector<8x5xi32>
    %cst_181 = arith.constant dense<2147483647> : vector<8xi32>
    %706 = vector.multi_reduction <minsi>, %705, %cst_181 [1] : vector<8x5xi32> to vector<8xi32>
    %707 = vector.shape_cast %706 : vector<8xi32> to vector<8x1xi32>
    %708 = vector.extract_strided_slice %204 {offsets = [4, 0], sizes = [1, 5], strides = [1, 1]} : vector<5x5xf32> to vector<1x5xf32>
    %709 = vector.broadcast %708 : vector<1x5xf32> to vector<8x5xf32>
    %710 = arith.addf %654, %709 : vector<8x5xf32>
    %cst_182 = arith.constant dense<0xFF800000> : vector<8xf32>
    %711 = vector.multi_reduction <maximumf>, %710, %cst_182 [1] : vector<8x5xf32> to vector<8xf32>
    %712 = vector.shape_cast %711 : vector<8xf32> to vector<8x1xf32>
    %713 = vector.broadcast %712 : vector<8x1xf32> to vector<8x5xf32>
    %714 = arith.cmpf oeq, %710, %713 : vector<8x5xf32>
    %c5_i32_183 = arith.constant 5 : i32
    %715 = vector.shape_cast %205 : vector<1x5xi32> to vector<1x5xi32>
    %716 = vector.broadcast %715 : vector<1x5xi32> to vector<8x5xi32>
    %717 = vector.broadcast %c5_i32_183 : i32 to vector<8x5xi32>
    %718 = arith.select %714, %716, %717 : vector<8x5xi1>, vector<8x5xi32>
    %cst_184 = arith.constant dense<2147483647> : vector<8xi32>
    %719 = vector.multi_reduction <minsi>, %718, %cst_184 [1] : vector<8x5xi32> to vector<8xi32>
    %720 = vector.shape_cast %719 : vector<8xi32> to vector<8x1xi32>
    %721 = tpu.concatenate %668, %681, %694, %707, %720 in 1 : vector<8x1xi32>, vector<8x1xi32>, vector<8x1xi32>, vector<8x1xi32>, vector<8x1xi32> -> vector<8x5xi32>
    %722 = tpu.concatenate %660, %673, %686, %699, %712 in 1 : vector<8x1xf32>, vector<8x1xf32>, vector<8x1xf32>, vector<8x1xf32>, vector<8x1xf32> -> vector<8x5xf32>
    %723 = arith.addf %722, %655 : vector<8x5xf32>
    %724 = vector.extract_strided_slice %204 {offsets = [4, 0], sizes = [1, 5], strides = [1, 1]} : vector<5x5xf32> to vector<1x5xf32>
    %725 = vector.broadcast %724 : vector<1x5xf32> to vector<8x5xf32>
    %726 = arith.addf %723, %725 : vector<8x5xf32>
    %cst_185 = arith.constant dense<0xFF800000> : vector<8xf32>
    %727 = vector.multi_reduction <maximumf>, %726, %cst_185 [1] : vector<8x5xf32> to vector<8xf32>
    %728 = vector.shape_cast %727 : vector<8xf32> to vector<8x1xf32>
    %729 = vector.broadcast %728 : vector<8x1xf32> to vector<8x5xf32>
    %730 = arith.cmpf oeq, %726, %729 : vector<8x5xf32>
    %c5_i32_186 = arith.constant 5 : i32
    %731 = vector.shape_cast %205 : vector<1x5xi32> to vector<1x5xi32>
    %732 = vector.broadcast %731 : vector<1x5xi32> to vector<8x5xi32>
    %733 = vector.broadcast %c5_i32_186 : i32 to vector<8x5xi32>
    %734 = arith.select %730, %732, %733 : vector<8x5xi1>, vector<8x5xi32>
    %cst_187 = arith.constant dense<2147483647> : vector<8xi32>
    %735 = vector.multi_reduction <minsi>, %734, %cst_187 [1] : vector<8x5xi32> to vector<8xi32>
    %736 = vector.shape_cast %735 : vector<8xi32> to vector<8x1xi32>
    %737 = vector.broadcast %205 : vector<1x5xi32> to vector<8x5xi32>
    %738 = vector.broadcast %736 : vector<8x1xi32> to vector<8x5xi32>
    %739 = arith.cmpi eq, %737, %738 : vector<8x5xi32>
    %c0_i32 = arith.constant 0 : i32
    %740 = vector.broadcast %c0_i32 : i32 to vector<8x5xi32>
    %741 = arith.select %739, %721, %740 : vector<8x5xi1>, vector<8x5xi32>
    %cst_188 = arith.constant dense<0> : vector<8xi32>
    %742 = vector.multi_reduction <add>, %741, %cst_188 [1] : vector<8x5xi32> to vector<8xi32>
    %743 = vector.shape_cast %742 : vector<8xi32> to vector<8x1xi32>
    %744 = vector.broadcast %205 : vector<1x5xi32> to vector<8x5xi32>
    %745 = vector.broadcast %743 : vector<8x1xi32> to vector<8x5xi32>
    %746 = arith.cmpi eq, %744, %745 : vector<8x5xi32>
    %c0_i32_189 = arith.constant 0 : i32
    %747 = vector.broadcast %c0_i32_189 : i32 to vector<8x5xi32>
    %748 = arith.select %746, %652, %747 : vector<8x5xi1>, vector<8x5xi32>
    %cst_190 = arith.constant dense<0> : vector<8xi32>
    %749 = vector.multi_reduction <add>, %748, %cst_190 [1] : vector<8x5xi32> to vector<8xi32>
    %750 = vector.shape_cast %749 : vector<8xi32> to vector<8x1xi32>
    %751 = vector.broadcast %205 : vector<1x5xi32> to vector<8x5xi32>
    %752 = vector.broadcast %750 : vector<8x1xi32> to vector<8x5xi32>
    %753 = arith.cmpi eq, %751, %752 : vector<8x5xi32>
    %c0_i32_191 = arith.constant 0 : i32
    %754 = vector.broadcast %c0_i32_191 : i32 to vector<8x5xi32>
    %755 = arith.select %753, %583, %754 : vector<8x5xi1>, vector<8x5xi32>
    %cst_192 = arith.constant dense<0> : vector<8xi32>
    %756 = vector.multi_reduction <add>, %755, %cst_192 [1] : vector<8x5xi32> to vector<8xi32>
    %757 = vector.shape_cast %756 : vector<8xi32> to vector<8x1xi32>
    %758 = vector.broadcast %205 : vector<1x5xi32> to vector<8x5xi32>
    %759 = vector.broadcast %757 : vector<8x1xi32> to vector<8x5xi32>
    %760 = arith.cmpi eq, %758, %759 : vector<8x5xi32>
    %c0_i32_193 = arith.constant 0 : i32
    %761 = vector.broadcast %c0_i32_193 : i32 to vector<8x5xi32>
    %762 = arith.select %760, %514, %761 : vector<8x5xi1>, vector<8x5xi32>
    %cst_194 = arith.constant dense<0> : vector<8xi32>
    %763 = vector.multi_reduction <add>, %762, %cst_194 [1] : vector<8x5xi32> to vector<8xi32>
    %764 = vector.shape_cast %763 : vector<8xi32> to vector<8x1xi32>
    %765 = vector.broadcast %205 : vector<1x5xi32> to vector<8x5xi32>
    %766 = vector.broadcast %764 : vector<8x1xi32> to vector<8x5xi32>
    %767 = arith.cmpi eq, %765, %766 : vector<8x5xi32>
    %c0_i32_195 = arith.constant 0 : i32
    %768 = vector.broadcast %c0_i32_195 : i32 to vector<8x5xi32>
    %769 = arith.select %767, %445, %768 : vector<8x5xi1>, vector<8x5xi32>
    %cst_196 = arith.constant dense<0> : vector<8xi32>
    %770 = vector.multi_reduction <add>, %769, %cst_196 [1] : vector<8x5xi32> to vector<8xi32>
    %771 = vector.shape_cast %770 : vector<8xi32> to vector<8x1xi32>
    %772 = vector.broadcast %205 : vector<1x5xi32> to vector<8x5xi32>
    %773 = vector.broadcast %771 : vector<8x1xi32> to vector<8x5xi32>
    %774 = arith.cmpi eq, %772, %773 : vector<8x5xi32>
    %c0_i32_197 = arith.constant 0 : i32
    %775 = vector.broadcast %c0_i32_197 : i32 to vector<8x5xi32>
    %776 = arith.select %774, %376, %775 : vector<8x5xi1>, vector<8x5xi32>
    %cst_198 = arith.constant dense<0> : vector<8xi32>
    %777 = vector.multi_reduction <add>, %776, %cst_198 [1] : vector<8x5xi32> to vector<8xi32>
    %778 = vector.shape_cast %777 : vector<8xi32> to vector<8x1xi32>
    %779 = vector.broadcast %205 : vector<1x5xi32> to vector<8x5xi32>
    %780 = vector.broadcast %778 : vector<8x1xi32> to vector<8x5xi32>
    %781 = arith.cmpi eq, %779, %780 : vector<8x5xi32>
    %c0_i32_199 = arith.constant 0 : i32
    %782 = vector.broadcast %c0_i32_199 : i32 to vector<8x5xi32>
    %783 = arith.select %781, %307, %782 : vector<8x5xi1>, vector<8x5xi32>
    %cst_200 = arith.constant dense<0> : vector<8xi32>
    %784 = vector.multi_reduction <add>, %783, %cst_200 [1] : vector<8x5xi32> to vector<8xi32>
    %785 = vector.shape_cast %784 : vector<8xi32> to vector<8x1xi32>
    %786 = tpu.concatenate %785, %778, %771, %764, %757, %750, %743, %736 in 1 : vector<8x1xi32>, vector<8x1xi32>, vector<8x1xi32>, vector<8x1xi32>, vector<8x1xi32>, vector<8x1xi32>, vector<8x1xi32>, vector<8x1xi32> -> vector<8x8xi32>
    %c0_i32_201 = arith.constant 0 : i32
    %787 = vector.broadcast %c0_i32_201 : i32 to vector<8x120xi32>
    %788 = tpu.concatenate %786, %787 in 1 : vector<8x8xi32>, vector<8x120xi32> -> vector<8x128xi32>
    %c0_202 = arith.constant 0 : index
    %c0_203 = arith.constant 0 : index
    %789 = vector.load %arg14[%c0_202, %c0_203] : memref<8x128xi32, #tpu.memory_space<vmem>>, vector<8x128xi32>
    tpu.vector_store %arg14[%c0_202, %c0_203], %788 {strides = array<i32>} : memref<8x128xi32, #tpu.memory_space<vmem>>, vector<8x128xi32>,
    %790 = vector.shape_cast %728 : vector<8x1xf32> to vector<8x1xf32>
    %791 = vector.broadcast %790 : vector<8x1xf32> to vector<8x128xf32>
    %c0_204 = arith.constant 0 : index
    %c0_205 = arith.constant 0 : index
    %792 = vector.load %arg15[%c0_204, %c0_205] : memref<8x128xf32, #tpu.memory_space<vmem>>, vector<8x128xf32>
    tpu.vector_store %arg15[%c0_204, %c0_205], %791 {strides = array<i32>} : memref<8x128xf32, #tpu.memory_space<vmem>>, vector<8x128xf32>,
    return
  }
  func.func @transform_0(%arg0: i32) -> (i32, i32) {
    %c0_i32 = arith.constant 0 : i32
    %c0_i32_0 = arith.constant 0 : i32
    return %arg0, %c0_i32 : i32, i32
  }
  func.func @transform_1(%arg0: i32) -> (i32, i32) {
    %c0_i32 = arith.constant 0 : i32
    %c0_i32_0 = arith.constant 0 : i32
    %c0_i32_1 = arith.constant 0 : i32
    return %c0_i32, %c0_i32_0 : i32, i32
  }
  func.func @transform_2(%arg0: i32) -> (i32, i32) {
    %c0_i32 = arith.constant 0 : i32
    %c0_i32_0 = arith.constant 0 : i32
    %c0_i32_1 = arith.constant 0 : i32
    return %c0_i32, %c0_i32_0 : i32, i32
  }
  func.func @transform_3(%arg0: i32) -> (i32, i32) {
    %c0_i32 = arith.constant 0 : i32
    %c0_i32_0 = arith.constant 0 : i32
    %c0_i32_1 = arith.constant 0 : i32
    return %c0_i32, %c0_i32_0 : i32, i32
  }
  func.func @transform_4(%arg0: i32) -> (i32, i32) {
    %c0_i32 = arith.constant 0 : i32
    %c0_i32_0 = arith.constant 0 : i32
    %c0_i32_1 = arith.constant 0 : i32
    return %c0_i32, %c0_i32_0 : i32, i32
  }
  func.func @transform_5(%arg0: i32) -> (i32, i32) {
    %c0_i32 = arith.constant 0 : i32
    %c0_i32_0 = arith.constant 0 : i32
    %c0_i32_1 = arith.constant 0 : i32
    return %c0_i32, %c0_i32_0 : i32, i32
  }
  func.func @transform_6(%arg0: i32) -> (i32, i32) {
    %c0_i32 = arith.constant 0 : i32
    %c0_i32_0 = arith.constant 0 : i32
    %c0_i32_1 = arith.constant 0 : i32
    return %c0_i32, %c0_i32_0 : i32, i32
  }
  func.func @transform_7(%arg0: i32) -> (i32, i32) {
    %c0_i32 = arith.constant 0 : i32
    %c0_i32_0 = arith.constant 0 : i32
    %c0_i32_1 = arith.constant 0 : i32
    return %c0_i32, %c0_i32_0 : i32, i32
  }
  func.func @transform_8(%arg0: i32) -> (i32, i32) {
    %c0_i32 = arith.constant 0 : i32
    %c0_i32_0 = arith.constant 0 : i32
    %c0_i32_1 = arith.constant 0 : i32
    return %c0_i32, %c0_i32_0 : i32, i32
  }
  func.func @transform_9(%arg0: i32) -> (i32, i32) {
    %c0_i32 = arith.constant 0 : i32
    %c0_i32_0 = arith.constant 0 : i32
    %c0_i32_1 = arith.constant 0 : i32
    return %c0_i32, %c0_i32_0 : i32, i32
  }
  func.func @transform_10(%arg0: i32) -> (i32, i32) {
    %c0_i32 = arith.constant 0 : i32
    %c0_i32_0 = arith.constant 0 : i32
    %c0_i32_1 = arith.constant 0 : i32
    return %c0_i32, %c0_i32_0 : i32, i32
  }
  func.func @transform_11(%arg0: i32) -> (i32, i32) {
    %c0_i32 = arith.constant 0 : i32
    %c0_i32_0 = arith.constant 0 : i32
    %c0_i32_1 = arith.constant 0 : i32
    return %c0_i32, %c0_i32_0 : i32, i32
  }
  func.func @transform_12(%arg0: i32) -> (i32, i32) {
    %c0_i32 = arith.constant 0 : i32
    %c0_i32_0 = arith.constant 0 : i32
    return %arg0, %c0_i32 : i32, i32
  }
  func.func @transform_13(%arg0: i32) -> (i32, i32) {
    %c0_i32 = arith.constant 0 : i32
    %c0_i32_0 = arith.constant 0 : i32
    return %arg0, %c0_i32 : i32, i32
  }
  func.func @transform_14(%arg0: i32) -> (i32, i32) {
    %c0_i32 = arith.constant 0 : i32
    %c0_i32_0 = arith.constant 0 : i32
    return %arg0, %c0_i32 : i32, i32
  }
}

</mosaic_0001>

<bundles_post_ra>
// kernel: tpu_custom_call.1
= control target key start
LH: loop header
LB: loop body
LE: loop exit
PB: predicated region body
PF: predicated region fallthrough
CT: control target
= control target key end

     0   :  { %s7200_s0 = inlined_call_operand.vmem [shape: s32[128,1], index: 0, kind: input, shape index: {}]   ;;  %s7201_s1 = inlined_call_operand.hbm [shape: f32[20,32], index: 1, kind: input, shape index: {}]   ;;  %s7202_s2 = inlined_call_operand.vmem [shape: f32[32,512], index: 2, kind: input, shape index: {}]   ;;  %s7203_s3 = inlined_call_operand.hbm [shape: f32[32,512], index: 3, kind: input, shape index: {}]   ;;  %s7204_s4 = inlined_call_operand.hbm [shape: f32[1,512], index: 4, kind: input, shape index: {}]   ;;  %s7205_s5 = inlined_call_operand.hbm [shape: f32[128,512], index: 5, kind: input, shape index: {}]   ;;  %s7206_s6 = inlined_call_operand.hbm [shape: f32[1,128], index: 6, kind: input, shape index: {}]   ;;  %s7207_s7 = inlined_call_operand.hbm [shape: f32[1,128], index: 7, kind: input, shape index: {}]   ;;  %s7208_s8 = inlined_call_operand.hbm [shape: f32[128,128], index: 8, kind: input, shape index: {}]   ;;  %s7209_s9 = inlined_call_operand.hbm [shape: f32[128,128], index: 9, kind: input, shape index: {}]   ;;  %s7210_s10 = inlined_call_operand.vmem [shape: f32[1,128], index: 10, kind: input, shape index: {}]   ;;  %s7211_s11 = inlined_call_operand.vmem [shape: f32[5,5], index: 11, kind: input, shape index: {}]   ;;  %s7212_s12 = inlined_call_operand.hbm [shape: f32[128,128], index: 12, kind: output, shape index: {0}]   ;;  %s7213_s13 = inlined_call_operand.hbm [shape: s32[16,128], index: 13, kind: output, shape index: {1}]   ;;  %s7214_s14 = inlined_call_operand.hbm [shape: f32[16,128], index: 14, kind: output, shape index: {2}]  }
   0x1   :  { %7335 = sst [smem:[#allocation86_spill]] %s7203_s3 }
   0x2   :  { %7336 = sst [smem:[#allocation87_spill]] %s7205_s5 }
   0x3   :  { %7337 = sst [smem:[#allocation88_spill]] %s7213_s13 }
   0x4   :  { %7338 = sst [smem:[#allocation89_spill]] %s7214_s14 }
   0x5   :  { %20 = vsyncpa [#allocation5], 0 }
   0x6   :  { %21 = vsyncpa [#allocation8], 0 }
   0x7   :  { %22 = vsyncpa [#allocation11], 0 }
   0x8   :  { %23 = vsyncpa [#allocation14], 0 }
   0x9   :  { %24 = vsyncpa [#allocation17], 0 }
   0xa   :  { %25 = vsyncpa [#allocation6], 0 }
   0xb   :  { %27 = vsyncpa [#allocation6 + $0x1], 0 }
   0xc   :  { %28 = vsyncpa [#allocation20], 0 }
   0xd   :  { %30 = vsyncpa [#allocation20 + $0x1], 0  ;;  %s4892_s29 = smov 0   ;;  %s4894_s30 = smov 0  }
   0xe   :  { %s4896_s15 = smov 0   ;;  %s4898_s16 = smov 0  }
   0xf LB: > { %7339 = sst [smem:[#allocation29_spill]] %s4786_s29  ;;  %s4913_s17 = sadd.s32 4294967295, %s4798_s16   ;;  %s4798_s16 = sphi %s4898_s16, %s7580_s16   ;;  %s4794_s15 = sphi %s4896_s15, %s7582_s15   ;;  %s4790_s30 = sphi %s4894_s30, %s7584_s30   ;;  %s4786_s29 = sphi %s4892_s29, %s7583_s29  }
  0x10   : > { %7340 = sst [smem:[#allocation30_spill]] %s4794_s15  ;;  %s7215_s18 = sadd.s32 4294967294, %s4798_s16  }
  0x11   : > { %7341 = sst [smem:[#allocation31_spill]] %s4798_s16  ;;  %s4917_s19 = sadd.s32 1, %s4798_s16  }
  0x12   : > { %7342 = sst [smem:[#allocation32_spill]] %s4917_s19  ;;  %s300_s20 = sadd.s32 1, %s4794_s15 }
  0x13   : > { %s297_s21 = ssub.s32 %s4798_s16, %s4917_s19  ;;  %p310_p0 = scmp.ne.s32.totalorder %s4794_s15, %s4790_s30 }
  0x14   : > { %p298_p1 = scmp.eq.s32.totalorder %s297_s21, 0  ;;  %p311_p2 = scmp.eq.s32.totalorder %s4913_s17, 1 }
  0x15   : > { %p316_p3 = scmp.ne.s32.totalorder %s4790_s30, %s4786_s29  ;;  %p317_p4 = scmp.eq.s32.totalorder %s7215_s18, 1 }
  0x16   : > { %s4930_s22 = scalar_select %p298_p1, %s4794_s15, %s300_s20  }
  0x17   : > { %p4932_p5 = por %p311_p2, %p310_p0  ;;  %p4936_p6 = por %p317_p4, %p316_p3 }
  0x18   : > { %7343 = sst [smem:[#allocation33_spill]] %s4930_s22  ;;  %p3916_p7 = scmp.ge.s32.totalorder %s4798_s16, 1 }
  0x19   : > { %s7345_s24 = scalar_select %p4936_p6, 1, 0 }
  0x1a   : > { %p376_p8 = scmp.lt.s32.totalorder %s4798_s16, 3  ;;  %p4136_p9 = scmp.eq.s32.totalorder %s4913_s17, 0 }
  0x1b   : > { %7346 = sst [smem:[#allocation34_spill]] %s7345_s24  ;;  %s4800_s20 = smov [#allocation7]  }
  0x1c   : > { %p4943_p10 = pnand %p3916_p7, %p376_p8  ;;  %s7348_s3 = sld [smem:[#allocation86_spill]] }
  0x1d   : > { %s406_s21 = sshll.u32 %s4800_s20, 4  ;;  %s7350_s5 = sld [smem:[#allocation87_spill]]  ;;  %s407_s21 = int_to_ptr.vmem [resolvable:$true] %s406_s21 }
  0x1e   : > { %p4101_p11 = pneg %p4943_p10  ;;  %s4801_s26 = smov 512  }
  0x1f   : > { %s4802_s27 = smov 32   ;;  %s457_s16 = sshll.u32 %s7207_s7, 4  ;;  %s458_s16 = int_to_ptr.hbm [resolvable:$true] %s457_s16 }
  0x20   : > { %p4954_p12 = pnand %p4136_p9, %p4101_p11  ;;  %s4804_s14 = smov [#allocation13]  }
  0x21   : > { %s459_s13 = sshll.u32 %s4804_s14, 4  ;;  %s4806_s29 = smov 128   ;;  %s460_s13 = int_to_ptr.vmem [resolvable:$true] %s459_s13 }
  0x22   : > { %s404_s28 = sshll.u32 %s7348_s3, 4  ;;  %s4803_s3 = smov [#allocation10]   ;;  %s405_s28 = int_to_ptr.hbm [resolvable:$true] %s404_s28 }
  0x23   : > { %s430_s19 = sshll.u32 %s7350_s5, 4  ;;  %s432_s20 = sshll.u32 %s4803_s3, 4  ;;  %s431_s19 = int_to_ptr.hbm [resolvable:$true] %s430_s19  ;;  %s433_s20 = int_to_ptr.vmem [resolvable:$true] %s432_s20 }
  0x24   : > { %4107 = dma.hbm_to_vmem [thread:$0]  (!%p4954_p12), %s405_s28, 2048, %s407_s21, [#allocation8], %s4801_s26, %s4801_s26, %s4802_s27  }
  0x25   : > { %4113 = dma.hbm_to_vmem [thread:$0]  (!%p4954_p12), %s431_s19, 8192, %s433_s20, [#allocation11], %s4801_s26, %s4801_s26, %s4802_s27  }
  0x26   : > { %s387_s5 = sshll.u32 %s7201_s1, 4  ;;  %s4805_s3 = smov [#allocation4]   ;;  %s388_s5 = int_to_ptr.hbm [resolvable:$true] %s387_s5 }
  0x27   : > { %4119 = dma.hbm_to_vmem [thread:$0]  (!%p4954_p12), %s458_s16, 16, %s460_s13, [#allocation14]  }
  0x28   : > { %s389_s28 = sshll.u32 %s4805_s3, 4  ;;  %s4807_s24 = smov 8   ;;  %s390_s28 = int_to_ptr.vmem [resolvable:$true] %s389_s28 }
  0x29   : > { %4104 = dma.hbm_to_vmem [thread:$0]  (!%p4954_p12), %s388_s5, 384, %s390_s28, [#allocation5], %s4806_s29, %s4806_s29, %s4807_s24  }
  0x2a   : > { %s419_s26 = sshll.u32 %s7204_s4, 4  ;;  %s4808_s27 = smov [#allocation9]   ;;  %s420_s26 = int_to_ptr.hbm [resolvable:$true] %s419_s26 }
  0x2b   : > { %s421_s14 = sshll.u32 %s4808_s27, 4  ;;  %s445_s13 = sshll.u32 %s7206_s6, 4  ;;  %s422_s14 = int_to_ptr.vmem [resolvable:$true] %s421_s14  ;;  %s446_s13 = int_to_ptr.hbm [resolvable:$true] %s445_s13 }
  0x2c   : > { %4110 = dma.hbm_to_vmem [thread:$0]  (!%p4954_p12), %s420_s26, 64, %s422_s14, [#allocation8]  }
  0x2d   : > { %s4809_s16 = smov [#allocation12]   ;;  %s468_s28 = sshll.u32 %s7208_s8, 4  ;;  %s469_s28 = int_to_ptr.hbm [resolvable:$true] %s468_s28 }
  0x2e   : > { %s447_s22 = sshll.u32 %s4809_s16, 4  ;;  %s482_s27 = sshll.u32 %s7209_s9, 4  ;;  %s448_s22 = int_to_ptr.vmem [resolvable:$true] %s447_s22  ;;  %s483_s27 = int_to_ptr.hbm [resolvable:$true] %s482_s27 }
  0x2f   : > { %4116 = dma.hbm_to_vmem [thread:$0]  (!%p4954_p12), %s446_s13, 16, %s448_s22, [#allocation11]  }
  0x30   : > { %s4810_s20 = smov [#allocation15]   ;;  %s4811_s26 = smov [#allocation16]  }
  0x31   : > { %s470_s15 = sshll.u32 %s4810_s20, 4  ;;  %s484_s14 = sshll.u32 %s4811_s26, 4  ;;  %s471_s15 = int_to_ptr.vmem [resolvable:$true] %s470_s15  ;;  %s485_s14 = int_to_ptr.vmem [resolvable:$true] %s484_s14 }
  0x32   : > { %4122 = dma.hbm_to_vmem [thread:$0]  (!%p4954_p12), %s469_s28, 2048, %s471_s15, [#allocation14], %s4806_s29, %s4806_s29, %s4807_s24  }
  0x33   : > { %4125 = dma.hbm_to_vmem [thread:$0]  (!%p4954_p12), %s483_s27, 2048, %s485_s14, [#allocation17], %s4806_s29, %s4806_s29, %s4807_s24  }
  0x34   : > { %515 = sbr.rel (%p4943_p10) target bundleno = 4269 (0x10ad), region = 68 }
  0x39   : > { %4757 = dma.done.wait (%p4136_p9), [#allocation5], 384  }
  0x3a   : > { %4759 = vsyncadd (%p4136_p9), [#allocation5], 4294966912 }
  0x3b   : > { %4761 = dma.done.wait (%p4136_p9), [#allocation8], 2112  }
  0x3c   : > { %4763 = vsyncadd (%p4136_p9), [#allocation8], 4294965184 }
  0x3d   : > { %4765 = dma.done.wait (%p4136_p9), [#allocation11], 8208  }
  0x3e   : > { %4767 = vsyncadd (%p4136_p9), [#allocation11], 4294959088 }
  0x3f   : > { %4769 = dma.done.wait (%p4136_p9), [#allocation14], 2064  }
  0x40   : > { %4771 = vsyncadd (%p4136_p9), [#allocation14], 4294965232 }
  0x41   : > { %4773 = dma.done.wait (%p4136_p9), [#allocation17], 2048  }
  0x42   : > { %4775 = vsyncadd (%p4136_p9), [#allocation17], 4294965248  ;;  %s5018_s18 = sshll.u32 %s4913_s17, 3  ;;  %v4812_v0 = vmov 0   ;;  %vm700_vm0 = vcmask 1043456   ;;  %v673_v5 = vld [vmem:[#allocation4 + $0x8] sm:$0xff]  ;;  %v614_v12 = vlaneseq }
  0x43   : > { %4203 = vset.pattern.permute.xlu1 %v4812_v0  ;;  %4202 = vset.pattern.permute.xlu0 %v4812_v0  ;;  %p608_p13 = scmp.lt.s32.totalorder %s5018_s18, 15  ;;  %v674_v4 = vld [vmem:[#allocation4 + $0x10] sm:$0xf]  ;;  %v672_v11 = vld [vmem:[#allocation4] sm:$0xff]  ;;  %vm675_vm1 = vcmask 162816   ;;  %v4813_v15 = vmov 0.0  }
  0x44   : > { %4204 = vset.pattern.permute.xlu2 %v4812_v0  ;;  %3948 = vmatpush.msk.msra.mxu0 %vm700_vm0, %v674_v4  ;;  %v5025_v13 = vand.u32 127, %v614_v12  ;;  %v760_v24 = vld [vmem:[%s7202_s2 + $0x78] sm:$0xff]  ;;  %v757_v26 = vld [vmem:[%s7202_s2 + $0x60] sm:$0xff]  ;;  %v758_v27 = vld [vmem:[%s7202_s2 + $0x68] sm:$0xff]  ;;  %vm771_vm10 = vcmask 261120   ;;  %s6319_s3 = sand.u32 1, %s4790_s30  }
  0x45   : > { %s609_s25 = scalar_select %p608_p13, %s5018_s18, 15  ;;  %v756_v25 = vld [vmem:[%s7202_s2 + $0x58] sm:$0xff]  ;;  %v753_v28 = vld [vmem:[%s7202_s2 + $0x40] sm:$0xff]  ;;  %808 = vmatpush.msra.mxu1 %v757_v26  ;;  %849 = vmatpush.msra.mxu2 %v758_v27  ;;  %v754_v30 = vld [vmem:[%s7202_s2 + $0x48] sm:$0xff] }
  0x46   : > { %718 = vmatpush.msra.mxu0 %v673_v5  ;;  %7351 = vst [vmem:[#allocation35_spill] sm:$0xff] %v5025_v13  ;;  %v752_v29 = vld [vmem:[%s7202_s2 + $0x38] sm:$0xff]  ;;  %v749_v31 = vld [vmem:[%s7202_s2 + $0x20] sm:$0xff]  ;;  %v750_v32 = vld [vmem:[%s7202_s2 + $0x28] sm:$0xff]  ;;  %s3935_s28 = sshll.u32 %s6319_s3, 6  ;;  %s7334_s20 = sshll.u32 %s6319_s3, 3 }
  0x47   : > { %s3939_s29 = sshll.u32 %s609_s25, 3  ;;  %809 = vmatpush.msra.mxu1 %v753_v28  ;;  %850 = vmatpush.msra.mxu2 %v754_v30  ;;  %v745_v40 = vld [vmem:[%s7202_s2] sm:$0xff]  ;;  %v746_v41 = vld [vmem:[%s7202_s2 + $0x8] sm:$0xff]  ;;  %v748_v42 = vld [vmem:[%s7202_s2 + $0x18] sm:$0xff]  ;;  %s6328_s27 = scalar_lea.vmem [#allocation18], %s3935_s28 }
  0x48   : > { %s611_s16 = scalar_lea.vmem %s7200_s0, %s3939_s29  ;;  %719 = vmatpush.msra.mxu0 %v672_v11  ;;  %v759_v43 = vld [vmem:[%s7202_s2 + $0x70] sm:$0xff]  ;;  %v1005_v45 = vld [vmem:[#allocation7 + $0x68] sm:$0xff]  ;;  %v1006_v53 = vld [vmem:[#allocation7 + $0x70] sm:$0xff]  ;;  %s6668_s15 = scalar_lea.vmem [#allocation21], %s7334_s20 }
  0x49   : > { %v618_v1 = vld [vmem:[%s611_s16 + $0x10] sm:$0xff]  ;;  %v616_v2 = vld [vmem:[%s611_s16] sm:$0xff]  ;;  %v619_v6 = vld [vmem:[%s611_s16 + $0x18] sm:$0xff]  ;;  %810 = vmatpush.msra.mxu1 %v749_v31  ;;  %851 = vmatpush.msra.mxu2 %v750_v32  ;;  %s3680_s26 = sshll.u32 %s6328_s27, 4  ;;  %s4054_s14 = sshll.u32 %s4913_s17, 6  ;;  %s3681_s26 = int_to_ptr.vmem [resolvable:$true] %s3680_s26 }
  0x4a   : > { %631 = vperm.xlu1 %4203, %v618_v1   ;;  %625 = vperm.xlu0 %4202, %v616_v2   ;;  %v620_v3 = vld [vmem:[%s611_s16 + $0x20] sm:$0xff]  ;;  %v617_v7 = vld [vmem:[%s611_s16 + $0x8] sm:$0xff]  ;;  %v623_v9 = vld [vmem:[%s611_s16 + $0x38] sm:$0xff]  ;;  %s3679_s24 = scalar_lea.hbm %s7212_s12, %s4054_s14  ;;  %s4676_s21 = scalar_lea.hbm %s7212_s12, 128 }
  0x4b   : > { %637 = vperm.xlu2 %4204, %v620_v3   ;;  %v621_v8 = vld [vmem:[%s611_s16 + $0x28] sm:$0xff]  ;;  %v622_v10 = vld [vmem:[%s611_s16 + $0x30] sm:$0xff]  ;;  %931 = vmatpush.msrb.mxu0 %v760_v24  ;;  %v1001_v49 = vld [vmem:[#allocation7 + $0x48] sm:$0xff]  ;;  %s3682_s13 = sshll.u32 %s3679_s24, 4  ;;  %s3658_s16 = scalar_lea.sflag [#allocation6], %s6319_s3  ;;  %s3683_s13 = int_to_ptr.hbm [resolvable:$true] %s3682_s13 }
  0x4c   : > { %811 = vmatpush.msra.mxu1 %v745_v40  ;;  %852 = vmatpush.msra.mxu2 %v746_v41  ;;  %v755_v44 = vld [vmem:[%s7202_s2 + $0x50] sm:$0xff]  ;;  %v997_v52 = vld [vmem:[#allocation7 + $0x28] sm:$0xff]  ;;  %v1002_v55 = vld [vmem:[#allocation7 + $0x50] sm:$0xff]  ;;  %s4670_s22 = sshra.s32 %s3683_s13, 4  ;;  %s4671_s22 = int_to_ptr.hbm [resolvable:$true] %s4670_s22 }
  0x4d   : > { %932 = vmatpush.msrb.mxu0 %v756_v25  ;;  %4055 = vmatpush.msra.mxu3 %v759_v43  ;;  %v751_v46 = vld [vmem:[%s7202_s2 + $0x30] sm:$0xff]  ;;  %v998_v56 = vld [vmem:[#allocation7 + $0x30] sm:$0xff]  ;;  %v993_v57 = vld [vmem:[#allocation7 + $0x8] sm:$0xff]  ;;  %s4672_s5 = scalar_lea.hbm %s4671_s22, 64  ;;  %p4677_p3 = scmp.lt.s32.totalorder %s4671_s22, %s7212_s12 }
  0x4e   : > { %890 = vmatpush.msrb.mxu1 %v759_v43  ;;  %4059 = vmatpush.msrb.mxu2 %v1005_v45  ;;  %v747_v47 = vld [vmem:[%s7202_s2 + $0x10] sm:$0xff]  ;;  %v994_v58 = vld [vmem:[#allocation7 + $0x10] sm:$0xff]  ;;  %v1004_v60 = vld [vmem:[#allocation7 + $0x60] sm:$0xff]  ;;  %p4673_p0 = scmp.ne.s32.totalorder %s4671_s22, %s4672_s5  ;;  %p4678_p4 = scmp.lt.s32.totalorder %s4676_s21, %s4672_s5 }
  0x4f   : > { %933 = vmatpush.msrb.mxu0 %v752_v29  ;;  %4056 = vmatpush.msra.mxu3 %v755_v44  ;;  %v5135_v61 = vld [vmem:[#allocation10 + $0x1e8] sm:$0xff]  ;;  %v1000_v63 = vld [vmem:[#allocation7 + $0x40] sm:$0xff]  ;;  %v5220_v25 = vld [vmem:[#allocation10 + $0x1d0] sm:$0xff] }
  0x50   : > { %891 = vmatpush.msrb.mxu1 %v755_v44  ;;  %4060 = vmatpush.msrb.mxu2 %v1001_v49  ;;  %v5137_v62 = vld [vmem:[#allocation10 + $0x1c8] sm:$0xff]  ;;  %v996_v4 = vld [vmem:[#allocation7 + $0x20] sm:$0xff]  ;;  %v5224_v26 = vld [vmem:[#allocation10 + $0x1b0] sm:$0xff]  ;;  %p4674_p1 = pnand %p4673_p0, %p4932_p5  ;;  %p4679_p7 = por %p4678_p4, %p4677_p3 }
  0x51   : > { %934 = vmatpush.msrb.mxu0 %v748_v42  ;;  %4057 = vmatpush.msra.mxu3 %v751_v46  ;;  %v5140_v0 = vld [vmem:[#allocation10 + $0x1a8] sm:$0xff]  ;;  %v5218_v24 = vld [vmem:[#allocation10 + $0x1c0] sm:$0xff]  ;;  %7352 = vst [vmem:[#allocation36_spill] sm:$0xff] %v5224_v26  ;;  %v5234_v29 = vld [vmem:[#allocation10 + $0x190] sm:$0xff] }
  0x52   : > { %634 = vperm.xlu1 %4203, %v619_v6   ;;  %628 = vperm.xlu0 %4202, %v617_v7   ;;  %v5146_v2 = vld [vmem:[#allocation10 + $0x188] sm:$0xff]  ;;  %v5228_v28 = vld [vmem:[#allocation10 + $0x1a0] sm:$0xff]  ;;  %7353 = vst [vmem:[#allocation37_spill] sm:$0xff] %v5234_v29  ;;  %v5290_v40 = vld [vmem:[#allocation10 + $0xf0] sm:$0xff]  ;;  %p4675_p2 = pneg %p4674_p1 }
  0x53   : > { %640 = vperm.xlu2 %4204, %v621_v8   ;;  %892 = vmatpush.msrb.mxu1 %v751_v46  ;;  %v5156_v3 = vld [vmem:[#allocation10 + $0x168] sm:$0xff]  ;;  %v5242_v31 = vld [vmem:[#allocation10 + $0x180] sm:$0xff]  ;;  %7362 = vst [vmem:[#allocation46_spill] sm:$0xff] %v5290_v40  ;;  %v5296_v42 = vld [vmem:[#allocation10 + $0xd0] sm:$0xff] }
  0x54   : > { %4058 = vmatpush.msra.mxu3 %v747_v47  ;;  %4061 = vmatpush.msrb.mxu2 %v997_v52  ;;  %v5159_v5 = vld [vmem:[#allocation10 + $0x148] sm:$0xff]  ;;  %7354 = vst [vmem:[#allocation38_spill] sm:$0xff] %v5242_v31  ;;  %v5254_v32 = vld [vmem:[#allocation10 + $0x160] sm:$0xff]  ;;  %v5308_v44 = vld [vmem:[#allocation10 + $0xb0] sm:$0xff]  ;;  %p4680_p8 = pnand %p4679_p7, %p4675_p2 }
  0x55   : > { %893 = vmatpush.msrb.mxu1 %v747_v47  ;;  %v5165_v7 = vld [vmem:[#allocation10 + $0x128] sm:$0xff]  ;;  %v5294_v41 = vld [vmem:[#allocation10 + $0xe0] sm:$0xff]  ;;  %7364 = vst [vmem:[#allocation48_spill] sm:$0xff] %v5296_v42  ;;  %v5322_v46 = vld [vmem:[#allocation10 + $0x90] sm:$0xff] }
  0x56   : > { %1102 = vmatpush.msrb.mxu3 %v1006_v53  ;;  %4062 = vmatpush.msrb.mxu2 %v993_v57  ;;  %v5175_v8 = vld [vmem:[#allocation10 + $0x108] sm:$0xff]  ;;  %7363 = vst [vmem:[#allocation47_spill] sm:$0xff] %v5294_v41  ;;  %v5306_v43 = vld [vmem:[#allocation10 + $0xc0] sm:$0xff] }
  0x57   : > { %v5178_v11 = vld [vmem:[#allocation10 + $0xe8] sm:$0xff]  ;;  %7365 = vst [vmem:[#allocation49_spill] sm:$0xff] %v5306_v43  ;;  %v5326_v47 = vld [vmem:[#allocation10 + $0x80] sm:$0xff] }
  0x58   : > { %1103 = vmatpush.msrb.mxu3 %v1002_v55  ;;  %v5226_v27 = vld [vmem:[#allocation10 + $0x28] sm:$0xff]  ;;  %7366 = vst [vmem:[#allocation50_spill] sm:$0xff] %v5308_v44  ;;  %v5340_v53 = vld [vmem:[#allocation10 + $0x60] sm:$0xff]  ;;  %v5342_v55 = vld [vmem:[#allocation10 + $0x50] sm:$0xff] }
  0x59   : > { %v5240_v30 = vld [vmem:[#allocation10 + $0x8] sm:$0xff]  ;;  %7368 = vst [vmem:[#allocation52_spill] sm:$0xff] %v5322_v46 }
  0x5a   : > { %646 = vperm.xlu1 %4203, %v623_v9   ;;  %643 = vperm.xlu0 %4202, %v622_v10   ;;  %v992_v9 = vld [vmem:[#allocation7] sm:$0xff]  ;;  %v1007_v10 = vld [vmem:[#allocation7 + $0x78] sm:$0xff]  ;;  %7369 = vst [vmem:[#allocation53_spill] sm:$0xff] %v5326_v47 }
  0x5b   : > { %1104 = vmatpush.msrb.mxu3 %v998_v56  ;;  %7371 = vst [vmem:[#allocation55_spill] sm:$0xff] %v5340_v53  ;;  %v5353_v56 = vld [vmem:[#allocation10 + $0x40] sm:$0xff] }
  0x5c   : > { %7372 = vst [vmem:[#allocation56_spill] sm:$0xff] %v5342_v55 }
  0x5d   : > { %1105 = vmatpush.msrb.mxu3 %v994_v58  ;;  %7373 = vst [vmem:[#allocation57_spill] sm:$0xff] %v5353_v56  ;;  %v5359_v58 = vld [vmem:[#allocation10 + $0x20] sm:$0xff] }
  0x5e   : > { %7375 = vst [vmem:[#allocation59_spill] sm:$0xff] %v5359_v58 }
  0xa5   : > { %v638_v23 = vpop.permute.xlu2 %637 }
  0xa6   : > { %vm652_vm6 = vcmp.eq.s32.totalorder %v638_v23, %v5025_v13  ;;  %v5216_v23 = vld [vmem:[#allocation10 + $0x48] sm:$0xff] }
  0xa7   : > { %v3944_v33 = vsel %vm652_vm6, 1.0, %v4813_v15 }
  0xad   : > { %v641_v34 = vpop.permute.xlu2 %640 }
  0xae   : > { %vm653_vm7 = vcmp.eq.s32.totalorder %v641_v34, %v5025_v13  ;;  %v5260_v34 = vld [vmem:[#allocation10 + $0x150] sm:$0xff] }
  0xaf   : > { %v3945_v35 = vsel %vm653_vm7, 1.0, %v4813_v15  ;;  %7356 = vst [vmem:[#allocation40_spill] sm:$0xff] %v5260_v34 }
  0xbc   : > { %v626_v14 = vpop.permute.xlu0 %625  ;;  %v632_v19 = vpop.permute.xlu1 %631 }
  0xbd   : > { %vm648_vm2 = vcmp.eq.s32.totalorder %v626_v14, %v5025_v13  ;;  %vm650_vm4 = vcmp.eq.s32.totalorder %v632_v19, %v5025_v13  ;;  %v5184_v14 = vld [vmem:[#allocation10 + $0xc8] sm:$0xff]  ;;  %v5199_v19 = vld [vmem:[#allocation10 + $0x1f0] sm:$0xff] }
  0xbe   : > { %v3940_v16 = vsel %vm648_vm2, 1.0, %v4813_v15  ;;  %v3942_v20 = vsel %vm650_vm4, 1.0, %v4813_v15 }
  0xbf   : > { %3949 = vmatmul.msk.f32.vlgmr.msra.gmra.mxu0 %vm675_vm1, %v3940_v16  ;;  %v1003_v16 = vld [vmem:[#allocation7 + $0x58] sm:$0xff] }
  0xc0   : > { %1061 = vmatpush.msra.mxu0 %v1005_v45  ;;  %v5320_v45 = vld [vmem:[#allocation10 + $0xa0] sm:$0xff] }
  0xc1   : > { %7367 = vst [vmem:[#allocation51_spill] sm:$0xff] %v5320_v45 }
  0xc2   : > { %1062 = vmatpush.msra.mxu0 %v1001_v49  ;;  %v5328_v49 = vld [vmem:[#allocation10 + $0x70] sm:$0xff] }
  0xc3   : > { %7370 = vst [vmem:[#allocation54_spill] sm:$0xff] %v5328_v49 }
  0xc4   : > { %v629_v17 = vpop.permute.xlu0 %628  ;;  %v635_v21 = vpop.permute.xlu1 %634  ;;  %1063 = vmatpush.msra.mxu0 %v997_v52  ;;  %v5332_v52 = vld [vmem:[#allocation12] ss:$0 sm:$0xff] }
  0xc5   : > { %vm649_vm3 = vcmp.eq.s32.totalorder %v629_v17, %v5025_v13  ;;  %vm651_vm5 = vcmp.eq.s32.totalorder %v635_v21, %v5025_v13  ;;  %v999_v17 = vld [vmem:[#allocation7 + $0x38] sm:$0xff]  ;;  %v5204_v21 = vld [vmem:[#allocation10 + $0x1e0] sm:$0xff] }
  0xc6   : > { %v3941_v18 = vsel %vm649_vm3, 1.0, %v4813_v15  ;;  %v3943_v22 = vsel %vm651_vm5, 1.0, %v4813_v15  ;;  %1064 = vmatpush.msra.mxu0 %v993_v57  ;;  %v5355_v57 = vld [vmem:[#allocation10 + $0x30] sm:$0xff] }
  0xc7   : > { %3950 = vmatmul.msk.f32.gmra.mxu0 %vm675_vm1, %v3941_v18  ;;  %v5197_v18 = vld [vmem:[#allocation10 + $0x88] sm:$0xff]  ;;  %7374 = vst [vmem:[#allocation58_spill] sm:$0xff] %v5355_v57 }
  0xcc   : > { %v644_v36 = vpop.permute.xlu0 %643  ;;  %v647_v38 = vpop.permute.xlu1 %646 }
  0xcd   : > { %vm654_vm8 = vcmp.eq.s32.totalorder %v644_v36, %v5025_v13  ;;  %vm655_vm9 = vcmp.eq.s32.totalorder %v647_v38, %v5025_v13  ;;  %v5267_v36 = vld [vmem:[#allocation10 + $0x130] sm:$0xff] }
  0xce   : > { %v3946_v37 = vsel %vm654_vm8, 1.0, %v4813_v15  ;;  %v3947_v39 = vsel %vm655_vm9, 1.0, %v4813_v15  ;;  %v5194_v15 = vld [vmem:[#allocation10 + $0xa8] sm:$0xff]  ;;  %7358 = vst [vmem:[#allocation42_spill] sm:$0xff] %v5267_v36  ;;  %v5277_v38 = vld [vmem:[#allocation10 + $0x110] sm:$0xff] }
  0xcf   : > { %3951 = vmatmul.msk.f32.gmra.mxu0 %vm675_vm1, %v3942_v20  ;;  %v995_v20 = vld [vmem:[#allocation7 + $0x18] sm:$0xff]  ;;  %7360 = vst [vmem:[#allocation44_spill] sm:$0xff] %v5277_v38 }
  0xd7   : > { %3952 = vmatmul.msk.f32.gmra.mxu0 %vm675_vm1, %v3943_v22  ;;  %v5206_v22 = vld [vmem:[#allocation10 + $0x68] sm:$0xff] }
  0xdf   : > { %3953 = vmatmul.msk.f32.gmra.mxu0 %vm675_vm1, %v3944_v33  ;;  %v5256_v33 = vld [vmem:[#allocation10 + $0x170] sm:$0xff] }
  0xe0   : > { %7355 = vst [vmem:[#allocation39_spill] sm:$0xff] %v5256_v33 }
  0xe7   : > { %3954 = vmatmul.msk.f32.gmra.mxu0 %vm675_vm1, %v3945_v35  ;;  %v5263_v35 = vld [vmem:[#allocation10 + $0x140] sm:$0xff] }
  0xe8   : > { %7357 = vst [vmem:[#allocation41_spill] sm:$0xff] %v5263_v35 }
  0xef   : > { %3955 = vmatmul.msk.f32.gmra.mxu0 %vm675_vm1, %v3946_v37  ;;  %v5275_v37 = vld [vmem:[#allocation10 + $0x120] sm:$0xff] }
  0xf0   : > { %7359 = vst [vmem:[#allocation43_spill] sm:$0xff] %v5275_v37 }
  0xf7   : > { %3956 = vmatmul.msk.f32.gmra.mxu0 %vm675_vm1, %v3947_v39  ;;  %v5288_v39 = vld [vmem:[#allocation10 + $0x100] sm:$0xff] }
  0xf8   : > { %7361 = vst [vmem:[#allocation45_spill] sm:$0xff] %v5288_v39 }
 0x13c   : > { %v5091_v48 = vpop.f32.mrf.mxu0 }
 0x13d   : > { %3957 = vmatmul.msk.f32.vlgmr.msra.gmra.mxu1 %vm771_vm10, %v5091_v48  ;;  %3965 = vmatmul.msk.f32.vlgmr.msra.gmra.mxu2 %vm771_vm10, %v5091_v48 }
 0x13e   : > { %3981 = vmatmul.msk.f32.vlgmr.msrb.gmra.mxu0 %vm771_vm10, %v5091_v48  ;;  %1020 = vmatpush.msra.mxu1 %v1004_v60  ;;  %v5361_v60 = vld [vmem:[#allocation10 + $0x10] sm:$0xff] }
 0x13f   : > { %1308 = vmatpush.msra.mxu2 %v5135_v61  ;;  %1143 = vmatpush.msrb.mxu0 %v1007_v10  ;;  %7376 = vst [vmem:[#allocation60_spill] sm:$0xff] %v5361_v60  ;;  %v5409_v10 = vld [vmem:[#allocation10 + $0x178] sm:$0xff] }
 0x140   : > { %1021 = vmatpush.msra.mxu1 %v1000_v63  ;;  %v5377_v63 = vld [vmem:[#allocation10 + $0x1f8] sm:$0xff]  ;;  %7378 = vst [vmem:[#allocation62_spill] sm:$0xff] %v5409_v10 }
 0x141   : > { %1309 = vmatpush.msra.mxu2 %v5137_v62  ;;  %1144 = vmatpush.msrb.mxu0 %v1003_v16  ;;  %v5413_v16 = vld [vmem:[#allocation10 + $0x158] sm:$0xff] }
 0x142   : > { %1022 = vmatpush.msra.mxu1 %v996_v4  ;;  %v5385_v4 = vld [vmem:[#allocation10 + $0x1d8] sm:$0xff] }
 0x143   : > { %1310 = vmatpush.msra.mxu2 %v5140_v0  ;;  %1145 = vmatpush.msrb.mxu0 %v999_v17  ;;  %v5434_v17 = vld [vmem:[#allocation10 + $0x118] sm:$0xff] }
 0x144   : > { %v5099_v50 = vpop.f32.mrf.mxu0  ;;  %1023 = vmatpush.msra.mxu1 %v992_v9  ;;  %v5390_v9 = vld [vmem:[#allocation10 + $0x1b8] sm:$0xff] }
 0x145   : > { %3958 = vmatmul.msk.f32.gmra.mxu1 %vm771_vm10, %v5099_v50  ;;  %3966 = vmatmul.msk.f32.gmra.mxu2 %vm771_vm10, %v5099_v50 }
 0x146   : > { %3982 = vmatmul.msk.f32.gmra.mxu0 %vm771_vm10, %v5099_v50  ;;  %1311 = vmatpush.msra.mxu2 %v5146_v2 }
 0x147   : > { %1146 = vmatpush.msrb.mxu0 %v995_v20  ;;  %v5438_v20 = vld [vmem:[#allocation10 + $0xf8] sm:$0xff] }
 0x148   : > { %1312 = vmatpush.msra.mxu2 %v5156_v3 }
 0x14a   : > { %1313 = vmatpush.msra.mxu2 %v5159_v5 }
 0x14c   : > { %v5107_v51 = vpop.f32.mrf.mxu0  ;;  %1314 = vmatpush.msra.mxu2 %v5165_v7 }
 0x14d   : > { %3959 = vmatmul.msk.f32.gmra.mxu1 %vm771_vm10, %v5107_v51  ;;  %3967 = vmatmul.msk.f32.gmra.mxu2 %vm771_vm10, %v5107_v51 }
 0x14e   : > { %3983 = vmatmul.msk.f32.gmra.mxu0 %vm771_vm10, %v5107_v51  ;;  %1315 = vmatpush.msra.mxu2 %v5175_v8 }
 0x150   : > { %1316 = vmatpush.msra.mxu2 %v5178_v11 }
 0x152   : > { %1317 = vmatpush.msra.mxu2 %v5184_v14 }
 0x154   : > { %v5115_v54 = vpop.f32.mrf.mxu0  ;;  %1318 = vmatpush.msra.mxu2 %v5194_v15 }
 0x155   : > { %3960 = vmatmul.msk.f32.gmra.mxu1 %vm771_vm10, %v5115_v54  ;;  %3968 = vmatmul.msk.f32.gmra.mxu2 %vm771_vm10, %v5115_v54 }
 0x156   : > { %3976 = vmatmul.msk.f32.vlgmr.msra.gmra.mxu3 %vm771_vm10, %v5115_v54  ;;  %3984 = vmatmul.msk.f32.gmra.mxu0 %vm771_vm10, %v5115_v54 }
 0x157   : > { %1328 = vmatpush.msra.mxu3 %v5199_v19  ;;  %1319 = vmatpush.msra.mxu2 %v5197_v18 }
 0x159   : > { %1320 = vmatpush.msra.mxu2 %v5206_v22  ;;  %1329 = vmatpush.msra.mxu3 %v5220_v25 }
 0x15b   : > { %1321 = vmatpush.msra.mxu2 %v5216_v23  ;;  %1330 = vmatpush.msra.mxu3 %v5224_v26 }
 0x15c   : > { %v5125_v59 = vpop.f32.mrf.mxu0 }
 0x15d   : > { %3961 = vmatmul.msk.f32.gmra.mxu1 %vm771_vm10, %v5125_v59  ;;  %3969 = vmatmul.msk.f32.gmra.mxu2 %vm771_vm10, %v5125_v59 }
 0x15e   : > { %3977 = vmatmul.msk.f32.gmra.mxu3 %vm771_vm10, %v5125_v59  ;;  %3985 = vmatmul.msk.f32.gmra.mxu0 %vm771_vm10, %v5125_v59 }
 0x15f   : > { %1322 = vmatpush.msra.mxu2 %v5226_v27  ;;  %1331 = vmatpush.msra.mxu3 %v5234_v29 }
 0x161   : > { %1323 = vmatpush.msra.mxu2 %v5240_v30  ;;  %1332 = vmatpush.msra.mxu3 %v5256_v33 }
 0x163   : > { %1333 = vmatpush.msra.mxu3 %v5260_v34 }
 0x164   : > { %v5144_v1 = vpop.f32.mrf.mxu0 }
 0x165   : > { %3962 = vmatmul.msk.f32.gmra.mxu1 %vm771_vm10, %v5144_v1  ;;  %3970 = vmatmul.msk.f32.gmra.mxu2 %vm771_vm10, %v5144_v1 }
 0x166   : > { %3978 = vmatmul.msk.f32.gmra.mxu3 %vm771_vm10, %v5144_v1  ;;  %3986 = vmatmul.msk.f32.gmra.mxu0 %vm771_vm10, %v5144_v1 }
 0x167   : > { %1334 = vmatpush.msra.mxu3 %v5267_v36 }
 0x169   : > { %1335 = vmatpush.msra.mxu3 %v5277_v38 }
 0x16b   : > { %1336 = vmatpush.msra.mxu3 %v5290_v40 }
 0x16c   : > { %v5163_v6 = vpop.f32.mrf.mxu0 }
 0x16d   : > { %3963 = vmatmul.msk.f32.gmra.mxu1 %vm771_vm10, %v5163_v6  ;;  %3971 = vmatmul.msk.f32.gmra.mxu2 %vm771_vm10, %v5163_v6 }
 0x16e   : > { %3979 = vmatmul.msk.f32.gmra.mxu3 %vm771_vm10, %v5163_v6  ;;  %3987 = vmatmul.msk.f32.gmra.mxu0 %vm771_vm10, %v5163_v6 }
 0x16f   : > { %1337 = vmatpush.msra.mxu3 %v5296_v42 }
 0x171   : > { %1338 = vmatpush.msra.mxu3 %v5308_v44 }
 0x173   : > { %1339 = vmatpush.msra.mxu3 %v5322_v46 }
 0x174   : > { %v5182_v12 = vpop.f32.mrf.mxu0 }
 0x175   : > { %3964 = vmatmul.msk.f32.gmra.mxu1 %vm771_vm10, %v5182_v12  ;;  %3972 = vmatmul.msk.f32.gmra.mxu2 %vm771_vm10, %v5182_v12 }
 0x176   : > { %3980 = vmatmul.msk.f32.gmra.mxu3 %vm771_vm10, %v5182_v12  ;;  %3988 = vmatmul.msk.f32.gmra.mxu0 %vm771_vm10, %v5182_v12 }
 0x177   : > { %1340 = vmatpush.msra.mxu3 %v5328_v49 }
 0x179   : > { %1341 = vmatpush.msra.mxu3 %v5342_v55 }
 0x17b   : > { %1342 = vmatpush.msra.mxu3 %v5355_v57 }
 0x17d   : > { %3973 = vmatmul.msk.f32.vlgmr.msrb.gmra.mxu1 %vm771_vm10, %v5091_v48  ;;  %4001 = vmatmul.msk.f32.vlgmr.msrb.gmra.mxu2 %vm771_vm10, %v5125_v59 }
 0x17e   : > { %3997 = vmatmul.msk.f32.vlgmr.msra.gmra.mxu0 %vm771_vm10, %v5091_v48  ;;  %4005 = vmatmul.msk.f32.vlgmr.msrb.gmra.mxu3 %vm771_vm10, %v5091_v48 }
 0x17f   : > { %1288 = vmatpush.msrb.mxu1 %v5204_v21  ;;  %1487 = vmatpush.msra.mxu0 %v5199_v19 }
 0x180   : > { %1447 = vmatpush.msrb.mxu2 %v5204_v21  ;;  %1343 = vmatpush.msra.mxu3 %v5361_v60 }
 0x181   : > { %1289 = vmatpush.msrb.mxu1 %v5218_v24  ;;  %1488 = vmatpush.msra.mxu0 %v5220_v25 }
 0x182   : > { %1448 = vmatpush.msrb.mxu2 %v5218_v24  ;;  %1467 = vmatpush.msrb.mxu3 %v5135_v61 }
 0x183   : > { %1290 = vmatpush.msrb.mxu1 %v5228_v28  ;;  %1489 = vmatpush.msra.mxu0 %v5224_v26 }
 0x184   : > { %1449 = vmatpush.msrb.mxu2 %v5228_v28  ;;  %1468 = vmatpush.msrb.mxu3 %v5137_v62 }
 0x185   : > { %3974 = vmatmul.msk.f32.gmra.mxu1 %vm771_vm10, %v5099_v50  ;;  %4002 = vmatmul.msk.f32.gmra.mxu2 %vm771_vm10, %v5144_v1 }
 0x186   : > { %3998 = vmatmul.msk.f32.gmra.mxu0 %vm771_vm10, %v5099_v50  ;;  %4006 = vmatmul.msk.f32.gmra.mxu3 %vm771_vm10, %v5099_v50 }
 0x187   : > { %1291 = vmatpush.msrb.mxu1 %v5242_v31  ;;  %1490 = vmatpush.msra.mxu0 %v5234_v29 }
 0x188   : > { %1450 = vmatpush.msrb.mxu2 %v5242_v31  ;;  %1469 = vmatpush.msrb.mxu3 %v5140_v0 }
 0x189   : > { %1292 = vmatpush.msrb.mxu1 %v5254_v32  ;;  %1491 = vmatpush.msra.mxu0 %v5256_v33 }
 0x18a   : > { %1451 = vmatpush.msrb.mxu2 %v5254_v32  ;;  %1470 = vmatpush.msrb.mxu3 %v5146_v2 }
 0x18b   : > { %1293 = vmatpush.msrb.mxu1 %v5263_v35  ;;  %1492 = vmatpush.msra.mxu0 %v5260_v34 }
 0x18c   : > { %1452 = vmatpush.msrb.mxu2 %v5263_v35  ;;  %1471 = vmatpush.msrb.mxu3 %v5156_v3 }
 0x18d   : > { %3975 = vmatmul.msk.f32.gmra.mxu1 %vm771_vm10, %v5107_v51  ;;  %4003 = vmatmul.msk.f32.gmra.mxu2 %vm771_vm10, %v5163_v6 }
 0x18e   : > { %3999 = vmatmul.msk.f32.gmra.mxu0 %vm771_vm10, %v5107_v51  ;;  %4007 = vmatmul.msk.f32.gmra.mxu3 %vm771_vm10, %v5107_v51 }
 0x18f   : > { %1294 = vmatpush.msrb.mxu1 %v5275_v37  ;;  %1493 = vmatpush.msra.mxu0 %v5267_v36 }
 0x190   : > { %1453 = vmatpush.msrb.mxu2 %v5275_v37  ;;  %1472 = vmatpush.msrb.mxu3 %v5159_v5 }
 0x191   : > { %1295 = vmatpush.msrb.mxu1 %v5288_v39  ;;  %1494 = vmatpush.msra.mxu0 %v5277_v38 }
 0x192   : > { %1454 = vmatpush.msrb.mxu2 %v5288_v39  ;;  %1473 = vmatpush.msrb.mxu3 %v5165_v7 }
 0x193   : > { %1296 = vmatpush.msrb.mxu1 %v5294_v41  ;;  %1495 = vmatpush.msra.mxu0 %v5290_v40 }
 0x194   : > { %1455 = vmatpush.msrb.mxu2 %v5294_v41  ;;  %1474 = vmatpush.msrb.mxu3 %v5175_v8 }
 0x195   : > { %3989 = vmatmul.msk.f32.vlgmr.msra.gmra.mxu1 %vm771_vm10, %v5091_v48  ;;  %4004 = vmatmul.msk.f32.gmra.mxu2 %vm771_vm10, %v5182_v12 }
 0x196   : > { %4000 = vmatmul.msk.f32.gmra.mxu0 %vm771_vm10, %v5115_v54  ;;  %4008 = vmatmul.msk.f32.gmra.mxu3 %vm771_vm10, %v5115_v54 }
 0x197   : > { %1297 = vmatpush.msrb.mxu1 %v5306_v43  ;;  %1496 = vmatpush.msra.mxu0 %v5296_v42 }
 0x198   : > { %1456 = vmatpush.msrb.mxu2 %v5306_v43  ;;  %1475 = vmatpush.msrb.mxu3 %v5178_v11 }
 0x199   : > { %1298 = vmatpush.msrb.mxu1 %v5320_v45  ;;  %1497 = vmatpush.msra.mxu0 %v5308_v44 }
 0x19a   : > { %1457 = vmatpush.msrb.mxu2 %v5320_v45  ;;  %1476 = vmatpush.msrb.mxu3 %v5184_v14 }
 0x19b   : > { %1299 = vmatpush.msrb.mxu1 %v5326_v47  ;;  %1498 = vmatpush.msra.mxu0 %v5322_v46 }
 0x19c   : > { %1458 = vmatpush.msrb.mxu2 %v5326_v47  ;;  %1477 = vmatpush.msrb.mxu3 %v5194_v15 }
 0x19d   : > { %3990 = vmatmul.msk.f32.gmra.mxu1 %vm771_vm10, %v5099_v50  ;;  %1324 = vmatmul.f32.vlgmr.msra.gmra.mxu2 %v5332_v52 }
 0x19e   : > { %4009 = vmatmul.msk.f32.gmra.mxu3 %vm771_vm10, %v5125_v59  ;;  %4013 = vmatmul.msk.f32.vlgmr.msrb.gmra.mxu0 %vm771_vm10, %v5091_v48  ;;  %v5371_v48 = vld [vmem:[#allocation10] sm:$0xff] }
 0x19f   : > { %1300 = vmatpush.msrb.mxu1 %v5340_v53  ;;  %1499 = vmatpush.msra.mxu0 %v5328_v49  ;;  %7377 = vst [vmem:[#allocation61_spill] sm:$0xff] %v5371_v48 }
 0x1a0   : > { %1459 = vmatpush.msrb.mxu2 %v5340_v53  ;;  %1478 = vmatpush.msrb.mxu3 %v5197_v18 }
 0x1a1   : > { %1301 = vmatpush.msrb.mxu1 %v5353_v56  ;;  %1500 = vmatpush.msra.mxu0 %v5342_v55 }
 0x1a2   : > { %1460 = vmatpush.msrb.mxu2 %v5353_v56  ;;  %1479 = vmatpush.msrb.mxu3 %v5206_v22 }
 0x1a3   : > { %1302 = vmatpush.msrb.mxu1 %v5359_v58  ;;  %1501 = vmatpush.msra.mxu0 %v5355_v57 }
 0x1a4   : > { %1461 = vmatpush.msrb.mxu2 %v5359_v58  ;;  %1480 = vmatpush.msrb.mxu3 %v5216_v23 }
 0x1a5   : > { %3991 = vmatmul.msk.f32.gmra.mxu1 %vm771_vm10, %v5107_v51  ;;  %1502 = vmatpush.msra.mxu0 %v5361_v60 }
 0x1a6   : > { %4010 = vmatmul.msk.f32.gmra.mxu3 %vm771_vm10, %v5144_v1  ;;  %4014 = vmatmul.msk.f32.gmra.mxu0 %vm771_vm10, %v5099_v50  ;;  %v5399_v50 = vld [vmem:[#allocation10 + $0x198] sm:$0xff] }
 0x1a7   : > { %1303 = vmatpush.msrb.mxu1 %v5371_v48  ;;  %1646 = vmatpush.msrb.mxu0 %v5199_v19 }
 0x1a8   : > { %1462 = vmatpush.msrb.mxu2 %v5371_v48  ;;  %1481 = vmatpush.msrb.mxu3 %v5226_v27 }
 0x1a9   : > { %1348 = vmatpush.msra.mxu1 %v5377_v63  ;;  %1647 = vmatpush.msrb.mxu0 %v5220_v25 }
 0x1aa   : > { %1606 = vmatpush.msra.mxu2 %v5204_v21  ;;  %1482 = vmatpush.msrb.mxu3 %v5240_v30 }
 0x1ab   : > { %1349 = vmatpush.msra.mxu1 %v5385_v4  ;;  %1648 = vmatpush.msrb.mxu0 %v5224_v26  ;;  %v5481_v26 = vld [vmem:[#allocation10 + $0x78] sm:$0xff] }
 0x1ac   : > { %1607 = vmatpush.msra.mxu2 %v5218_v24 }
 0x1ad   : > { %1350 = vmatpush.msra.mxu1 %v5390_v9  ;;  %1649 = vmatpush.msrb.mxu0 %v5234_v29  ;;  %v5452_v29 = vld [vmem:[#allocation10 + $0xd8] sm:$0xff] }
 0x1ae   : > { %3992 = vmatmul.msk.f32.gmra.mxu1 %vm771_vm10, %v5115_v54  ;;  %4011 = vmatmul.msk.f32.gmra.mxu3 %vm771_vm10, %v5163_v6 }
 0x1af   : > { %4015 = vmatmul.msk.f32.gmra.mxu0 %vm771_vm10, %v5107_v51  ;;  %1351 = vmatpush.msra.mxu1 %v5399_v50  ;;  %v5423_v51 = vld [vmem:[#allocation10 + $0x138] sm:$0xff] }
 0x1b0   : > { %1650 = vmatpush.msrb.mxu0 %v5256_v33  ;;  %1608 = vmatpush.msra.mxu2 %v5228_v28 }
 0x1b1   : > { %1352 = vmatpush.msra.mxu1 %v5409_v10 }
 0x1b2   : > { %1651 = vmatpush.msrb.mxu0 %v5260_v34  ;;  %1609 = vmatpush.msra.mxu2 %v5242_v31  ;;  %v5462_v34 = vld [vmem:[#allocation10 + $0xb8] sm:$0xff] }
 0x1b3   : > { %1353 = vmatpush.msra.mxu1 %v5413_v16  ;;  %v5468_v31 = vld [vmem:[#allocation10 + $0x98] sm:$0xff] }
 0x1b4   : > { %1652 = vmatpush.msrb.mxu0 %v5267_v36  ;;  %1610 = vmatpush.msra.mxu2 %v5254_v32 }
 0x1b5   : > { %1354 = vmatpush.msra.mxu1 %v5423_v51 }
 0x1b6   : > { %3993 = vmatmul.msk.f32.gmra.mxu1 %vm771_vm10, %v5125_v59  ;;  %4012 = vmatmul.msk.f32.gmra.mxu3 %vm771_vm10, %v5182_v12 }
 0x1b7   : > { %4016 = vmatmul.msk.f32.gmra.mxu0 %vm771_vm10, %v5115_v54  ;;  %1355 = vmatpush.msra.mxu1 %v5434_v17 }
 0x1b8   : > { %1653 = vmatpush.msrb.mxu0 %v5277_v38  ;;  %1611 = vmatpush.msra.mxu2 %v5263_v35  ;;  %v5488_v38 = vld [vmem:[#allocation10 + $0x58] sm:$0xff] }
 0x1b9   : > { %1356 = vmatpush.msra.mxu1 %v5438_v20 }
 0x1ba   : > { %v5444_v13 = vpop.f32.mrf.mxu1  ;;  %1654 = vmatpush.msrb.mxu0 %v5290_v40  ;;  %1612 = vmatpush.msra.mxu2 %v5275_v37  ;;  %v5494_v40 = vld [vmem:[#allocation10 + $0x38] sm:$0xff] }
 0x1bb   : > { %v5448_v54 = vpop.f32.mrf.mxu0  ;;  %1357 = vmatpush.msra.mxu1 %v5452_v29  ;;  %v5502_v37 = vld [vmem:[#allocation10 + $0x18] sm:$0xff] }
 0x1bc   : > { %1655 = vmatpush.msrb.mxu0 %v5296_v42  ;;  %1613 = vmatpush.msra.mxu2 %v5288_v39 }
 0x1bd   : > { %1358 = vmatpush.msra.mxu1 %v5462_v34 }
 0x1be   : > { %3994 = vmatmul.msk.f32.gmra.mxu1 %vm771_vm10, %v5144_v1  ;;  %1344 = vmatmul.f32.vlgmr.msra.gmra.mxu3 %v5332_v52 }
 0x1bf   : > { %4017 = vmatmul.msk.f32.gmra.mxu0 %vm771_vm10, %v5125_v59  ;;  %1359 = vmatpush.msra.mxu1 %v5468_v31 }
 0x1c0   : > { %v5466_v33 = vpop.f32.mrf.mxu2  ;;  %1626 = vmatpush.msra.mxu3 %v5135_v61  ;;  %1656 = vmatpush.msrb.mxu0 %v5308_v44 }
 0x1c1   : > { %1360 = vmatpush.msra.mxu1 %v5481_v26  ;;  %1614 = vmatpush.msra.mxu2 %v5294_v41 }
 0x1c2   : > { %v5474_v59 = vpop.f32.mrf.mxu1  ;;  %1627 = vmatpush.msra.mxu3 %v5137_v62  ;;  %1657 = vmatpush.msrb.mxu0 %v5322_v46 }
 0x1c3   : > { %v5478_v36 = vpop.f32.mrf.mxu0  ;;  %1361 = vmatpush.msra.mxu1 %v5488_v38  ;;  %1615 = vmatpush.msra.mxu2 %v5306_v43 }
 0x1c4   : > { %1628 = vmatpush.msra.mxu3 %v5140_v0  ;;  %1658 = vmatpush.msrb.mxu0 %v5328_v49  ;;  %v5522_v0 = vld [vmem:[#allocation9] sm:$0xf] }
 0x1c5   : > { %1362 = vmatpush.msra.mxu1 %v5494_v40  ;;  %1616 = vmatpush.msra.mxu2 %v5320_v45 }
 0x1c6   : > { %3995 = vmatmul.msk.f32.gmra.mxu1 %vm771_vm10, %v5163_v6  ;;  %1629 = vmatpush.msra.mxu3 %v5146_v2 }
 0x1c7   : > { %4018 = vmatmul.msk.f32.gmra.mxu0 %vm771_vm10, %v5144_v1  ;;  %1363 = vmatpush.msra.mxu1 %v5502_v37 }
 0x1c8   : > { %v5498_v61 = vpop.f32.mrf.mxu2  ;;  %1630 = vmatpush.msra.mxu3 %v5156_v3  ;;  %1659 = vmatpush.msrb.mxu0 %v5342_v55  ;;  %v5532_v3 = vperm.slane %v5522_v0, 3 }
 0x1c9   : > { %1617 = vmatpush.msra.mxu2 %v5326_v47 }
 0x1ca   : > { %v5506_v1 = vpop.f32.mrf.mxu1  ;;  %1631 = vmatpush.msra.mxu3 %v5159_v5  ;;  %1660 = vmatpush.msrb.mxu0 %v5355_v57 }
 0x1cb   : > { %v5510_v62 = vpop.f32.mrf.mxu0  ;;  %1618 = vmatpush.msra.mxu2 %v5340_v53 }
 0x1cc   : > { %1632 = vmatpush.msra.mxu3 %v5165_v7  ;;  %1661 = vmatpush.msrb.mxu0 %v5361_v60 }
 0x1cd   : > { %1619 = vmatpush.msra.mxu2 %v5353_v56 }
 0x1ce   : > { %3996 = vmatmul.msk.f32.gmra.mxu1 %vm771_vm10, %v5182_v12  ;;  %1633 = vmatpush.msra.mxu3 %v5175_v8  ;;  %v5554_v8 = vperm.slane %v5522_v0, 0 }
 0x1cf   : > { %4019 = vmatmul.msk.f32.gmra.mxu0 %vm771_vm10, %v5163_v6  ;;  %1620 = vmatpush.msra.mxu2 %v5359_v58 }
 0x1d0   : > { %v5526_v2 = vpop.f32.mrf.mxu2  ;;  %1634 = vmatpush.msra.mxu3 %v5178_v11 }
 0x1d1   : > { %1621 = vmatpush.msra.mxu2 %v5371_v48 }
 0x1d2   : > { %v5534_v6 = vpop.f32.mrf.mxu1  ;;  %1635 = vmatpush.msra.mxu3 %v5184_v14 }
 0x1d3   : > { %v945_v49 = vpop.f32.mrf.mxu0 }
 0x1d4   : > { %v5540_v5 = vadd.f32 %v945_v49, %v5532_v3  ;;  %1636 = vmatpush.msra.mxu3 %v5194_v15  ;;  %v5573_v15 = vperm.slane %v5522_v0, 1 }
 0x1d6   : > { %1304 = vmatmul.f32.vlgmr.msrb.gmra.mxu1 %v5332_v52  ;;  %1637 = vmatpush.msra.mxu3 %v5197_v18 }
 0x1d7   : > { %4020 = vmatmul.msk.f32.gmra.mxu0 %vm771_vm10, %v5182_v12  ;;  %1507 = vmatpush.msrb.mxu1 %v5377_v63 }
 0x1d8   : > { %v5550_v7 = vpop.f32.mrf.mxu2  ;;  %1638 = vmatpush.msra.mxu3 %v5206_v22 }
 0x1d9   : > { %1508 = vmatpush.msrb.mxu1 %v5385_v4  ;;  %v5556_v49 = vpop.f32.mrf.mxu3  ;;  %v864_v43 = vadd.f32 %v5550_v7, %v5573_v15 }
 0x1da   : > { %v825_v11 = vpop.f32.mrf.mxu1  ;;  %1639 = vmatpush.msra.mxu3 %v5216_v23 }
 0x1db   : > { %1509 = vmatpush.msrb.mxu1 %v5390_v9  ;;  %v5562_v12 = vadd.f32 %v825_v11, %v5554_v8  ;;  %v948_v14 = vpop.f32.mrf.mxu0 }
 0x1dc   : > { %v5566_v60 = vadd.f32 %v948_v14, %v5532_v3  ;;  %1640 = vmatpush.msra.mxu3 %v5226_v27 }
 0x1dd   : > { %1510 = vmatpush.msrb.mxu1 %v5399_v50 }
 0x1de   : > { %1364 = vmatmul.f32.vlgmr.msra.gmra.mxu1 %v5332_v52  ;;  %1641 = vmatpush.msra.mxu3 %v5240_v30 }
 0x1df   : > { %1511 = vmatpush.msrb.mxu1 %v5409_v10 }
 0x1e0   : > { %v866_v11 = vpop.f32.mrf.mxu2 }
 0x1e1   : > { %1512 = vmatpush.msrb.mxu1 %v5413_v16  ;;  %v5578_v18 = vadd.f32 %v866_v11, %v5573_v15  ;;  %v5580_v14 = vpop.f32.mrf.mxu3 }
 0x1e2   : > { %v828_v52 = vpop.f32.mrf.mxu1 }
 0x1e3   : > { %1513 = vmatpush.msrb.mxu1 %v5423_v51  ;;  %v5585_v22 = vadd.f32 %v828_v52, %v5554_v8  ;;  %v951_v48 = vpop.f32.mrf.mxu0 }
 0x1e4   : > { %v5589_v23 = vadd.f32 %v951_v48, %v5532_v3 }
 0x1e5   : > { %1514 = vmatpush.msrb.mxu1 %v5434_v17 }
 0x1e7   : > { %1515 = vmatpush.msrb.mxu1 %v5438_v20 }
 0x1e8   : > { %v869_v11 = vpop.f32.mrf.mxu2 }
 0x1e9   : > { %1516 = vmatpush.msrb.mxu1 %v5452_v29  ;;  %v870_v27 = vadd.f32 %v869_v11, %v5573_v15  ;;  %v910_v57 = vpop.f32.mrf.mxu3 }
 0x1ea   : > { %v831_v58 = vpop.f32.mrf.mxu1 }
 0x1eb   : > { %1517 = vmatpush.msrb.mxu1 %v5462_v34  ;;  %v5597_v52 = vadd.f32 %v831_v58, %v5554_v8  ;;  %v954_v30 = vpop.f32.mrf.mxu0 }
 0x1ec   : > { %v5600_v48 = vadd.f32 %v954_v30, %v5532_v3 }
 0x1ed   : > { %1518 = vmatpush.msrb.mxu1 %v5468_v31 }
 0x1ef   : > { %1519 = vmatpush.msrb.mxu1 %v5481_v26 }
 0x1f0   : > { %v872_v55 = vpop.f32.mrf.mxu2 }
 0x1f1   : > { %1520 = vmatpush.msrb.mxu1 %v5488_v38  ;;  %v873_v11 = vadd.f32 %v872_v55, %v5573_v15  ;;  %v913_v56 = vpop.f32.mrf.mxu3 }
 0x1f2   : > { %v834_v53 = vpop.f32.mrf.mxu1 }
 0x1f3   : > { %1521 = vmatpush.msrb.mxu1 %v5494_v40  ;;  %v835_v58 = vadd.f32 %v834_v53, %v5554_v8  ;;  %v957_v46 = vpop.f32.mrf.mxu0 }
 0x1f4   : > { %v958_v47 = vadd.f32 %v957_v46, %v5532_v3  ;;  %v5621_v46 = vperm.slane %v5522_v0, 2 }
 0x1f5   : > { %1522 = vmatpush.msrb.mxu1 %v5502_v37 }
 0x1f7   : > { %1666 = vmatpush.msra.mxu1 %v5377_v63 }
 0x1f8   : > { %v875_v30 = vpop.f32.mrf.mxu2 }
 0x1f9   : > { %1667 = vmatpush.msra.mxu1 %v5385_v4  ;;  %v876_v44 = vadd.f32 %v875_v30, %v5573_v15  ;;  %v916_v45 = vpop.f32.mrf.mxu3 }
 0x1fa   : > { %v5614_v55 = vpop.f32.mrf.mxu1  ;;  %v917_v30 = vadd.f32 %v916_v45, %v5621_v46  ;;  %v861_v45 = vadd.f32 %v5526_v2, %v5573_v15  ;;  %v911_v2 = vadd.f32 %v910_v57, %v5621_v46  ;;  %v908_v57 = vadd.f32 %v5580_v14, %v5621_v46 }
 0x1fb   : > { %1668 = vmatpush.msra.mxu1 %v5390_v9  ;;  %v1066_v42 = vpop.f32.mrf.mxu0 }
 0x1fc   : > { %v5617_v53 = vadd.f32 %v1066_v42, %v876_v44 }
 0x1fd   : > { %1669 = vmatpush.msra.mxu1 %v5399_v50 }
 0x1fe   : > { %7379 = vst [vmem:[#allocation63_spill] sm:$0xff] %v5617_v53 }
 0x1ff   : > { %1670 = vmatpush.msra.mxu1 %v5409_v10 }
 0x200   : > { %v1078_v41 = vpop.f32.mrf.mxu2 }
 0x201   : > { %1671 = vmatpush.msra.mxu1 %v5413_v16  ;;  %v5627_v39 = vadd.f32 %v1078_v41, %v864_v43  ;;  %v1107_v35 = vpop.f32.mrf.mxu3  ;;  %v914_v41 = vadd.f32 %v913_v56, %v5621_v46  ;;  %v858_v56 = vadd.f32 %v5498_v61, %v5573_v15 }
 0x202   : > { %v5630_v42 = vadd.f32 %v1107_v35, %v917_v30  ;;  %v898_v44 = vpop.f32.mrf.mxu1 }
 0x203   : > { %7380 = vst [vmem:[#allocation64_spill] sm:$0xff] %v5627_v39  ;;  %1672 = vmatpush.msra.mxu1 %v5423_v51  ;;  %v899_v53 = vadd.f32 %v898_v44, %v5621_v46  ;;  %v1069_v0 = vpop.f32.mrf.mxu0 }
 0x204   : > { %7381 = vst [vmem:[#allocation65_spill] sm:$0xff] %v5630_v42  ;;  %v5634_v10 = vadd.f32 %v1069_v0, %v873_v11 }
 0x205   : > { %1673 = vmatpush.msra.mxu1 %v5434_v17 }
 0x206   : > { %7382 = vst [vmem:[#allocation66_spill] sm:$0xff] %v5634_v10 }
 0x207   : > { %1674 = vmatpush.msra.mxu1 %v5438_v20 }
 0x208   : > { %v1081_v43 = vpop.f32.mrf.mxu2 }
 0x209   : > { %1675 = vmatpush.msra.mxu1 %v5452_v29  ;;  %v5641_v35 = vadd.f32 %v1081_v43, %v861_v45  ;;  %v1110_v7 = vpop.f32.mrf.mxu3 }
 0x20a   : > { %v5644_v30 = vadd.f32 %v1110_v7, %v914_v41  ;;  %v901_v44 = vpop.f32.mrf.mxu1 }
 0x20b   : > { %1676 = vmatpush.msra.mxu1 %v5462_v34  ;;  %v902_v11 = vadd.f32 %v901_v44, %v5621_v46  ;;  %v1072_v0 = vpop.f32.mrf.mxu0 }
 0x20c   : > { %7383 = vst [vmem:[#allocation67_spill] sm:$0xff] %v5644_v30  ;;  %v5648_v42 = vadd.f32 %v1072_v0, %v870_v27 }
 0x20d   : > { %1677 = vmatpush.msra.mxu1 %v5468_v31 }
 0x20e   : > { %7384 = vst [vmem:[#allocation68_spill] sm:$0xff] %v5648_v42 }
 0x20f   : > { %1678 = vmatpush.msra.mxu1 %v5481_v26 }
 0x210   : > { %v1084_v45 = vpop.f32.mrf.mxu2 }
 0x211   : > { %1679 = vmatpush.msra.mxu1 %v5488_v38  ;;  %v5655_v41 = vadd.f32 %v1084_v45, %v858_v56  ;;  %v1113_v43 = vpop.f32.mrf.mxu3 }
 0x212   : > { %v5658_v7 = vadd.f32 %v1113_v43, %v911_v2  ;;  %v1025_v44 = vpop.f32.mrf.mxu1 }
 0x213   : > { %1680 = vmatpush.msra.mxu1 %v5494_v40  ;;  %v5660_v27 = vadd.f32 %v1025_v44, %v835_v58  ;;  %v1075_v0 = vpop.f32.mrf.mxu0  ;;  %v905_v58 = vadd.f32 %v5556_v49, %v5621_v46 }
 0x214   : > { %7385 = vst [vmem:[#allocation69_spill] sm:$0xff] %v5658_v7  ;;  %v5664_v61 = vadd.f32 %v1075_v0, %v5578_v18 }
 0x215   : > { %7386 = vst [vmem:[#allocation70_spill] sm:$0xff] %v5660_v27  ;;  %1681 = vmatpush.msra.mxu1 %v5502_v37 }
 0x216   : > { %7387 = vst [vmem:[#allocation71_spill] sm:$0xff] %v5664_v61 }
 0x219   : > { %v1116_v10 = vpop.f32.mrf.mxu3 }
 0x21a   : > { %v5668_v56 = vadd.f32 %v1116_v10, %v908_v57  ;;  %v1028_v45 = vpop.f32.mrf.mxu1 }
 0x21b   : > { %v5671_v30 = vadd.f32 %v1028_v45, %v5597_v52  ;;  %v1148_v2 = vpop.f32.mrf.mxu0 }
 0x21c   : > { %7388 = vst [vmem:[#allocation72_spill] sm:$0xff] %v5668_v56  ;;  %v5673_v43 = vadd.f32 %v1148_v2, %v958_v47 }
 0x21d   : > { %7389 = vst [vmem:[#allocation73_spill] sm:$0xff] %v5671_v30 }
 0x21e   : > { %7390 = vst [vmem:[#allocation74_spill] sm:$0xff] %v5673_v43 }
 0x221   : > { %v1119_v44 = vpop.f32.mrf.mxu3 }
 0x222   : > { %v5677_v27 = vadd.f32 %v1119_v44, %v905_v58  ;;  %v1031_v18 = vpop.f32.mrf.mxu1  ;;  %v1087_v58 = vpop.f32.mrf.mxu2 }
 0x223   : > { %v5680_v0 = vadd.f32 %v1031_v18, %v5585_v22  ;;  %v1151_v14 = vpop.f32.mrf.mxu0  ;;  %v823_v22 = vadd.f32 %v5534_v6, %v5554_v8 }
 0x224   : > { %7391 = vst [vmem:[#allocation75_spill] sm:$0xff] %v5677_v27  ;;  %v5683_v10 = vadd.f32 %v1151_v14, %v5600_v48 }
 0x225   : > { %7392 = vst [vmem:[#allocation76_spill] sm:$0xff] %v5680_v0 }
 0x226   : > { %7393 = vst [vmem:[#allocation77_spill] sm:$0xff] %v5683_v10 }
 0x229   : > { %v1122_v57 = vpop.f32.mrf.mxu3 }
 0x22a   : > { %v5685_v52 = vadd.f32 %v1122_v57, %v902_v11 }
 0x22b   : > { %v1034_v45 = vpop.f32.mrf.mxu1 }
 0x22c   : > { %v5688_v47 = vadd.f32 %v1034_v45, %v5562_v12  ;;  %v1154_v2 = vpop.f32.mrf.mxu0  ;;  %v855_v12 = vadd.f32 %v5466_v33, %v5573_v15  ;;  %v1325_v45 = vpop.f32.mrf.mxu2  ;;  %v943_v33 = vadd.f32 %v5510_v62, %v5532_v3 }
 0x22d   : > { %v5691_v49 = vadd.f32 %v1154_v2, %v5589_v23  ;;  %v820_v23 = vadd.f32 %v5506_v1, %v5554_v8 }
 0x22e   : > { %7394 = vst [vmem:[#allocation78_spill] sm:$0xff] %v5688_v47  ;;  %v1285_v2 = vadd.f32 %v1087_v58, %v855_v12 }
 0x22f   : > { %7395 = vst [vmem:[#allocation79_spill] sm:$0xff] %v5691_v49 }
 0x231   : > { %v1125_v44 = vpop.f32.mrf.mxu3 }
 0x232   : > { %v5695_v18 = vadd.f32 %v1125_v44, %v899_v53  ;;  %v1369_v44 = vadd.f32 %v1325_v45, %v1285_v2  ;;  %v940_v45 = vadd.f32 %v5478_v36, %v5532_v3 }
 0x233   : > { %v1037_v48 = vpop.f32.mrf.mxu1 }
 0x234   : > { %v5697_v14 = vadd.f32 %v1037_v48, %v823_v22  ;;  %v1157_v11 = vpop.f32.mrf.mxu0  ;;  %v4022_v10 = vmul.f32 -1.442695, %v1369_v44 }
 0x235   : > { %v5700_v57 = vadd.f32 %v1157_v11, %v5566_v60  ;;  %v817_v60 = vadd.f32 %v5474_v59, %v5554_v8  ;;  %v896_v11 = vadd.f32 %v5614_v55, %v5621_v46 }
 0x236   : > { %7396 = vst [vmem:[#allocation80_spill] sm:$0xff] %v5697_v14  ;;  %4208 = vpow2.f32 %v4022_v10  ;;  %v814_v10 = vadd.f32 %v5444_v13, %v5554_v8  ;;  %v937_v13 = vadd.f32 %v5448_v54, %v5532_v3 }
 0x237   : > { %7397 = vst [vmem:[#allocation81_spill] sm:$0xff] %v5700_v57 }
 0x239   : > { %v1128_v48 = vpop.f32.mrf.mxu3 }
 0x23a   : > { %v1286_v12 = vadd.f32 %v1128_v48, %v896_v11 }
 0x23b   : > { %v1040_v43 = vpop.f32.mrf.mxu1 }
 0x23c   : > { %v5706_v6 = vadd.f32 %v1040_v43, %v820_v23  ;;  %v1160_v53 = vpop.f32.mrf.mxu0  ;;  %v4209_v23 = vpop.eup %4208 }
 0x23d   : > { %v5709_v22 = vadd.f32 %v1160_v53, %v5540_v5  ;;  %v1382_v44 = vadd.f32 1.0, %v4209_v23 }
 0x23f   : > { %7398 = vst [vmem:[#allocation82_spill] sm:$0xff] %v5709_v22  ;;  %4210 = vrcp.f32 %v1382_v44  ;;  %vm1404_vm12 = vweird.f32 %v1382_v44 }
 0x241   : > { %v1345_v5 = vpop.f32.mrf.mxu3 }
 0x242   : > { %v1370_v59 = vadd.f32 %v1345_v5, %v1286_v12 }
 0x243   : > { %v1043_v15 = vpop.f32.mrf.mxu1 }
 0x244   : > { %v5715_v1 = vadd.f32 %v1043_v15, %v817_v60  ;;  %v1163_v58 = vpop.f32.mrf.mxu0  ;;  %v4023_v60 = vmul.f32 -1.442695, %v1370_v59 }
 0x245   : > { %v5717_v43 = vadd.f32 %v1163_v58, %v943_v33  ;;  %v4211_v15 = vpop.eup %4210 }
 0x246   : > { %4212 = vpow2.f32 %v4023_v60  ;;  %v1400_v36 = vmul.f32 %v4211_v15, %v1382_v44  ;;  %vm1405_vm11 = vweird.f32 %v4211_v15 }
 0x247   : > { %vm5729_vm13 = vmor %vm1404_vm12, %vm1405_vm11 }
 0x24b   : > { %v1046_v2 = vpop.f32.mrf.mxu1 }
 0x24c   : > { %v1166_v53 = vpop.f32.mrf.mxu0  ;;  %v1284_v33 = vadd.f32 %v1046_v2, %v814_v10  ;;  %v4213_v58 = vpop.eup %4212 }
 0x24d   : > { %v5723_v62 = vadd.f32 %v1166_v53, %v940_v45  ;;  %v1383_v11 = vadd.f32 1.0, %v4213_v58  ;;  %v1401_v45 = vsub.f32 1.0, %v1400_v36  ;;  %v1408_v36 = vand.u32 2147483647, %v1382_v44 }
 0x24f   : > { %v1402_v8 = vmul.f32 %v4211_v15, %v1401_v45  ;;  %vm1409_vm0 = vcmp.eq.f32.partialorder %v1408_v36, 8.507059e+37  ;;  %vm1419_vm4 = vweird.f32 %v1383_v11  ;;  %v7407_v36 = vld [vmem:[#allocation41_spill] sm:$0xff] }
 0x253   : > { %v1305_v55 = vpop.f32.mrf.mxu1 }
 0x254   : > { %v1368_v46 = vadd.f32 %v1305_v55, %v1284_v33  ;;  %v1169_v23 = vpop.f32.mrf.mxu0  ;;  %v1403_v55 = vadd.f32 %v4211_v15, %v1402_v8  ;;  %v4206_v8 = vld [vmem:[#allocation13] ss:$0 sm:$0xff] }
 0x255   : > { %v1287_v2 = vadd.f32 %v1169_v23, %v937_v13 }
 0x256   : > { %v4021_v48 = vmul.f32 -1.442695, %v1368_v46  ;;  %v1410_v46 = vand.u32 2147483648, %v1382_v44  ;;  %v1407_v45 = vsel %vm5729_vm13, %v4211_v15, %v1403_v55  ;;  %v1425_v15 = vand.u32 2147483648, %v1383_v11 }
 0x258   : > { %4214 = vpow2.f32 %v4021_v48  ;;  %v1411_v23 = vor.u32 1.1754944e-38, %v1410_v46 }
 0x259   : > { %4216 = vrcp.f32 %v1383_v11 }
 0x25b   : > { %v1365_v59 = vpop.f32.mrf.mxu1 }
 0x25c   : > { %v1371_v10 = vadd.f32 %v1365_v59, %v1287_v2  ;;  %v1412_v2 = vsel %vm1409_vm0, %v1411_v23, %v1407_v45  ;;  %v7409_v45 = vld [vmem:[#allocation43_spill] sm:$0xff]  ;;  %v7410_v23 = vld [vmem:[#allocation42_spill] sm:$0xff] }
 0x25e   : > { %v4215_v5 = vpop.eup %4214 }
 0x25f   : > { %v1381_v12 = vadd.f32 1.0, %v4215_v5  ;;  %v4217_v53 = vpop.eup %4216 }
 0x260   : > { %v1415_v48 = vmul.f32 %v4217_v53, %v1383_v11  ;;  %vm1420_vm3 = vweird.f32 %v4217_v53 }
 0x261   : > { %4218 = vrcp.f32 %v1381_v12  ;;  %v1395_v30 = vand.u32 2147483648, %v1381_v12  ;;  %v1393_v3 = vand.u32 2147483647, %v1381_v12  ;;  %vm1389_vm15 = vweird.f32 %v1381_v12  ;;  %vm1421_vm5 = vmor %vm1419_vm4, %vm1420_vm3 }
 0x262   : > { %4220 = vtanh.f32 %v1371_v10  ;;  %v1416_v13 = vsub.f32 1.0, %v1415_v48 }
 0x263   : > { %v1396_v44 = vor.u32 1.1754944e-38, %v1395_v30  ;;  %vm1394_vm2 = vcmp.eq.f32.partialorder %v1393_v3, 8.507059e+37  ;;  %v1426_v30 = vor.u32 1.1754944e-38, %v1425_v15  ;;  %v7408_v3 = vld [vmem:[#allocation40_spill] sm:$0xff]  ;;  %v7418_v15 = vld [vmem:[#allocation51_spill] sm:$0xff] }
 0x264   : > { %v1417_v42 = vmul.f32 %v4217_v53, %v1416_v13  ;;  %v7411_v13 = vld [vmem:[#allocation45_spill] sm:$0xff] }
 0x266   : > { %v1418_v5 = vadd.f32 %v4217_v53, %v1417_v42  ;;  %v5745_v42 = vld [vmem:[#allocation10 + $0x1e8] sm:$0xff] }
 0x267   : > { %v4219_v60 = vpop.eup %4218 }
 0x268   : > { %v1385_v33 = vmul.f32 %v4219_v60, %v1381_v12  ;;  %vm1390_vm14 = vweird.f32 %v4219_v60  ;;  %v4221_v49 = vpop.eup %4220  ;;  %v1423_v12 = vand.u32 2147483647, %v1383_v11  ;;  %v1422_v55 = vsel %vm1421_vm5, %v4217_v53, %v1418_v5  ;;  %v7404_v11 = vld [vmem:[#allocation37_spill] sm:$0xff]  ;;  %v7406_v53 = vld [vmem:[#allocation62_spill] sm:$0xff]  ;;  %v7417_v5 = vld [vmem:[#allocation48_spill] sm:$0xff] }
 0x269   : > { %vm1391_vm1 = vmor %vm1389_vm15, %vm1390_vm14 }
 0x26a   : > { %v1386_v58 = vsub.f32 1.0, %v1385_v33  ;;  %vm1424_vm6 = vcmp.eq.f32.partialorder %v1423_v12, 8.507059e+37  ;;  %v5805_v12 = vld [vmem:[#allocation10 + $0xa8] sm:$0xff] }
 0x26b   : > { %v1427_v46 = vsel %vm1424_vm6, %v1426_v30, %v1422_v55  ;;  %v7420_v55 = vld [vmem:[#allocation50_spill] sm:$0xff]  ;;  %v7421_v30 = vld [vmem:[#allocation53_spill] sm:$0xff] }
 0x26c   : > { %v1387_v54 = vmul.f32 %v4219_v60, %v1386_v58  ;;  %v1430_v58 = vmul.f32 %v4206_v8, %v1412_v2  ;;  %v5787_v8 = vld [vmem:[#allocation10 + $0x108] sm:$0xff] }
 0x26d   : > { %v5793_v2 = vld [vmem:[#allocation10 + $0xe8] sm:$0xff] }
 0x26e   : > { %v1388_v59 = vadd.f32 %v4219_v60, %v1387_v54  ;;  %v5775_v54 = vld [vmem:[#allocation10 + $0x148] sm:$0xff] }
 0x270   : > { %v1392_v33 = vsel %vm1391_vm1, %v4219_v60, %v1388_v59  ;;  %v7412_v59 = vld [vmem:[#allocation44_spill] sm:$0xff] }
 0x271   : > { %v1397_v10 = vsel %vm1394_vm2, %v1396_v44, %v1392_v33  ;;  %v7413_v44 = vld [vmem:[#allocation47_spill] sm:$0xff]  ;;  %v7414_v33 = vld [vmem:[#allocation46_spill] sm:$0xff] }
 0x272   : > { %v1431_v0 = vmul.f32 %v4221_v49, %v1397_v10  ;;  %v7402_v49 = vld [vmem:[#allocation36_spill] sm:$0xff]  ;;  %v7415_v10 = vld [vmem:[#allocation49_spill] sm:$0xff] }
 0x274   : > { %v5735_v7 = vadd.f32 %v1431_v0, %v1430_v58  ;;  %v5751_v0 = vld [vmem:[#allocation10 + $0x1c8] sm:$0xff] }
 0x275   : > { %v5799_v58 = vld [vmem:[#allocation10 + $0xc8] sm:$0xff] }
 0x276   : > { %4222 = vtanh.f32 %v5735_v7  ;;  %7416 = vst [vmem:[#allocation36_spill] sm:$0xff] %v5799_v58 }
 0x27c   : > { %v4223_v60 = vpop.eup %4222 }
 0x27d   : > { %v5738_v48 = vmul.f32 %v4223_v60, %v1427_v46  ;;  %v5811_v60 = vld [vmem:[#allocation10 + $0x88] sm:$0xff] }
 0x27e   : > { %7422 = vst [vmem:[#allocation37_spill] sm:$0xff] %v5811_v60  ;;  %v7423_v46 = vld [vmem:[#allocation52_spill] sm:$0xff] }
 0x27f   : > { %7401 = vst [vmem:[#allocation83_spill] sm:$0xff] %v5738_v48  ;;  %1463 = vmatmul.f32.vlgmr.msrb.gmra.mxu2 %v5738_v48  ;;  %1483 = vmatmul.f32.vlgmr.msrb.gmra.mxu3 %v5738_v48 }
 0x280   : > { %1503 = vmatmul.f32.vlgmr.msra.gmra.mxu0 %v5738_v48  ;;  %1523 = vmatmul.f32.vlgmr.msrb.gmra.mxu1 %v5738_v48 }
 0x281   : > { %1765 = vmatpush.msrb.mxu2 %v5204_v21  ;;  %1785 = vmatpush.msrb.mxu3 %v5745_v42  ;;  %v5757_v21 = vld [vmem:[#allocation10 + $0x1a8] sm:$0xff] }
 0x282   : > { %1805 = vmatpush.msra.mxu0 %v5199_v19  ;;  %1825 = vmatpush.msrb.mxu1 %v5377_v63  ;;  %v7403_v19 = vld [vmem:[#allocation38_spill] sm:$0xff] }
 0x283   : > { %1766 = vmatpush.msrb.mxu2 %v5218_v24  ;;  %1786 = vmatpush.msrb.mxu3 %v5751_v0  ;;  %v5763_v24 = vld [vmem:[#allocation10 + $0x188] sm:$0xff]  ;;  %7419 = vst [vmem:[#allocation38_spill] sm:$0xff] %v5805_v12 }
 0x284   : > { %1806 = vmatpush.msra.mxu0 %v5220_v25  ;;  %1826 = vmatpush.msrb.mxu1 %v5385_v4  ;;  %v5769_v25 = vld [vmem:[#allocation10 + $0x168] sm:$0xff] }
 0x285   : > { %1767 = vmatpush.msrb.mxu2 %v5228_v28  ;;  %1787 = vmatpush.msrb.mxu3 %v5757_v21  ;;  %v7405_v28 = vld [vmem:[#allocation39_spill] sm:$0xff] }
 0x286   : > { %1807 = vmatpush.msra.mxu0 %v7402_v49  ;;  %1827 = vmatpush.msrb.mxu1 %v5390_v9  ;;  %v7424_v49 = vld [vmem:[#allocation55_spill] sm:$0xff] }
 0x287   : > { %1768 = vmatpush.msrb.mxu2 %v7403_v19  ;;  %1788 = vmatpush.msrb.mxu3 %v5763_v24  ;;  %v5817_v19 = vld [vmem:[#allocation10 + $0x68] sm:$0xff] }
 0x288   : > { %1808 = vmatpush.msra.mxu0 %v7404_v11  ;;  %1828 = vmatpush.msrb.mxu1 %v5399_v50  ;;  %7425 = vst [vmem:[#allocation39_spill] sm:$0xff] %v5817_v19  ;;  %v7426_v11 = vld [vmem:[#allocation54_spill] sm:$0xff] }
 0x289   : > { %1769 = vmatpush.msrb.mxu2 %v5254_v32  ;;  %1789 = vmatpush.msrb.mxu3 %v5769_v25  ;;  %v5781_v32 = vld [vmem:[#allocation10 + $0x128] sm:$0xff] }
 0x28a   : > { %1809 = vmatpush.msra.mxu0 %v7405_v28  ;;  %1829 = vmatpush.msrb.mxu1 %v7406_v53  ;;  %v7427_v28 = vld [vmem:[#allocation57_spill] sm:$0xff] }
 0x28b   : > { %1770 = vmatpush.msrb.mxu2 %v7407_v36  ;;  %1790 = vmatpush.msrb.mxu3 %v5775_v54  ;;  %v5823_v36 = vld [vmem:[#allocation10 + $0x48] sm:$0xff] }
 0x28c   : > { %1810 = vmatpush.msra.mxu0 %v7408_v3  ;;  %1830 = vmatpush.msrb.mxu1 %v5413_v16  ;;  %7428 = vst [vmem:[#allocation62_spill] sm:$0xff] %v5823_v36  ;;  %v7429_v3 = vld [vmem:[#allocation56_spill] sm:$0xff] }
 0x28d   : > { %1771 = vmatpush.msrb.mxu2 %v7409_v45  ;;  %1791 = vmatpush.msrb.mxu3 %v5781_v32  ;;  %v7430_v45 = vld [vmem:[#allocation59_spill] sm:$0xff] }
 0x28e   : > { %1811 = vmatpush.msra.mxu0 %v7410_v23  ;;  %1831 = vmatpush.msrb.mxu1 %v5423_v51  ;;  %v5829_v23 = vld [vmem:[#allocation10 + $0x28] sm:$0xff] }
 0x28f   : > { %1772 = vmatpush.msrb.mxu2 %v7411_v13  ;;  %1792 = vmatpush.msrb.mxu3 %v5787_v8  ;;  %7431 = vst [vmem:[#allocation41_spill] sm:$0xff] %v5829_v23  ;;  %v7432_v13 = vld [vmem:[#allocation58_spill] sm:$0xff] }
 0x290   : > { %1812 = vmatpush.msra.mxu0 %v7412_v59  ;;  %1832 = vmatpush.msrb.mxu1 %v5434_v17  ;;  %v7433_v59 = vld [vmem:[#allocation61_spill] sm:$0xff] }
 0x291   : > { %1773 = vmatpush.msrb.mxu2 %v7413_v44  ;;  %1793 = vmatpush.msrb.mxu3 %v5793_v2  ;;  %v5835_v44 = vld [vmem:[#allocation10 + $0x8] sm:$0xff] }
 0x292   : > { %1813 = vmatpush.msra.mxu0 %v7414_v33  ;;  %1833 = vmatpush.msrb.mxu1 %v5438_v20  ;;  %7434 = vst [vmem:[#allocation40_spill] sm:$0xff] %v5835_v44  ;;  %v7435_v33 = vld [vmem:[#allocation60_spill] sm:$0xff] }
 0x293   : > { %1774 = vmatpush.msrb.mxu2 %v7415_v10  ;;  %1794 = vmatpush.msrb.mxu3 %v5799_v58 }
 0x294   : > { %1814 = vmatpush.msra.mxu0 %v7417_v5  ;;  %1834 = vmatpush.msrb.mxu1 %v5452_v29 }
 0x295   : > { %1775 = vmatpush.msrb.mxu2 %v7418_v15  ;;  %1795 = vmatpush.msrb.mxu3 %v5805_v12 }
 0x296   : > { %1815 = vmatpush.msra.mxu0 %v7420_v55  ;;  %1835 = vmatpush.msrb.mxu1 %v5462_v34 }
 0x297   : > { %1776 = vmatpush.msrb.mxu2 %v7421_v30  ;;  %1796 = vmatpush.msrb.mxu3 %v5811_v60 }
 0x298   : > { %1816 = vmatpush.msra.mxu0 %v7423_v46  ;;  %1836 = vmatpush.msrb.mxu1 %v5468_v31 }
 0x299   : > { %1777 = vmatpush.msrb.mxu2 %v7424_v49  ;;  %1797 = vmatpush.msrb.mxu3 %v5817_v19 }
 0x29a   : > { %1817 = vmatpush.msra.mxu0 %v7426_v11  ;;  %1837 = vmatpush.msrb.mxu1 %v5481_v26 }
 0x29b   : > { %1778 = vmatpush.msrb.mxu2 %v7427_v28  ;;  %1798 = vmatpush.msrb.mxu3 %v5823_v36 }
 0x29c   : > { %1818 = vmatpush.msra.mxu0 %v7429_v3  ;;  %1838 = vmatpush.msrb.mxu1 %v5488_v38 }
 0x29d   : > { %1779 = vmatpush.msrb.mxu2 %v7430_v45  ;;  %1799 = vmatpush.msrb.mxu3 %v5829_v23 }
 0x29e   : > { %1819 = vmatpush.msra.mxu0 %v7432_v13  ;;  %1839 = vmatpush.msrb.mxu1 %v5494_v40 }
 0x29f   : > { %1780 = vmatpush.msrb.mxu2 %v7433_v59  ;;  %1800 = vmatpush.msrb.mxu3 %v5835_v44 }
 0x2a0   : > { %1820 = vmatpush.msra.mxu0 %v7435_v33  ;;  %1840 = vmatpush.msrb.mxu1 %v5502_v37 }
 0x2fd   : > { %v1504_v10 = vpop.f32.mrf.mxu0 }
 0x2fe   : > { %v1529_v5 = vadd.f32 %v1504_v10, %v5695_v18  ;;  %v1524_v18 = vpop.f32.mrf.mxu1 }
 0x300   : > { %v4026_v15 = vmul.f32 -1.442695, %v1529_v5 }
 0x302   : > { %4224 = vpow2.f32 %v4026_v15  ;;  %v1464_v55 = vpop.f32.mrf.mxu2  ;;  %v1484_v30 = vpop.f32.mrf.mxu3 }
 0x303   : > { %v1527_v46 = vadd.f32 %v1464_v55, %v5715_v1  ;;  %v1528_v49 = vadd.f32 %v1484_v30, %v5655_v41  ;;  %v1530_v1 = vadd.f32 %v1524_v18, %v5723_v62 }
 0x305   : > { %v4024_v11 = vmul.f32 -1.442695, %v1527_v46  ;;  %v4025_v28 = vmul.f32 -1.442695, %v1528_v49 }
 0x307   : > { %4226 = vpow2.f32 %v4024_v11 }
 0x308   : > { %v4225_v3 = vpop.eup %4224  ;;  %4228 = vpow2.f32 %v4025_v28 }
 0x309   : > { %v1542_v45 = vadd.f32 1.0, %v4225_v3 }
 0x30b   : > { %4230 = vrcp.f32 %v1542_v45  ;;  %vm1578_vm0 = vweird.f32 %v1542_v45 }
 0x30d   : > { %v4227_v13 = vpop.eup %4226 }
 0x30e   : > { %v4229_v59 = vpop.eup %4228  ;;  %v1540_v33 = vadd.f32 1.0, %v4227_v13 }
 0x30f   : > { %v1541_v48 = vadd.f32 1.0, %v4229_v59 }
 0x310   : > { %4232 = vrcp.f32 %v1540_v33  ;;  %v1554_v49 = vand.u32 2147483648, %v1540_v33  ;;  %v1552_v3 = vand.u32 2147483647, %v1540_v33  ;;  %vm1548_vm9 = vweird.f32 %v1540_v33 }
 0x311   : > { %4234 = vrcp.f32 %v1541_v48  ;;  %v4231_v10 = vpop.eup %4230  ;;  %v1569_v13 = vand.u32 2147483648, %v1541_v48  ;;  %v1567_v57 = vand.u32 2147483647, %v1541_v48  ;;  %vm1563_vm11 = vweird.f32 %v1541_v48 }
 0x312   : > { %v1574_v30 = vmul.f32 %v4231_v10, %v1542_v45  ;;  %4236 = vtanh.f32 %v1530_v1  ;;  %v1555_v62 = vor.u32 1.1754944e-38, %v1554_v49  ;;  %vm1553_vm12 = vcmp.eq.f32.partialorder %v1552_v3, 8.507059e+37  ;;  %v5898_v3 = vld [vmem:[#allocation10 + $0x150] sm:$0xff] }
 0x313   : > { %v1570_v1 = vor.u32 1.1754944e-38, %v1569_v13  ;;  %vm1568_vm14 = vcmp.eq.f32.partialorder %v1567_v57, 8.507059e+37  ;;  %vm1579_vm15 = vweird.f32 %v4231_v10  ;;  %v1584_v49 = vand.u32 2147483648, %v1542_v45  ;;  %v5906_v13 = vld [vmem:[#allocation10 + $0x130] sm:$0xff] }
 0x314   : > { %v1575_v61 = vsub.f32 1.0, %v1574_v30  ;;  %vm1580_vm1 = vmor %vm1578_vm0, %vm1579_vm15 }
 0x316   : > { %v4233_v5 = vpop.eup %4232  ;;  %v1576_v22 = vmul.f32 %v4231_v10, %v1575_v61 }
 0x317   : > { %v4235_v15 = vpop.eup %4234  ;;  %v1544_v41 = vmul.f32 %v4233_v5, %v1540_v33  ;;  %vm1549_vm7 = vweird.f32 %v4233_v5 }
 0x318   : > { %v1559_v55 = vmul.f32 %v4235_v15, %v1541_v48  ;;  %vm1564_vm8 = vweird.f32 %v4235_v15  ;;  %vm1550_vm10 = vmor %vm1548_vm9, %vm1549_vm7  ;;  %v1577_v33 = vadd.f32 %v4231_v10, %v1576_v22  ;;  %v5866_v22 = vld [vmem:[#allocation10 + $0x1d0] sm:$0xff] }
 0x319   : > { %v1545_v46 = vsub.f32 1.0, %v1544_v41  ;;  %vm1565_vm13 = vmor %vm1563_vm11, %vm1564_vm8  ;;  %v4237_v41 = vpop.eup %4236 }
 0x31a   : > { %v1560_v11 = vsub.f32 1.0, %v1559_v55  ;;  %v1581_v48 = vsel %vm1580_vm1, %v4231_v10, %v1577_v33  ;;  %v5874_v10 = vld [vmem:[#allocation10 + $0x1b0] sm:$0xff] }
 0x31b   : > { %v1546_v28 = vmul.f32 %v4233_v5, %v1545_v46  ;;  %v5978_v33 = vld [vmem:[#allocation10 + $0x10] sm:$0xff] }
 0x31c   : > { %v1561_v59 = vmul.f32 %v4235_v15, %v1560_v11  ;;  %7449 = vst [vmem:[#allocation54_spill] sm:$0xff] %v5978_v33 }
 0x31d   : > { %v1547_v47 = vadd.f32 %v4233_v5, %v1546_v28  ;;  %v5890_v28 = vld [vmem:[#allocation10 + $0x170] sm:$0xff] }
 0x31e   : > { %v1562_v18 = vadd.f32 %v4235_v15, %v1561_v59  ;;  %v5914_v59 = vld [vmem:[#allocation10 + $0x110] sm:$0xff] }
 0x31f   : > { %v1551_v56 = vsel %vm1550_vm10, %v4233_v5, %v1547_v47  ;;  %v1582_v47 = vand.u32 2147483647, %v1542_v45  ;;  %v1585_v5 = vor.u32 1.1754944e-38, %v1584_v49  ;;  %v5870_v45 = vld [vmem:[#allocation10 + $0x1a0] sm:$0xff] }
 0x320   : > { %v1556_v55 = vsel %vm1553_vm12, %v1555_v62, %v1551_v56  ;;  %v1566_v46 = vsel %vm1565_vm13, %v4235_v15, %v1562_v18  ;;  %v5882_v15 = vld [vmem:[#allocation10 + $0x190] sm:$0xff] }
 0x321   : > { %v1590_v39 = vmul.f32 %v4237_v41, %v1556_v55  ;;  %v1571_v11 = vsel %vm1568_vm14, %v1570_v1, %v1566_v46  ;;  %vm1583_vm2 = vcmp.eq.f32.partialorder %v1582_v47, 8.507059e+37  ;;  %v5922_v62 = vld [vmem:[#allocation10 + $0xf0] sm:$0xff] }
 0x322   : > { %v1589_v14 = vmul.f32 %v1571_v11, %v5735_v7  ;;  %v1586_v57 = vsel %vm1583_vm2, %v1585_v5, %v1581_v48  ;;  %v5858_v7 = vld [vmem:[#allocation10 + $0x1f0] sm:$0xff] }
 0x323   : > { %v5930_v18 = vld [vmem:[#allocation10 + $0xd0] sm:$0xff] }
 0x324   : > { %v5845_v30 = vadd.f32 %v1590_v39, %v1589_v14  ;;  %v5854_v39 = vld [vmem:[#allocation10 + $0x1e0] sm:$0xff]  ;;  %7437 = vst [vmem:[#allocation42_spill] sm:$0xff] %v5930_v18  ;;  %v5938_v1 = vld [vmem:[#allocation10 + $0xb0] sm:$0xff] }
 0x325   : > { %v5862_v14 = vld [vmem:[#allocation10 + $0x1c0] sm:$0xff]  ;;  %7439 = vst [vmem:[#allocation44_spill] sm:$0xff] %v5938_v1  ;;  %v5946_v41 = vld [vmem:[#allocation10 + $0x90] sm:$0xff] }
 0x326   : > { %4238 = vtanh.f32 %v5845_v30  ;;  %7441 = vst [vmem:[#allocation46_spill] sm:$0xff] %v5946_v41  ;;  %v5954_v55 = vld [vmem:[#allocation10 + $0x70] sm:$0xff] }
 0x327   : > { %7443 = vst [vmem:[#allocation48_spill] sm:$0xff] %v5954_v55  ;;  %v5962_v46 = vld [vmem:[#allocation10 + $0x50] sm:$0xff] }
 0x328   : > { %7445 = vst [vmem:[#allocation50_spill] sm:$0xff] %v5962_v46  ;;  %v5970_v11 = vld [vmem:[#allocation10 + $0x30] sm:$0xff] }
 0x329   : > { %7447 = vst [vmem:[#allocation52_spill] sm:$0xff] %v5970_v11 }
 0x32c   : > { %v4239_v56 = vpop.eup %4238 }
 0x32d   : > { %v5848_v61 = vmul.f32 %v4239_v56, %v1586_v57 }
 0x32f   : > { %7436 = vst [vmem:[#allocation43_spill] sm:$0xff] %v5848_v61  ;;  %1622 = vmatmul.f32.vlgmr.msra.gmra.mxu2 %v5848_v61  ;;  %1642 = vmatmul.f32.vlgmr.msra.gmra.mxu3 %v5848_v61 }
 0x330   : > { %1662 = vmatmul.f32.vlgmr.msrb.gmra.mxu0 %v5848_v61  ;;  %1682 = vmatmul.f32.vlgmr.msra.gmra.mxu1 %v5848_v61 }
 0x331   : > { %1924 = vmatpush.msra.mxu2 %v5854_v39  ;;  %1944 = vmatpush.msra.mxu3 %v5745_v42 }
 0x332   : > { %1964 = vmatpush.msrb.mxu0 %v5858_v7  ;;  %1984 = vmatpush.msra.mxu1 %v5377_v63  ;;  %v5878_v63 = vld [vmem:[#allocation10 + $0x180] sm:$0xff] }
 0x333   : > { %1925 = vmatpush.msra.mxu2 %v5862_v14  ;;  %1945 = vmatpush.msra.mxu3 %v5751_v0 }
 0x334   : > { %1965 = vmatpush.msrb.mxu0 %v5866_v22  ;;  %1985 = vmatpush.msra.mxu1 %v5385_v4  ;;  %v5886_v4 = vld [vmem:[#allocation10 + $0x160] sm:$0xff] }
 0x335   : > { %1926 = vmatpush.msra.mxu2 %v5870_v45  ;;  %1946 = vmatpush.msra.mxu3 %v5757_v21 }
 0x336   : > { %1966 = vmatpush.msrb.mxu0 %v5874_v10  ;;  %1986 = vmatpush.msra.mxu1 %v5390_v9  ;;  %v5894_v9 = vld [vmem:[#allocation10 + $0x140] sm:$0xff] }
 0x337   : > { %1927 = vmatpush.msra.mxu2 %v5878_v63  ;;  %1947 = vmatpush.msra.mxu3 %v5763_v24 }
 0x338   : > { %1967 = vmatpush.msrb.mxu0 %v5882_v15  ;;  %1987 = vmatpush.msra.mxu1 %v5399_v50  ;;  %v5902_v50 = vld [vmem:[#allocation10 + $0x120] sm:$0xff] }
 0x339   : > { %1928 = vmatpush.msra.mxu2 %v5886_v4  ;;  %1948 = vmatpush.msra.mxu3 %v5769_v25 }
 0x33a   : > { %1968 = vmatpush.msrb.mxu0 %v5890_v28  ;;  %1988 = vmatpush.msra.mxu1 %v7406_v53  ;;  %v5910_v53 = vld [vmem:[#allocation10 + $0x100] sm:$0xff] }
 0x33b   : > { %1929 = vmatpush.msra.mxu2 %v5894_v9  ;;  %1949 = vmatpush.msra.mxu3 %v5775_v54 }
 0x33c   : > { %1969 = vmatpush.msrb.mxu0 %v5898_v3  ;;  %1989 = vmatpush.msra.mxu1 %v5413_v16  ;;  %v5918_v16 = vld [vmem:[#allocation10 + $0xe0] sm:$0xff] }
 0x33d   : > { %1930 = vmatpush.msra.mxu2 %v5902_v50  ;;  %1950 = vmatpush.msra.mxu3 %v5781_v32 }
 0x33e   : > { %1970 = vmatpush.msrb.mxu0 %v5906_v13  ;;  %1990 = vmatpush.msra.mxu1 %v5423_v51  ;;  %v5926_v51 = vld [vmem:[#allocation10 + $0xc0] sm:$0xff] }
 0x33f   : > { %1931 = vmatpush.msra.mxu2 %v5910_v53  ;;  %1951 = vmatpush.msra.mxu3 %v5787_v8 }
 0x340   : > { %1971 = vmatpush.msrb.mxu0 %v5914_v59  ;;  %1991 = vmatpush.msra.mxu1 %v5434_v17  ;;  %v5934_v17 = vld [vmem:[#allocation10 + $0xa0] sm:$0xff] }
 0x341   : > { %1932 = vmatpush.msra.mxu2 %v5918_v16  ;;  %1952 = vmatpush.msra.mxu3 %v5793_v2  ;;  %7438 = vst [vmem:[#allocation45_spill] sm:$0xff] %v5934_v17 }
 0x342   : > { %1972 = vmatpush.msrb.mxu0 %v5922_v62  ;;  %1992 = vmatpush.msra.mxu1 %v5438_v20  ;;  %v5942_v20 = vld [vmem:[#allocation10 + $0x80] sm:$0xff] }
 0x343   : > { %1933 = vmatpush.msra.mxu2 %v5926_v51  ;;  %1953 = vmatpush.msra.mxu3 %v5799_v58  ;;  %7440 = vst [vmem:[#allocation47_spill] sm:$0xff] %v5942_v20 }
 0x344   : > { %1973 = vmatpush.msrb.mxu0 %v5930_v18  ;;  %1993 = vmatpush.msra.mxu1 %v5452_v29  ;;  %v5950_v29 = vld [vmem:[#allocation10 + $0x60] sm:$0xff] }
 0x345   : > { %1934 = vmatpush.msra.mxu2 %v5934_v17  ;;  %1954 = vmatpush.msra.mxu3 %v5805_v12  ;;  %7442 = vst [vmem:[#allocation49_spill] sm:$0xff] %v5950_v29 }
 0x346   : > { %1974 = vmatpush.msrb.mxu0 %v5938_v1  ;;  %1994 = vmatpush.msra.mxu1 %v5462_v34  ;;  %v5958_v34 = vld [vmem:[#allocation10 + $0x40] sm:$0xff] }
 0x347   : > { %1935 = vmatpush.msra.mxu2 %v5942_v20  ;;  %1955 = vmatpush.msra.mxu3 %v5811_v60  ;;  %7444 = vst [vmem:[#allocation51_spill] sm:$0xff] %v5958_v34 }
 0x348   : > { %1975 = vmatpush.msrb.mxu0 %v5946_v41  ;;  %1995 = vmatpush.msra.mxu1 %v5468_v31  ;;  %v5966_v31 = vld [vmem:[#allocation10 + $0x20] sm:$0xff] }
 0x349   : > { %1936 = vmatpush.msra.mxu2 %v5950_v29  ;;  %1956 = vmatpush.msra.mxu3 %v5817_v19  ;;  %7446 = vst [vmem:[#allocation53_spill] sm:$0xff] %v5966_v31 }
 0x34a   : > { %1976 = vmatpush.msrb.mxu0 %v5954_v55  ;;  %1996 = vmatpush.msra.mxu1 %v5481_v26  ;;  %v5974_v26 = vld [vmem:[#allocation10] sm:$0xff] }
 0x34b   : > { %1937 = vmatpush.msra.mxu2 %v5958_v34  ;;  %1957 = vmatpush.msra.mxu3 %v5823_v36  ;;  %7448 = vst [vmem:[#allocation55_spill] sm:$0xff] %v5974_v26 }
 0x34c   : > { %1977 = vmatpush.msrb.mxu0 %v5962_v46  ;;  %1997 = vmatpush.msra.mxu1 %v5488_v38 }
 0x34d   : > { %1938 = vmatpush.msra.mxu2 %v5966_v31  ;;  %1958 = vmatpush.msra.mxu3 %v5829_v23 }
 0x34e   : > { %1978 = vmatpush.msrb.mxu0 %v5970_v11  ;;  %1998 = vmatpush.msra.mxu1 %v5494_v40 }
 0x34f   : > { %1939 = vmatpush.msra.mxu2 %v5974_v26  ;;  %1959 = vmatpush.msra.mxu3 %v5835_v44 }
 0x350   : > { %1979 = vmatpush.msrb.mxu0 %v5978_v33  ;;  %1999 = vmatpush.msra.mxu1 %v5502_v37 }
 0x3ad   : > { %v1663_v38 = vpop.f32.mrf.mxu0 }
 0x3ae   : > { %v1688_v49 = vadd.f32 %v1663_v38, %v5685_v52  ;;  %v1683_v52 = vpop.f32.mrf.mxu1 }
 0x3b0   : > { %v4029_v47 = vmul.f32 -1.442695, %v1688_v49 }
 0x3b2   : > { %4240 = vpow2.f32 %v4029_v47  ;;  %v1623_v48 = vpop.f32.mrf.mxu2  ;;  %v1643_v5 = vpop.f32.mrf.mxu3 }
 0x3b3   : > { %v1686_v40 = vadd.f32 %v1623_v48, %v5706_v6  ;;  %v1687_v56 = vadd.f32 %v1643_v5, %v5641_v35  ;;  %v1689_v6 = vadd.f32 %v1683_v52, %v5717_v43 }
 0x3b5   : > { %v4027_v57 = vmul.f32 -1.442695, %v1686_v40  ;;  %v4028_v61 = vmul.f32 -1.442695, %v1687_v56 }
 0x3b7   : > { %4242 = vpow2.f32 %v4027_v57 }
 0x3b8   : > { %v4241_v27 = vpop.eup %4240  ;;  %4244 = vpow2.f32 %v4028_v61 }
 0x3b9   : > { %v1701_v44 = vadd.f32 1.0, %v4241_v27 }
 0x3bb   : > { %4246 = vrcp.f32 %v1701_v44  ;;  %vm1737_vm12 = vweird.f32 %v1701_v44 }
 0x3bd   : > { %v4243_v33 = vpop.eup %4242 }
 0x3be   : > { %v4245_v26 = vpop.eup %4244  ;;  %v1699_v37 = vadd.f32 1.0, %v4243_v33 }
 0x3bf   : > { %v1700_v11 = vadd.f32 1.0, %v4245_v26 }
 0x3c0   : > { %4248 = vrcp.f32 %v1699_v37  ;;  %v1713_v61 = vand.u32 2147483648, %v1699_v37  ;;  %v1711_v33 = vand.u32 2147483647, %v1699_v37  ;;  %vm1707_vm5 = vweird.f32 %v1699_v37 }
 0x3c1   : > { %4250 = vrcp.f32 %v1700_v11  ;;  %v4247_v38 = vpop.eup %4246  ;;  %v1728_v57 = vand.u32 2147483648, %v1700_v11  ;;  %v1726_v23 = vand.u32 2147483647, %v1700_v11  ;;  %vm1722_vm7 = vweird.f32 %v1700_v11 }
 0x3c2   : > { %v1733_v5 = vmul.f32 %v4247_v38, %v1701_v44  ;;  %4252 = vtanh.f32 %v1689_v6  ;;  %v1714_v43 = vor.u32 1.1754944e-38, %v1713_v61  ;;  %vm1712_vm8 = vcmp.eq.f32.partialorder %v1711_v33, 8.507059e+37  ;;  %v6047_v33 = vld [vmem:[#allocation10 + $0xf8] sm:$0xff] }
 0x3c3   : > { %v1729_v6 = vor.u32 1.1754944e-38, %v1728_v57  ;;  %vm1727_vm10 = vcmp.eq.f32.partialorder %v1726_v23, 8.507059e+37  ;;  %vm1738_vm11 = vweird.f32 %v4247_v38  ;;  %v1743_v61 = vand.u32 2147483648, %v1701_v44  ;;  %v6053_v57 = vld [vmem:[#allocation10 + $0xd8] sm:$0xff] }
 0x3c4   : > { %v1734_v31 = vsub.f32 1.0, %v1733_v5  ;;  %vm1739_vm13 = vmor %vm1737_vm12, %vm1738_vm11  ;;  %7451 = vst [vmem:[#allocation56_spill] sm:$0xff] %v6053_v57 }
 0x3c6   : > { %v4249_v49 = vpop.eup %4248  ;;  %v1735_v34 = vmul.f32 %v4247_v38, %v1734_v31 }
 0x3c7   : > { %v4251_v47 = vpop.eup %4250  ;;  %v1703_v35 = vmul.f32 %v4249_v49, %v1699_v37  ;;  %vm1708_vm3 = vweird.f32 %v4249_v49 }
 0x3c8   : > { %v1718_v48 = vmul.f32 %v4251_v47, %v1700_v11  ;;  %vm1723_vm4 = vweird.f32 %v4251_v47  ;;  %vm1709_vm6 = vmor %vm1707_vm5, %vm1708_vm3  ;;  %v1736_v37 = vadd.f32 %v4247_v38, %v1735_v34  ;;  %v6023_v34 = vld [vmem:[#allocation10 + $0x178] sm:$0xff] }
 0x3c9   : > { %v1704_v40 = vsub.f32 1.0, %v1703_v35  ;;  %vm1724_vm9 = vmor %vm1722_vm7, %vm1723_vm4  ;;  %v4253_v35 = vpop.eup %4252 }
 0x3ca   : > { %v1719_v27 = vsub.f32 1.0, %v1718_v48  ;;  %v1740_v11 = vsel %vm1739_vm13, %v4247_v38, %v1736_v37  ;;  %v6029_v38 = vld [vmem:[#allocation10 + $0x158] sm:$0xff] }
 0x3cb   : > { %v1705_v56 = vmul.f32 %v4249_v49, %v1704_v40  ;;  %v6077_v37 = vld [vmem:[#allocation10 + $0x58] sm:$0xff] }
 0x3cc   : > { %v1720_v26 = vmul.f32 %v4251_v47, %v1719_v27  ;;  %7460 = vst [vmem:[#allocation60_spill] sm:$0xff] %v6077_v37 }
 0x3cd   : > { %v1706_v46 = vadd.f32 %v4249_v49, %v1705_v56  ;;  %v6041_v56 = vld [vmem:[#allocation10 + $0x118] sm:$0xff] }
 0x3ce   : > { %v1721_v52 = vadd.f32 %v4251_v47, %v1720_v26  ;;  %v6059_v26 = vld [vmem:[#allocation10 + $0xb8] sm:$0xff] }
 0x3cf   : > { %v1710_v36 = vsel %vm1709_vm6, %v4249_v49, %v1706_v46  ;;  %v1741_v46 = vand.u32 2147483647, %v1701_v44  ;;  %v1744_v49 = vor.u32 1.1754944e-38, %v1743_v61  ;;  %v6005_v44 = vld [vmem:[#allocation10 + $0x1d8] sm:$0xff]  ;;  %7452 = vst [vmem:[#allocation59_spill] sm:$0xff] %v6059_v26 }
 0x3d0   : > { %v1715_v48 = vsel %vm1712_vm8, %v1714_v43, %v1710_v36  ;;  %v1725_v40 = vsel %vm1724_vm9, %v4251_v47, %v1721_v52  ;;  %v6035_v47 = vld [vmem:[#allocation10 + $0x138] sm:$0xff]  ;;  %v7454_v52 = vld [vmem:[#allocation39_spill] sm:$0xff] }
 0x3d1   : > { %v1749_v55 = vmul.f32 %v4253_v35, %v1715_v48  ;;  %v1730_v27 = vsel %vm1727_vm10, %v1729_v6, %v1725_v40  ;;  %vm1742_vm14 = vcmp.eq.f32.partialorder %v1741_v46, 8.507059e+37  ;;  %v6065_v43 = vld [vmem:[#allocation10 + $0x98] sm:$0xff]  ;;  %v7455_v6 = vld [vmem:[#allocation48_spill] sm:$0xff]  ;;  %v7457_v48 = vld [vmem:[#allocation51_spill] sm:$0xff] }
 0x3d2   : > { %v1748_v19 = vmul.f32 %v1730_v27, %v5845_v30  ;;  %v1745_v23 = vsel %vm1742_vm14, %v1744_v49, %v1740_v11  ;;  %v6011_v30 = vld [vmem:[#allocation10 + $0x1b8] sm:$0xff]  ;;  %7453 = vst [vmem:[#allocation58_spill] sm:$0xff] %v6065_v43  ;;  %v7463_v11 = vld [vmem:[#allocation52_spill] sm:$0xff] }
 0x3d3   : > { %v6071_v35 = vld [vmem:[#allocation10 + $0x78] sm:$0xff] }
 0x3d4   : > { %v5987_v5 = vadd.f32 %v1749_v55, %v1748_v19  ;;  %v5999_v19 = vld [vmem:[#allocation10 + $0x1f8] sm:$0xff]  ;;  %7456 = vst [vmem:[#allocation61_spill] sm:$0xff] %v6071_v35 }
 0x3d5   : > { %v6017_v55 = vld [vmem:[#allocation10 + $0x198] sm:$0xff] }
 0x3d6   : > { %4254 = vtanh.f32 %v5987_v5  ;;  %v7458_v40 = vld [vmem:[#allocation62_spill] sm:$0xff]  ;;  %v7461_v61 = vld [vmem:[#allocation53_spill] sm:$0xff] }
 0x3d7   : > { %v7459_v27 = vld [vmem:[#allocation50_spill] sm:$0xff]  ;;  %v7462_v46 = vld [vmem:[#allocation41_spill] sm:$0xff] }
 0x3d8   : > { %v6083_v49 = vld [vmem:[#allocation10 + $0x38] sm:$0xff] }
 0x3d9   : > { %7464 = vst [vmem:[#allocation84_spill] sm:$0xff] %v6083_v49 }
 0x3dc   : > { %v4255_v36 = vpop.eup %4254 }
 0x3dd   : > { %v5990_v31 = vmul.f32 %v4255_v36, %v1745_v23  ;;  %v7465_v36 = vld [vmem:[#allocation55_spill] sm:$0xff]  ;;  %v7466_v23 = vld [vmem:[#allocation40_spill] sm:$0xff] }
 0x3df   : > { %7450 = vst [vmem:[#allocation57_spill] sm:$0xff] %v5990_v31  ;;  %1781 = vmatmul.f32.vlgmr.msrb.gmra.mxu2 %v5990_v31  ;;  %1801 = vmatmul.f32.vlgmr.msrb.gmra.mxu3 %v5990_v31 }
 0x3e0   : > { %1821 = vmatmul.f32.vlgmr.msra.gmra.mxu0 %v5990_v31  ;;  %1841 = vmatmul.f32.vlgmr.msrb.gmra.mxu1 %v5990_v31  ;;  %v7467_v31 = vld [vmem:[#allocation54_spill] sm:$0xff] }
 0x3e1   : > { %2083 = vmatpush.msrb.mxu2 %v5854_v39  ;;  %2103 = vmatpush.msrb.mxu3 %v5745_v42 }
 0x3e2   : > { %2123 = vmatpush.msra.mxu0 %v5858_v7  ;;  %2143 = vmatpush.msrb.mxu1 %v5999_v19 }
 0x3e3   : > { %2084 = vmatpush.msrb.mxu2 %v5862_v14  ;;  %2104 = vmatpush.msrb.mxu3 %v5751_v0 }
 0x3e4   : > { %2124 = vmatpush.msra.mxu0 %v5866_v22  ;;  %2144 = vmatpush.msrb.mxu1 %v6005_v44 }
 0x3e5   : > { %2085 = vmatpush.msrb.mxu2 %v5870_v45  ;;  %2105 = vmatpush.msrb.mxu3 %v5757_v21 }
 0x3e6   : > { %2125 = vmatpush.msra.mxu0 %v5874_v10  ;;  %2145 = vmatpush.msrb.mxu1 %v6011_v30 }
 0x3e7   : > { %2086 = vmatpush.msrb.mxu2 %v5878_v63  ;;  %2106 = vmatpush.msrb.mxu3 %v5763_v24 }
 0x3e8   : > { %2126 = vmatpush.msra.mxu0 %v5882_v15  ;;  %2146 = vmatpush.msrb.mxu1 %v6017_v55 }
 0x3e9   : > { %2087 = vmatpush.msrb.mxu2 %v5886_v4  ;;  %2107 = vmatpush.msrb.mxu3 %v5769_v25 }
 0x3ea   : > { %2127 = vmatpush.msra.mxu0 %v5890_v28  ;;  %2147 = vmatpush.msrb.mxu1 %v6023_v34 }
 0x3eb   : > { %2088 = vmatpush.msrb.mxu2 %v5894_v9  ;;  %2108 = vmatpush.msrb.mxu3 %v5775_v54 }
 0x3ec   : > { %2128 = vmatpush.msra.mxu0 %v5898_v3  ;;  %2148 = vmatpush.msrb.mxu1 %v6029_v38 }
 0x3ed   : > { %2089 = vmatpush.msrb.mxu2 %v5902_v50  ;;  %2109 = vmatpush.msrb.mxu3 %v5781_v32 }
 0x3ee   : > { %2129 = vmatpush.msra.mxu0 %v5906_v13  ;;  %2149 = vmatpush.msrb.mxu1 %v6035_v47 }
 0x3ef   : > { %2090 = vmatpush.msrb.mxu2 %v5910_v53  ;;  %2110 = vmatpush.msrb.mxu3 %v5787_v8 }
 0x3f0   : > { %2130 = vmatpush.msra.mxu0 %v5914_v59  ;;  %2150 = vmatpush.msrb.mxu1 %v6041_v56 }
 0x3f1   : > { %2091 = vmatpush.msrb.mxu2 %v5918_v16  ;;  %2111 = vmatpush.msrb.mxu3 %v5793_v2 }
 0x3f2   : > { %2131 = vmatpush.msra.mxu0 %v5922_v62  ;;  %2151 = vmatpush.msrb.mxu1 %v6047_v33 }
 0x3f3   : > { %2092 = vmatpush.msrb.mxu2 %v5926_v51  ;;  %2112 = vmatpush.msrb.mxu3 %v5799_v58 }
 0x3f4   : > { %2132 = vmatpush.msra.mxu0 %v5930_v18  ;;  %2152 = vmatpush.msrb.mxu1 %v6053_v57 }
 0x3f5   : > { %2093 = vmatpush.msrb.mxu2 %v5934_v17  ;;  %2113 = vmatpush.msrb.mxu3 %v5805_v12 }
 0x3f6   : > { %2133 = vmatpush.msra.mxu0 %v5938_v1  ;;  %2153 = vmatpush.msrb.mxu1 %v6059_v26 }
 0x3f7   : > { %2094 = vmatpush.msrb.mxu2 %v5942_v20  ;;  %2114 = vmatpush.msrb.mxu3 %v5811_v60 }
 0x3f8   : > { %2134 = vmatpush.msra.mxu0 %v5946_v41  ;;  %2154 = vmatpush.msrb.mxu1 %v6065_v43 }
 0x3f9   : > { %2095 = vmatpush.msrb.mxu2 %v5950_v29  ;;  %2115 = vmatpush.msrb.mxu3 %v7454_v52 }
 0x3fa   : > { %2135 = vmatpush.msra.mxu0 %v7455_v6  ;;  %2155 = vmatpush.msrb.mxu1 %v6071_v35  ;;  %v7470_v35 = vld [vmem:[#allocation80_spill] sm:$0xff] }
 0x3fb   : > { %2096 = vmatpush.msrb.mxu2 %v7457_v48  ;;  %2116 = vmatpush.msrb.mxu3 %v7458_v40 }
 0x3fc   : > { %2136 = vmatpush.msra.mxu0 %v7459_v27  ;;  %2156 = vmatpush.msrb.mxu1 %v6077_v37  ;;  %v6089_v27 = vld [vmem:[#allocation10 + $0x18] sm:$0xff] }
 0x3fd   : > { %2097 = vmatpush.msrb.mxu2 %v7461_v61  ;;  %2117 = vmatpush.msrb.mxu3 %v7462_v46  ;;  %7468 = vst [vmem:[#allocation85_spill] sm:$0xff] %v6089_v27  ;;  %v7469_v61 = vld [vmem:[#allocation75_spill] sm:$0xff] }
 0x3fe   : > { %2137 = vmatpush.msra.mxu0 %v7463_v11  ;;  %2157 = vmatpush.msrb.mxu1 %v6083_v49  ;;  %v7471_v49 = vld [vmem:[#allocation64_spill] sm:$0xff] }
 0x3ff   : > { %2098 = vmatpush.msrb.mxu2 %v7465_v36  ;;  %2118 = vmatpush.msrb.mxu3 %v7466_v23 }
 0x400   : > { %2138 = vmatpush.msra.mxu0 %v7467_v31  ;;  %2158 = vmatpush.msrb.mxu1 %v6089_v27 }
 0x45d   : > { %v1822_v37 = vpop.f32.mrf.mxu0 }
 0x45e   : > { %v1847_v40 = vadd.f32 %v1822_v37, %v7469_v61 }
 0x460   : > { %v4032_v46 = vmul.f32 -1.442695, %v1847_v40  ;;  %v1842_v40 = vpop.f32.mrf.mxu1 }
 0x462   : > { %4256 = vpow2.f32 %v4032_v46  ;;  %v1782_v11 = vpop.f32.mrf.mxu2  ;;  %v1802_v48 = vpop.f32.mrf.mxu3  ;;  %v7472_v46 = vld [vmem:[#allocation82_spill] sm:$0xff] }
 0x463   : > { %v1845_v6 = vadd.f32 %v1782_v11, %v7470_v35  ;;  %v1846_v52 = vadd.f32 %v1802_v48, %v7471_v49  ;;  %v1848_v35 = vadd.f32 %v1842_v40, %v7472_v46 }
 0x465   : > { %v4030_v36 = vmul.f32 -1.442695, %v1845_v6  ;;  %v4031_v29 = vmul.f32 -1.442695, %v1846_v52 }
 0x467   : > { %4258 = vpow2.f32 %v4030_v36 }
 0x468   : > { %v4257_v23 = vpop.eup %4256  ;;  %4260 = vpow2.f32 %v4031_v29 }
 0x469   : > { %v1860_v31 = vadd.f32 1.0, %v4257_v23 }
 0x46b   : > { %4262 = vrcp.f32 %v1860_v31  ;;  %vm1896_vm8 = vweird.f32 %v1860_v31 }
 0x46d   : > { %v4259_v43 = vpop.eup %4258 }
 0x46e   : > { %v4261_v41 = vpop.eup %4260  ;;  %v1858_v27 = vadd.f32 1.0, %v4259_v43 }
 0x46f   : > { %v1859_v60 = vadd.f32 1.0, %v4261_v41 }
 0x470   : > { %4264 = vrcp.f32 %v1858_v27  ;;  %v1872_v29 = vand.u32 2147483648, %v1858_v27  ;;  %v1870_v43 = vand.u32 2147483647, %v1858_v27  ;;  %vm1866_vm1 = vweird.f32 %v1858_v27 }
 0x471   : > { %4266 = vrcp.f32 %v1859_v60  ;;  %v4263_v37 = vpop.eup %4262  ;;  %v1887_v20 = vand.u32 2147483648, %v1859_v60  ;;  %v1885_v26 = vand.u32 2147483647, %v1859_v60  ;;  %vm1881_vm3 = vweird.f32 %v1859_v60 }
 0x472   : > { %v1892_v52 = vmul.f32 %v4263_v37, %v1860_v31  ;;  %4268 = vtanh.f32 %v1848_v35  ;;  %v1873_v40 = vor.u32 1.1754944e-38, %v1872_v29  ;;  %vm1871_vm4 = vcmp.eq.f32.partialorder %v1870_v43, 8.507059e+37  ;;  %v7492_v43 = vld [vmem:[#allocation60_spill] sm:$0xff] }
 0x473   : > { %v1888_v35 = vor.u32 1.1754944e-38, %v1887_v20  ;;  %vm1886_vm6 = vcmp.eq.f32.partialorder %v1885_v26, 8.507059e+37  ;;  %vm1897_vm7 = vweird.f32 %v4263_v37  ;;  %v1902_v29 = vand.u32 2147483648, %v1860_v31 }
 0x474   : > { %v1893_v1 = vsub.f32 1.0, %v1892_v52  ;;  %vm1898_vm9 = vmor %vm1896_vm8, %vm1897_vm7 }
 0x475   : > { %v1903_v20 = vor.u32 1.1754944e-38, %v1902_v29  ;;  %v7501_v29 = vld [vmem:[#allocation72_spill] sm:$0xff] }
 0x476   : > { %v4265_v61 = vpop.eup %4264  ;;  %v1894_v57 = vmul.f32 %v4263_v37, %v1893_v1 }
 0x477   : > { %v4267_v11 = vpop.eup %4266  ;;  %v1862_v48 = vmul.f32 %v4265_v61, %v1858_v27  ;;  %vm1867_vm15 = vweird.f32 %v4265_v61 }
 0x478   : > { %v1877_v6 = vmul.f32 %v4267_v11, %v1859_v60  ;;  %vm1882_vm0 = vweird.f32 %v4267_v11  ;;  %vm1868_vm2 = vmor %vm1866_vm1, %vm1867_vm15  ;;  %v1895_v27 = vadd.f32 %v4263_v37, %v1894_v57  ;;  %v7487_v57 = vld [vmem:[#allocation48_spill] sm:$0xff] }
 0x479   : > { %v1863_v49 = vsub.f32 1.0, %v1862_v48  ;;  %vm1883_vm5 = vmor %vm1881_vm3, %vm1882_vm0  ;;  %v4269_v48 = vpop.eup %4268 }
 0x47a   : > { %v1878_v36 = vsub.f32 1.0, %v1877_v6  ;;  %v1899_v60 = vsel %vm1898_vm9, %v4263_v37, %v1895_v27  ;;  %v7488_v37 = vld [vmem:[#allocation61_spill] sm:$0xff] }
 0x47b   : > { %v1864_v23 = vmul.f32 %v4265_v61, %v1863_v49 }
 0x47c   : > { %v1879_v41 = vmul.f32 %v4267_v11, %v1878_v36 }
 0x47d   : > { %v1865_v12 = vadd.f32 %v4265_v61, %v1864_v23  ;;  %v7491_v23 = vld [vmem:[#allocation50_spill] sm:$0xff] }
 0x47e   : > { %v1880_v46 = vadd.f32 %v4267_v11, %v1879_v41  ;;  %v7493_v41 = vld [vmem:[#allocation53_spill] sm:$0xff] }
 0x47f   : > { %v1869_v17 = vsel %vm1868_vm2, %v4265_v61, %v1865_v12  ;;  %v1900_v12 = vand.u32 2147483647, %v1860_v31  ;;  %v7486_v31 = vld [vmem:[#allocation39_spill] sm:$0xff] }
 0x480   : > { %v1874_v6 = vsel %vm1871_vm4, %v1873_v40, %v1869_v17  ;;  %v1884_v49 = vsel %vm1883_vm5, %v4267_v11, %v1880_v46  ;;  %v7489_v61 = vld [vmem:[#allocation51_spill] sm:$0xff]  ;;  %v7490_v11 = vld [vmem:[#allocation62_spill] sm:$0xff]  ;;  %v7494_v40 = vld [vmem:[#allocation41_spill] sm:$0xff] }
 0x481   : > { %v1908_v18 = vmul.f32 %v4269_v48, %v1874_v6  ;;  %v1889_v36 = vsel %vm1886_vm6, %v1888_v35, %v1884_v49  ;;  %vm1901_vm10 = vcmp.eq.f32.partialorder %v1900_v12, 8.507059e+37  ;;  %v7495_v46 = vld [vmem:[#allocation52_spill] sm:$0xff]  ;;  %v7497_v48 = vld [vmem:[#allocation55_spill] sm:$0xff]  ;;  %v7499_v49 = vld [vmem:[#allocation54_spill] sm:$0xff] }
 0x482   : > { %v1907_v58 = vmul.f32 %v1889_v36, %v5987_v5  ;;  %v1904_v26 = vsel %vm1901_vm10, %v1903_v20, %v1899_v60  ;;  %v7485_v5 = vld [vmem:[#allocation49_spill] sm:$0xff]  ;;  %v7496_v35 = vld [vmem:[#allocation84_spill] sm:$0xff] }
 0x483   : > { %v7498_v6 = vld [vmem:[#allocation40_spill] sm:$0xff]  ;;  %v7500_v36 = vld [vmem:[#allocation85_spill] sm:$0xff] }
 0x484   : > { %v6097_v52 = vadd.f32 %v1908_v18, %v1907_v58  ;;  %v7483_v58 = vld [vmem:[#allocation46_spill] sm:$0xff] }
 0x485   : > { %v7484_v18 = vld [vmem:[#allocation58_spill] sm:$0xff] }
 0x486   : > { %4270 = vtanh.f32 %v6097_v52 }
 0x48c   : > { %v4271_v17 = vpop.eup %4270 }
 0x48d   : > { %v6100_v1 = vmul.f32 %v4271_v17, %v1904_v26  ;;  %v7502_v26 = vld [vmem:[#allocation78_spill] sm:$0xff] }
 0x48f   : > { %7473 = vst [vmem:[#allocation75_spill] sm:$0xff] %v6100_v1  ;;  %1940 = vmatmul.f32.vlgmr.msra.gmra.mxu2 %v6100_v1  ;;  %1960 = vmatmul.f32.vlgmr.msra.gmra.mxu3 %v6100_v1 }
 0x490   : > { %1980 = vmatmul.f32.vlgmr.msrb.gmra.mxu0 %v6100_v1  ;;  %2000 = vmatmul.f32.vlgmr.msra.gmra.mxu1 %v6100_v1 }
 0x491   : > { %2242 = vmatpush.msra.mxu2 %v5854_v39  ;;  %2262 = vmatpush.msra.mxu3 %v5745_v42  ;;  %v7474_v42 = vld [vmem:[#allocation36_spill] sm:$0xff] }
 0x492   : > { %2282 = vmatpush.msrb.mxu0 %v5858_v7  ;;  %2302 = vmatpush.msra.mxu1 %v5999_v19 }
 0x493   : > { %2243 = vmatpush.msra.mxu2 %v5862_v14  ;;  %2263 = vmatpush.msra.mxu3 %v5751_v0  ;;  %v7475_v0 = vld [vmem:[#allocation42_spill] sm:$0xff] }
 0x494   : > { %2283 = vmatpush.msrb.mxu0 %v5866_v22  ;;  %2303 = vmatpush.msra.mxu1 %v6005_v44 }
 0x495   : > { %2244 = vmatpush.msra.mxu2 %v5870_v45  ;;  %2264 = vmatpush.msra.mxu3 %v5757_v21  ;;  %v7476_v21 = vld [vmem:[#allocation56_spill] sm:$0xff] }
 0x496   : > { %2284 = vmatpush.msrb.mxu0 %v5874_v10  ;;  %2304 = vmatpush.msra.mxu1 %v6011_v30 }
 0x497   : > { %2245 = vmatpush.msra.mxu2 %v5878_v63  ;;  %2265 = vmatpush.msra.mxu3 %v5763_v24  ;;  %v7477_v24 = vld [vmem:[#allocation45_spill] sm:$0xff] }
 0x498   : > { %2285 = vmatpush.msrb.mxu0 %v5882_v15  ;;  %2305 = vmatpush.msra.mxu1 %v6017_v55 }
 0x499   : > { %2246 = vmatpush.msra.mxu2 %v5886_v4  ;;  %2266 = vmatpush.msra.mxu3 %v5769_v25  ;;  %v7478_v25 = vld [vmem:[#allocation38_spill] sm:$0xff] }
 0x49a   : > { %2286 = vmatpush.msrb.mxu0 %v5890_v28  ;;  %2306 = vmatpush.msra.mxu1 %v6023_v34 }
 0x49b   : > { %2247 = vmatpush.msra.mxu2 %v5894_v9  ;;  %2267 = vmatpush.msra.mxu3 %v5775_v54  ;;  %v7479_v54 = vld [vmem:[#allocation44_spill] sm:$0xff] }
 0x49c   : > { %2287 = vmatpush.msrb.mxu0 %v5898_v3  ;;  %2307 = vmatpush.msra.mxu1 %v6029_v38 }
 0x49d   : > { %2248 = vmatpush.msra.mxu2 %v5902_v50  ;;  %2268 = vmatpush.msra.mxu3 %v5781_v32  ;;  %v7480_v32 = vld [vmem:[#allocation59_spill] sm:$0xff] }
 0x49e   : > { %2288 = vmatpush.msrb.mxu0 %v5906_v13  ;;  %2308 = vmatpush.msra.mxu1 %v6035_v47 }
 0x49f   : > { %2249 = vmatpush.msra.mxu2 %v5910_v53  ;;  %2269 = vmatpush.msra.mxu3 %v5787_v8  ;;  %v7481_v8 = vld [vmem:[#allocation47_spill] sm:$0xff] }
 0x4a0   : > { %2289 = vmatpush.msrb.mxu0 %v5914_v59  ;;  %2309 = vmatpush.msra.mxu1 %v6041_v56 }
 0x4a1   : > { %2250 = vmatpush.msra.mxu2 %v5918_v16  ;;  %2270 = vmatpush.msra.mxu3 %v5793_v2  ;;  %v7482_v2 = vld [vmem:[#allocation37_spill] sm:$0xff] }
 0x4a2   : > { %2290 = vmatpush.msrb.mxu0 %v5922_v62  ;;  %2310 = vmatpush.msra.mxu1 %v6047_v33 }
 0x4a3   : > { %2251 = vmatpush.msra.mxu2 %v5926_v51  ;;  %2271 = vmatpush.msra.mxu3 %v7474_v42 }
 0x4a4   : > { %2291 = vmatpush.msrb.mxu0 %v7475_v0  ;;  %2311 = vmatpush.msra.mxu1 %v7476_v21 }
 0x4a5   : > { %2252 = vmatpush.msra.mxu2 %v7477_v24  ;;  %2272 = vmatpush.msra.mxu3 %v7478_v25  ;;  %v7503_v25 = vld [vmem:[#allocation71_spill] sm:$0xff] }
 0x4a6   : > { %2292 = vmatpush.msrb.mxu0 %v7479_v54  ;;  %2312 = vmatpush.msra.mxu1 %v7480_v32 }
 0x4a7   : > { %2253 = vmatpush.msra.mxu2 %v7481_v8  ;;  %2273 = vmatpush.msra.mxu3 %v7482_v2 }
 0x4a8   : > { %2293 = vmatpush.msrb.mxu0 %v7483_v58  ;;  %2313 = vmatpush.msra.mxu1 %v7484_v18 }
 0x4a9   : > { %2254 = vmatpush.msra.mxu2 %v7485_v5  ;;  %2274 = vmatpush.msra.mxu3 %v7486_v31 }
 0x4aa   : > { %2294 = vmatpush.msrb.mxu0 %v7487_v57  ;;  %2314 = vmatpush.msra.mxu1 %v7488_v37 }
 0x4ab   : > { %2255 = vmatpush.msra.mxu2 %v7489_v61  ;;  %2275 = vmatpush.msra.mxu3 %v7490_v11 }
 0x4ac   : > { %2295 = vmatpush.msrb.mxu0 %v7491_v23  ;;  %2315 = vmatpush.msra.mxu1 %v7492_v43 }
 0x4ad   : > { %2256 = vmatpush.msra.mxu2 %v7493_v41  ;;  %2276 = vmatpush.msra.mxu3 %v7494_v40 }
 0x4ae   : > { %2296 = vmatpush.msrb.mxu0 %v7495_v46  ;;  %2316 = vmatpush.msra.mxu1 %v7496_v35 }
 0x4af   : > { %2257 = vmatpush.msra.mxu2 %v7497_v48  ;;  %2277 = vmatpush.msra.mxu3 %v7498_v6 }
 0x4b0   : > { %2297 = vmatpush.msrb.mxu0 %v7499_v49  ;;  %2317 = vmatpush.msra.mxu1 %v7500_v36 }
 0x50d   : > { %v1981_v27 = vpop.f32.mrf.mxu0 }
 0x50e   : > { %v2006_v12 = vadd.f32 %v1981_v27, %v7501_v29  ;;  %v2001_v27 = vpop.f32.mrf.mxu1 }
 0x510   : > { %v4035_v60 = vmul.f32 -1.442695, %v2006_v12 }
 0x512   : > { %4272 = vpow2.f32 %v4035_v60  ;;  %v1941_v20 = vpop.f32.mrf.mxu2  ;;  %v1961_v17 = vpop.f32.mrf.mxu3  ;;  %v7504_v60 = vld [vmem:[#allocation81_spill] sm:$0xff] }
 0x513   : > { %v2004_v42 = vadd.f32 %v1941_v20, %v7502_v26  ;;  %v2005_v2 = vadd.f32 %v1961_v17, %v7503_v25  ;;  %v2007_v20 = vadd.f32 %v2001_v27, %v7504_v60 }
 0x515   : > { %v4033_v31 = vmul.f32 -1.442695, %v2004_v42  ;;  %v4034_v11 = vmul.f32 -1.442695, %v2005_v2 }
 0x517   : > { %4274 = vpow2.f32 %v4033_v31 }
 0x518   : > { %v4273_v40 = vpop.eup %4272  ;;  %4276 = vpow2.f32 %v4034_v11 }
 0x519   : > { %v2019_v6 = vadd.f32 1.0, %v4273_v40 }
 0x51b   : > { %4278 = vrcp.f32 %v2019_v6  ;;  %vm2055_vm4 = vweird.f32 %v2019_v6 }
 0x51d   : > { %v4275_v1 = vpop.eup %4274 }
 0x51e   : > { %v4277_v49 = vpop.eup %4276  ;;  %v2017_v36 = vadd.f32 1.0, %v4275_v1 }
 0x51f   : > { %v2018_v48 = vadd.f32 1.0, %v4277_v49 }
 0x520   : > { %4280 = vrcp.f32 %v2017_v36  ;;  %v2031_v31 = vand.u32 2147483648, %v2017_v36  ;;  %v2029_v1 = vand.u32 2147483647, %v2017_v36  ;;  %vm2025_vm13 = vweird.f32 %v2017_v36 }
 0x521   : > { %4282 = vrcp.f32 %v2018_v48  ;;  %v4279_v29 = vpop.eup %4278  ;;  %v2046_v35 = vand.u32 2147483648, %v2018_v48  ;;  %v2044_v46 = vand.u32 2147483647, %v2018_v48  ;;  %vm2040_vm15 = vweird.f32 %v2018_v48 }
 0x522   : > { %v2051_v25 = vmul.f32 %v4279_v29, %v2019_v6  ;;  %4284 = vtanh.f32 %v2007_v20  ;;  %v2032_v27 = vor.u32 1.1754944e-38, %v2031_v31  ;;  %vm2030_vm0 = vcmp.eq.f32.partialorder %v2029_v1, 8.507059e+37 }
 0x523   : > { %v2047_v20 = vor.u32 1.1754944e-38, %v2046_v35  ;;  %vm2045_vm2 = vcmp.eq.f32.partialorder %v2044_v46, 8.507059e+37  ;;  %vm2056_vm3 = vweird.f32 %v4279_v29  ;;  %v2061_v31 = vand.u32 2147483648, %v2019_v6 }
 0x524   : > { %v2052_v41 = vsub.f32 1.0, %v2051_v25  ;;  %vm2057_vm5 = vmor %vm2055_vm4, %vm2056_vm3 }
 0x526   : > { %v4281_v12 = vpop.eup %4280  ;;  %v2053_v61 = vmul.f32 %v4279_v29, %v2052_v41 }
 0x527   : > { %v4283_v26 = vpop.eup %4282  ;;  %v2021_v17 = vmul.f32 %v4281_v12, %v2017_v36  ;;  %vm2026_vm11 = vweird.f32 %v4281_v12 }
 0x528   : > { %v2036_v42 = vmul.f32 %v4283_v26, %v2018_v48  ;;  %vm2041_vm12 = vweird.f32 %v4283_v26  ;;  %vm2027_vm14 = vmor %vm2025_vm13, %vm2026_vm11  ;;  %v2054_v36 = vadd.f32 %v4279_v29, %v2053_v61  ;;  %v2062_v48 = vor.u32 1.1754944e-38, %v2061_v31 }
 0x529   : > { %v2022_v2 = vsub.f32 1.0, %v2021_v17  ;;  %vm2042_vm1 = vmor %vm2040_vm15, %vm2041_vm12  ;;  %v4285_v17 = vpop.eup %4284 }
 0x52a   : > { %v2037_v11 = vsub.f32 1.0, %v2036_v42  ;;  %v2058_v35 = vsel %vm2057_vm5, %v4279_v29, %v2054_v36 }
 0x52b   : > { %v2023_v40 = vmul.f32 %v4281_v12, %v2022_v2 }
 0x52c   : > { %v2038_v49 = vmul.f32 %v4283_v26, %v2037_v11 }
 0x52d   : > { %v2024_v43 = vadd.f32 %v4281_v12, %v2023_v40 }
 0x52e   : > { %v2039_v60 = vadd.f32 %v4283_v26, %v2038_v49 }
 0x52f   : > { %v2028_v23 = vsel %vm2027_vm14, %v4281_v12, %v2024_v43  ;;  %v2059_v43 = vand.u32 2147483647, %v2019_v6 }
 0x530   : > { %v2033_v42 = vsel %vm2030_vm0, %v2032_v27, %v2028_v23  ;;  %v2043_v2 = vsel %vm2042_vm1, %v4283_v26, %v2039_v60  ;;  %v7519_v27 = vld [vmem:[#allocation79_spill] sm:$0xff] }
 0x531   : > { %v2067_v37 = vmul.f32 %v4285_v17, %v2033_v42  ;;  %v2048_v11 = vsel %vm2045_vm2, %v2047_v20, %v2043_v2  ;;  %vm2060_vm6 = vcmp.eq.f32.partialorder %v2059_v43, 8.507059e+37 }
 0x532   : > { %v2066_v57 = vmul.f32 %v2048_v11, %v6097_v52  ;;  %v2063_v46 = vsel %vm2060_vm6, %v2062_v48, %v2058_v35  ;;  %v4400_v52 = vld [vmem:[#allocation10 + $0x1e8] sm:$0xff] }
 0x534   : > { %v6175_v25 = vadd.f32 %v2067_v37, %v2066_v57  ;;  %v4401_v57 = vld [vmem:[#allocation10 + $0x1c8] sm:$0xff] }
 0x535   : > { %v4402_v37 = vld [vmem:[#allocation10 + $0x1a8] sm:$0xff] }
 0x536   : > { %4286 = vtanh.f32 %v6175_v25 }
 0x53c   : > { %v4287_v23 = vpop.eup %4286 }
 0x53d   : > { %v6178_v41 = vmul.f32 %v4287_v23, %v2063_v46 }
 0x53f   : > { %2099 = vmatmul.f32.vlgmr.msrb.gmra.mxu2 %v6178_v41  ;;  %2119 = vmatmul.f32.vlgmr.msrb.gmra.mxu3 %v6178_v41 }
 0x540   : > { %2139 = vmatmul.f32.vlgmr.msra.gmra.mxu0 %v6178_v41  ;;  %2159 = vmatmul.f32.vlgmr.msrb.gmra.mxu1 %v6178_v41 }
 0x541   : > { %2421 = vmatpush.msrb.mxu3 %v4400_v52  ;;  %2401 = vmatpush.msrb.mxu2 %v5854_v39  ;;  %v4403_v39 = vld [vmem:[#allocation10 + $0x188] sm:$0xff] }
 0x542   : > { %2441 = vmatpush.msra.mxu0 %v5858_v7  ;;  %2461 = vmatpush.msrb.mxu1 %v5999_v19  ;;  %v4404_v7 = vld [vmem:[#allocation10 + $0x168] sm:$0xff] }
 0x543   : > { %2422 = vmatpush.msrb.mxu3 %v4401_v57  ;;  %2402 = vmatpush.msrb.mxu2 %v5862_v14  ;;  %v4405_v14 = vld [vmem:[#allocation10 + $0x148] sm:$0xff] }
 0x544   : > { %2442 = vmatpush.msra.mxu0 %v5866_v22  ;;  %2462 = vmatpush.msrb.mxu1 %v6005_v44  ;;  %v4406_v22 = vld [vmem:[#allocation10 + $0x128] sm:$0xff] }
 0x545   : > { %2423 = vmatpush.msrb.mxu3 %v4402_v37  ;;  %2403 = vmatpush.msrb.mxu2 %v5870_v45  ;;  %v4407_v45 = vld [vmem:[#allocation10 + $0x108] sm:$0xff] }
 0x546   : > { %2443 = vmatpush.msra.mxu0 %v5874_v10  ;;  %2463 = vmatpush.msrb.mxu1 %v6011_v30  ;;  %v4408_v10 = vld [vmem:[#allocation10 + $0xe8] sm:$0xff] }
 0x547   : > { %2424 = vmatpush.msrb.mxu3 %v4403_v39  ;;  %2404 = vmatpush.msrb.mxu2 %v5878_v63  ;;  %v4409_v63 = vld [vmem:[#allocation10 + $0xc8] sm:$0xff] }
 0x548   : > { %2444 = vmatpush.msra.mxu0 %v5882_v15  ;;  %2464 = vmatpush.msrb.mxu1 %v6017_v55  ;;  %v4410_v15 = vld [vmem:[#allocation10 + $0xa8] sm:$0xff]  ;;  %v7514_v55 = vld [vmem:[#allocation54_spill] sm:$0xff] }
 0x549   : > { %2425 = vmatpush.msrb.mxu3 %v4404_v7  ;;  %2405 = vmatpush.msrb.mxu2 %v5886_v4  ;;  %v4411_v4 = vld [vmem:[#allocation10 + $0x88] sm:$0xff] }
 0x54a   : > { %2445 = vmatpush.msra.mxu0 %v5890_v28  ;;  %2465 = vmatpush.msrb.mxu1 %v6023_v34  ;;  %v4412_v28 = vld [vmem:[#allocation10 + $0x68] sm:$0xff]  ;;  %v7515_v34 = vld [vmem:[#allocation85_spill] sm:$0xff] }
 0x54b   : > { %2426 = vmatpush.msrb.mxu3 %v4405_v14  ;;  %2406 = vmatpush.msrb.mxu2 %v5894_v9  ;;  %v7505_v9 = vld [vmem:[#allocation48_spill] sm:$0xff]  ;;  %v7513_v30 = vld [vmem:[#allocation55_spill] sm:$0xff] }
 0x54c   : > { %2446 = vmatpush.msra.mxu0 %v5898_v3  ;;  %2466 = vmatpush.msrb.mxu1 %v6029_v38  ;;  %v7506_v3 = vld [vmem:[#allocation61_spill] sm:$0xff]  ;;  %v7512_v19 = vld [vmem:[#allocation84_spill] sm:$0xff] }
 0x54d   : > { %2427 = vmatpush.msrb.mxu3 %v4406_v22  ;;  %2407 = vmatpush.msrb.mxu2 %v5902_v50  ;;  %v4413_v50 = vld [vmem:[#allocation10 + $0x48] sm:$0xff] }
 0x54e   : > { %2447 = vmatpush.msra.mxu0 %v5906_v13  ;;  %2467 = vmatpush.msrb.mxu1 %v6035_v47  ;;  %v7507_v13 = vld [vmem:[#allocation51_spill] sm:$0xff]  ;;  %v7516_v47 = vld [vmem:[#allocation69_spill] sm:$0xff] }
 0x54f   : > { %2428 = vmatpush.msrb.mxu3 %v4407_v45  ;;  %2408 = vmatpush.msrb.mxu2 %v5910_v53  ;;  %v7508_v53 = vld [vmem:[#allocation50_spill] sm:$0xff]  ;;  %v4415_v44 = vld [vmem:[#allocation10 + $0x8] sm:$0xff] }
 0x550   : > { %2448 = vmatpush.msra.mxu0 %v5914_v59  ;;  %2468 = vmatpush.msrb.mxu1 %v6041_v56  ;;  %v7509_v59 = vld [vmem:[#allocation60_spill] sm:$0xff] }
 0x551   : > { %2429 = vmatpush.msrb.mxu3 %v4408_v10  ;;  %2409 = vmatpush.msrb.mxu2 %v5918_v16  ;;  %v4414_v16 = vld [vmem:[#allocation10 + $0x28] sm:$0xff] }
 0x552   : > { %2449 = vmatpush.msra.mxu0 %v5922_v62  ;;  %2469 = vmatpush.msrb.mxu1 %v6047_v33  ;;  %v7510_v62 = vld [vmem:[#allocation53_spill] sm:$0xff] }
 0x553   : > { %2430 = vmatpush.msrb.mxu3 %v4409_v63  ;;  %2410 = vmatpush.msrb.mxu2 %v5926_v51  ;;  %v7511_v51 = vld [vmem:[#allocation52_spill] sm:$0xff] }
 0x554   : > { %2450 = vmatpush.msra.mxu0 %v7475_v0  ;;  %2470 = vmatpush.msrb.mxu1 %v7476_v21 }
 0x555   : > { %2431 = vmatpush.msrb.mxu3 %v4410_v15  ;;  %2411 = vmatpush.msrb.mxu2 %v7477_v24  ;;  %v7517_v24 = vld [vmem:[#allocation76_spill] sm:$0xff] }
 0x556   : > { %2451 = vmatpush.msra.mxu0 %v7479_v54  ;;  %2471 = vmatpush.msrb.mxu1 %v7480_v32  ;;  %v7518_v32 = vld [vmem:[#allocation68_spill] sm:$0xff] }
 0x557   : > { %2432 = vmatpush.msrb.mxu3 %v4411_v4  ;;  %2412 = vmatpush.msrb.mxu2 %v7481_v8 }
 0x558   : > { %2452 = vmatpush.msra.mxu0 %v7483_v58  ;;  %2472 = vmatpush.msrb.mxu1 %v7484_v18 }
 0x559   : > { %2433 = vmatpush.msrb.mxu3 %v4412_v28  ;;  %2413 = vmatpush.msrb.mxu2 %v7485_v5 }
 0x55a   : > { %2453 = vmatpush.msra.mxu0 %v7505_v9  ;;  %2473 = vmatpush.msrb.mxu1 %v7506_v3 }
 0x55b   : > { %2434 = vmatpush.msrb.mxu3 %v4413_v50  ;;  %2414 = vmatpush.msrb.mxu2 %v7507_v13 }
 0x55c   : > { %2454 = vmatpush.msra.mxu0 %v7508_v53  ;;  %2474 = vmatpush.msrb.mxu1 %v7509_v59 }
 0x55d   : > { %2435 = vmatpush.msrb.mxu3 %v4414_v16  ;;  %2415 = vmatpush.msrb.mxu2 %v7510_v62 }
 0x55e   : > { %2455 = vmatpush.msra.mxu0 %v7511_v51  ;;  %2475 = vmatpush.msrb.mxu1 %v7512_v19  ;;  %v2562_v19 = vld [vmem:[#allocation15 + $0x70] sm:$0xff] }
 0x55f   : > { %2436 = vmatpush.msrb.mxu3 %v4415_v44  ;;  %2416 = vmatpush.msrb.mxu2 %v7513_v30  ;;  %v2561_v44 = vld [vmem:[#allocation15 + $0x68] sm:$0xff] }
 0x560   : > { %2456 = vmatpush.msra.mxu0 %v7514_v55  ;;  %2476 = vmatpush.msrb.mxu1 %v7515_v34  ;;  %v2560_v55 = vld [vmem:[#allocation15 + $0x60] sm:$0xff] }
 0x561   : > { %v7520_v34 = vld [vmem:[#allocation67_spill] sm:$0xff] }
 0x5bd   : > { %v2140_v38 = vpop.f32.mrf.mxu0  ;;  %v2160_v40 = vpop.f32.mrf.mxu1 }
 0x5be   : > { %v2165_v56 = vadd.f32 %v2140_v38, %v7516_v47  ;;  %v2166_v60 = vadd.f32 %v2160_v40, %v7519_v27  ;;  %v2559_v47 = vld [vmem:[#allocation15 + $0x58] sm:$0xff] }
 0x5c0   : > { %v4038_v33 = vmul.f32 -1.442695, %v2165_v56 }
 0x5c2   : > { %4288 = vpow2.f32 %v4038_v33  ;;  %v2100_v0 = vpop.f32.mrf.mxu2  ;;  %v2120_v21 = vpop.f32.mrf.mxu3  ;;  %v2558_v33 = vld [vmem:[#allocation15 + $0x50] sm:$0xff] }
 0x5c3   : > { %v2163_v54 = vadd.f32 %v2100_v0, %v7517_v24  ;;  %v2164_v8 = vadd.f32 %v2120_v21, %v7518_v32  ;;  %v7521_v24 = vld [vmem:[#allocation73_spill] sm:$0xff]  ;;  %v7522_v32 = vld [vmem:[#allocation66_spill] sm:$0xff] }
 0x5c5   : > { %v4036_v58 = vmul.f32 -1.442695, %v2163_v54  ;;  %v4037_v18 = vmul.f32 -1.442695, %v2164_v8 }
 0x5c7   : > { %4290 = vpow2.f32 %v4036_v58  ;;  %v2557_v58 = vld [vmem:[#allocation15 + $0x48] sm:$0xff] }
 0x5c8   : > { %v4289_v5 = vpop.eup %4288  ;;  %4292 = vpow2.f32 %v4037_v18 }
 0x5c9   : > { %v2178_v61 = vadd.f32 1.0, %v4289_v5 }
 0x5cb   : > { %4294 = vrcp.f32 %v2178_v61  ;;  %v2220_v50 = vand.u32 2147483648, %v2178_v61  ;;  %vm2214_vm0 = vweird.f32 %v2178_v61  ;;  %v2218_v13 = vand.u32 2147483647, %v2178_v61 }
 0x5cd   : > { %v4291_v6 = vpop.eup %4290  ;;  %v2221_v59 = vor.u32 1.1754944e-38, %v2220_v50  ;;  %vm2219_vm2 = vcmp.eq.f32.partialorder %v2218_v13, 8.507059e+37 }
 0x5ce   : > { %v4293_v29 = vpop.eup %4292  ;;  %v2176_v12 = vadd.f32 1.0, %v4291_v6  ;;  %v2555_v6 = vld [vmem:[#allocation15 + $0x38] sm:$0xff] }
 0x5cf   : > { %v2177_v26 = vadd.f32 1.0, %v4293_v29  ;;  %v2554_v29 = vld [vmem:[#allocation15 + $0x30] sm:$0xff] }
 0x5d0   : > { %4296 = vrcp.f32 %v2176_v12  ;;  %v2190_v36 = vand.u32 2147483648, %v2176_v12  ;;  %v2188_v35 = vand.u32 2147483647, %v2176_v12  ;;  %vm2184_vm9 = vweird.f32 %v2176_v12 }
 0x5d1   : > { %4298 = vrcp.f32 %v2177_v26  ;;  %v4295_v1 = vpop.eup %4294  ;;  %v2205_v48 = vand.u32 2147483648, %v2177_v26  ;;  %v2203_v46 = vand.u32 2147483647, %v2177_v26  ;;  %vm2199_vm11 = vweird.f32 %v2177_v26 }
 0x5d2   : > { %v2210_v2 = vmul.f32 %v4295_v1, %v2178_v61  ;;  %4300 = vtanh.f32 %v2166_v60  ;;  %v2191_v37 = vor.u32 1.1754944e-38, %v2190_v36  ;;  %vm2189_vm12 = vcmp.eq.f32.partialorder %v2188_v35, 8.507059e+37  ;;  %v2556_v61 = vld [vmem:[#allocation15 + $0x40] sm:$0xff]  ;;  %v7523_v35 = vld [vmem:[#allocation77_spill] sm:$0xff] }
 0x5d3   : > { %v2206_v14 = vor.u32 1.1754944e-38, %v2205_v48  ;;  %vm2204_vm14 = vcmp.eq.f32.partialorder %v2203_v46, 8.507059e+37  ;;  %vm2215_vm15 = vweird.f32 %v4295_v1  ;;  %v2548_v36 = vld [vmem:[#allocation15] sm:$0xff] }
 0x5d4   : > { %v2211_v52 = vsub.f32 1.0, %v2210_v2  ;;  %vm2216_vm1 = vmor %vm2214_vm0, %vm2215_vm15  ;;  %v2549_v2 = vld [vmem:[#allocation15 + $0x8] sm:$0xff]  ;;  %vm2687_vm0 = vcmask 39936  }
 0x5d6   : > { %v4297_v49 = vpop.eup %4296  ;;  %v2212_v63 = vmul.f32 %v4295_v1, %v2211_v52 }
 0x5d7   : > { %v4299_v20 = vpop.eup %4298  ;;  %v2180_v17 = vmul.f32 %v4297_v49, %v2176_v12  ;;  %vm2185_vm7 = vweird.f32 %v4297_v49 }
 0x5d8   : > { %v2195_v42 = vmul.f32 %v4299_v20, %v2177_v26  ;;  %vm2200_vm8 = vweird.f32 %v4299_v20  ;;  %vm2186_vm10 = vmor %vm2184_vm9, %vm2185_vm7  ;;  %v4301_v22 = vpop.eup %4300  ;;  %v2213_v3 = vadd.f32 %v4295_v1, %v2212_v63  ;;  %v2553_v26 = vld [vmem:[#allocation15 + $0x28] sm:$0xff] }
 0x5d9   : > { %v2181_v11 = vsub.f32 1.0, %v2180_v17  ;;  %vm2201_vm13 = vmor %vm2199_vm11, %vm2200_vm8  ;;  %v2551_v17 = vld [vmem:[#allocation15 + $0x18] sm:$0xff] }
 0x5da   : > { %v2196_v31 = vsub.f32 1.0, %v2195_v42  ;;  %v2217_v53 = vsel %vm2216_vm1, %v4295_v1, %v2213_v3  ;;  %v2552_v1 = vld [vmem:[#allocation15 + $0x20] sm:$0xff]  ;;  %v2550_v42 = vld [vmem:[#allocation15 + $0x10] sm:$0xff] }
 0x5db   : > { %v2182_v43 = vmul.f32 %v4297_v49, %v2181_v11  ;;  %v2222_v62 = vsel %vm2219_vm2, %v2221_v59, %v2217_v53 }
 0x5dc   : > { %v2197_v23 = vmul.f32 %v4299_v20, %v2196_v31 }
 0x5dd   : > { %v2183_v57 = vadd.f32 %v4297_v49, %v2182_v43 }
 0x5de   : > { %v2198_v39 = vadd.f32 %v4299_v20, %v2197_v23 }
 0x5df   : > { %v2187_v7 = vsel %vm2186_vm10, %v4297_v49, %v2183_v57 }
 0x5e0   : > { %v2192_v45 = vsel %vm2189_vm12, %v2191_v37, %v2187_v7  ;;  %v2202_v10 = vsel %vm2201_vm13, %v4299_v20, %v2198_v39 }
 0x5e1   : > { %v2226_v15 = vmul.f32 %v4301_v22, %v2192_v45  ;;  %v2207_v4 = vsel %vm2204_vm14, %v2206_v14, %v2202_v10 }
 0x5e2   : > { %v2225_v28 = vmul.f32 %v2207_v4, %v6175_v25  ;;  %v2563_v25 = vld [vmem:[#allocation15 + $0x78] sm:$0xff] }
 0x5e4   : > { %v6237_v9 = vadd.f32 %v2226_v15, %v2225_v28 }
 0x5e6   : > { %4302 = vtanh.f32 %v6237_v9 }
 0x5ec   : > { %v4303_v16 = vpop.eup %4302 }
 0x5ed   : > { %v6240_v51 = vmul.f32 %v4303_v16, %v2222_v62 }
 0x5ef   : > { %2258 = vmatmul.f32.vlgmr.msra.gmra.mxu2 %v6240_v51  ;;  %2278 = vmatmul.f32.vlgmr.msra.gmra.mxu3 %v6240_v51 }
 0x5f0   : > { %2298 = vmatmul.f32.vlgmr.msrb.gmra.mxu0 %v6240_v51  ;;  %2318 = vmatmul.f32.vlgmr.msra.gmra.mxu1 %v6240_v51 }
 0x5f1   : > { %2621 = vmatpush.msra.mxu3 %v2563_v25 }
 0x5f3   : > { %2622 = vmatpush.msra.mxu3 %v2562_v19 }
 0x5f5   : > { %2623 = vmatpush.msra.mxu3 %v2561_v44 }
 0x5f7   : > { %2624 = vmatpush.msra.mxu3 %v2560_v55 }
 0x5f9   : > { %2625 = vmatpush.msra.mxu3 %v2559_v47 }
 0x5fb   : > { %2626 = vmatpush.msra.mxu3 %v2558_v33 }
 0x5fd   : > { %2627 = vmatpush.msra.mxu3 %v2557_v58  ;;  %v2578_v58 = vld [vmem:[#allocation16 + $0x70] sm:$0xff] }
 0x5ff   : > { %2628 = vmatpush.msra.mxu3 %v2556_v61  ;;  %v2575_v61 = vld [vmem:[#allocation16 + $0x58] sm:$0xff] }
 0x601   : > { %2629 = vmatpush.msra.mxu3 %v2555_v6  ;;  %v2574_v6 = vld [vmem:[#allocation16 + $0x50] sm:$0xff] }
 0x603   : > { %2630 = vmatpush.msra.mxu3 %v2554_v29  ;;  %v2573_v29 = vld [vmem:[#allocation16 + $0x48] sm:$0xff] }
 0x605   : > { %2631 = vmatpush.msra.mxu3 %v2553_v26  ;;  %v2572_v26 = vld [vmem:[#allocation16 + $0x40] sm:$0xff] }
 0x607   : > { %2632 = vmatpush.msra.mxu3 %v2552_v1 }
 0x609   : > { %2633 = vmatpush.msra.mxu3 %v2551_v17  ;;  %v7529_v17 = vld [vmem:[#allocation35_spill] sm:$0xff] }
 0x60a   : > { %vm2683_vm15 = vcmp.eq.s32.totalorder %v7529_v17, 3 }
 0x60b   : > { %2634 = vmatpush.msra.mxu3 %v2550_v42  ;;  %v4814_v42 = vmov -10000.0  }
 0x60d   : > { %2635 = vmatpush.msra.mxu3 %v2549_v2  ;;  %v2684_v2 = vsel %vm2683_vm15, 0.0, %v4814_v42  ;;  %vm2715_vm15 = vcmask 23552  }
 0x60f   : > { %2636 = vmatpush.msra.mxu3 %v2548_v36 }
 0x66d   : > { %v2299_v30 = vpop.f32.mrf.mxu0  ;;  %v2319_v11 = vpop.f32.mrf.mxu1 }
 0x66e   : > { %v2324_v38 = vadd.f32 %v2299_v30, %v7520_v34  ;;  %v2325_v48 = vadd.f32 %v2319_v11, %v7523_v35  ;;  %v7530_v35 = vld [vmem:[#allocation70_spill] sm:$0xff] }
 0x670   : > { %v4041_v56 = vmul.f32 -1.442695, %v2324_v38 }
 0x672   : > { %4304 = vpow2.f32 %v4041_v56  ;;  %v2259_v0 = vpop.f32.mrf.mxu2  ;;  %v2279_v21 = vpop.f32.mrf.mxu3 }
 0x673   : > { %v2322_v54 = vadd.f32 %v2259_v0, %v7521_v24  ;;  %v2323_v8 = vadd.f32 %v2279_v21, %v7522_v32  ;;  %v7525_v24 = vld [vmem:[#allocation43_spill] sm:$0xff] }
 0x674   : > { %v7527_v32 = vld [vmem:[#allocation75_spill] sm:$0xff] }
 0x675   : > { %v4039_v18 = vmul.f32 -1.442695, %v2322_v54  ;;  %v4040_v5 = vmul.f32 -1.442695, %v2323_v8  ;;  %v7526_v54 = vld [vmem:[#allocation57_spill] sm:$0xff]  ;;  %v2579_v8 = vld [vmem:[#allocation16 + $0x78] sm:$0xff] }
 0x676   : > { %2580 = vmatpush.msra.mxu2 %v2579_v8 }
 0x677   : > { %4306 = vpow2.f32 %v4039_v18  ;;  %v2577_v18 = vld [vmem:[#allocation16 + $0x68] sm:$0xff] }
 0x678   : > { %v4305_v12 = vpop.eup %4304  ;;  %4308 = vpow2.f32 %v4040_v5  ;;  %2581 = vmatpush.msra.mxu2 %v2578_v58  ;;  %v2576_v5 = vld [vmem:[#allocation16 + $0x60] sm:$0xff] }
 0x679   : > { %v6249_v40 = vadd.f32 1.0, %v4305_v12 }
 0x67a   : > { %2582 = vmatpush.msra.mxu2 %v2577_v18 }
 0x67b   : > { %4310 = vrcp.f32 %v6249_v40  ;;  %v2379_v34 = vand.u32 2147483648, %v6249_v40  ;;  %vm2373_vm12 = vweird.f32 %v6249_v40  ;;  %v2377_v38 = vand.u32 2147483647, %v6249_v40 }
 0x67c   : > { %2583 = vmatpush.msra.mxu2 %v2576_v5 }
 0x67d   : > { %v4307_v49 = vpop.eup %4306  ;;  %v2380_v56 = vor.u32 1.1754944e-38, %v2379_v34  ;;  %vm2378_vm14 = vcmp.eq.f32.partialorder %v2377_v38, 8.507059e+37 }
 0x67e   : > { %v4309_v27 = vpop.eup %4308  ;;  %v2335_v60 = vadd.f32 1.0, %v4307_v49  ;;  %2584 = vmatpush.msra.mxu2 %v2575_v61  ;;  %v2571_v49 = vld [vmem:[#allocation16 + $0x38] sm:$0xff] }
 0x67f   : > { %v2336_v20 = vadd.f32 1.0, %v4309_v27  ;;  %v2682_v27 = vld [vmem:[%s7211_s11] sm:$0x1f] }
 0x680   : > { %4312 = vrcp.f32 %v2335_v60  ;;  %v2349_v39 = vand.u32 2147483648, %v2335_v60  ;;  %v2347_v22 = vand.u32 2147483647, %v2335_v60  ;;  %vm2343_vm5 = vweird.f32 %v2335_v60  ;;  %2585 = vmatpush.msra.mxu2 %v2574_v6 }
 0x681   : > { %4314 = vrcp.f32 %v2336_v20  ;;  %v4311_v31 = vpop.eup %4310  ;;  %v2364_v45 = vand.u32 2147483648, %v2336_v20  ;;  %v2362_v63 = vand.u32 2147483647, %v2336_v20  ;;  %vm2358_vm7 = vweird.f32 %v2336_v20 }
 0x682   : > { %v2369_v57 = vmul.f32 %v4311_v31, %v6249_v40  ;;  %4316 = vtanh.f32 %v2325_v48  ;;  %v2350_v28 = vor.u32 1.1754944e-38, %v2349_v39  ;;  %vm2348_vm8 = vcmp.eq.f32.partialorder %v2347_v22, 8.507059e+37  ;;  %2586 = vmatpush.msra.mxu2 %v2573_v29  ;;  %v7528_v40 = vld [vmem:[#allocation65_spill] sm:$0xff] }
 0x683   : > { %v2365_v13 = vor.u32 1.1754944e-38, %v2364_v45  ;;  %vm2363_vm10 = vcmp.eq.f32.partialorder %v2362_v63, 8.507059e+37  ;;  %vm2374_vm11 = vweird.f32 %v4311_v31  ;;  %v6279_v11 = vperm.slane %v2682_v27, 0  ;;  %v2566_v22 = vld [vmem:[#allocation16 + $0x10] sm:$0xff]  ;;  %v2565_v63 = vld [vmem:[#allocation16 + $0x8] sm:$0xff] }
 0x684   : > { %v2370_v15 = vsub.f32 1.0, %v2369_v57  ;;  %vm2375_vm13 = vmor %vm2373_vm12, %vm2374_vm11  ;;  %2587 = vmatpush.msra.mxu2 %v2572_v26  ;;  %v2568_v57 = vld [vmem:[#allocation16 + $0x20] sm:$0xff]  ;;  %v6299_v34 = vperm.slane %v2682_v27, 4 }
 0x686   : > { %v4313_v43 = vpop.eup %4312  ;;  %v2371_v62 = vmul.f32 %v4311_v31, %v2370_v15  ;;  %2588 = vmatpush.msra.mxu2 %v2571_v49  ;;  %v2707_v8 = vadd.f32 %v6299_v34, %v2684_v2 }
 0x687   : > { %v4315_v23 = vpop.eup %4314  ;;  %v2339_v46 = vmul.f32 %v4313_v43, %v2335_v60  ;;  %vm2344_vm3 = vweird.f32 %v4313_v43 }
 0x688   : > { %v2354_v52 = vmul.f32 %v4315_v23, %v2336_v20  ;;  %vm2359_vm4 = vweird.f32 %v4315_v23  ;;  %vm2345_vm6 = vmor %vm2343_vm5, %vm2344_vm3  ;;  %v4317_v53 = vpop.eup %4316  ;;  %v2372_v55 = vadd.f32 %v4311_v31, %v2371_v62  ;;  %v2570_v20 = vld [vmem:[#allocation16 + $0x30] sm:$0xff]  ;;  %v2708_v61 = vsel %vm2687_vm0, %v2707_v8, -inf }
 0x689   : > { %v2340_v37 = vsub.f32 1.0, %v2339_v46  ;;  %vm2360_vm9 = vmor %vm2358_vm7, %vm2359_vm4  ;;  %2589 = vmatpush.msra.mxu2 %v2570_v20 }
 0x68a   : > { %v2355_v7 = vsub.f32 1.0, %v2354_v52  ;;  %v2376_v47 = vsel %vm2375_vm13, %v4311_v31, %v2372_v55  ;;  %v2686_v52 = vadd.f32 %v6279_v11, %v2684_v2  ;;  %vm2711_vm13 = vcmask 7168  }
 0x68b   : > { %v2341_v14 = vmul.f32 %v4313_v43, %v2340_v37  ;;  %v2381_v0 = vsel %vm2378_vm14, %v2380_v56, %v2376_v47  ;;  %vm2713_vm14 = vcmask 15360  }
 0x68c   : > { %v2356_v10 = vmul.f32 %v4315_v23, %v2355_v7  ;;  %v2688_v7 = vsel %vm2687_vm0, %v2686_v52, -inf }
 0x68d   : > { %v2342_v4 = vadd.f32 %v4313_v43, %v2341_v14  ;;  %v2567_v14 = vld [vmem:[#allocation16 + $0x18] sm:$0xff]  ;;  %2689 = vmax.xlane.f32.xlu2 %v2688_v7 }
 0x68e   : > { %v2357_v3 = vadd.f32 %v4315_v23, %v2356_v10  ;;  %v6285_v10 = vperm.slane %v2682_v27, 3 }
 0x68f   : > { %v2346_v50 = vsel %vm2345_vm6, %v4313_v43, %v2342_v4  ;;  %v2569_v43 = vld [vmem:[#allocation16 + $0x28] sm:$0xff] }
 0x690   : > { %v2351_v59 = vsel %vm2348_vm8, %v2350_v28, %v2346_v50  ;;  %v2361_v16 = vsel %vm2360_vm9, %v4315_v23, %v2357_v3  ;;  %v7531_v23 = vld [vmem:[#allocation63_spill] sm:$0xff]  ;;  %2590 = vmatpush.msra.mxu2 %v2569_v43  ;;  %v2702_v15 = vadd.f32 %v6285_v10, %v2684_v2 }
 0x691   : > { %v2385_v25 = vmul.f32 %v4317_v53, %v2351_v59  ;;  %v2366_v19 = vsel %vm2363_vm10, %v2365_v13, %v2361_v16  ;;  %v2564_v28 = vld [vmem:[#allocation16] sm:$0xff]  ;;  %v6291_v13 = vperm.slane %v2682_v27, 1 }
 0x692   : > { %v2384_v44 = vmul.f32 %v2366_v19, %v6237_v9  ;;  %v7524_v9 = vld [vmem:[#allocation83_spill] sm:$0xff]  ;;  %2591 = vmatpush.msra.mxu2 %v2568_v57  ;;  %v2703_v3 = vsel %vm2687_vm0, %v2702_v15, -inf }
 0x693   : > { %v2692_v62 = vadd.f32 %v6291_v13, %v2684_v2 }
 0x694   : > { %v6255_v30 = vadd.f32 %v2385_v25, %v2384_v44  ;;  %2592 = vmatpush.msra.mxu2 %v2567_v14  ;;  %v6295_v25 = vperm.slane %v2682_v27, 2 }
 0x695   : > { %2704 = vmax.xlane.f32.xlu2 %v2703_v3  ;;  %v2693_v44 = vsel %vm2687_vm0, %v2692_v62, -inf }
 0x696   : > { %4318 = vtanh.f32 %v6255_v30  ;;  %2593 = vmatpush.msra.mxu2 %v2566_v22  ;;  %v2697_v55 = vadd.f32 %v6295_v25, %v2684_v2  ;;  %2694 = vmax.xlane.f32.xlu0 %v2693_v44 }
 0x698   : > { %2594 = vmatpush.msra.mxu2 %v2565_v63  ;;  %v2698_v47 = vsel %vm2687_vm0, %v2697_v55, -inf }
 0x699   : > { %2699 = vmax.xlane.f32.xlu1 %v2698_v47 }
 0x69a   : > { %2595 = vmatpush.msra.mxu2 %v2564_v28 }
 0x69c   : > { %v4319_v33 = vpop.eup %4318 }
 0x69d   : > { %v6261_v21 = vmul.f32 %v4319_v33, %v2381_v0  ;;  %v7532_v33 = vld [vmem:[#allocation74_spill] sm:$0xff]  ;;  %2709 = vmax.xlane.f32.xlu2 %v2708_v61 }
 0x69f   : > { %2417 = vmatmul.f32.vlgmr.msrb.gmra.mxu2 %v6261_v21  ;;  %2437 = vmatmul.f32.vlgmr.msrb.gmra.mxu3 %v6261_v21 }
 0x6a0   : > { %2457 = vmatmul.f32.vlgmr.msra.gmra.mxu0 %v6261_v21  ;;  %2477 = vmatmul.f32.vlgmr.msrb.gmra.mxu1 %v6261_v21 }
 0x6a7   : > { %2637 = vmatmul.f32.vlgmr.msra.gmra.mxu3 %v7524_v9 }
 0x6af   : > { %2640 = vmatmul.f32.gmra.mxu3 %v7525_v24 }
 0x6b7   : > { %2643 = vmatmul.f32.gmra.mxu3 %v7526_v54 }
 0x6bf   : > { %2646 = vmatmul.f32.gmra.mxu3 %v7527_v32 }
 0x6c7   : > { %2649 = vmatmul.f32.gmra.mxu3 %v6178_v41 }
 0x6cf   : > { %2652 = vmatmul.f32.gmra.mxu3 %v6240_v51 }
 0x6d7   : > { %2655 = vmatmul.f32.gmra.mxu3 %v6261_v21 }
 0x71d   : > { %v2458_v12 = vpop.f32.mrf.mxu0  ;;  %v2478_v19 = vpop.f32.mrf.mxu1 }
 0x71e   : > { %v2483_v1 = vadd.f32 %v2458_v12, %v7528_v40  ;;  %v2484_v0 = vadd.f32 %v2478_v19, %v7532_v33 }
 0x720   : > { %v4044_v60 = vmul.f32 -1.442695, %v2483_v1 }
 0x722   : > { %4320 = vpow2.f32 %v4044_v60  ;;  %v2418_v36 = vpop.f32.mrf.mxu2  ;;  %v2438_v31 = vpop.f32.mrf.mxu3 }
 0x723   : > { %v2481_v48 = vadd.f32 %v2418_v36, %v7530_v35  ;;  %v2482_v46 = vadd.f32 %v2438_v31, %v7531_v23 }
 0x725   : > { %v4042_v37 = vmul.f32 -1.442695, %v2481_v48  ;;  %v4043_v39 = vmul.f32 -1.442695, %v2482_v46 }
 0x727   : > { %4322 = vpow2.f32 %v4042_v37 }
 0x728   : > { %v4321_v45 = vpop.eup %4320  ;;  %4324 = vpow2.f32 %v4043_v39 }
 0x729   : > { %v6288_v4 = vadd.f32 1.0, %v4321_v45 }
 0x72b   : > { %4326 = vrcp.f32 %v6288_v4  ;;  %v2538_v14 = vand.u32 2147483648, %v6288_v4  ;;  %vm2532_vm10 = vweird.f32 %v6288_v4  ;;  %v2536_v22 = vand.u32 2147483647, %v6288_v4 }
 0x72d   : > { %v4323_v50 = vpop.eup %4322  ;;  %v2539_v63 = vor.u32 1.1754944e-38, %v2538_v14  ;;  %vm2537_vm12 = vcmp.eq.f32.partialorder %v2536_v22, 8.507059e+37 }
 0x72e   : > { %v4325_v53 = vpop.eup %4324  ;;  %v2494_v59 = vadd.f32 1.0, %v4323_v50 }
 0x72f   : > { %v2495_v16 = vadd.f32 1.0, %v4325_v53  ;;  %v2695_v53 = vpop.xlane.xlu0 %2694 }
 0x730   : > { %4328 = vrcp.f32 %v2494_v59  ;;  %v2508_v12 = vand.u32 2147483648, %v2494_v59  ;;  %v2506_v1 = vand.u32 2147483647, %v2494_v59  ;;  %vm2502_vm3 = vweird.f32 %v2494_v59 }
 0x731   : > { %4330 = vrcp.f32 %v2495_v16  ;;  %v4327_v38 = vpop.eup %4326  ;;  %v2523_v49 = vand.u32 2147483648, %v2495_v16  ;;  %v2521_v60 = vand.u32 2147483647, %v2495_v16  ;;  %vm2517_vm5 = vweird.f32 %v2495_v16 }
 0x732   : > { %v2528_v6 = vmul.f32 %v4327_v38, %v6288_v4  ;;  %4332 = vtanh.f32 %v2484_v0  ;;  %v2509_v2 = vor.u32 1.1754944e-38, %v2508_v12  ;;  %vm2507_vm6 = vcmp.eq.f32.partialorder %v2506_v1, 8.507059e+37  ;;  %v2638_v4 = vpop.f32.mrf.mxu3 }
 0x733   : > { %v2524_v43 = vor.u32 1.1754944e-38, %v2523_v49  ;;  %vm2522_vm8 = vcmp.eq.f32.partialorder %v2521_v60, 8.507059e+37  ;;  %vm2533_vm9 = vweird.f32 %v4327_v38 }
 0x734   : > { %v2529_v20 = vsub.f32 1.0, %v2528_v6  ;;  %vm2534_vm11 = vmor %vm2532_vm10, %vm2533_vm9 }
 0x736   : > { %v4329_v56 = vpop.eup %4328  ;;  %v2530_v52 = vmul.f32 %v4327_v38, %v2529_v20 }
 0x737   : > { %v4331_v58 = vpop.eup %4330  ;;  %v2498_v18 = vmul.f32 %v4329_v56, %v2494_v59  ;;  %vm2503_vm1 = vweird.f32 %v4329_v56 }
 0x738   : > { %v2513_v5 = vmul.f32 %v4331_v58, %v2495_v16  ;;  %vm2518_vm2 = vweird.f32 %v4331_v58  ;;  %vm2504_vm4 = vmor %vm2502_vm3, %vm2503_vm1  ;;  %v4333_v35 = vpop.eup %4332  ;;  %v2531_v7 = vadd.f32 %v4327_v38, %v2530_v52  ;;  %vm2717_vm1 = vcmask 31744  }
 0x739   : > { %v2499_v29 = vsub.f32 1.0, %v2498_v18  ;;  %vm2519_vm7 = vmor %vm2517_vm5, %vm2518_vm2 }
 0x73a   : > { %v2514_v26 = vsub.f32 1.0, %v2513_v5  ;;  %v2535_v45 = vsel %vm2534_vm11, %v4327_v38, %v2531_v7 }
 0x73b   : > { %v2500_v40 = vmul.f32 %v4329_v56, %v2499_v29  ;;  %v2540_v28 = vsel %vm2537_vm12, %v2539_v63, %v2535_v45 }
 0x73c   : > { %v2515_v27 = vmul.f32 %v4331_v58, %v2514_v26 }
 0x73d   : > { %v2501_v42 = vadd.f32 %v4329_v56, %v2500_v40 }
 0x73e   : > { %v2516_v36 = vadd.f32 %v4331_v58, %v2515_v27 }
 0x73f   : > { %v2505_v31 = vsel %vm2504_vm4, %v4329_v56, %v2501_v42 }
 0x740   : > { %v2520_v48 = vsel %vm2519_vm7, %v4331_v58, %v2516_v36  ;;  %v2510_v23 = vsel %vm2507_vm6, %v2509_v2, %v2505_v31 }
 0x741   : > { %v2525_v46 = vsel %vm2522_vm8, %v2524_v43, %v2520_v48  ;;  %v2544_v57 = vmul.f32 %v4333_v35, %v2510_v23 }
 0x742   : > { %v2543_v37 = vmul.f32 %v2525_v46, %v6255_v30  ;;  %v2690_v30 = vpop.xlane.xlu2 %2689 }
 0x743   : > { %v2712_v59 = vsel %vm2711_vm13, %v2690_v30, %v2695_v53 }
 0x744   : > { %v2545_v39 = vadd.f32 %v2544_v57, %v2543_v37 }
 0x746   : > { %4334 = vtanh.f32 %v2545_v39 }
 0x74a   : > { %v2705_v50 = vpop.xlane.xlu2 %2704 }
 0x74c   : > { %v4335_v15 = vpop.eup %4334 }
 0x74d   : > { %v2547_v3 = vmul.f32 %v4335_v15, %v2540_v28 }
 0x74f   : > { %2596 = vmatmul.f32.vlgmr.msra.gmra.mxu2 %v2547_v3  ;;  %2658 = vmatmul.f32.gmra.mxu3 %v2547_v3 }
 0x757   : > { %2599 = vmatmul.f32.gmra.mxu2 %v6261_v21  ;;  %v2700_v21 = vpop.xlane.xlu1 %2699 }
 0x75f   : > { %2602 = vmatmul.f32.gmra.mxu2 %v6240_v51  ;;  %v2714_v51 = vsel %vm2713_vm14, %v2712_v59, %v2700_v21 }
 0x767   : > { %2605 = vmatmul.f32.gmra.mxu2 %v6178_v41  ;;  %v2641_v41 = vpop.f32.mrf.mxu3 }
 0x76f   : > { %2608 = vmatmul.f32.gmra.mxu2 %v7527_v32  ;;  %v2716_v32 = vsel %vm2715_vm15, %v2714_v51, %v2705_v50  ;;  %v2644_v56 = vpop.f32.mrf.mxu3 }
 0x777   : > { %2611 = vmatmul.f32.gmra.mxu2 %v7526_v54  ;;  %v2710_v54 = vpop.xlane.xlu2 %2709  ;;  %v2647_v40 = vpop.f32.mrf.mxu3 }
 0x778   : > { %v2718_v19 = vsel %vm2717_vm1, %v2716_v32, %v2710_v54 }
 0x77f   : > { %2614 = vmatmul.f32.gmra.mxu2 %v7525_v24  ;;  %v2650_v42 = vpop.f32.mrf.mxu3 }
 0x787   : > { %2617 = vmatmul.f32.gmra.mxu2 %v7524_v9  ;;  %v4207_v9 = vld [vmem:[%s7210_s10] ss:$0 sm:$0xff]  ;;  %v2653_v43 = vpop.f32.mrf.mxu3 }
 0x78f   : > { %v2656_v46 = vpop.f32.mrf.mxu3 }
 0x7d2   : > { %v2597_v24 = vpop.f32.mrf.mxu2  ;;  %v2659_v39 = vpop.f32.mrf.mxu3 }
 0x7d3   : > { %v2639_v16 = vadd.f32 %v2638_v4, %v2597_v24 }
 0x7d5   : > { %v2666_v62 = vadd.f32 %v4207_v9, %v2639_v16 }
 0x7d7   : > { %2674 = vst [vmem:[%s6328_s27] sm:$0xff] %v2666_v62  ;;  %v2719_v44 = vadd.f32 %v2718_v19, %v2666_v62 }
 0x7d9   : > { %v6332_v55 = vadd.f32 %v2719_v44, %v6295_v25  ;;  %v6335_v38 = vadd.f32 %v2719_v44, %v6291_v13  ;;  %v6338_v47 = vadd.f32 %v2719_v44, %v6279_v11  ;;  %v6348_v61 = vadd.f32 %v2719_v44, %v6299_v34 }
 0x7da   : > { %v2600_v33 = vpop.f32.mrf.mxu2  ;;  %v6351_v6 = vadd.f32 %v2719_v44, %v6285_v10 }
 0x7db   : > { %7533 = vst [vmem:[#allocation80_spill] sm:$0xff] %v6332_v55  ;;  %v2642_v0 = vadd.f32 %v2641_v41, %v2600_v33  ;;  %v2763_v8 = vsel %vm2687_vm0, %v6332_v55, -inf  ;;  %v2742_v58 = vsel %vm2687_vm0, %v6335_v38, -inf  ;;  %v2721_v18 = vsel %vm2687_vm0, %v6338_v47, -inf }
 0x7dc   : > { %7534 = vst [vmem:[#allocation64_spill] sm:$0xff] %v6335_v38  ;;  %2764 = vmax.xlane.f32.xlu2 %v2763_v8  ;;  %2743 = vmax.xlane.f32.xlu1 %v2742_v58  ;;  %v2805_v26 = vsel %vm2687_vm0, %v6348_v61, -inf  ;;  %v2784_v1 = vsel %vm2687_vm0, %v6351_v6, -inf }
 0x7dd   : > { %7535 = vst [vmem:[#allocation82_spill] sm:$0xff] %v6338_v47  ;;  %v2667_v5 = vadd.f32 %v4207_v9, %v2642_v0  ;;  %2722 = vmax.xlane.f32.xlu0 %v2721_v18 }
 0x7de   : > { %7536 = vst [vmem:[#allocation36_spill] sm:$0xff] %v6348_v61 }
 0x7df   : > { %2675 = vst [vmem:[%s6328_s27 + $0x8] sm:$0xff] %v2667_v5 }
 0x7e0   : > { %7537 = vst [vmem:[#allocation42_spill] sm:$0xff] %v6351_v6 }
 0x7e2   : > { %v2603_v29 = vpop.f32.mrf.mxu2 }
 0x7e3   : > { %v2645_v12 = vadd.f32 %v2644_v56, %v2603_v29 }
 0x7e4   : > { %2806 = vmax.xlane.f32.xlu1 %v2805_v26 }
 0x7e5   : > { %v2668_v49 = vadd.f32 %v4207_v9, %v2645_v12  ;;  %2785 = vmax.xlane.f32.xlu0 %v2784_v1 }
 0x7e7   : > { %2676 = vst [vmem:[%s6328_s27 + $0x10] sm:$0xff] %v2668_v49 }
 0x7ea   : > { %v2606_v27 = vpop.f32.mrf.mxu2 }
 0x7eb   : > { %v2648_v60 = vadd.f32 %v2647_v40, %v2606_v27 }
 0x7ed   : > { %v6358_v20 = vadd.f32 %v4207_v9, %v2648_v60 }
 0x7ef   : > { %2677 = vst [vmem:[%s6328_s27 + $0x18] sm:$0xff] %v6358_v20 }
 0x7f2   : > { %v2609_v2 = vpop.f32.mrf.mxu2 }
 0x7f3   : > { %v2651_v36 = vadd.f32 %v2650_v42, %v2609_v2 }
 0x7f5   : > { %v6362_v31 = vadd.f32 %v4207_v9, %v2651_v36 }
 0x7f7   : > { %2678 = vst [vmem:[%s6328_s27 + $0x20] sm:$0xff] %v6362_v31 }
 0x7fa   : > { %v2612_v35 = vpop.f32.mrf.mxu2 }
 0x7fb   : > { %v2654_v48 = vadd.f32 %v2653_v43, %v2612_v35 }
 0x7fd   : > { %v6366_v23 = vadd.f32 %v4207_v9, %v2654_v48 }
 0x7ff   : > { %2679 = vst [vmem:[%s6328_s27 + $0x28] sm:$0xff] %v6366_v23 }
 0x802   : > { %v2615_v52 = vpop.f32.mrf.mxu2 }
 0x803   : > { %v2657_v57 = vadd.f32 %v2656_v46, %v2615_v52 }
 0x805   : > { %v6370_v37 = vadd.f32 %v4207_v9, %v2657_v57 }
 0x807   : > { %2680 = vst [vmem:[%s6328_s27 + $0x30] sm:$0xff] %v6370_v37 }
 0x80a   : > { %v2618_v7 = vpop.f32.mrf.mxu2 }
 0x80b   : > { %v2660_v14 = vadd.f32 %v2659_v39, %v2618_v7 }
 0x80d   : > { %v6374_v22 = vadd.f32 %v4207_v9, %v2660_v14 }
 0x80f   : > { %2681 = vst [vmem:[%s6328_s27 + $0x38] sm:$0xff] %v6374_v22 }
 0x84f   : > { %v6378_v45 = vpop.xlane.xlu1 %2743  ;;  %v6382_v15 = vpop.xlane.xlu2 %2764 }
 0x850   : > { %7538 = vst [vmem:[#allocation56_spill] sm:$0xff] %v6378_v45  ;;  %v6380_v63 = vpop.xlane.xlu0 %2722 }
 0x851   : > { %7539 = vst [vmem:[#allocation45_spill] sm:$0xff] %v6380_v63  ;;  %v2829_v28 = vsel %vm2711_vm13, %v6380_v63, %v6378_v45 }
 0x852   : > { %7540 = vst [vmem:[#allocation38_spill] sm:$0xff] %v6382_v15  ;;  %v2830_v30 = vsel %vm2713_vm14, %v2829_v28, %v6382_v15 }
 0x857   : > { %v6387_v3 = vpop.xlane.xlu1 %2806 }
 0x858   : > { %7541 = vst [vmem:[#allocation44_spill] sm:$0xff] %v6387_v3  ;;  %v6391_v4 = vpop.xlane.xlu0 %2785 }
 0x859   : > { %7542 = vst [vmem:[#allocation59_spill] sm:$0xff] %v6391_v4  ;;  %v2831_v50 = vsel %vm2715_vm15, %v2830_v30, %v6391_v4 }
 0x85a   : > { %v2832_v53 = vsel %vm2717_vm1, %v2831_v50, %v6387_v3 }
 0x85b   : > { %v2833_v59 = vadd.f32 %v2832_v53, %v2667_v5 }
 0x85d   : > { %v6398_v21 = vadd.f32 %v2833_v59, %v6295_v25  ;;  %v6401_v41 = vadd.f32 %v2833_v59, %v6291_v13  ;;  %v6404_v51 = vadd.f32 %v2833_v59, %v6279_v11  ;;  %v6413_v32 = vadd.f32 %v2833_v59, %v6299_v34 }
 0x85e   : > { %v6416_v16 = vadd.f32 %v2833_v59, %v6285_v10 }
 0x85f   : > { %7543 = vst [vmem:[#allocation47_spill] sm:$0xff] %v6398_v21  ;;  %v2877_v9 = vsel %vm2687_vm0, %v6398_v21, -inf  ;;  %v2856_v24 = vsel %vm2687_vm0, %v6401_v41, -inf  ;;  %v2835_v54 = vsel %vm2687_vm0, %v6404_v51, -inf  ;;  %v2919_v62 = vsel %vm2687_vm0, %v6413_v32, -inf }
 0x860   : > { %7544 = vst [vmem:[#allocation37_spill] sm:$0xff] %v6401_v41  ;;  %2878 = vmax.xlane.f32.xlu1 %v2877_v9  ;;  %2857 = vmax.xlane.f32.xlu0 %v2856_v24  ;;  %v2898_v19 = vsel %vm2687_vm0, %v6416_v16, -inf }
 0x861   : > { %7545 = vst [vmem:[#allocation46_spill] sm:$0xff] %v6404_v51  ;;  %2836 = vmax.xlane.f32.xlu2 %v2835_v54 }
 0x862   : > { %7546 = vst [vmem:[#allocation58_spill] sm:$0xff] %v6413_v32 }
 0x863   : > { %7547 = vst [vmem:[#allocation49_spill] sm:$0xff] %v6416_v16 }
 0x868   : > { %2920 = vmax.xlane.f32.xlu0 %v2919_v62 }
 0x869   : > { %2899 = vmax.xlane.f32.xlu2 %v2898_v19 }
 0x8d3   : > { %v6422_v44 = vpop.xlane.xlu0 %2857  ;;  %v6426_v33 = vpop.xlane.xlu1 %2878 }
 0x8d4   : > { %7548 = vst [vmem:[#allocation39_spill] sm:$0xff] %v6422_v44  ;;  %v6424_v56 = vpop.xlane.xlu2 %2836 }
 0x8d5   : > { %7549 = vst [vmem:[#allocation62_spill] sm:$0xff] %v6424_v56  ;;  %v2943_v0 = vsel %vm2711_vm13, %v6424_v56, %v6422_v44 }
 0x8d6   : > { %7550 = vst [vmem:[#allocation41_spill] sm:$0xff] %v6426_v33  ;;  %v2944_v58 = vsel %vm2713_vm14, %v2943_v0, %v6426_v33 }
 0x8db   : > { %v6431_v8 = vpop.xlane.xlu0 %2920 }
 0x8dc   : > { %7551 = vst [vmem:[#allocation40_spill] sm:$0xff] %v6431_v8  ;;  %v6435_v18 = vpop.xlane.xlu2 %2899 }
 0x8dd   : > { %7552 = vst [vmem:[#allocation72_spill] sm:$0xff] %v6435_v18  ;;  %v2945_v5 = vsel %vm2715_vm15, %v2944_v58, %v6435_v18 }
 0x8de   : > { %v2946_v29 = vsel %vm2717_vm1, %v2945_v5, %v6431_v8 }
 0x8df   : > { %v2947_v12 = vadd.f32 %v2946_v29, %v2668_v49 }
 0x8e1   : > { %v6442_v26 = vadd.f32 %v2947_v12, %v6295_v25  ;;  %v6445_v40 = vadd.f32 %v2947_v12, %v6291_v13  ;;  %v6448_v1 = vadd.f32 %v2947_v12, %v6279_v11  ;;  %v6457_v49 = vadd.f32 %v2947_v12, %v6299_v34 }
 0x8e2   : > { %v6460_v2 = vadd.f32 %v2947_v12, %v6285_v10 }
 0x8e3   : > { %v2991_v27 = vsel %vm2687_vm0, %v6442_v26, -inf  ;;  %v2970_v60 = vsel %vm2687_vm0, %v6445_v40, -inf  ;;  %v2949_v42 = vsel %vm2687_vm0, %v6448_v1, -inf  ;;  %v3033_v36 = vsel %vm2687_vm0, %v6457_v49, -inf }
 0x8e4   : > { %2992 = vmax.xlane.f32.xlu0 %v2991_v27  ;;  %2971 = vmax.xlane.f32.xlu2 %v2970_v60  ;;  %v3012_v43 = vsel %vm2687_vm0, %v6460_v2, -inf }
 0x8e5   : > { %2950 = vmax.xlane.f32.xlu1 %v2949_v42 }
 0x8ec   : > { %3034 = vmax.xlane.f32.xlu2 %v3033_v36 }
 0x8ed   : > { %3013 = vmax.xlane.f32.xlu1 %v3012_v43 }
 0x957   : > { %v6466_v35 = vpop.xlane.xlu2 %2971  ;;  %v6470_v46 = vpop.xlane.xlu0 %2992 }
 0x958   : > { %v6468_v48 = vpop.xlane.xlu1 %2950 }
 0x959   : > { %v3057_v52 = vsel %vm2711_vm13, %v6468_v48, %v6466_v35 }
 0x95a   : > { %v3058_v39 = vsel %vm2713_vm14, %v3057_v52, %v6470_v46 }
 0x95f   : > { %v6475_v57 = vpop.xlane.xlu2 %3034 }
 0x960   : > { %v6479_v7 = vpop.xlane.xlu1 %3013 }
 0x961   : > { %v3059_v14 = vsel %vm2715_vm15, %v3058_v39, %v6479_v7 }
 0x962   : > { %v3060_v28 = vsel %vm2717_vm1, %v3059_v14, %v6475_v57 }
 0x963   : > { %v3061_v30 = vadd.f32 %v3060_v28, %v6358_v20 }
 0x965   : > { %v6487_v50 = vadd.f32 %v3061_v30, %v6295_v25  ;;  %v6490_v53 = vadd.f32 %v3061_v30, %v6291_v13  ;;  %v6493_v59 = vadd.f32 %v3061_v30, %v6279_v11  ;;  %v6502_v20 = vadd.f32 %v3061_v30, %v6299_v34 }
 0x966   : > { %v6505_v62 = vadd.f32 %v3061_v30, %v6285_v10 }
 0x967   : > { %v3105_v9 = vsel %vm2687_vm0, %v6487_v50, -inf  ;;  %v3084_v24 = vsel %vm2687_vm0, %v6490_v53, -inf  ;;  %v3063_v54 = vsel %vm2687_vm0, %v6493_v59, -inf  ;;  %v3147_v19 = vsel %vm2687_vm0, %v6502_v20, -inf }
 0x968   : > { %3106 = vmax.xlane.f32.xlu2 %v3105_v9  ;;  %3085 = vmax.xlane.f32.xlu1 %v3084_v24  ;;  %v3126_v0 = vsel %vm2687_vm0, %v6505_v62, -inf }
 0x969   : > { %3064 = vmax.xlane.f32.xlu0 %v3063_v54 }
 0x970   : > { %3148 = vmax.xlane.f32.xlu1 %v3147_v19 }
 0x971   : > { %3127 = vmax.xlane.f32.xlu0 %v3126_v0 }
 0x9db   : > { %v6511_v58 = vpop.xlane.xlu1 %3085  ;;  %v6515_v29 = vpop.xlane.xlu2 %3106 }
 0x9dc   : > { %v6513_v5 = vpop.xlane.xlu0 %3064 }
 0x9dd   : > { %v3171_v12 = vsel %vm2711_vm13, %v6513_v5, %v6511_v58 }
 0x9de   : > { %v3172_v60 = vsel %vm2713_vm14, %v3171_v12, %v6515_v29 }
 0x9e3   : > { %v6520_v27 = vpop.xlane.xlu1 %3148 }
 0x9e4   : > { %v6524_v42 = vpop.xlane.xlu0 %3127 }
 0x9e5   : > { %v3173_v36 = vsel %vm2715_vm15, %v3172_v60, %v6524_v42 }
 0x9e6   : > { %v3174_v43 = vsel %vm2717_vm1, %v3173_v36, %v6520_v27 }
 0x9e7   : > { %v3175_v52 = vadd.f32 %v3174_v43, %v6362_v31 }
 0x9e9   : > { %v6532_v39 = vadd.f32 %v3175_v52, %v6295_v25  ;;  %v6535_v14 = vadd.f32 %v3175_v52, %v6291_v13  ;;  %v6538_v28 = vadd.f32 %v3175_v52, %v6279_v11  ;;  %v6547_v31 = vadd.f32 %v3175_v52, %v6299_v34 }
 0x9ea   : > { %v6550_v54 = vadd.f32 %v3175_v52, %v6285_v10 }
 0x9eb   : > { %v3219_v30 = vsel %vm2687_vm0, %v6532_v39, -inf  ;;  %v3198_v9 = vsel %vm2687_vm0, %v6535_v14, -inf  ;;  %v3177_v24 = vsel %vm2687_vm0, %v6538_v28, -inf  ;;  %v3261_v19 = vsel %vm2687_vm0, %v6547_v31, -inf }
 0x9ec   : > { %3220 = vmax.xlane.f32.xlu1 %v3219_v30  ;;  %3199 = vmax.xlane.f32.xlu0 %v3198_v9  ;;  %v3240_v0 = vsel %vm2687_vm0, %v6550_v54, -inf }
 0x9ed   : > { %3178 = vmax.xlane.f32.xlu2 %v3177_v24 }
 0x9f4   : > { %3262 = vmax.xlane.f32.xlu0 %v3261_v19 }
 0x9f5   : > { %3241 = vmax.xlane.f32.xlu2 %v3240_v0 }
 0xa5f   : > { %v6556_v12 = vpop.xlane.xlu0 %3199  ;;  %v6560_v36 = vpop.xlane.xlu1 %3220 }
 0xa60   : > { %v6558_v60 = vpop.xlane.xlu2 %3178 }
 0xa61   : > { %v3285_v43 = vsel %vm2711_vm13, %v6558_v60, %v6556_v12 }
 0xa62   : > { %v3286_v30 = vsel %vm2713_vm14, %v3285_v43, %v6560_v36 }
 0xa67   : > { %v6565_v52 = vpop.xlane.xlu0 %3262 }
 0xa68   : > { %v6569_v9 = vpop.xlane.xlu2 %3241 }
 0xa69   : > { %v3287_v24 = vsel %vm2715_vm15, %v3286_v30, %v6569_v9 }
 0xa6a   : > { %v3288_v19 = vsel %vm2717_vm1, %v3287_v24, %v6565_v52 }
 0xa6b   : > { %v3289_v0 = vadd.f32 %v3288_v19, %v6366_v23 }
 0xa6d   : > { %v6577_v61 = vadd.f32 %v3289_v0, %v6295_v25  ;;  %v6580_v3 = vadd.f32 %v3289_v0, %v6291_v13  ;;  %v6583_v6 = vadd.f32 %v3289_v0, %v6279_v11  ;;  %v6592_v23 = vadd.f32 %v3289_v0, %v6299_v34 }
 0xa6e   : > { %v6595_v19 = vadd.f32 %v3289_v0, %v6285_v10 }
 0xa6f   : > { %v3333_v43 = vsel %vm2687_vm0, %v6577_v61, -inf  ;;  %v3312_v30 = vsel %vm2687_vm0, %v6580_v3, -inf  ;;  %v3291_v24 = vsel %vm2687_vm0, %v6583_v6, -inf  ;;  %v3375_v4 = vsel %vm2687_vm0, %v6592_v23, -inf }
 0xa70   : > { %3334 = vmax.xlane.f32.xlu0 %v3333_v43  ;;  %3313 = vmax.xlane.f32.xlu2 %v3312_v30  ;;  %v3354_v55 = vsel %vm2687_vm0, %v6595_v19, -inf }
 0xa71   : > { %3292 = vmax.xlane.f32.xlu1 %v3291_v24 }
 0xa78   : > { %3376 = vmax.xlane.f32.xlu2 %v3375_v4 }
 0xa79   : > { %3355 = vmax.xlane.f32.xlu1 %v3354_v55 }
 0xae3   : > { %v6601_v15 = vpop.xlane.xlu2 %3313  ;;  %v6605_v43 = vpop.xlane.xlu0 %3334 }
 0xae4   : > { %v6603_v38 = vpop.xlane.xlu1 %3292  ;;  %vm3315_vm9 = vcmp.eq.f32.partialorder %v6580_v3, %v6601_v15 }
 0xae5   : > { %v3399_v30 = vsel %vm2711_vm13, %v6603_v38, %v6601_v15  ;;  %vm3294_vm10 = vcmp.eq.f32.partialorder %v6583_v6, %v6603_v38 }
 0xae6   : > { %v3400_v24 = vsel %vm2713_vm14, %v3399_v30, %v6605_v43 }
 0xaeb   : > { %v6610_v0 = vpop.xlane.xlu2 %3376 }
 0xaec   : > { %v6614_v4 = vpop.xlane.xlu1 %3355 }
 0xaed   : > { %v3401_v55 = vsel %vm2715_vm15, %v3400_v24, %v6614_v4 }
 0xaee   : > { %v3402_v45 = vsel %vm2717_vm1, %v3401_v55, %v6610_v0 }
 0xaef   : > { %v3403_v47 = vadd.f32 %v3402_v45, %v6370_v37 }
 0xaf1   : > { %v3446_v63 = vadd.f32 %v3403_v47, %v6295_v25  ;;  %v3425_v32 = vadd.f32 %v3403_v47, %v6291_v13  ;;  %v3404_v8 = vadd.f32 %v3403_v47, %v6279_v11  ;;  %v3488_v24 = vadd.f32 %v3403_v47, %v6299_v34 }
 0xaf2   : > { %v3467_v55 = vadd.f32 %v3403_v47, %v6285_v10 }
 0xaf3   : > { %v3447_v16 = vsel %vm2687_vm0, %v3446_v63, -inf  ;;  %v3426_v30 = vsel %vm2687_vm0, %v3425_v32, -inf  ;;  %v3405_v18 = vsel %vm2687_vm0, %v3404_v8, -inf  ;;  %v3489_v37 = vsel %vm2687_vm0, %v3488_v24, -inf }
 0xaf4   : > { %3448 = vmax.xlane.f32.xlu2 %v3447_v16  ;;  %3427 = vmax.xlane.f32.xlu1 %v3426_v30  ;;  %v3468_v13 = vsel %vm2687_vm0, %v3467_v55, -inf }
 0xaf5   : > { %3406 = vmax.xlane.f32.xlu0 %v3405_v18 }
 0xafc   : > { %3490 = vmax.xlane.f32.xlu1 %v3489_v37 }
 0xafd   : > { %3469 = vmax.xlane.f32.xlu0 %v3468_v13 }
 0xb67   : > { %v3428_v11 = vpop.xlane.xlu1 %3427  ;;  %v3449_v47 = vpop.xlane.xlu2 %3448 }
 0xb68   : > { %vm3429_vm2 = vcmp.eq.f32.partialorder %v3425_v32, %v3428_v11  ;;  %v3407_v25 = vpop.xlane.xlu0 %3406  ;;  %vm3450_vm5 = vcmp.eq.f32.partialorder %v3446_v63, %v3449_v47 }
 0xb69   : > { %v3430_v45 = vsel %vm3429_vm2, %v7529_v17, 5  ;;  %vm3408_vm3 = vcmp.eq.f32.partialorder %v3404_v8, %v3407_v25  ;;  %v3513_v37 = vsel %vm2711_vm13, %v3407_v25, %v3428_v11 }
 0xb6a   : > { %v3409_v16 = vsel %vm3408_vm3, %v7529_v17, 5  ;;  %v3431_v18 = vsel %vm2687_vm0, %v3430_v45, 2147483647  ;;  %v3514_v32 = vsel %vm2713_vm14, %v3513_v37, %v3449_v47  ;;  %vm3378_vm3 = vcmp.eq.f32.partialorder %v6592_v23, %v6610_v0 }
 0xb6b   : > { %v3433_v30 = vshra.s32 %v3431_v18, 16  ;;  %v3410_v21 = vsel %vm2687_vm0, %v3409_v16, 2147483647 }
 0xb6c   : > { %v3412_v10 = vshra.s32 %v3410_v21, 16 }
 0xb6d   : > { %v3435_v33 = vcvt.s32.f32 %v3433_v30 }
 0xb6e   : > { %v3414_v41 = vcvt.s32.f32 %v3412_v10  ;;  %v3451_v10 = vsel %vm3450_vm5, %v7529_v17, 5 }
 0xb6f   : > { %3436 = vmin.xlane.f32.xlu1 %v3435_v33  ;;  %v3491_v13 = vpop.xlane.xlu1 %3490 }
 0xb70   : > { %vm3492_vm4 = vcmp.eq.f32.partialorder %v3488_v24, %v3491_v13  ;;  %3415 = vmin.xlane.f32.xlu0 %v3414_v41  ;;  %v3470_v8 = vpop.xlane.xlu0 %3469 }
 0xb71   : > { %v3493_v44 = vsel %vm3492_vm4, %v7529_v17, 5  ;;  %vm3471_vm6 = vcmp.eq.f32.partialorder %v3467_v55, %v3470_v8  ;;  %v3515_v45 = vsel %vm2715_vm15, %v3514_v32, %v3470_v8  ;;  %v3452_v8 = vsel %vm2687_vm0, %v3451_v10, 2147483647 }
 0xb72   : > { %v3472_v16 = vsel %vm3471_vm6, %v7529_v17, 5  ;;  %v3516_v51 = vsel %vm2717_vm1, %v3515_v45, %v3491_v13  ;;  %v3494_v11 = vsel %vm2687_vm0, %v3493_v44, 2147483647  ;;  %v3454_v44 = vshra.s32 %v3452_v8, 16 }
 0xb73   : > { %v3496_v25 = vshra.s32 %v3494_v11, 16  ;;  %v3517_v30 = vadd.f32 %v3516_v51, %v6374_v22  ;;  %v3473_v24 = vsel %vm2687_vm0, %v3472_v16, 2147483647  ;;  %v3432_v22 = vand.u32 65535, %v3431_v18 }
 0xb74   : > { %v3475_v37 = vshra.s32 %v3473_v24, 16  ;;  %v3456_v13 = vcvt.s32.f32 %v3454_v44  ;;  %v3411_v51 = vand.u32 65535, %v3410_v21  ;;  %v3495_v21 = vand.u32 65535, %v3494_v11 }
 0xb75   : > { %v3498_v63 = vcvt.s32.f32 %v3496_v25  ;;  %v3518_v47 = vadd.f32 %v3517_v30, %v6299_v34  ;;  %v3434_v16 = vcvt.s32.f32 %v3432_v22  ;;  %v3474_v18 = vand.u32 65535, %v3473_v24 }
 0xb76   : > { %v3477_v55 = vcvt.s32.f32 %v3475_v37  ;;  %v3413_v34 = vcvt.s32.f32 %v3411_v51  ;;  %v3316_v37 = vsel %vm3315_vm9, %v7529_v17, 5  ;;  %vm3357_vm4 = vcmp.eq.f32.partialorder %v6595_v19, %v6614_v4 }
 0xb77   : > { %3499 = vmin.xlane.f32.xlu1 %v3498_v63  ;;  %v3519_v32 = vsel %vm2687_vm0, %v3518_v47, -inf  ;;  %v3476_v15 = vcvt.s32.f32 %v3474_v18  ;;  %v3317_v6 = vsel %vm2687_vm0, %v3316_v37, 2147483647  ;;  %v3453_v23 = vand.u32 65535, %v3452_v8 }
 0xb78   : > { %3520 = vmax.xlane.f32.xlu2 %v3519_v32  ;;  %3478 = vmin.xlane.f32.xlu0 %v3477_v55  ;;  %vm3336_vm6 = vcmp.eq.f32.partialorder %v6577_v61, %v6605_v43  ;;  %vm3180_vm9 = vcmp.eq.f32.partialorder %v6538_v28, %v6558_v60 }
 0xb79   : > { %v3455_v37 = vcvt.s32.f32 %v3453_v23 }
 0xb80   : > { %3457 = vmin.xlane.f32.xlu2 %v3456_v13 }
 0xbe2   : > { %v6648_v45 = vpop.xlane.xlu1 %3436 }
 0xbe3   : > { %v6650_v25 = vpop.xlane.xlu0 %3415  ;;  %vm3438_vm7 = vcmp.eq.f32.partialorder %v3435_v33, %v6648_v45  ;;  %v3295_v33 = vsel %vm3294_vm10, %v7529_v17, 5  ;;  %v3443_v8 = vcvt.f32.s32 %v6648_v45  ;;  %v3337_v45 = vsel %vm3336_vm6, %v7529_v17, 5 }
 0xbe4   : > { %v3439_v30 = vsel %vm3438_vm7, %v3434_v16, inf  ;;  %vm3417_vm8 = vcmp.eq.f32.partialorder %v3414_v41, %v6650_v25  ;;  %v3497_v41 = vcvt.s32.f32 %v3495_v21  ;;  %v6675_v24 = vsel %vm2687_vm0, %v3295_v33, 2147483647 }
 0xbe5   : > { %3440 = vmin.xlane.f32.xlu1 %v3439_v30  ;;  %v3418_v10 = vsel %vm3417_vm8, %v3413_v34, inf  ;;  %v3298_v51 = vshra.s32 %v6675_v24, 16  ;;  %v3379_v16 = vsel %vm3378_vm3, %v7529_v17, 5  ;;  %v3358_v30 = vsel %vm3357_vm4, %v7529_v17, 5 }
 0xbe6   : > { %3419 = vmin.xlane.f32.xlu0 %v3418_v10  ;;  %v6688_v0 = vsel %vm2687_vm0, %v3379_v16, 2147483647  ;;  %v3359_v19 = vsel %vm2687_vm0, %v3358_v30, 2147483647  ;;  %v3297_v28 = vand.u32 65535, %v6675_v24  ;;  %vm3201_vm4 = vcmp.eq.f32.partialorder %v6535_v14, %v6556_v12 }
 0xbe7   : > { %v6685_v18 = vcvt.s32.f32 %v3298_v51  ;;  %v3382_v4 = vshra.s32 %v6688_v0, 16  ;;  %v3361_v33 = vshra.s32 %v3359_v19, 16 }
 0xbea   : > { %v6661_v32 = vpop.xlane.xlu1 %3499 }
 0xbeb   : > { %v3521_v44 = vpop.xlane.xlu2 %3520  ;;  %v6663_v22 = vpop.xlane.xlu0 %3478  ;;  %vm3501_vm11 = vcmp.eq.f32.partialorder %v3498_v63, %v6661_v32 }
 0xbec   : > { %vm3522_vm12 = vcmp.eq.f32.partialorder %v3518_v47, %v3521_v44  ;;  %3656 = vst [vmem:[%s6668_s15] sm:$0xff] %v3521_v44  ;;  %v3502_v38 = vsel %vm3501_vm11, %v3497_v41, inf  ;;  %vm3480_vm2 = vcmp.eq.f32.partialorder %v3477_v55, %v6663_v22  ;;  %v3319_v55 = vshra.s32 %v3317_v6, 16 }
 0xbed   : > { %v3523_v3 = vsel %vm3522_vm12, %v7529_v17, 5  ;;  %3503 = vmin.xlane.f32.xlu1 %v3502_v38  ;;  %v3481_v11 = vsel %vm3480_vm2, %v3476_v15, inf  ;;  %v6693_v44 = vcvt.s32.f32 %v3382_v4  ;;  %v3363_v15 = vcvt.s32.f32 %v3361_v33 }
 0xbee   : > { %3482 = vmin.xlane.f32.xlu0 %v3481_v11  ;;  %v3524_v63 = vsel %vm2687_vm0, %v3523_v3, 2147483647  ;;  %v3321_v10 = vcvt.s32.f32 %v3319_v55  ;;  %v3422_v38 = vcvt.f32.s32 %v6650_v25  ;;  %v3444_v11 = vshll.u32 %v3443_v8, 16 }
 0xbef   : > { %v3526_v47 = vshra.s32 %v3524_v63, 16  ;;  %v3525_v33 = vand.u32 65535, %v3524_v63  ;;  %v3485_v43 = vcvt.f32.s32 %v6663_v22  ;;  %vm3243_vm11 = vcmp.eq.f32.partialorder %v6550_v54, %v6569_v9 }
 0xbf0   : > { %v3423_v55 = vshll.u32 %v3422_v38, 16 }
 0xbf1   : > { %v3528_v34 = vcvt.s32.f32 %v3526_v47  ;;  %v3527_v56 = vcvt.s32.f32 %v3525_v33 }
 0xbf3   : > { %3529 = vmin.xlane.f32.xlu2 %v3528_v34  ;;  %v3458_v21 = vpop.xlane.xlu2 %3457 }
 0xbf4   : > { %vm3459_vm5 = vcmp.eq.f32.partialorder %v3456_v13, %v3458_v21 }
 0xbf5   : > { %3322 = vmin.xlane.f32.xlu1 %v3321_v10  ;;  %v3460_v41 = vsel %vm3459_vm5, %v3455_v37, inf  ;;  %vm3222_vm5 = vcmp.eq.f32.partialorder %v6532_v39, %v6560_v36 }
 0xbf6   : > { %3301 = vmin.xlane.f32.xlu0 %v6685_v18 }
 0xbfb   : > { %3461 = vmin.xlane.f32.xlu2 %v3460_v41  ;;  %v3318_v41 = vand.u32 65535, %v3317_v6  ;;  %v3360_v6 = vand.u32 65535, %v3359_v19 }
 0xbfd   : > { %3385 = vmin.xlane.f32.xlu1 %v6693_v44  ;;  %v3320_v38 = vcvt.s32.f32 %v3318_v41  ;;  %v3362_v22 = vcvt.s32.f32 %v3360_v6 }
 0xbfe   : > { %3364 = vmin.xlane.f32.xlu0 %v3363_v15 }
 0xc58   : > { %v3441_v3 = vpop.xlane.xlu1 %3440 }
 0xc59   : > { %v3442_v47 = vcvt.f32.s32 %v3441_v3  ;;  %v3420_v13 = vpop.xlane.xlu0 %3419 }
 0xc5a   : > { %v3421_v51 = vcvt.f32.s32 %v3420_v13 }
 0xc5b   : > { %v3445_v16 = vadd.s32 %v3444_v11, %v3442_v47  ;;  %v6703_v11 = vsel %vm2687_vm0, %v3337_v45, 2147483647 }
 0xc5c   : > { %v3424_v30 = vadd.s32 %v3423_v55, %v3421_v51  ;;  %v3464_v55 = vcvt.f32.s32 %v3458_v21  ;;  %v3340_v61 = vshra.s32 %v6703_v11, 16  ;;  %v3486_v21 = vshll.u32 %v3485_v43, 16 }
 0xc5e   : > { %v3509_v23 = vsel %vm2711_vm13, %v3424_v30, %v3445_v16  ;;  %v3465_v51 = vshll.u32 %v3464_v55, 16  ;;  %v3342_v33 = vcvt.s32.f32 %v3340_v61 }
 0xc60   : > { %v3504_v4 = vpop.xlane.xlu1 %3503 }
 0xc61   : > { %v3483_v37 = vpop.xlane.xlu0 %3482  ;;  %v3505_v16 = vcvt.f32.s32 %v3504_v4 }
 0xc62   : > { %v3484_v63 = vcvt.f32.s32 %v3483_v37 }
 0xc66   : > { %v3530_v25 = vpop.xlane.xlu2 %3529 }
 0xc67   : > { %vm3531_vm7 = vcmp.eq.f32.partialorder %v3528_v34, %v3530_v25 }
 0xc68   : > { %v3323_v8 = vpop.xlane.xlu1 %3322  ;;  %v3532_v3 = vsel %vm3531_vm7, %v3527_v56, inf  ;;  %v3506_v56 = vcvt.f32.s32 %v6661_v32  ;;  %vm3264_vm7 = vcmp.eq.f32.partialorder %v6547_v31, %v6565_v52 }
 0xc69   : > { %3533 = vmin.xlane.f32.xlu2 %v3532_v3  ;;  %v6705_v47 = vpop.xlane.xlu0 %3301  ;;  %vm3324_vm8 = vcmp.eq.f32.partialorder %v3321_v10, %v3323_v8  ;;  %v3181_v10 = vsel %vm3180_vm9, %v7529_v17, 5 }
 0xc6a   : > { %v3325_v13 = vsel %vm3324_vm8, %v3320_v38, inf  ;;  %v3507_v41 = vshll.u32 %v3506_v56, 16  ;;  %v3487_v38 = vadd.s32 %v3486_v21, %v3484_v63  ;;  %v6719_v4 = vsel %vm2687_vm0, %v3181_v10, 2147483647 }
 0xc6b   : > { %3326 = vmin.xlane.f32.xlu0 %v3325_v13  ;;  %vm3303_vm12 = vcmp.eq.f32.partialorder %v6685_v18, %v6705_v47  ;;  %v3299_v13 = vcvt.s32.f32 %v3297_v28  ;;  %v3184_v24 = vshra.s32 %v6719_v4, 16  ;;  %v3536_v18 = vcvt.f32.s32 %v3530_v25 }
 0xc6c   : > { %v3508_v60 = vadd.s32 %v3507_v41, %v3505_v16  ;;  %v3329_v56 = vcvt.f32.s32 %v3323_v8  ;;  %v3339_v21 = vand.u32 65535, %v6703_v11  ;;  %v3381_v11 = vand.u32 65535, %v6688_v0 }
 0xc6d   : > { %v3304_v55 = vsel %vm3303_vm12, %v3299_v13, inf  ;;  %v6729_v61 = vcvt.s32.f32 %v3184_v24  ;;  %v3537_v63 = vshll.u32 %v3536_v18, 16  ;;  %v3183_v31 = vand.u32 65535, %v6719_v4 }
 0xc6e   : > { %v3462_v34 = vpop.xlane.xlu2 %3461  ;;  %v3330_v16 = vshll.u32 %v3329_v56, 16  ;;  %v3341_v25 = vcvt.s32.f32 %v3339_v21  ;;  %v3383_v24 = vcvt.s32.f32 %v3381_v11  ;;  %v3265_v56 = vsel %vm3264_vm7, %v7529_v17, 5 }
 0xc6f   : > { %v3463_v30 = vcvt.f32.s32 %v3462_v34  ;;  %vm3066_vm12 = vcmp.eq.f32.partialorder %v6493_v59, %v6513_v5  ;;  %vm3150_vm7 = vcmp.eq.f32.partialorder %v6502_v20, %v6520_v27 }
 0xc71   : > { %v3466_v45 = vadd.s32 %v3465_v51, %v3463_v30  ;;  %3343 = vmin.xlane.f32.xlu2 %v3342_v33  ;;  %v6713_v3 = vpop.xlane.xlu0 %3364 }
 0xc72   : > { %vm3366_vm10 = vcmp.eq.f32.partialorder %v3363_v15, %v6713_v3 }
 0xc73   : > { %v3510_v32 = vsel %vm2713_vm14, %v3509_v23, %v3466_v45  ;;  %v3367_v19 = vsel %vm3366_vm10, %v3362_v22, inf  ;;  %v3244_v23 = vsel %vm3243_vm11, %v7529_v17, 5 }
 0xc74   : > { %3368 = vmin.xlane.f32.xlu0 %v3367_v19  ;;  %v3511_v37 = vsel %vm2715_vm15, %v3510_v32, %v3487_v38  ;;  %v6732_v43 = vsel %vm2687_vm0, %v3244_v23, 2147483647  ;;  %v3386_v32 = vpop.xlane.xlu1 %3385  ;;  %v3308_v19 = vcvt.f32.s32 %v6705_v47 }
 0xc75   : > { %v3512_v15 = vsel %vm2717_vm1, %v3511_v37, %v3508_v60  ;;  %v3247_v54 = vshra.s32 %v6732_v43, 16  ;;  %vm3387_vm6 = vcmp.eq.f32.partialorder %v6693_v44, %v3386_v32 }
 0xc76   : > { %v3309_v23 = vshll.u32 %v3308_v19, 16  ;;  %v3388_v12 = vsel %vm3387_vm6, %v3383_v24, inf  ;;  %vm3129_vm6 = vcmp.eq.f32.partialorder %v6505_v62, %v6524_v42 }
 0xc77   : > { %v6736_v9 = vcvt.s32.f32 %v3247_v54 }
 0xc79   : > { %3305 = vmin.xlane.f32.xlu2 %v3304_v55 }
 0xc7c   : > { %3187 = vmin.xlane.f32.xlu0 %v6729_v61 }
 0xc84   : > { %3250 = vmin.xlane.f32.xlu0 %v6736_v9 }
 0xcdc   : > { %v3534_v6 = vpop.xlane.xlu2 %3533 }
 0xcdd   : > { %v3535_v34 = vcvt.f32.s32 %v3534_v6 }
 0xcde   : > { %v3327_v51 = vpop.xlane.xlu0 %3326 }
 0xcdf   : > { %v6739_v30 = vadd.s32 %v3537_v63, %v3535_v34  ;;  %v3328_v10 = vcvt.f32.s32 %v3327_v51  ;;  %v6761_v34 = vsel %vm2687_vm0, %v3265_v56, 2147483647 }
 0xce1   : > { %vm3539_vm2 = vcmp.eq.s32.totalorder %v7529_v17, %v6739_v30  ;;  %v3331_v41 = vadd.s32 %v3330_v16, %v3328_v10  ;;  %v3268_v16 = vshra.s32 %v6761_v34, 16  ;;  %v3185_v10 = vcvt.s32.f32 %v3183_v31 }
 0xce2   : > { %v3540_v45 = vsel %vm3539_vm2, %v3512_v15, 0  ;;  %v3202_v15 = vsel %vm3201_vm4, %v7529_v17, 5  ;;  %vm3087_vm2 = vcmp.eq.f32.partialorder %v6490_v53, %v6511_v58 }
 0xce3   : > { %v3541_v22 = vsel %vm2687_vm0, %v3540_v45, 0  ;;  %v3203_v0 = vsel %vm2687_vm0, %v3202_v15, 2147483647  ;;  %v6769_v52 = vcvt.s32.f32 %v3268_v16  ;;  %v3371_v45 = vcvt.f32.s32 %v6713_v3 }
 0xce4   : > { %v3344_v38 = vpop.xlane.xlu2 %3343  ;;  %v3543_v8 = vshrl.u32 %v3541_v22, 16  ;;  %v3542_v37 = vand.u32 65535, %v3541_v22  ;;  %v3205_v44 = vshra.s32 %v3203_v0, 16  ;;  %v3088_v5 = vsel %vm3087_vm2, %v7529_v17, 5 }
 0xce5   : > { %vm3345_vm3 = vcmp.eq.f32.partialorder %v3342_v33, %v3344_v38  ;;  %v3223_v33 = vsel %vm3222_vm5, %v7529_v17, 5  ;;  %v3372_v11 = vshll.u32 %v3371_v45, 16  ;;  %v3246_v45 = vand.u32 65535, %v6732_v43 }
 0xce6   : > { %v3346_v28 = vsel %vm3345_vm3, %v3341_v25, inf  ;;  %v3545_v60 = vcvt.s32.f32 %v3543_v8  ;;  %v3544_v55 = vcvt.s32.f32 %v3542_v37  ;;  %v3224_v39 = vsel %vm2687_vm0, %v3223_v33, 2147483647 }
 0xce7   : > { %3347 = vmin.xlane.f32.xlu1 %v3346_v28  ;;  %v3369_v54 = vpop.xlane.xlu0 %3368  ;;  %v3226_v47 = vshra.s32 %v3224_v39, 16  ;;  %v3207_v6 = vcvt.s32.f32 %v3205_v44  ;;  %v3392_v37 = vcvt.f32.s32 %v3386_v32  ;;  %vm3108_vm3 = vcmp.eq.f32.partialorder %v6487_v50, %v6515_v29 }
 0xce8   : > { %3548 = vadd.xlane.f32.xlu2 %v3545_v60  ;;  %v3370_v22 = vcvt.f32.s32 %v3369_v54  ;;  %v3204_v54 = vand.u32 65535, %v3203_v0  ;;  %v6807_v29 = vsel %vm2687_vm0, %v3088_v5, 2147483647  ;;  %vm2973_vm2 = vcmp.eq.f32.partialorder %v6445_v40, %v6466_v35 }
 0xce9   : > { %v3228_v63 = vcvt.s32.f32 %v3226_v47  ;;  %v3393_v24 = vshll.u32 %v3392_v37, 16 }
 0xcea   : > { %v3373_v19 = vadd.s32 %v3372_v11, %v3370_v22  ;;  %v3206_v47 = vcvt.s32.f32 %v3204_v54  ;;  %v3267_v22 = vand.u32 65535, %v6761_v34  ;;  %v3109_v34 = vsel %vm3108_vm3, %v7529_v17, 5 }
 0xcec   : > { %v3306_v13 = vpop.xlane.xlu2 %3305  ;;  %v3269_v43 = vcvt.s32.f32 %v3267_v22 }
 0xced   : > { %v3307_v14 = vcvt.f32.s32 %v3306_v13 }
 0xcef   : > { %v3310_v18 = vadd.s32 %v3309_v23, %v3307_v14  ;;  %3389 = vmin.xlane.f32.xlu1 %v3388_v12  ;;  %v6763_v51 = vpop.xlane.xlu0 %3187 }
 0xcf0   : > { %3546 = vadd.xlane.f32.xlu2 %v3544_v55  ;;  %vm3189_vm8 = vcmp.eq.f32.partialorder %v6729_v61, %v6763_v51 }
 0xcf1   : > { %v3395_v36 = vsel %vm2711_vm13, %v3310_v18, %v3331_v41  ;;  %v3190_v21 = vsel %vm3189_vm8, %v3185_v10, inf  ;;  %v3350_v41 = vcvt.f32.s32 %v3344_v38  ;;  %v3225_v18 = vand.u32 65535, %v3224_v39 }
 0xcf3   : > { %v3351_v8 = vshll.u32 %v3350_v41, 16  ;;  %v3227_v31 = vcvt.s32.f32 %v3225_v18 }
 0xcf7   : > { %3208 = vmin.xlane.f32.xlu1 %v3207_v6  ;;  %v6789_v41 = vpop.xlane.xlu0 %3250 }
 0xcf8   : > { %3229 = vmin.xlane.f32.xlu2 %v3228_v63  ;;  %vm3252_vm4 = vcmp.eq.f32.partialorder %v6736_v9, %v6789_v41  ;;  %v6812_v9 = vsel %vm2687_vm0, %v3109_v34, 2147483647 }
 0xcf9   : > { %v3112_v11 = vshra.s32 %v6812_v9, 16 }
 0xcfb   : > { %v6826_v37 = vcvt.s32.f32 %v3112_v11 }
 0xcff   : > { %3271 = vmin.xlane.f32.xlu1 %v6769_v52 }
 0xd00   : > { %3191 = vmin.xlane.f32.xlu2 %v3190_v21 }
 0xd5a   : > { %v3348_v25 = vpop.xlane.xlu1 %3347 }
 0xd5b   : > { %v3349_v28 = vcvt.f32.s32 %v3348_v25  ;;  %v3549_v60 = vpop.xlane.xlu2 %3548  ;;  %v3248_v25 = vcvt.s32.f32 %v3246_v45 }
 0xd5c   : > { %v3551_v15 = vcvt.f32.s32 %v3549_v60  ;;  %v3130_v60 = vsel %vm3129_vm6, %v7529_v17, 5  ;;  %vm3015_vm6 = vcmp.eq.f32.partialorder %v6460_v2, %v6479_v7 }
 0xd5d   : > { %v3352_v4 = vadd.s32 %v3351_v8, %v3349_v28  ;;  %v3253_v53 = vsel %vm3252_vm4, %v3248_v25, inf  ;;  %v3091_v28 = vshra.s32 %v6807_v29, 16  ;;  %v6824_v42 = vsel %vm2687_vm0, %v3130_v60, 2147483647 }
 0xd5e   : > { %v3552_v14 = vshll.u32 %v3551_v15, 16  ;;  %v3133_v27 = vshra.s32 %v6824_v42, 16  ;;  %v3111_v60 = vand.u32 65535, %v6812_v9 }
 0xd5f   : > { %v3396_v61 = vsel %vm2713_vm14, %v3395_v36, %v3352_v4  ;;  %v3151_v4 = vsel %vm3150_vm7, %v7529_v17, 5  ;;  %v6821_v62 = vcvt.s32.f32 %v3091_v28  ;;  %vm3036_vm7 = vcmp.eq.f32.partialorder %v6457_v49, %v6475_v57 }
 0xd60   : > { %v3397_v33 = vsel %vm2715_vm15, %v3396_v61, %v3373_v19  ;;  %v6829_v20 = vsel %vm2687_vm0, %v3151_v4, 2147483647  ;;  %v6835_v15 = vcvt.s32.f32 %v3133_v27 }
 0xd61   : > { %v3154_v61 = vshra.s32 %v6829_v20, 16 }
 0xd62   : > { %v3390_v13 = vpop.xlane.xlu1 %3389 }
 0xd63   : > { %v3391_v23 = vcvt.f32.s32 %v3390_v13  ;;  %v3547_v38 = vpop.xlane.xlu2 %3546 }
 0xd64   : > { %v3550_v3 = vcvt.f32.s32 %v3547_v38 }
 0xd65   : > { %v3394_v12 = vadd.s32 %v3393_v24, %v3391_v23  ;;  %v3194_v24 = vcvt.f32.s32 %v6763_v51 }
 0xd66   : > { %v6775_v55 = vadd.s32 %v3552_v14, %v3550_v3 }
 0xd67   : > { %v3398_v44 = vsel %vm2717_vm1, %v3397_v33, %v3394_v12  ;;  %v6837_v33 = vcvt.s32.f32 %v3154_v61  ;;  %v3195_v12 = vshll.u32 %v3194_v24, 16 }
 0xd68   : > { %vm3554_vm9 = vcmp.eq.s32.totalorder %v7529_v17, %v6775_v55 }
 0xd69   : > { %v3555_v32 = vsel %vm3554_vm9, %v3398_v44, 0 }
 0xd6a   : > { %v6780_v36 = vpop.xlane.xlu1 %3208  ;;  %v3556_v56 = vsel %vm2687_vm0, %v3555_v32, 0 }
 0xd6b   : > { %v6783_v16 = vpop.xlane.xlu2 %3229  ;;  %vm3210_vm10 = vcmp.eq.f32.partialorder %v3207_v6, %v6780_v36  ;;  %v3558_v10 = vshrl.u32 %v3556_v56, 16  ;;  %v3067_v6 = vsel %vm3066_vm12, %v7529_v17, 5  ;;  %v3557_v59 = vand.u32 65535, %v3556_v56 }
 0xd6c   : > { %v3211_v21 = vsel %vm3210_vm10, %v3206_v47, inf  ;;  %vm3231_vm11 = vcmp.eq.f32.partialorder %v3228_v63, %v6783_v16  ;;  %v6804_v8 = vsel %vm2687_vm0, %v3067_v6, 2147483647  ;;  %v3215_v23 = vcvt.f32.s32 %v6780_v36 }
 0xd6d   : > { %3212 = vmin.xlane.f32.xlu0 %v3211_v21  ;;  %v3232_v0 = vsel %vm3231_vm11, %v3227_v31, inf  ;;  %v3560_v39 = vcvt.s32.f32 %v3558_v10  ;;  %v3559_v50 = vcvt.s32.f32 %v3557_v59  ;;  %v3236_v38 = vcvt.f32.s32 %v6783_v16 }
 0xd6e   : > { %3233 = vmin.xlane.f32.xlu1 %v3232_v0  ;;  %v3216_v54 = vshll.u32 %v3215_v23, 16  ;;  %v3257_v0 = vcvt.f32.s32 %v6789_v41  ;;  %vm2952_vm12 = vcmp.eq.f32.partialorder %v6448_v1, %v6468_v48 }
 0xd6f   : > { %3563 = vadd.xlane.f32.xlu2 %v3560_v39  ;;  %v3237_v32 = vshll.u32 %v3236_v38, 16 }
 0xd70   : > { %v3258_v22 = vshll.u32 %v3257_v0, 16 }
 0xd72   : > { %v3272_v63 = vpop.xlane.xlu1 %3271 }
 0xd73   : > { %vm3273_vm5 = vcmp.eq.f32.partialorder %v6769_v52, %v3272_v63  ;;  %v3070_v52 = vshra.s32 %v6804_v8, 16  ;;  %v3192_v13 = vpop.xlane.xlu2 %3191  ;;  %v3278_v39 = vcvt.f32.s32 %v3272_v63  ;;  %v3090_v63 = vand.u32 65535, %v6807_v29 }
 0xd74   : > { %v3274_v58 = vsel %vm3273_vm5, %v3269_v43, inf  ;;  %v3193_v14 = vcvt.f32.s32 %v3192_v13  ;;  %v3113_v29 = vcvt.s32.f32 %v3111_v60  ;;  %vm2994_vm5 = vcmp.eq.f32.partialorder %v6442_v26, %v6470_v46 }
 0xd75   : > { %3254 = vmin.xlane.f32.xlu0 %v3253_v53  ;;  %v3072_v19 = vcvt.s32.f32 %v3070_v52  ;;  %v3279_v5 = vshll.u32 %v3278_v39, 16  ;;  %v3069_v52 = vand.u32 65535, %v6804_v8  ;;  %v3092_v8 = vcvt.s32.f32 %v3090_v63 }
 0xd76   : > { %3275 = vmin.xlane.f32.xlu1 %v3274_v58  ;;  %v3196_v31 = vadd.s32 %v3195_v12, %v3193_v14  ;;  %v3153_v12 = vand.u32 65535, %v6829_v20  ;;  %v3037_v26 = vsel %vm3036_vm7, %v7529_v17, 5 }
 0xd77   : > { %3561 = vadd.xlane.f32.xlu2 %v3559_v50  ;;  %v3071_v27 = vcvt.s32.f32 %v3069_v52  ;;  %v6905_v49 = vsel %vm2687_vm0, %v3037_v26, 2147483647 }
 0xd78   : > { %v3155_v1 = vcvt.s32.f32 %v3153_v12  ;;  %v3040_v0 = vshra.s32 %v6905_v49, 16 }
 0xd7d   : > { %3073 = vmin.xlane.f32.xlu0 %v3072_v19 }
 0xd7e   : > { %3094 = vmin.xlane.f32.xlu1 %v6821_v62 }
 0xd7f   : > { %3115 = vmin.xlane.f32.xlu2 %v6826_v37 }
 0xd85   : > { %3136 = vmin.xlane.f32.xlu0 %v6835_v15 }
 0xd86   : > { %3157 = vmin.xlane.f32.xlu1 %v6837_v33 }
 0xde0   : > { %v3213_v3 = vpop.xlane.xlu0 %3212 }
 0xde1   : > { %v3214_v18 = vcvt.f32.s32 %v3213_v3  ;;  %v3234_v44 = vpop.xlane.xlu1 %3233  ;;  %v3132_v3 = vand.u32 65535, %v6824_v42 }
 0xde2   : > { %v3235_v47 = vcvt.f32.s32 %v3234_v44  ;;  %v3564_v56 = vpop.xlane.xlu2 %3563 }
 0xde3   : > { %v3217_v10 = vadd.s32 %v3216_v54, %v3214_v18  ;;  %v3566_v16 = vcvt.f32.s32 %v3564_v56  ;;  %v3134_v18 = vcvt.s32.f32 %v3132_v3  ;;  %v3016_v56 = vsel %vm3015_vm6, %v7529_v17, 5 }
 0xde4   : > { %v3238_v21 = vadd.s32 %v3237_v32, %v3235_v47  ;;  %v2995_v32 = vsel %vm2994_vm5, %v7529_v17, 5  ;;  %v6902_v7 = vsel %vm2687_vm0, %v3016_v56, 2147483647  ;;  %v7554_v56 = vld [vmem:[#allocation46_spill] sm:$0xff] }
 0xde5   : > { %v3281_v51 = vsel %vm2711_vm13, %v3196_v31, %v3217_v10  ;;  %v3567_v34 = vshll.u32 %v3566_v16, 16  ;;  %v6899_v10 = vsel %vm2687_vm0, %v2995_v32, 2147483647  ;;  %v3018_v32 = vand.u32 65535, %v6902_v7 }
 0xde6   : > { %v3282_v36 = vsel %vm2713_vm14, %v3281_v51, %v3238_v21  ;;  %v2998_v57 = vshra.s32 %v6899_v10, 16  ;;  %v3019_v21 = vshra.s32 %v6902_v7, 16 }
 0xde8   : > { %v3255_v45 = vpop.xlane.xlu0 %3254  ;;  %v6910_v51 = vcvt.s32.f32 %v2998_v57  ;;  %v6912_v39 = vcvt.s32.f32 %v3019_v21 }
 0xde9   : > { %v3256_v6 = vcvt.f32.s32 %v3255_v45  ;;  %v3276_v59 = vpop.xlane.xlu1 %3275 }
 0xdea   : > { %v3277_v25 = vcvt.f32.s32 %v3276_v59  ;;  %v3562_v43 = vpop.xlane.xlu2 %3561 }
 0xdeb   : > { %v3259_v53 = vadd.s32 %v3258_v22, %v3256_v6  ;;  %v3565_v58 = vcvt.f32.s32 %v3562_v43 }
 0xdec   : > { %v3280_v50 = vadd.s32 %v3279_v5, %v3277_v25 }
 0xded   : > { %v3283_v41 = vsel %vm2715_vm15, %v3282_v36, %v3259_v53  ;;  %v6849_v28 = vadd.s32 %v3567_v34, %v3565_v58  ;;  %v6915_v36 = vcvt.s32.f32 %v3040_v0  ;;  %v3020_v0 = vcvt.s32.f32 %v3018_v32 }
 0xdee   : > { %v3284_v11 = vsel %vm2717_vm1, %v3283_v41, %v3280_v50 }
 0xdef   : > { %vm3569_vm8 = vcmp.eq.s32.totalorder %v7529_v17, %v6849_v28 }
 0xdf0   : > { %v6856_v4 = vpop.xlane.xlu0 %3073  ;;  %v3570_v61 = vsel %vm3569_vm8, %v3284_v11, 0 }
 0xdf1   : > { %v6858_v13 = vpop.xlane.xlu1 %3094  ;;  %vm3075_vm9 = vcmp.eq.f32.partialorder %v3072_v19, %v6856_v4  ;;  %v3571_v9 = vsel %vm2687_vm0, %v3570_v61, 0  ;;  %v3080_v16 = vcvt.f32.s32 %v6856_v4 }
 0xdf2   : > { %v6861_v24 = vpop.xlane.xlu2 %3115  ;;  %v3076_v23 = vsel %vm3075_vm9, %v3071_v27, inf  ;;  %vm3096_vm10 = vcmp.eq.f32.partialorder %v6821_v62, %v6858_v13  ;;  %v3573_v19 = vshrl.u32 %v3571_v9, 16  ;;  %v2953_v62 = vsel %vm2952_vm12, %v7529_v17, 5 }
 0xdf3   : > { %3077 = vmin.xlane.f32.xlu2 %v3076_v23  ;;  %v3097_v38 = vsel %vm3096_vm10, %v3092_v8, inf  ;;  %vm3117_vm11 = vcmp.eq.f32.partialorder %v6826_v37, %v6861_v24  ;;  %v2974_v37 = vsel %vm2973_vm2, %v7529_v17, 5  ;;  %v2954_v35 = vsel %vm2687_vm0, %v2953_v62, 2147483647 }
 0xdf4   : > { %3098 = vmin.xlane.f32.xlu0 %v3097_v38  ;;  %v3118_v14 = vsel %vm3117_vm11, %v3113_v29, inf  ;;  %v3575_v42 = vcvt.s32.f32 %v3573_v19  ;;  %v6888_v20 = vsel %vm2687_vm0, %v2974_v37, 2147483647  ;;  %v3101_v45 = vcvt.f32.s32 %v6858_v13 }
 0xdf5   : > { %3119 = vmin.xlane.f32.xlu1 %v3118_v14  ;;  %v2977_v47 = vshra.s32 %v6888_v20, 16  ;;  %v3081_v6 = vshll.u32 %v3080_v16, 16  ;;  %v3122_v52 = vcvt.f32.s32 %v6861_v24  ;;  %v2955_v23 = vand.u32 65535, %v2954_v35 }
 0xdf6   : > { %v3102_v25 = vshll.u32 %v3101_v45, 16  ;;  %v2976_v3 = vand.u32 65535, %v6888_v20 }
 0xdf7   : > { %v2979_v2 = vcvt.s32.f32 %v2977_v47  ;;  %v3123_v61 = vshll.u32 %v3122_v52, 16  ;;  %v2957_v12 = vcvt.s32.f32 %v2955_v23  ;;  %v7553_v47 = vld [vmem:[#allocation62_spill] sm:$0xff] }
 0xdf8   : > { %v6875_v54 = vpop.xlane.xlu0 %3136  ;;  %vm2838_vm11 = vcmp.eq.f32.partialorder %v7554_v56, %v7553_v47 }
 0xdf9   : > { %v6878_v44 = vpop.xlane.xlu1 %3157  ;;  %vm3138_vm3 = vcmp.eq.f32.partialorder %v6835_v15, %v6875_v54  ;;  %v3572_v15 = vand.u32 65535, %v3571_v9  ;;  %v3143_v41 = vcvt.f32.s32 %v6875_v54 }
 0xdfa   : > { %v3139_v48 = vsel %vm3138_vm3, %v3134_v18, inf  ;;  %vm3159_vm4 = vcmp.eq.f32.partialorder %v6837_v33, %v6878_v44  ;;  %v2956_v33 = vshra.s32 %v2954_v35, 16  ;;  %v3164_v13 = vcvt.f32.s32 %v6878_v44 }
 0xdfb   : > { %3578 = vadd.xlane.f32.xlu2 %v3575_v42  ;;  %v3160_v40 = vsel %vm3159_vm4, %v3155_v1, inf  ;;  %v3574_v46 = vcvt.s32.f32 %v3572_v15  ;;  %v3144_v8 = vshll.u32 %v3143_v41, 16  ;;  %v2997_v15 = vand.u32 65535, %v6899_v10 }
 0xdfc   : > { %3140 = vmin.xlane.f32.xlu0 %v3139_v48  ;;  %v2958_v31 = vcvt.s32.f32 %v2956_v33  ;;  %v3165_v19 = vshll.u32 %v3164_v13, 16  ;;  %v2978_v48 = vcvt.s32.f32 %v2976_v3  ;;  %v2839_v10 = vsel %vm2838_vm11, %v7529_v17, 5  ;;  %v7562_v13 = vld [vmem:[#allocation58_spill] sm:$0xff] }
 0xdfd   : > { %3161 = vmin.xlane.f32.xlu1 %v3160_v40 }
 0xe03   : > { %3576 = vadd.xlane.f32.xlu2 %v3574_v46 }
 0xe04   : > { %2959 = vmin.xlane.f32.xlu0 %v2958_v31 }
 0xe05   : > { %2980 = vmin.xlane.f32.xlu1 %v2979_v2 }
 0xe0b   : > { %3001 = vmin.xlane.f32.xlu2 %v6910_v51 }
 0xe0c   : > { %3022 = vmin.xlane.f32.xlu0 %v6912_v39 }
 0xe0d   : > { %3043 = vmin.xlane.f32.xlu1 %v6915_v36 }
 0xe66   : > { %v3078_v22 = vpop.xlane.xlu2 %3077 }
 0xe67   : > { %v3079_v59 = vcvt.f32.s32 %v3078_v22  ;;  %v3099_v5 = vpop.xlane.xlu0 %3098  ;;  %v7555_v22 = vld [vmem:[#allocation39_spill] sm:$0xff] }
 0xe68   : > { %v3100_v43 = vcvt.f32.s32 %v3099_v5  ;;  %v3120_v34 = vpop.xlane.xlu1 %3119  ;;  %v3039_v5 = vand.u32 65535, %v6905_v49 }
 0xe69   : > { %v3082_v53 = vadd.s32 %v3081_v6, %v3079_v59  ;;  %v3121_v60 = vcvt.f32.s32 %v3120_v34  ;;  %v7556_v6 = vld [vmem:[#allocation37_spill] sm:$0xff]  ;;  %v7559_v34 = vld [vmem:[#allocation72_spill] sm:$0xff] }
 0xe6a   : > { %v3103_v58 = vadd.s32 %v3102_v25, %v3100_v43  ;;  %vm2859_vm3 = vcmp.eq.f32.partialorder %v7556_v6, %v7555_v22  ;;  %v6959_v25 = vsel %vm2687_vm0, %v2839_v10, 2147483647  ;;  %v7558_v43 = vld [vmem:[#allocation47_spill] sm:$0xff]  ;;  %v3041_v52 = vcvt.s32.f32 %v3039_v5 }
 0xe6b   : > { %v3124_v29 = vadd.s32 %v3123_v61, %v3121_v60  ;;  %v7561_v61 = vld [vmem:[#allocation40_spill] sm:$0xff] }
 0xe6c   : > { %v3167_v50 = vsel %vm2711_vm13, %v3082_v53, %v3103_v58  ;;  %v7560_v53 = vld [vmem:[#allocation49_spill] sm:$0xff]  ;;  %v2860_v58 = vsel %vm2859_vm3, %v7529_v17, 5  ;;  %vm2922_vm7 = vcmp.eq.f32.partialorder %v7562_v13, %v7561_v61 }
 0xe6d   : > { %v3168_v62 = vsel %vm2713_vm14, %v3167_v50, %v3124_v29  ;;  %vm2901_vm5 = vcmp.eq.f32.partialorder %v7560_v53, %v7559_v34  ;;  %v2842_v50 = vshra.s32 %v6959_v25, 16  ;;  %v2923_v29 = vsel %vm2922_vm7, %v7529_v17, 5 }
 0xe6e   : > { %v3579_v63 = vpop.xlane.xlu2 %3578  ;;  %v2902_v41 = vsel %vm2901_vm5, %v7529_v17, 5  ;;  %v6991_v3 = vsel %vm2687_vm0, %v2923_v29, 2147483647 }
 0xe6f   : > { %v3141_v11 = vpop.xlane.xlu0 %3140  ;;  %v3581_v9 = vcvt.f32.s32 %v3579_v63 }
 0xe70   : > { %v3142_v4 = vcvt.f32.s32 %v3141_v11  ;;  %v3162_v27 = vpop.xlane.xlu1 %3161  ;;  %v6972_v11 = vsel %vm2687_vm0, %v2860_v58, 2147483647 }
 0xe71   : > { %v3163_v38 = vcvt.f32.s32 %v3162_v27  ;;  %v3582_v54 = vshll.u32 %v3581_v9, 16 }
 0xe72   : > { %v3145_v14 = vadd.s32 %v3144_v8, %v3142_v4  ;;  %v2844_v4 = vcvt.s32.f32 %v2842_v50  ;;  %v2863_v8 = vshra.s32 %v6972_v11, 16 }
 0xe73   : > { %v3166_v18 = vadd.s32 %v3165_v19, %v3163_v38 }
 0xe74   : > { %v3169_v44 = vsel %vm2715_vm15, %v3168_v62, %v3145_v14  ;;  %v6986_v38 = vcvt.s32.f32 %v2863_v8 }
 0xe75   : > { %v3170_v33 = vsel %vm2717_vm1, %v3169_v44, %v3166_v18 }
 0xe76   : > { %v3577_v24 = vpop.xlane.xlu2 %3576 }
 0xe77   : > { %v3580_v37 = vcvt.f32.s32 %v3577_v24  ;;  %v6927_v42 = vpop.xlane.xlu0 %2959  ;;  %v2926_v24 = vshra.s32 %v6991_v3, 16 }
 0xe78   : > { %v6930_v1 = vpop.xlane.xlu1 %2980  ;;  %vm2961_vm8 = vcmp.eq.f32.partialorder %v2958_v31, %v6927_v42  ;;  %v2966_v62 = vcvt.f32.s32 %v6927_v42 }
 0xe79   : > { %v6933_v40 = vadd.s32 %v3582_v54, %v3580_v37  ;;  %v2962_v35 = vsel %vm2961_vm8, %v2957_v12, inf  ;;  %vm2982_vm9 = vcmp.eq.f32.partialorder %v2979_v2, %v6930_v1  ;;  %v2999_v2 = vcvt.s32.f32 %v2997_v15 }
 0xe7a   : > { %2963 = vmin.xlane.f32.xlu2 %v2962_v35  ;;  %v2983_v20 = vsel %vm2982_vm9, %v2978_v48, inf  ;;  %v6999_v12 = vcvt.s32.f32 %v2926_v24  ;;  %v2987_v54 = vcvt.f32.s32 %v6930_v1  ;;  %v2967_v37 = vshll.u32 %v2966_v62, 16  ;;  %v7564_v24 = vld [vmem:[#allocation82_spill] sm:$0xff] }
 0xe7b   : > { %vm3584_vm10 = vcmp.eq.s32.totalorder %v7529_v17, %v6933_v40  ;;  %2984 = vmin.xlane.f32.xlu0 %v2983_v20 }
 0xe7c   : > { %v3585_v26 = vsel %vm3584_vm10, %v3170_v33, 0  ;;  %v2988_v35 = vshll.u32 %v2987_v54, 16 }
 0xe7d   : > { %v3586_v46 = vsel %vm2687_vm0, %v3585_v26, 0 }
 0xe7e   : > { %v6944_v31 = vpop.xlane.xlu2 %3001  ;;  %v3588_v57 = vshrl.u32 %v3586_v46, 16 }
 0xe7f   : > { %v6947_v21 = vpop.xlane.xlu0 %3022  ;;  %vm3003_vm12 = vcmp.eq.f32.partialorder %v6910_v51, %v6944_v31  ;;  %v7557_v51 = vld [vmem:[#allocation41_spill] sm:$0xff]  ;;  %v3008_v32 = vcvt.f32.s32 %v6944_v31 }
 0xe80   : > { %v3004_v16 = vsel %vm3003_vm12, %v2999_v2, inf  ;;  %v3590_v7 = vcvt.s32.f32 %v3588_v57  ;;  %vm3024_vm2 = vcmp.eq.f32.partialorder %v6912_v39, %v6947_v21  ;;  %v6955_v59 = vpop.xlane.xlu1 %3043  ;;  %vm2880_vm4 = vcmp.eq.f32.partialorder %v7558_v43, %v7557_v51 }
 0xe81   : > { %3005 = vmin.xlane.f32.xlu1 %v3004_v16  ;;  %v3025_v45 = vsel %vm3024_vm2, %v3020_v0, inf  ;;  %v3587_v39 = vand.u32 65535, %v3586_v46  ;;  %vm3045_vm6 = vcmp.eq.f32.partialorder %v6915_v36, %v6955_v59  ;;  %v2881_v49 = vsel %vm2880_vm4, %v7529_v17, 5 }
 0xe82   : > { %3593 = vadd.xlane.f32.xlu2 %v3590_v7  ;;  %v3046_v63 = vsel %vm3045_vm6, %v3041_v52, inf  ;;  %v6975_v27 = vsel %vm2687_vm0, %v2881_v49, 2147483647  ;;  %v6980_v36 = vsel %vm2687_vm0, %v2902_v41, 2147483647  ;;  %v3029_v2 = vcvt.f32.s32 %v6947_v21 }
 0xe83   : > { %3026 = vmin.xlane.f32.xlu0 %v3025_v45  ;;  %v3589_v60 = vcvt.s32.f32 %v3587_v39  ;;  %v2884_v23 = vshra.s32 %v6975_v27, 16  ;;  %v2905_v9 = vshra.s32 %v6980_v36, 16  ;;  %v3009_v57 = vshll.u32 %v3008_v32, 16 }
 0xe84   : > { %v3050_v10 = vcvt.f32.s32 %v6955_v59  ;;  %v3030_v16 = vshll.u32 %v3029_v2, 16  ;;  %v2841_v45 = vand.u32 65535, %v6959_v25  ;;  %v2862_v49 = vand.u32 65535, %v6972_v11  ;;  %v7570_v2 = vld [vmem:[#allocation42_spill] sm:$0xff] }
 0xe85   : > { %v6988_v14 = vcvt.s32.f32 %v2884_v23  ;;  %v6994_v19 = vcvt.s32.f32 %v2905_v9  ;;  %v2883_v52 = vand.u32 65535, %v6975_v27  ;;  %v7563_v9 = vld [vmem:[#allocation45_spill] sm:$0xff]  ;;  %v2904_v54 = vand.u32 65535, %v6980_v36 }
 0xe86   : > { %v3051_v31 = vshll.u32 %v3050_v10, 16  ;;  %v2843_v39 = vcvt.s32.f32 %v2841_v45  ;;  %v2864_v61 = vcvt.s32.f32 %v2862_v49  ;;  %vm2724_vm12 = vcmp.eq.f32.partialorder %v7564_v24, %v7563_v9 }
 0xe87   : > { %v2885_v11 = vcvt.s32.f32 %v2883_v52 }
 0xe89   : > { %3047 = vmin.xlane.f32.xlu1 %v3046_v63 }
 0xe8a   : > { %3591 = vadd.xlane.f32.xlu2 %v3589_v60 }
 0xe8b   : > { %2845 = vmin.xlane.f32.xlu0 %v2844_v4 }
 0xe91   : > { %2866 = vmin.xlane.f32.xlu1 %v6986_v38 }
 0xe92   : > { %2887 = vmin.xlane.f32.xlu2 %v6988_v14 }
 0xe93   : > { %2908 = vmin.xlane.f32.xlu0 %v6994_v19 }
 0xe99   : > { %2929 = vmin.xlane.f32.xlu1 %v6999_v12 }
 0xeed   : > { %v2964_v18 = vpop.xlane.xlu2 %2963 }
 0xeee   : > { %v2965_v44 = vcvt.f32.s32 %v2964_v18  ;;  %v2985_v48 = vpop.xlane.xlu0 %2984  ;;  %v2925_v18 = vand.u32 65535, %v6991_v3 }
 0xeef   : > { %v2986_v20 = vcvt.f32.s32 %v2985_v48  ;;  %v7568_v48 = vld [vmem:[#allocation80_spill] sm:$0xff] }
 0xef0   : > { %v2968_v15 = vadd.s32 %v2967_v37, %v2965_v44  ;;  %v7566_v37 = vld [vmem:[#allocation64_spill] sm:$0xff]  ;;  %v7567_v44 = vld [vmem:[#allocation38_spill] sm:$0xff]  ;;  %v2927_v36 = vcvt.s32.f32 %v2925_v18 }
 0xef1   : > { %v2989_v33 = vadd.s32 %v2988_v35, %v2986_v20  ;;  %vm2766_vm3 = vcmp.eq.f32.partialorder %v7568_v48, %v7567_v44 }
 0xef2   : > { %v2767_v3 = vsel %vm2766_vm3, %v7529_v17, 5 }
 0xef3   : > { %v3053_v47 = vsel %vm2711_vm13, %v2968_v15, %v2989_v33  ;;  %v2906_v33 = vcvt.s32.f32 %v2904_v54 }
 0xef4   : > { %v3006_v56 = vpop.xlane.xlu1 %3005 }
 0xef5   : > { %v3007_v26 = vcvt.f32.s32 %v3006_v56  ;;  %v3594_v46 = vpop.xlane.xlu2 %3593 }
 0xef6   : > { %v3027_v42 = vpop.xlane.xlu0 %3026  ;;  %v3596_v7 = vcvt.f32.s32 %v3594_v46 }
 0xef7   : > { %v3028_v1 = vcvt.f32.s32 %v3027_v42  ;;  %v3010_v0 = vadd.s32 %v3009_v57, %v3007_v26  ;;  %v7055_v42 = vsel %vm2687_vm0, %v2767_v3, 2147483647  ;;  %v7571_v57 = vld [vmem:[#allocation44_spill] sm:$0xff] }
 0xef8   : > { %v3597_v34 = vshll.u32 %v3596_v7, 16 }
 0xef9   : > { %v3031_v22 = vadd.s32 %v3030_v16, %v3028_v1  ;;  %v3054_v5 = vsel %vm2713_vm14, %v3053_v47, %v3010_v0  ;;  %v7572_v1 = vld [vmem:[#allocation36_spill] sm:$0xff]  ;;  %v2770_v16 = vshra.s32 %v7055_v42, 16 }
 0xefa   : > { %vm2808_vm7 = vcmp.eq.f32.partialorder %v7572_v1, %v7571_v57 }
 0xefb   : > { %v3055_v59 = vsel %vm2715_vm15, %v3054_v5, %v3031_v22  ;;  %v2809_v7 = vsel %vm2808_vm7, %v7529_v17, 5 }
 0xefc   : > { %v3048_v6 = vpop.xlane.xlu1 %3047  ;;  %v7072_v5 = vsel %vm2687_vm0, %v2809_v7, 2147483647 }
 0xefd   : > { %v3049_v51 = vcvt.f32.s32 %v3048_v6  ;;  %v3592_v43 = vpop.xlane.xlu2 %3591 }
 0xefe   : > { %v3595_v53 = vcvt.f32.s32 %v3592_v43  ;;  %v7010_v21 = vpop.xlane.xlu0 %2845  ;;  %v2812_v43 = vshra.s32 %v7072_v5, 16 }
 0xeff   : > { %v3052_v58 = vadd.s32 %v3051_v31, %v3049_v51  ;;  %vm2847_vm8 = vcmp.eq.f32.partialorder %v2844_v4, %v7010_v21  ;;  %v7069_v31 = vcvt.s32.f32 %v2770_v16 }
 0xf00   : > { %v7014_v50 = vadd.s32 %v3597_v34, %v3595_v53  ;;  %v2848_v25 = vsel %vm2847_vm8, %v2843_v39, inf  ;;  %v7080_v53 = vcvt.s32.f32 %v2812_v43 }
 0xf01   : > { %2849 = vmin.xlane.f32.xlu2 %v2848_v25  ;;  %v3056_v41 = vsel %vm2717_vm1, %v3055_v59, %v3052_v58  ;;  %v2852_v58 = vcvt.f32.s32 %v7010_v21 }
 0xf02   : > { %vm3599_vm9 = vcmp.eq.s32.totalorder %v7529_v17, %v7014_v50 }
 0xf03   : > { %v3600_v63 = vsel %vm3599_vm9, %v3056_v41, 0  ;;  %v2853_v52 = vshll.u32 %v2852_v58, 16 }
 0xf04   : > { %v7021_v60 = vpop.xlane.xlu1 %2866  ;;  %v3601_v4 = vsel %vm2687_vm0, %v3600_v63, 0 }
 0xf05   : > { %v7024_v13 = vpop.xlane.xlu2 %2887  ;;  %vm2868_vm10 = vcmp.eq.f32.partialorder %v6986_v38, %v7021_v60  ;;  %v3603_v8 = vshrl.u32 %v3601_v4, 16  ;;  %v7565_v38 = vld [vmem:[#allocation56_spill] sm:$0xff]  ;;  %v3602_v35 = vand.u32 65535, %v3601_v4  ;;  %v2873_v59 = vcvt.f32.s32 %v7021_v60 }
 0xf06   : > { %v2869_v23 = vsel %vm2868_vm10, %v2864_v61, inf  ;;  %vm2889_vm11 = vcmp.eq.f32.partialorder %v6988_v14, %v7024_v13  ;;  %v7032_v62 = vpop.xlane.xlu0 %2908  ;;  %vm2745_vm2 = vcmp.eq.f32.partialorder %v7566_v37, %v7565_v38  ;;  %v2725_v14 = vsel %vm2724_vm12, %v7529_v17, 5 }
 0xf07   : > { %2870 = vmin.xlane.f32.xlu0 %v2869_v23  ;;  %v2890_v27 = vsel %vm2889_vm11, %v2885_v11, inf  ;;  %v3605_v29 = vcvt.s32.f32 %v3603_v8  ;;  %vm2910_vm4 = vcmp.eq.f32.partialorder %v6994_v19, %v7032_v62  ;;  %v2746_v20 = vsel %vm2745_vm2, %v7529_v17, 5  ;;  %v7569_v19 = vld [vmem:[#allocation59_spill] sm:$0xff] }
 0xf08   : > { %2891 = vmin.xlane.f32.xlu1 %v2890_v27  ;;  %v2911_v32 = vsel %vm2910_vm4, %v2906_v33, inf  ;;  %v7047_v56 = vsel %vm2687_vm0, %v2725_v14, 2147483647  ;;  %v3604_v26 = vcvt.s32.f32 %v3602_v35  ;;  %v7050_v46 = vsel %vm2687_vm0, %v2746_v20, 2147483647 }
 0xf09   : > { %3608 = vadd.xlane.f32.xlu2 %v3605_v29  ;;  %vm2787_vm6 = vcmp.eq.f32.partialorder %v7570_v2, %v7569_v19  ;;  %v2749_v10 = vshra.s32 %v7050_v46, 16  ;;  %v2874_v41 = vshll.u32 %v2873_v59, 16  ;;  %v2894_v4 = vcvt.f32.s32 %v7024_v13 }
 0xf0a   : > { %v2788_v0 = vsel %vm2787_vm6, %v7529_v17, 5  ;;  %v2915_v29 = vcvt.f32.s32 %v7032_v62  ;;  %v2727_v62 = vand.u32 65535, %v7047_v56 }
 0xf0b   : > { %v7064_v22 = vcvt.s32.f32 %v2749_v10  ;;  %v7067_v6 = vsel %vm2687_vm0, %v2788_v0, 2147483647  ;;  %v2895_v24 = vshll.u32 %v2894_v4, 16 }
 0xf0c   : > { %v2930_v15 = vpop.xlane.xlu1 %2929  ;;  %v2791_v51 = vshra.s32 %v7067_v6, 16  ;;  %v2916_v38 = vshll.u32 %v2915_v29, 16  ;;  %v2729_v57 = vcvt.s32.f32 %v2727_v62 }
 0xf0d   : > { %vm2931_vm5 = vcmp.eq.f32.partialorder %v6999_v12, %v2930_v15  ;;  %v2728_v12 = vshra.s32 %v7047_v56, 16  ;;  %v2936_v21 = vcvt.f32.s32 %v2930_v15 }
 0xf0e   : > { %v2932_v47 = vsel %vm2931_vm5, %v2927_v36, inf  ;;  %v7078_v34 = vcvt.s32.f32 %v2791_v51  ;;  %v2790_v51 = vand.u32 65535, %v7067_v6 }
 0xf0f   : > { %2912 = vmin.xlane.f32.xlu0 %v2911_v32  ;;  %v2730_v45 = vcvt.s32.f32 %v2728_v12  ;;  %v2937_v48 = vshll.u32 %v2936_v21, 16 }
 0xf10   : > { %2933 = vmin.xlane.f32.xlu1 %v2932_v47  ;;  %v2748_v47 = vand.u32 65535, %v7050_v46  ;;  %v2792_v58 = vcvt.s32.f32 %v2790_v51 }
 0xf11   : > { %3606 = vadd.xlane.f32.xlu2 %v3604_v26  ;;  %v2769_v26 = vand.u32 65535, %v7055_v42 }
 0xf12   : > { %v2750_v10 = vcvt.s32.f32 %v2748_v47 }
 0xf13   : > { %v2771_v16 = vcvt.s32.f32 %v2769_v26 }
 0xf17   : > { %2731 = vmin.xlane.f32.xlu0 %v2730_v45 }
 0xf18   : > { %2752 = vmin.xlane.f32.xlu1 %v7064_v22 }
 0xf19   : > { %2773 = vmin.xlane.f32.xlu2 %v7069_v31 }
 0xf1f   : > { %2794 = vmin.xlane.f32.xlu0 %v7078_v34 }
 0xf20   : > { %2815 = vmin.xlane.f32.xlu1 %v7080_v53 }
 0xf74   : > { %v2850_v39 = vpop.xlane.xlu2 %2849 }
 0xf75   : > { %v2851_v25 = vcvt.f32.s32 %v2850_v39 }
 0xf77   : > { %v2854_v8 = vadd.s32 %v2853_v52, %v2851_v25 }
 0xf7a   : > { %v2871_v49 = vpop.xlane.xlu0 %2870 }
 0xf7b   : > { %v2872_v63 = vcvt.f32.s32 %v2871_v49  ;;  %v2892_v61 = vpop.xlane.xlu1 %2891 }
 0xf7c   : > { %v3609_v11 = vpop.xlane.xlu2 %3608  ;;  %v2893_v27 = vcvt.f32.s32 %v2892_v61 }
 0xf7d   : > { %v2875_v23 = vadd.s32 %v2874_v41, %v2872_v63  ;;  %v3611_v54 = vcvt.f32.s32 %v3609_v11 }
 0xf7e   : > { %v2896_v60 = vadd.s32 %v2895_v24, %v2893_v27 }
 0xf7f   : > { %v2939_v9 = vsel %vm2711_vm13, %v2854_v8, %v2875_v23  ;;  %v3612_v13 = vshll.u32 %v3611_v54, 16 }
 0xf80   : > { %v2940_v36 = vsel %vm2713_vm14, %v2939_v9, %v2896_v60 }
 0xf82   : > { %v2913_v18 = vpop.xlane.xlu0 %2912 }
 0xf83   : > { %v2914_v37 = vcvt.f32.s32 %v2913_v18  ;;  %v2934_v44 = vpop.xlane.xlu1 %2933 }
 0xf84   : > { %v2935_v14 = vcvt.f32.s32 %v2934_v44  ;;  %v3607_v35 = vpop.xlane.xlu2 %3606 }
 0xf85   : > { %v2917_v20 = vadd.s32 %v2916_v38, %v2914_v37  ;;  %v3610_v33 = vcvt.f32.s32 %v3607_v35 }
 0xf86   : > { %v2938_v3 = vadd.s32 %v2937_v48, %v2935_v14 }
 0xf87   : > { %v2941_v32 = vsel %vm2715_vm15, %v2940_v36, %v2917_v20  ;;  %v7092_v15 = vadd.s32 %v3612_v13, %v3610_v33 }
 0xf88   : > { %v2942_v19 = vsel %vm2717_vm1, %v2941_v32, %v2938_v3 }
 0xf89   : > { %vm3614_vm8 = vcmp.eq.s32.totalorder %v7529_v17, %v7092_v15 }
 0xf8a   : > { %v2732_v2 = vpop.xlane.xlu0 %2731  ;;  %v3615_v1 = vsel %vm3614_vm8, %v2942_v19, 0 }
 0xf8b   : > { %v2753_v12 = vpop.xlane.xlu1 %2752  ;;  %vm2733_vm9 = vcmp.eq.f32.partialorder %v2730_v45, %v2732_v2  ;;  %v3616_v46 = vsel %vm2687_vm0, %v3615_v1, 0  ;;  %v2811_v45 = vand.u32 65535, %v7072_v5  ;;  %v2738_v41 = vcvt.f32.s32 %v2732_v2 }
 0xf8c   : > { %v2774_v56 = vpop.xlane.xlu2 %2773  ;;  %v2734_v0 = vsel %vm2733_vm9, %v2729_v57, inf  ;;  %vm2754_vm10 = vcmp.eq.f32.partialorder %v7064_v22, %v2753_v12  ;;  %v3618_v43 = vshrl.u32 %v3616_v46, 16  ;;  %v3617_v52 = vand.u32 65535, %v3616_v46 }
 0xf8d   : > { %2735 = vmin.xlane.f32.xlu2 %v2734_v0  ;;  %v2755_v42 = vsel %vm2754_vm10, %v2750_v10, inf  ;;  %vm2775_vm11 = vcmp.eq.f32.partialorder %v7069_v31, %v2774_v56  ;;  %v2813_v22 = vcvt.s32.f32 %v2811_v45  ;;  %v2759_v63 = vcvt.f32.s32 %v2753_v12 }
 0xf8e   : > { %2756 = vmin.xlane.f32.xlu0 %v2755_v42  ;;  %v2776_v7 = vsel %vm2775_vm11, %v2771_v16, inf  ;;  %v3620_v25 = vcvt.s32.f32 %v3618_v43  ;;  %v3619_v6 = vcvt.s32.f32 %v3617_v52  ;;  %v2739_v61 = vshll.u32 %v2738_v41, 16 }
 0xf8f   : > { %2777 = vmin.xlane.f32.xlu1 %v2776_v7  ;;  %v2760_v8 = vshll.u32 %v2759_v63, 16  ;;  %v2780_v9 = vcvt.f32.s32 %v2774_v56 }
 0xf91   : > { %v2781_v37 = vshll.u32 %v2780_v9, 16 }
 0xf92   : > { %v2795_v39 = vpop.xlane.xlu0 %2794 }
 0xf93   : > { %v2816_v59 = vpop.xlane.xlu1 %2815  ;;  %vm2796_vm12 = vcmp.eq.f32.partialorder %v7078_v34, %v2795_v39  ;;  %v2801_v24 = vcvt.f32.s32 %v2795_v39 }
 0xf94   : > { %v2797_v49 = vsel %vm2796_vm12, %v2792_v58, inf  ;;  %vm2817_vm2 = vcmp.eq.f32.partialorder %v7080_v53, %v2816_v59  ;;  %v2822_v44 = vcvt.f32.s32 %v2816_v59 }
 0xf95   : > { %3623 = vadd.xlane.f32.xlu2 %v3620_v25  ;;  %v2818_v31 = vsel %vm2817_vm2, %v2813_v22, inf  ;;  %v2802_v48 = vshll.u32 %v2801_v24, 16 }
 0xf96   : > { %2798 = vmin.xlane.f32.xlu0 %v2797_v49  ;;  %v2823_v33 = vshll.u32 %v2822_v44, 16 }
 0xf97   : > { %2819 = vmin.xlane.f32.xlu1 %v2818_v31 }
 0xf9d   : > { %3621 = vadd.xlane.f32.xlu2 %v3619_v6 }
0x1000   : > { %v2736_v5 = vpop.xlane.xlu2 %2735 }
0x1001   : > { %v2737_v4 = vcvt.f32.s32 %v2736_v5  ;;  %v2757_v11 = vpop.xlane.xlu0 %2756 }
0x1002   : > { %v2758_v23 = vcvt.f32.s32 %v2757_v11  ;;  %v2778_v34 = vpop.xlane.xlu1 %2777 }
0x1003   : > { %v2740_v27 = vadd.s32 %v2739_v61, %v2737_v4  ;;  %v2779_v54 = vcvt.f32.s32 %v2778_v34 }
0x1004   : > { %v2761_v29 = vadd.s32 %v2760_v8, %v2758_v23 }
0x1005   : > { %v2782_v14 = vadd.s32 %v2781_v37, %v2779_v54 }
0x1006   : > { %v2825_v53 = vsel %vm2711_vm13, %v2740_v27, %v2761_v29 }
0x1007   : > { %v2826_v3 = vsel %vm2713_vm14, %v2825_v53, %v2782_v14 }
0x1008   : > { %v3624_v21 = vpop.xlane.xlu2 %3623 }
0x1009   : > { %v2799_v60 = vpop.xlane.xlu0 %2798  ;;  %v3626_v35 = vcvt.f32.s32 %v3624_v21 }
0x100a   : > { %v2800_v18 = vcvt.f32.s32 %v2799_v60  ;;  %v2820_v38 = vpop.xlane.xlu1 %2819 }
0x100b   : > { %v2821_v13 = vcvt.f32.s32 %v2820_v38  ;;  %v3627_v62 = vshll.u32 %v3626_v35, 16 }
0x100c   : > { %v2803_v20 = vadd.s32 %v2802_v48, %v2800_v18 }
0x100d   : > { %v2824_v32 = vadd.s32 %v2823_v33, %v2821_v13 }
0x100e   : > { %v2827_v26 = vsel %vm2715_vm15, %v2826_v3, %v2803_v20 }
0x100f   : > { %v2828_v2 = vsel %vm2717_vm1, %v2827_v26, %v2824_v32 }
0x1010   : > { %v3622_v36 = vpop.xlane.xlu2 %3621 }
0x1011   : > { %v3625_v47 = vcvt.f32.s32 %v3622_v36 }
0x1013   : > { %v3628_v19 = vadd.s32 %v3627_v62, %v3625_v47 }
0x1015   : > { %vm3629_vm3 = vcmp.eq.s32.totalorder %v7529_v17, %v3628_v19 }
0x1016   : > { %v3630_v57 = vsel %vm3629_vm3, %v2828_v2, 0 }
0x1017   : > { %v3631_v1 = vsel %vm2687_vm0, %v3630_v57, 0 }
0x1018   : > { %v3633_v12 = vshrl.u32 %v3631_v1, 16  ;;  %v3632_v10 = vand.u32 65535, %v3631_v1 }
0x101a   : > { %v3635_v56 = vcvt.s32.f32 %v3633_v12  ;;  %v3634_v0 = vcvt.s32.f32 %v3632_v10 }
0x101c   : > { %3638 = vadd.xlane.f32.xlu0 %v3635_v56  ;;  %3636 = vadd.xlane.f32.xlu1 %v3634_v0 }
0x101d   : > { %4683 = shalt.err (!%p4680_p8)
}
0x101e   : > { %s4815_s14 = smov 128   ;;  %s4816_s25 = smov 8   ;;  %vm3649_vm4 = vcmask 48128  }
0x101f   : > { %4095 = dma.vmem_to_hbm [thread:$0]  (%p4932_p5), %s3681_s26, 1024, %s3683_s13, %s3658_s16, %s4815_s14, %s4815_s14, %s4816_s25  }
0x1020   : > { %s7573_s24 = sld [smem:[#allocation88_spill]]  ;;  %s3662_s16 = sand.u32 1, %s4913_s17  }
0x1021   : > { %s7574_s26 = sld [smem:[#allocation89_spill]]  ;;  %s7575_s19 = sshll.u32 %s6319_s3, 3 }
0x1022   : > { %s599_s21 = scalar_lea.vmem [#allocation19], %s7575_s19  ;;  %s3711_s25 = sshll.u32 %s6668_s15, 4  ;;  %s7153_s25 = int_to_ptr.vmem [resolvable:$true] %s3711_s25 }
0x1023   : > { %s3697_s27 = sshll.u32 %s599_s21, 4  ;;  %s3663_s17 = scalar_lea.sflag [#allocation20], %s3662_s16  ;;  %s3698_s27 = int_to_ptr.vmem [resolvable:$true] %s3697_s27 }
0x1026   : > { %s3695_s22 = scalar_lea.hbm %s7573_s24, %s5018_s18 }
0x1027   : > { %s3709_s13 = scalar_lea.hbm %s7574_s26, %s5018_s18  ;;  %s3699_s14 = sshll.u32 %s3695_s22, 4  ;;  %s3700_s14 = int_to_ptr.hbm [resolvable:$true] %s3699_s14 }
0x1028   : > { %s7149_s18 = sshll.u32 %s3709_s13, 4  ;;  %s4698_s3 = sshra.s32 %s3700_s14, 4  ;;  %s3714_s18 = int_to_ptr.hbm [resolvable:$true] %s7149_s18  ;;  %s4699_s3 = int_to_ptr.hbm [resolvable:$true] %s4698_s3 }
0x1029   : > { %s4700_s15 = scalar_lea.hbm %s4699_s3, 8  ;;  %s4704_s22 = scalar_lea.hbm %s7573_s24, 16 }
0x102a   : > { %p4701_p9 = scmp.ne.s32.totalorder %s4699_s3, %s4700_s15  ;;  %p4705_p12 = scmp.lt.s32.totalorder %s4699_s3, %s7573_s24 }
0x102b   : > { %p4706_p13 = scmp.lt.s32.totalorder %s4704_s22, %s4700_s15 }
0x102c   : > { %p4702_p10 = pnand %p4701_p9, %p4932_p5 }
0x102d   : > { %p4707_p0 = por %p4706_p13, %p4705_p12 }
0x102e   : > { %p4703_p11 = pneg %p4702_p10 }
0x1030   : > { %p4708_p1 = pnand %p4707_p0, %p4703_p11 }
0x108f   : > { %v3639_v17 = vpop.xlane.xlu0 %3638  ;;  %v3637_v16 = vpop.xlane.xlu1 %3636 }
0x1090   : > { %v3641_v46 = vcvt.f32.s32 %v3639_v17  ;;  %v3640_v7 = vcvt.f32.s32 %v3637_v16 }
0x1092   : > { %v3642_v42 = vshll.u32 %v3641_v46, 16 }
0x1094   : > { %v3643_v51 = vadd.s32 %v3642_v42, %v3640_v7 }
0x1096   : > { %v3644_v43 = vsel %vm2711_vm13, %v3643_v51, %v3628_v19  ;;  %vm3651_vm13 = vcmask 56320  }
0x1097   : > { %v3645_v45 = vsel %vm2713_vm14, %v3644_v43, %v7092_v15  ;;  %vm3653_vm14 = vcmask 64512  }
0x1098   : > { %v3646_v39 = vsel %vm2715_vm15, %v3645_v45, %v7014_v50 }
0x1099   : > { %v3647_v58 = vsel %vm2717_vm1, %v3646_v39, %v6933_v40 }
0x109a   : > { %v3648_v15 = vsel %vm2687_vm0, %v3647_v58, %v6849_v28 }
0x109b   : > { %v3650_v50 = vsel %vm3649_vm4, %v3648_v15, %v6775_v55 }
0x109c   : > { %v3652_v59 = vsel %vm3651_vm13, %v3650_v50, %v6739_v30 }
0x109d   : > { %v3654_v40 = vsel %vm3653_vm14, %v3652_v59, 0 }
0x109e   : > { %3655 = vst [vmem:[%s599_s21] sm:$0xff] %v3654_v40 }
0x109f   : > { %4711 = shalt.err (!%p4708_p1)
}
0x10a0   : > { %4096 = dma.vmem_to_hbm [thread:$0]  (%p4932_p5), %s3698_s27, 128, %s3700_s14, %s3663_s17  }
0x10a1   : > { %s4726_s13 = sshra.s32 %s3714_s18, 4  ;;  %s4732_s3 = scalar_lea.hbm %s7574_s26, 16  ;;  %s4727_s13 = int_to_ptr.hbm [resolvable:$true] %s4726_s13 }
0x10a2   : > { %s4728_s16 = scalar_lea.hbm %s4727_s13, 8  ;;  %p4733_p7 = scmp.lt.s32.totalorder %s4727_s13, %s7574_s26 }
0x10a3   : > { %p4729_p2 = scmp.ne.s32.totalorder %s4727_s13, %s4728_s16  ;;  %p4734_p8 = scmp.lt.s32.totalorder %s4732_s3, %s4728_s16 }
0x10a5   : > { %p4730_p3 = pnand %p4729_p2, %p4932_p5  ;;  %p4735_p9 = por %p4734_p8, %p4733_p7 }
0x10a7   : > { %p4731_p4 = pneg %p4730_p3 }
0x10a9   : > { %p4736_p10 = pnand %p4735_p9, %p4731_p4 }
0x10ab   : > { %4739 = shalt.err (!%p4736_p10)
}
0x10ac   : > { %4097 = dma.vmem_to_hbm [thread:$0]  (%p4932_p5), %s7153_s25, 128, %s3714_s18, %s3663_s17  }
0x10ad PF: > { %s7576_s27 = sld [smem:[#allocation31_spill]] }
0x10ae   : > { %s7577_s14 = sld [smem:[#allocation29_spill]] }
0x10b3   : > { %p4152_p11 = scmp.ge.s32.totalorder %s7576_s27, 2 }
0x10b4   : > { %s3725_s22 = sand.u32 1, %s7577_s14  }
0x10b5   : > { %p4127_p12 = pnand %p4152_p11, %p4936_p6  ;;  %s3726_s5 = scalar_lea.sflag [#allocation6], %s3725_s22 }
0x10b7   : > { %p4128_p13 = pneg %p4127_p12 }
0x10b9   : > { %4777 = dma.done.wait (%p4128_p13), %s3726_s5, 1024  }
0x10ba   : > { %4779 = vsyncadd (%p4128_p13), %s3726_s5, 4294966272  ;;  %s7579_s28 = sadd.s32 4294967294, %s7576_s27  }
0x10bb   : > { %s3735_s13 = sand.u32 1, %s7579_s28  }
0x10bc   : > { %s3736_s23 = scalar_lea.sflag [#allocation20], %s3735_s13 }
0x10bd   : > { %4781 = dma.done.wait (%p4128_p13), %s3736_s23, 256  }
0x10be   : > { %4783 = vsyncadd (%p4128_p13), %s3736_s23, 4294967040  ;;  %s7580_s16 = sld [smem:[#allocation32_spill]]  ;;  %s7583_s29 = smov %s4790_s30 }
0x10bf   : > { %s7581_s25 = sld [smem:[#allocation30_spill]] }
0x10c0   : > { %s7582_s15 = sld [smem:[#allocation33_spill]] }
0x10c4   : > { %p33_p5 = scmp.ge.s32.totalorder %s7580_s16, 4  }
0x10c5   : > { %s7584_s30 = smov %s7581_s25 }
0x10c6   :  { %35 = sbr.rel (!%p33_p5) target bundleno = 15 (0xf), region = 168 }
0x10cb   :  { %3752 = vsyncpa [#allocation5], 1 }
0x10cc   :  { %3754 = vsyncpa [#allocation5 + $0x1], 1 }
0x10cd   :  { %3755 = vsyncpa [#allocation8], 1 }
0x10ce   :  { %3756 = vsyncpa [#allocation11], 1 }
0x10cf   :  { %3757 = vsyncpa [#allocation14], 1 }
0x10d0   :  { %3758 = vsyncpa [#allocation17], 1 }
0x10d1   :  { %3759 = vsyncpa [#allocation6], 1 }
0x10d2   :  { %3761 = vsyncpa [#allocation6 + $0x1], 1 }
0x10d3   :  { %3762 = vsyncpa [#allocation20], 1 }
0x10d4   :  { %3764 = vsyncpa [#allocation20 + $0x1], 1 }

</bundles_post_ra>
